<compile_context>
chip_gen: v7x
topology: tpu7x:2x2x1
jax: 0.10.0
libtpu: 0.0.40
codegen_flags: <defaults>
</compile_context>

<pallas_src>
import jax
import jax.numpy as jnp
from jax.experimental import pallas as pl
from jax.experimental.pallas import tpu as pltpu

BN_EPS = 1e-5


def _round_up(x, m):
    return ((x + m - 1) // m) * m


# ----------------------------------------------------------------------------- kernel
def _nin_block_kernel(p_ref, w1_ref, w2_ref, w3_ref, v_ref, o_ref):
    """Fused nin_block on one (TM, Kp) patch tile.

    p_ref : (TM, Kp)     bf16  im2col patches (K order (kh, kw, c), zero-padded to Kp)
    w1_ref: (Kp, Cp)     bf16  conv kxk weights with BN1 scale folded into the columns
    w2_ref: (Cp, Cp)     bf16  first 1x1 conv
    w3_ref: (Cp, Cp)     bf16  second 1x1 conv
    v_ref : (8,  Cp)     f32   rows = [t1 (conv bias folded), b2, s2, t2, b3, s3, t3, 0]
    o_ref : (TM, Cp)     bf16
    """
    v = v_ref[...]
    t1 = v[0:1]
    b2, s2, t2 = v[1:2], v[2:3], v[3:4]
    b3, s3, t3 = v[4:5], v[5:6], v[6:7]

    # Conv(kxk) -> BN -> ReLU   (BN1 scale folded into W1, conv1 bias folded into t1)
    z = jnp.dot(p_ref[...], w1_ref[...], preferred_element_type=jnp.float32)
    y = jnp.maximum(z + t1, 0.0)

    # Conv(1x1) -> ReLU -> BN
    z = jnp.dot(y.astype(w2_ref.dtype), w2_ref[...], preferred_element_type=jnp.float32)
    y = jnp.maximum(z + b2, 0.0) * s2 + t2

    # Conv(1x1) -> ReLU -> BN
    z = jnp.dot(y.astype(w3_ref.dtype), w3_ref[...], preferred_element_type=jnp.float32)
    y = jnp.maximum(z + b3, 0.0) * s3 + t3

    o_ref[...] = y.astype(o_ref.dtype)


# ----------------------------------------------------------------------------- glue
def im2col(x_nhwc, ksize, stride, padding):
    """Extract conv patches by concatenating shifted slices on the lane axis.

    Returns (N*Ho*Wo, K*K*C) with K-axis order (kh, kw, c) — no 6-D transpose pass.
    """
    N, H, W, C = x_nhwc.shape
    xp = jnp.pad(x_nhwc, ((0, 0), (padding, padding), (padding, padding), (0, 0)))
    Hp, Wp = H + 2 * padding, W + 2 * padding
    Ho = (Hp - ksize) // stride + 1
    Wo = (Wp - ksize) // stride + 1
    cols = []
    for kh in range(ksize):
        for kw in range(ksize):
            sl = xp[:, kh: kh + stride * (Ho - 1) + 1: stride,
                       kw: kw + stride * (Wo - 1) + 1: stride, :]       # (N,Ho,Wo,C)
            cols.append(sl)
    patches = jnp.concatenate(cols, axis=-1)                            # (N,Ho,Wo,K*K*C)
    return patches.reshape(N * Ho * Wo, ksize * ksize * C), (N, Ho, Wo)


def maxpool_3x3_s2(x_nhwc):
    """MaxPool2d(kernel_size=3, stride=2), separable pairwise max (exact in bf16)."""
    N, H, W, C = x_nhwc.shape
    Ho = (H - 3) // 2 + 1
    Wo = (W - 3) // 2 + 1
    r = jnp.maximum(jnp.maximum(x_nhwc[:, 0:H - 2], x_nhwc[:, 1:H - 1]), x_nhwc[:, 2:H])
    r = r[:, 0:2 * Ho - 1:2]                                            # (N, Ho, W, C)
    c = jnp.maximum(jnp.maximum(r[:, :, 0:W - 2], r[:, :, 1:W - 1]), r[:, :, 2:W])
    return c[:, :, 0:2 * Wo - 1:2]                                      # (N, Ho, Wo, C)


# ----------------------------------------------------------------------------- parameters
def init_conv(key, cin, cout, k):
    fan_in, fan_out = cin * k * k, cout * k * k
    a = (6.0 / (fan_in + fan_out)) ** 0.5  # xavier_uniform
    kw, kb = jax.random.split(key)
    w = jax.random.uniform(kw, (cout, cin, k, k), jnp.float32, -a, a)
    b = jax.random.uniform(kb, (cout,), jnp.float32, -0.1, 0.1)
    return {"w": w, "b": b}


def init_bn(key, c):
    k1, k2, k3, k4 = jax.random.split(key, 4)
    return {
        "gamma": jax.random.uniform(k1, (c,), jnp.float32, 0.5, 1.5),
        "beta": jax.random.normal(k2, (c,), jnp.float32) * 0.1,
        "mean": jax.random.normal(k3, (c,), jnp.float32) * 0.1,
        "var": jax.random.uniform(k4, (c,), jnp.float32, 0.5, 1.5),
    }


def bn_affine(bn):
    scale = bn["gamma"] * jax.lax.rsqrt(bn["var"] + BN_EPS)
    shift = bn["beta"] - bn["mean"] * scale
    return scale, shift


def init_nin_block(key, cin, cout, k):
    ks = jax.random.split(key, 6)
    return {
        "conv1": init_conv(ks[0], cin, cout, k), "bn1": init_bn(ks[1], cout),
        "conv2": init_conv(ks[2], cout, cout, 1), "bn2": init_bn(ks[3], cout),
        "conv3": init_conv(ks[4], cout, cout, 1), "bn3": init_bn(ks[5], cout),
    }


def init_nin_params(key):
    ks = jax.random.split(key, 4)
    return {
        "b1": init_nin_block(ks[0], 3, 96, 11),
        "b2": init_nin_block(ks[1], 96, 256, 5),
        "b3": init_nin_block(ks[2], 256, 384, 3),
        "b4": init_nin_block(ks[3], 384, 2, 3),
    }


def _prep_block_params(p, cin_act, k_pad, cout_pad):
    """Reshape / fold / zero-pad block parameters to MXU-friendly (Kp,Cp)/(Cp,Cp) layout.

    W1 rows follow the im2col K order (kh, kw, c); cin_act may exceed the conv's true
    Cin (lane-padded activation) — extra channel rows are zero.  Padded output channels
    get zero weights, zero bias and zero BN scale/shift so they stay exactly zero.
    """
    cout, cin, k, _ = p["conv1"]["w"].shape
    cpad = cout_pad - cout

    s1, t1 = bn_affine(p["bn1"])
    t1 = p["conv1"]["b"] * s1 + t1                              # fold conv1 bias into BN shift

    # (cout, cin, kh, kw) -> (kh, kw, cin_act, cout) -> (K, cout); fold BN1 scale into cols.
    w1 = jnp.transpose(p["conv1"]["w"], (2, 3, 1, 0))
    if cin_act > cin:
        w1 = jnp.pad(w1, ((0, 0), (0, 0), (0, cin_act - cin), (0, 0)))
    w1 = w1.reshape(k * k * cin_act, cout) * s1[None, :]
    if k_pad > k * k * cin_act:
        w1 = jnp.pad(w1, ((0, k_pad - k * k * cin_act), (0, 0)))
    if cpad:
        w1 = jnp.pad(w1, ((0, 0), (0, cpad)))
    w1 = w1.astype(jnp.bfloat16)

    w2 = p["conv2"]["w"].reshape(cout, cout).T                  # (cin, cout)
    w3 = p["conv3"]["w"].reshape(cout, cout).T
    if cpad:
        w2 = jnp.pad(w2, ((0, cpad), (0, cpad)))
        w3 = jnp.pad(w3, ((0, cpad), (0, cpad)))
    w2 = w2.astype(jnp.bfloat16)
    w3 = w3.astype(jnp.bfloat16)

    s2, t2 = bn_affine(p["bn2"])
    s3, t3 = bn_affine(p["bn3"])
    vec = jnp.stack([t1, p["conv2"]["b"], s2, t2,
                     p["conv3"]["b"], s3, t3, jnp.zeros_like(t1)], axis=0)  # (8, cout)
    if cpad:
        vec = jnp.pad(vec, ((0, 0), (0, cpad)))
    return w1, w2, w3, vec.astype(jnp.float32)


def _vmem_working_set(tm, kp, cp):
    """Rough VMEM bytes: double-buffered patch+output tiles, single-buffered residents."""
    return (2 * tm * kp * 2) + (2 * tm * cp * 2) + (kp * cp * 2) + 2 * (cp * cp * 2) + 8 * cp * 4


# ----------------------------------------------------------------------------- model
def nin_block_forward(x_nhwc, p, ksize, stride, padding):
    """Fused Conv->BN->ReLU, Conv1x1->ReLU->BN, Conv1x1->ReLU->BN in one pallas_call."""
    cout = p["conv1"]["w"].shape[0]
    cout_pad = _round_up(cout, 128)
    cin_act = x_nhwc.shape[-1]

    patches, (N, Ho, Wo) = im2col(x_nhwc, ksize, stride, padding)   # bf16 throughout
    M, K = patches.shape
    Kp = _round_up(K, 128)
    if Kp > K:
        patches = jnp.pad(patches, ((0, 0), (0, Kp - K)))           # zero K columns (exact)

    w1, w2, w3, vec = _prep_block_params(p, cin_act, Kp, cout_pad)

    # Row tiling: multiples of 16 (bf16 sublane packing); at least 2 tiles on the
    # "parallel" axis so both v7x TensorCores get work; 512-row tiles for large M,
    # shrunk to keep the VMEM working set ~<=24 MiB (fits v7x's 64 MiB VMEM).
    m16 = _round_up(max(M, 16), 16)
    if m16 <= 16:
        tm = 16
    elif m16 <= 1024:
        tm = _round_up((m16 + 1) // 2, 16)
    else:
        tm = 512
        while tm > 128 and _vmem_working_set(tm, Kp, cout_pad) > 24 * 1024 * 1024:
            tm //= 2
    m_pad = _round_up(M, tm)
    if m_pad > M:
        patches = jnp.pad(patches, ((0, m_pad - M), (0, 0)))

    def _resident(shape):
        # Grid-invariant operand: fetched once, single-buffered (saves VMEM headroom).
        return pl.BlockSpec(shape, lambda i: (0, 0), pipeline_mode=pl.Buffered(1))

    out = pl.pallas_call(
        _nin_block_kernel,
        out_shape=jax.ShapeDtypeStruct((m_pad, cout_pad), jnp.bfloat16),
        grid=(m_pad // tm,),
        in_specs=[
            pl.BlockSpec((tm, Kp), lambda i: (i, 0)),
            _resident((Kp, cout_pad)),
            _resident((cout_pad, cout_pad)),
            _resident((cout_pad, cout_pad)),
            _resident((8, cout_pad)),
        ],
        out_specs=pl.BlockSpec((tm, cout_pad), lambda i: (i, 0)),
        compiler_params=pltpu.CompilerParams(
            dimension_semantics=("parallel",),
            vmem_limit_bytes=32 * 1024 * 1024),
    )(patches, w1, w2, w3, vec)

    # Padded rows carry epilogue garbage -> slice once, before any pooling.
    return out[:M].reshape(N, Ho, Wo, cout_pad)


def nin_forward(x_nchw, params):
    # NCHW -> NHWC; cast to bf16 BEFORE patch extraction so all im2col glue is half-width.
    x = jnp.transpose(x_nchw, (0, 2, 3, 1)).astype(jnp.bfloat16)
    x = nin_block_forward(x, params["b1"], 11, 4, 2)             # channels 96 -> padded 128
    x = maxpool_3x3_s2(x)
    x = nin_block_forward(x, params["b2"], 5, 1, 2)              # 256
    x = maxpool_3x3_s2(x)
    x = nin_block_forward(x, params["b3"], 3, 1, 1)              # 384
    x = nin_block_forward(x, params["b4"], 3, 1, 1)              # 2 -> padded 128 (zeros)
    cout = params["b4"]["conv1"]["w"].shape[0]
    # AdaptiveAvgPool2d((1,1)) + Flatten: drop padded channels, f32 mean over spatial.
    return jnp.mean(x[..., :cout].astype(jnp.float32), axis=(1, 2))  # (N, 2)


# ----------------------------------------------------------------------------- main
if __name__ == "__main__":
    key = jax.random.PRNGKey(0)
    kx, kp = jax.random.split(key)

    # Small input consistent with the module: NCHW, 3 input channels.
    x = jax.random.normal(kx, (2, 3, 64, 64), jnp.float32)
    params = init_nin_params(kp)

    fwd = jax.jit(nin_forward)
    out = fwd(x, params)
    out = jax.block_until_ready(out)

    assert out.shape == (2, 2), out.shape
    assert bool(jnp.all(jnp.isfinite(out)))
    print("KERNEL_OK")
</pallas_src>

<mosaic_0001>
module attributes {stable_mosaic.version = 11 : i64} {
  func.func @_nin_block_kernel(%arg0: i32, %arg1: memref<240x384xbf16, #tpu.memory_space<vmem>>, %arg2: memref<384x128xbf16, #tpu.memory_space<vmem>>, %arg3: memref<128x128xbf16, #tpu.memory_space<vmem>>, %arg4: memref<128x128xbf16, #tpu.memory_space<vmem>>, %arg5: memref<8x128xf32, #tpu.memory_space<vmem>>, %arg6: memref<240x128xbf16, #tpu.memory_space<vmem>>) attributes {dimension_semantics = [#tpu.dimension_semantics<parallel>], iteration_bounds = array<i64: 2>, scalar_prefetch = 0 : i64, scratch_operands = 0 : i64, tpu.core_type = #tpu.core_type<tc>, window_params = [{transform_indices = @transform_0, window_bounds = array<i64: 240, 384>}, {pipeline_mode = #tpu.pipeline_mode<synchronous>, transform_indices = @transform_1, window_bounds = array<i64: 384, 128>}, {pipeline_mode = #tpu.pipeline_mode<synchronous>, transform_indices = @transform_2, window_bounds = array<i64: 128, 128>}, {pipeline_mode = #tpu.pipeline_mode<synchronous>, transform_indices = @transform_3, window_bounds = array<i64: 128, 128>}, {pipeline_mode = #tpu.pipeline_mode<synchronous>, transform_indices = @transform_4, window_bounds = array<i64: 8, 128>}, {transform_indices = @transform_5, window_bounds = array<i64: 240, 128>}]} {
    %c0 = arith.constant 0 : index
    %c0_0 = arith.constant 0 : index
    %0 = vector.load %arg5[%c0, %c0_0] : memref<8x128xf32, #tpu.memory_space<vmem>>, vector<8x128xf32>
    %1 = vector.extract_strided_slice %0 {offsets = [0, 0], sizes = [1, 128], strides = [1, 1]} : vector<8x128xf32> to vector<1x128xf32>
    %2 = vector.extract_strided_slice %0 {offsets = [1, 0], sizes = [1, 128], strides = [1, 1]} : vector<8x128xf32> to vector<1x128xf32>
    %3 = vector.extract_strided_slice %0 {offsets = [2, 0], sizes = [1, 128], strides = [1, 1]} : vector<8x128xf32> to vector<1x128xf32>
    %4 = vector.extract_strided_slice %0 {offsets = [3, 0], sizes = [1, 128], strides = [1, 1]} : vector<8x128xf32> to vector<1x128xf32>
    %5 = vector.extract_strided_slice %0 {offsets = [4, 0], sizes = [1, 128], strides = [1, 1]} : vector<8x128xf32> to vector<1x128xf32>
    %6 = vector.extract_strided_slice %0 {offsets = [5, 0], sizes = [1, 128], strides = [1, 1]} : vector<8x128xf32> to vector<1x128xf32>
    %7 = vector.extract_strided_slice %0 {offsets = [6, 0], sizes = [1, 128], strides = [1, 1]} : vector<8x128xf32> to vector<1x128xf32>
    %c0_1 = arith.constant 0 : index
    %c0_2 = arith.constant 0 : index
    %8 = vector.load %arg1[%c0_1, %c0_2] : memref<240x384xbf16, #tpu.memory_space<vmem>>, vector<240x384xbf16>
    %c0_3 = arith.constant 0 : index
    %c0_4 = arith.constant 0 : index
    %9 = vector.load %arg2[%c0_3, %c0_4] : memref<384x128xbf16, #tpu.memory_space<vmem>>, vector<384x128xbf16>
    %cst = arith.constant dense<0.000000e+00> : vector<240x128xf32>
    %10 = tpu.matmul %8, %9, %cst {dimension_numbers = #tpu.dot_dimension_numbers<[1], [0], [0], [1], [0, 0, 1, 1], [], []>} : vector<240x384xbf16>, vector<384x128xbf16>, vector<240x128xf32> -> vector<240x128xf32>
    %11 = vector.broadcast %1 : vector<1x128xf32> to vector<240x128xf32>
    %12 = arith.addf %10, %11 : vector<240x128xf32>
    %cst_5 = arith.constant 0.000000e+00 : f32
    %13 = vector.broadcast %cst_5 : f32 to vector<240x128xf32>
    %14 = arith.maximumf %12, %13 : vector<240x128xf32>
    %15 = arith.truncf %14 : vector<240x128xf32> to vector<240x128xbf16>
    %c0_6 = arith.constant 0 : index
    %c0_7 = arith.constant 0 : index
    %16 = vector.load %arg3[%c0_6, %c0_7] : memref<128x128xbf16, #tpu.memory_space<vmem>>, vector<128x128xbf16>
    %cst_8 = arith.constant dense<0.000000e+00> : vector<240x128xf32>
    %17 = tpu.matmul %15, %16, %cst_8 {dimension_numbers = #tpu.dot_dimension_numbers<[1], [0], [0], [1], [0, 0, 1, 1], [], []>} : vector<240x128xbf16>, vector<128x128xbf16>, vector<240x128xf32> -> vector<240x128xf32>
    %18 = vector.broadcast %2 : vector<1x128xf32> to vector<240x128xf32>
    %19 = arith.addf %17, %18 : vector<240x128xf32>
    %cst_9 = arith.constant 0.000000e+00 : f32
    %20 = vector.broadcast %cst_9 : f32 to vector<240x128xf32>
    %21 = arith.maximumf %19, %20 : vector<240x128xf32>
    %22 = vector.broadcast %3 : vector<1x128xf32> to vector<240x128xf32>
    %23 = arith.mulf %21, %22 : vector<240x128xf32>
    %24 = vector.broadcast %4 : vector<1x128xf32> to vector<240x128xf32>
    %25 = arith.addf %23, %24 : vector<240x128xf32>
    %26 = arith.truncf %25 : vector<240x128xf32> to vector<240x128xbf16>
    %c0_10 = arith.constant 0 : index
    %c0_11 = arith.constant 0 : index
    %27 = vector.load %arg4[%c0_10, %c0_11] : memref<128x128xbf16, #tpu.memory_space<vmem>>, vector<128x128xbf16>
    %cst_12 = arith.constant dense<0.000000e+00> : vector<240x128xf32>
    %28 = tpu.matmul %26, %27, %cst_12 {dimension_numbers = #tpu.dot_dimension_numbers<[1], [0], [0], [1], [0, 0, 1, 1], [], []>} : vector<240x128xbf16>, vector<128x128xbf16>, vector<240x128xf32> -> vector<240x128xf32>
    %29 = vector.broadcast %5 : vector<1x128xf32> to vector<240x128xf32>
    %30 = arith.addf %28, %29 : vector<240x128xf32>
    %cst_13 = arith.constant 0.000000e+00 : f32
    %31 = vector.broadcast %cst_13 : f32 to vector<240x128xf32>
    %32 = arith.maximumf %30, %31 : vector<240x128xf32>
    %33 = vector.broadcast %6 : vector<1x128xf32> to vector<240x128xf32>
    %34 = arith.mulf %32, %33 : vector<240x128xf32>
    %35 = vector.broadcast %7 : vector<1x128xf32> to vector<240x128xf32>
    %36 = arith.addf %34, %35 : vector<240x128xf32>
    %37 = arith.truncf %36 : vector<240x128xf32> to vector<240x128xbf16>
    %c0_14 = arith.constant 0 : index
    %c0_15 = arith.constant 0 : index
    %38 = vector.load %arg6[%c0_14, %c0_15] : memref<240x128xbf16, #tpu.memory_space<vmem>>, vector<240x128xbf16>
    tpu.vector_store %arg6[%c0_14, %c0_15], %37 {strides = array<i32>} : memref<240x128xbf16, #tpu.memory_space<vmem>>, vector<240x128xbf16>,
    return
  }
  func.func @transform_0(%arg0: i32) -> (i32, i32) {
    %c0_i32 = arith.constant 0 : i32
    %c0_i32_0 = arith.constant 0 : i32
    return %arg0, %c0_i32 : i32, i32
  }
  func.func @transform_1(%arg0: i32) -> (i32, i32) {
    %c0_i32 = arith.constant 0 : i32
    %c0_i32_0 = arith.constant 0 : i32
    %c0_i32_1 = arith.constant 0 : i32
    return %c0_i32, %c0_i32_0 : i32, i32
  }
  func.func @transform_2(%arg0: i32) -> (i32, i32) {
    %c0_i32 = arith.constant 0 : i32
    %c0_i32_0 = arith.constant 0 : i32
    %c0_i32_1 = arith.constant 0 : i32
    return %c0_i32, %c0_i32_0 : i32, i32
  }
  func.func @transform_3(%arg0: i32) -> (i32, i32) {
    %c0_i32 = arith.constant 0 : i32
    %c0_i32_0 = arith.constant 0 : i32
    %c0_i32_1 = arith.constant 0 : i32
    return %c0_i32, %c0_i32_0 : i32, i32
  }
  func.func @transform_4(%arg0: i32) -> (i32, i32) {
    %c0_i32 = arith.constant 0 : i32
    %c0_i32_0 = arith.constant 0 : i32
    %c0_i32_1 = arith.constant 0 : i32
    return %c0_i32, %c0_i32_0 : i32, i32
  }
  func.func @transform_5(%arg0: i32) -> (i32, i32) {
    %c0_i32 = arith.constant 0 : i32
    %c0_i32_0 = arith.constant 0 : i32
    return %arg0, %c0_i32 : i32, i32
  }
}

module attributes {stable_mosaic.version = 11 : i64} {
  func.func @_nin_block_kernel(%arg0: i32, %arg1: memref<64x3200xbf16, #tpu.memory_space<vmem>>, %arg2: memref<3200x256xbf16, #tpu.memory_space<vmem>>, %arg3: memref<256x256xbf16, #tpu.memory_space<vmem>>, %arg4: memref<256x256xbf16, #tpu.memory_space<vmem>>, %arg5: memref<8x256xf32, #tpu.memory_space<vmem>>, %arg6: memref<64x256xbf16, #tpu.memory_space<vmem>>) attributes {dimension_semantics = [#tpu.dimension_semantics<parallel>], iteration_bounds = array<i64: 2>, scalar_prefetch = 0 : i64, scratch_operands = 0 : i64, tpu.core_type = #tpu.core_type<tc>, window_params = [{transform_indices = @transform_0, window_bounds = array<i64: 64, 3200>}, {pipeline_mode = #tpu.pipeline_mode<synchronous>, transform_indices = @transform_1, window_bounds = array<i64: 3200, 256>}, {pipeline_mode = #tpu.pipeline_mode<synchronous>, transform_indices = @transform_2, window_bounds = array<i64: 256, 256>}, {pipeline_mode = #tpu.pipeline_mode<synchronous>, transform_indices = @transform_3, window_bounds = array<i64: 256, 256>}, {pipeline_mode = #tpu.pipeline_mode<synchronous>, transform_indices = @transform_4, window_bounds = array<i64: 8, 256>}, {transform_indices = @transform_5, window_bounds = array<i64: 64, 256>}]} {
    %c0 = arith.constant 0 : index
    %c0_0 = arith.constant 0 : index
    %0 = vector.load %arg5[%c0, %c0_0] : memref<8x256xf32, #tpu.memory_space<vmem>>, vector<8x256xf32>
    %1 = vector.extract_strided_slice %0 {offsets = [0, 0], sizes = [1, 256], strides = [1, 1]} : vector<8x256xf32> to vector<1x256xf32>
    %2 = vector.extract_strided_slice %0 {offsets = [1, 0], sizes = [1, 256], strides = [1, 1]} : vector<8x256xf32> to vector<1x256xf32>
    %3 = vector.extract_strided_slice %0 {offsets = [2, 0], sizes = [1, 256], strides = [1, 1]} : vector<8x256xf32> to vector<1x256xf32>
    %4 = vector.extract_strided_slice %0 {offsets = [3, 0], sizes = [1, 256], strides = [1, 1]} : vector<8x256xf32> to vector<1x256xf32>
    %5 = vector.extract_strided_slice %0 {offsets = [4, 0], sizes = [1, 256], strides = [1, 1]} : vector<8x256xf32> to vector<1x256xf32>
    %6 = vector.extract_strided_slice %0 {offsets = [5, 0], sizes = [1, 256], strides = [1, 1]} : vector<8x256xf32> to vector<1x256xf32>
    %7 = vector.extract_strided_slice %0 {offsets = [6, 0], sizes = [1, 256], strides = [1, 1]} : vector<8x256xf32> to vector<1x256xf32>
    %c0_1 = arith.constant 0 : index
    %c0_2 = arith.constant 0 : index
    %8 = vector.load %arg1[%c0_1, %c0_2] : memref<64x3200xbf16, #tpu.memory_space<vmem>>, vector<64x3200xbf16>
    %c0_3 = arith.constant 0 : index
    %c0_4 = arith.constant 0 : index
    %9 = vector.load %arg2[%c0_3, %c0_4] : memref<3200x256xbf16, #tpu.memory_space<vmem>>, vector<3200x256xbf16>
    %cst = arith.constant dense<0.000000e+00> : vector<64x256xf32>
    %10 = tpu.matmul %8, %9, %cst {dimension_numbers = #tpu.dot_dimension_numbers<[1], [0], [0], [1], [0, 0, 1, 1], [], []>} : vector<64x3200xbf16>, vector<3200x256xbf16>, vector<64x256xf32> -> vector<64x256xf32>
    %11 = vector.broadcast %1 : vector<1x256xf32> to vector<64x256xf32>
    %12 = arith.addf %10, %11 : vector<64x256xf32>
    %cst_5 = arith.constant 0.000000e+00 : f32
    %13 = vector.broadcast %cst_5 : f32 to vector<64x256xf32>
    %14 = arith.maximumf %12, %13 : vector<64x256xf32>
    %15 = arith.truncf %14 : vector<64x256xf32> to vector<64x256xbf16>
    %c0_6 = arith.constant 0 : index
    %c0_7 = arith.constant 0 : index
    %16 = vector.load %arg3[%c0_6, %c0_7] : memref<256x256xbf16, #tpu.memory_space<vmem>>, vector<256x256xbf16>
    %cst_8 = arith.constant dense<0.000000e+00> : vector<64x256xf32>
    %17 = tpu.matmul %15, %16, %cst_8 {dimension_numbers = #tpu.dot_dimension_numbers<[1], [0], [0], [1], [0, 0, 1, 1], [], []>} : vector<64x256xbf16>, vector<256x256xbf16>, vector<64x256xf32> -> vector<64x256xf32>
    %18 = vector.broadcast %2 : vector<1x256xf32> to vector<64x256xf32>
    %19 = arith.addf %17, %18 : vector<64x256xf32>
    %cst_9 = arith.constant 0.000000e+00 : f32
    %20 = vector.broadcast %cst_9 : f32 to vector<64x256xf32>
    %21 = arith.maximumf %19, %20 : vector<64x256xf32>
    %22 = vector.broadcast %3 : vector<1x256xf32> to vector<64x256xf32>
    %23 = arith.mulf %21, %22 : vector<64x256xf32>
    %24 = vector.broadcast %4 : vector<1x256xf32> to vector<64x256xf32>
    %25 = arith.addf %23, %24 : vector<64x256xf32>
    %26 = arith.truncf %25 : vector<64x256xf32> to vector<64x256xbf16>
    %c0_10 = arith.constant 0 : index
    %c0_11 = arith.constant 0 : index
    %27 = vector.load %arg4[%c0_10, %c0_11] : memref<256x256xbf16, #tpu.memory_space<vmem>>, vector<256x256xbf16>
    %cst_12 = arith.constant dense<0.000000e+00> : vector<64x256xf32>
    %28 = tpu.matmul %26, %27, %cst_12 {dimension_numbers = #tpu.dot_dimension_numbers<[1], [0], [0], [1], [0, 0, 1, 1], [], []>} : vector<64x256xbf16>, vector<256x256xbf16>, vector<64x256xf32> -> vector<64x256xf32>
    %29 = vector.broadcast %5 : vector<1x256xf32> to vector<64x256xf32>
    %30 = arith.addf %28, %29 : vector<64x256xf32>
    %cst_13 = arith.constant 0.000000e+00 : f32
    %31 = vector.broadcast %cst_13 : f32 to vector<64x256xf32>
    %32 = arith.maximumf %30, %31 : vector<64x256xf32>
    %33 = vector.broadcast %6 : vector<1x256xf32> to vector<64x256xf32>
    %34 = arith.mulf %32, %33 : vector<64x256xf32>
    %35 = vector.broadcast %7 : vector<1x256xf32> to vector<64x256xf32>
    %36 = arith.addf %34, %35 : vector<64x256xf32>
    %37 = arith.truncf %36 : vector<64x256xf32> to vector<64x256xbf16>
    %c0_14 = arith.constant 0 : index
    %c0_15 = arith.constant 0 : index
    %38 = vector.load %arg6[%c0_14, %c0_15] : memref<64x256xbf16, #tpu.memory_space<vmem>>, vector<64x256xbf16>
    tpu.vector_store %arg6[%c0_14, %c0_15], %37 {strides = array<i32>} : memref<64x256xbf16, #tpu.memory_space<vmem>>, vector<64x256xbf16>,
    return
  }
  func.func @transform_0(%arg0: i32) -> (i32, i32) {
    %c0_i32 = arith.constant 0 : i32
    %c0_i32_0 = arith.constant 0 : i32
    return %arg0, %c0_i32 : i32, i32
  }
  func.func @transform_1(%arg0: i32) -> (i32, i32) {
    %c0_i32 = arith.constant 0 : i32
    %c0_i32_0 = arith.constant 0 : i32
    %c0_i32_1 = arith.constant 0 : i32
    return %c0_i32, %c0_i32_0 : i32, i32
  }
  func.func @transform_2(%arg0: i32) -> (i32, i32) {
    %c0_i32 = arith.constant 0 : i32
    %c0_i32_0 = arith.constant 0 : i32
    %c0_i32_1 = arith.constant 0 : i32
    return %c0_i32, %c0_i32_0 : i32, i32
  }
  func.func @transform_3(%arg0: i32) -> (i32, i32) {
    %c0_i32 = arith.constant 0 : i32
    %c0_i32_0 = arith.constant 0 : i32
    %c0_i32_1 = arith.constant 0 : i32
    return %c0_i32, %c0_i32_0 : i32, i32
  }
  func.func @transform_4(%arg0: i32) -> (i32, i32) {
    %c0_i32 = arith.constant 0 : i32
    %c0_i32_0 = arith.constant 0 : i32
    %c0_i32_1 = arith.constant 0 : i32
    return %c0_i32, %c0_i32_0 : i32, i32
  }
  func.func @transform_5(%arg0: i32) -> (i32, i32) {
    %c0_i32 = arith.constant 0 : i32
    %c0_i32_0 = arith.constant 0 : i32
    return %arg0, %c0_i32 : i32, i32
  }
}

module attributes {stable_mosaic.version = 11 : i64} {
  func.func @_nin_block_kernel(%arg0: i32, %arg1: memref<16x2304xbf16, #tpu.memory_space<vmem>>, %arg2: memref<2304x384xbf16, #tpu.memory_space<vmem>>, %arg3: memref<384x384xbf16, #tpu.memory_space<vmem>>, %arg4: memref<384x384xbf16, #tpu.memory_space<vmem>>, %arg5: memref<8x384xf32, #tpu.memory_space<vmem>>, %arg6: memref<16x384xbf16, #tpu.memory_space<vmem>>) attributes {dimension_semantics = [#tpu.dimension_semantics<parallel>], iteration_bounds = array<i64: 2>, scalar_prefetch = 0 : i64, scratch_operands = 0 : i64, tpu.core_type = #tpu.core_type<tc>, window_params = [{transform_indices = @transform_0, window_bounds = array<i64: 16, 2304>}, {pipeline_mode = #tpu.pipeline_mode<synchronous>, transform_indices = @transform_1, window_bounds = array<i64: 2304, 384>}, {pipeline_mode = #tpu.pipeline_mode<synchronous>, transform_indices = @transform_2, window_bounds = array<i64: 384, 384>}, {pipeline_mode = #tpu.pipeline_mode<synchronous>, transform_indices = @transform_3, window_bounds = array<i64: 384, 384>}, {pipeline_mode = #tpu.pipeline_mode<synchronous>, transform_indices = @transform_4, window_bounds = array<i64: 8, 384>}, {transform_indices = @transform_5, window_bounds = array<i64: 16, 384>}]} {
    %c0 = arith.constant 0 : index
    %c0_0 = arith.constant 0 : index
    %0 = vector.load %arg5[%c0, %c0_0] : memref<8x384xf32, #tpu.memory_space<vmem>>, vector<8x384xf32>
    %1 = vector.extract_strided_slice %0 {offsets = [0, 0], sizes = [1, 384], strides = [1, 1]} : vector<8x384xf32> to vector<1x384xf32>
    %2 = vector.extract_strided_slice %0 {offsets = [1, 0], sizes = [1, 384], strides = [1, 1]} : vector<8x384xf32> to vector<1x384xf32>
    %3 = vector.extract_strided_slice %0 {offsets = [2, 0], sizes = [1, 384], strides = [1, 1]} : vector<8x384xf32> to vector<1x384xf32>
    %4 = vector.extract_strided_slice %0 {offsets = [3, 0], sizes = [1, 384], strides = [1, 1]} : vector<8x384xf32> to vector<1x384xf32>
    %5 = vector.extract_strided_slice %0 {offsets = [4, 0], sizes = [1, 384], strides = [1, 1]} : vector<8x384xf32> to vector<1x384xf32>
    %6 = vector.extract_strided_slice %0 {offsets = [5, 0], sizes = [1, 384], strides = [1, 1]} : vector<8x384xf32> to vector<1x384xf32>
    %7 = vector.extract_strided_slice %0 {offsets = [6, 0], sizes = [1, 384], strides = [1, 1]} : vector<8x384xf32> to vector<1x384xf32>
    %c0_1 = arith.constant 0 : index
    %c0_2 = arith.constant 0 : index
    %8 = vector.load %arg1[%c0_1, %c0_2] : memref<16x2304xbf16, #tpu.memory_space<vmem>>, vector<16x2304xbf16>
    %c0_3 = arith.constant 0 : index
    %c0_4 = arith.constant 0 : index
    %9 = vector.load %arg2[%c0_3, %c0_4] : memref<2304x384xbf16, #tpu.memory_space<vmem>>, vector<2304x384xbf16>
    %cst = arith.constant dense<0.000000e+00> : vector<16x384xf32>
    %10 = tpu.matmul %8, %9, %cst {dimension_numbers = #tpu.dot_dimension_numbers<[1], [0], [0], [1], [0, 0, 1, 1], [], []>} : vector<16x2304xbf16>, vector<2304x384xbf16>, vector<16x384xf32> -> vector<16x384xf32>
    %11 = vector.broadcast %1 : vector<1x384xf32> to vector<16x384xf32>
    %12 = arith.addf %10, %11 : vector<16x384xf32>
    %cst_5 = arith.constant 0.000000e+00 : f32
    %13 = vector.broadcast %cst_5 : f32 to vector<16x384xf32>
    %14 = arith.maximumf %12, %13 : vector<16x384xf32>
    %15 = arith.truncf %14 : vector<16x384xf32> to vector<16x384xbf16>
    %c0_6 = arith.constant 0 : index
    %c0_7 = arith.constant 0 : index
    %16 = vector.load %arg3[%c0_6, %c0_7] : memref<384x384xbf16, #tpu.memory_space<vmem>>, vector<384x384xbf16>
    %cst_8 = arith.constant dense<0.000000e+00> : vector<16x384xf32>
    %17 = tpu.matmul %15, %16, %cst_8 {dimension_numbers = #tpu.dot_dimension_numbers<[1], [0], [0], [1], [0, 0, 1, 1], [], []>} : vector<16x384xbf16>, vector<384x384xbf16>, vector<16x384xf32> -> vector<16x384xf32>
    %18 = vector.broadcast %2 : vector<1x384xf32> to vector<16x384xf32>
    %19 = arith.addf %17, %18 : vector<16x384xf32>
    %cst_9 = arith.constant 0.000000e+00 : f32
    %20 = vector.broadcast %cst_9 : f32 to vector<16x384xf32>
    %21 = arith.maximumf %19, %20 : vector<16x384xf32>
    %22 = vector.broadcast %3 : vector<1x384xf32> to vector<16x384xf32>
    %23 = arith.mulf %21, %22 : vector<16x384xf32>
    %24 = vector.broadcast %4 : vector<1x384xf32> to vector<16x384xf32>
    %25 = arith.addf %23, %24 : vector<16x384xf32>
    %26 = arith.truncf %25 : vector<16x384xf32> to vector<16x384xbf16>
    %c0_10 = arith.constant 0 : index
    %c0_11 = arith.constant 0 : index
    %27 = vector.load %arg4[%c0_10, %c0_11] : memref<384x384xbf16, #tpu.memory_space<vmem>>, vector<384x384xbf16>
    %cst_12 = arith.constant dense<0.000000e+00> : vector<16x384xf32>
    %28 = tpu.matmul %26, %27, %cst_12 {dimension_numbers = #tpu.dot_dimension_numbers<[1], [0], [0], [1], [0, 0, 1, 1], [], []>} : vector<16x384xbf16>, vector<384x384xbf16>, vector<16x384xf32> -> vector<16x384xf32>
    %29 = vector.broadcast %5 : vector<1x384xf32> to vector<16x384xf32>
    %30 = arith.addf %28, %29 : vector<16x384xf32>
    %cst_13 = arith.constant 0.000000e+00 : f32
    %31 = vector.broadcast %cst_13 : f32 to vector<16x384xf32>
    %32 = arith.maximumf %30, %31 : vector<16x384xf32>
    %33 = vector.broadcast %6 : vector<1x384xf32> to vector<16x384xf32>
    %34 = arith.mulf %32, %33 : vector<16x384xf32>
    %35 = vector.broadcast %7 : vector<1x384xf32> to vector<16x384xf32>
    %36 = arith.addf %34, %35 : vector<16x384xf32>
    %37 = arith.truncf %36 : vector<16x384xf32> to vector<16x384xbf16>
    %c0_14 = arith.constant 0 : index
    %c0_15 = arith.constant 0 : index
    %38 = vector.load %arg6[%c0_14, %c0_15] : memref<16x384xbf16, #tpu.memory_space<vmem>>, vector<16x384xbf16>
    tpu.vector_store %arg6[%c0_14, %c0_15], %37 {strides = array<i32>} : memref<16x384xbf16, #tpu.memory_space<vmem>>, vector<16x384xbf16>,
    return
  }
  func.func @transform_0(%arg0: i32) -> (i32, i32) {
    %c0_i32 = arith.constant 0 : i32
    %c0_i32_0 = arith.constant 0 : i32
    return %arg0, %c0_i32 : i32, i32
  }
  func.func @transform_1(%arg0: i32) -> (i32, i32) {
    %c0_i32 = arith.constant 0 : i32
    %c0_i32_0 = arith.constant 0 : i32
    %c0_i32_1 = arith.constant 0 : i32
    return %c0_i32, %c0_i32_0 : i32, i32
  }
  func.func @transform_2(%arg0: i32) -> (i32, i32) {
    %c0_i32 = arith.constant 0 : i32
    %c0_i32_0 = arith.constant 0 : i32
    %c0_i32_1 = arith.constant 0 : i32
    return %c0_i32, %c0_i32_0 : i32, i32
  }
  func.func @transform_3(%arg0: i32) -> (i32, i32) {
    %c0_i32 = arith.constant 0 : i32
    %c0_i32_0 = arith.constant 0 : i32
    %c0_i32_1 = arith.constant 0 : i32
    return %c0_i32, %c0_i32_0 : i32, i32
  }
  func.func @transform_4(%arg0: i32) -> (i32, i32) {
    %c0_i32 = arith.constant 0 : i32
    %c0_i32_0 = arith.constant 0 : i32
    %c0_i32_1 = arith.constant 0 : i32
    return %c0_i32, %c0_i32_0 : i32, i32
  }
  func.func @transform_5(%arg0: i32) -> (i32, i32) {
    %c0_i32 = arith.constant 0 : i32
    %c0_i32_0 = arith.constant 0 : i32
    return %arg0, %c0_i32 : i32, i32
  }
}

module attributes {stable_mosaic.version = 11 : i64} {
  func.func @_nin_block_kernel(%arg0: i32, %arg1: memref<16x3456xbf16, #tpu.memory_space<vmem>>, %arg2: memref<3456x128xbf16, #tpu.memory_space<vmem>>, %arg3: memref<128x128xbf16, #tpu.memory_space<vmem>>, %arg4: memref<128x128xbf16, #tpu.memory_space<vmem>>, %arg5: memref<8x128xf32, #tpu.memory_space<vmem>>, %arg6: memref<16x128xbf16, #tpu.memory_space<vmem>>) attributes {dimension_semantics = [#tpu.dimension_semantics<parallel>], iteration_bounds = array<i64: 2>, scalar_prefetch = 0 : i64, scratch_operands = 0 : i64, tpu.core_type = #tpu.core_type<tc>, window_params = [{transform_indices = @transform_0, window_bounds = array<i64: 16, 3456>}, {pipeline_mode = #tpu.pipeline_mode<synchronous>, transform_indices = @transform_1, window_bounds = array<i64: 3456, 128>}, {pipeline_mode = #tpu.pipeline_mode<synchronous>, transform_indices = @transform_2, window_bounds = array<i64: 128, 128>}, {pipeline_mode = #tpu.pipeline_mode<synchronous>, transform_indices = @transform_3, window_bounds = array<i64: 128, 128>}, {pipeline_mode = #tpu.pipeline_mode<synchronous>, transform_indices = @transform_4, window_bounds = array<i64: 8, 128>}, {transform_indices = @transform_5, window_bounds = array<i64: 16, 128>}]} {
    %c0 = arith.constant 0 : index
    %c0_0 = arith.constant 0 : index
    %0 = vector.load %arg5[%c0, %c0_0] : memref<8x128xf32, #tpu.memory_space<vmem>>, vector<8x128xf32>
    %1 = vector.extract_strided_slice %0 {offsets = [0, 0], sizes = [1, 128], strides = [1, 1]} : vector<8x128xf32> to vector<1x128xf32>
    %2 = vector.extract_strided_slice %0 {offsets = [1, 0], sizes = [1, 128], strides = [1, 1]} : vector<8x128xf32> to vector<1x128xf32>
    %3 = vector.extract_strided_slice %0 {offsets = [2, 0], sizes = [1, 128], strides = [1, 1]} : vector<8x128xf32> to vector<1x128xf32>
    %4 = vector.extract_strided_slice %0 {offsets = [3, 0], sizes = [1, 128], strides = [1, 1]} : vector<8x128xf32> to vector<1x128xf32>
    %5 = vector.extract_strided_slice %0 {offsets = [4, 0], sizes = [1, 128], strides = [1, 1]} : vector<8x128xf32> to vector<1x128xf32>
    %6 = vector.extract_strided_slice %0 {offsets = [5, 0], sizes = [1, 128], strides = [1, 1]} : vector<8x128xf32> to vector<1x128xf32>
    %7 = vector.extract_strided_slice %0 {offsets = [6, 0], sizes = [1, 128], strides = [1, 1]} : vector<8x128xf32> to vector<1x128xf32>
    %c0_1 = arith.constant 0 : index
    %c0_2 = arith.constant 0 : index
    %8 = vector.load %arg1[%c0_1, %c0_2] : memref<16x3456xbf16, #tpu.memory_space<vmem>>, vector<16x3456xbf16>
    %c0_3 = arith.constant 0 : index
    %c0_4 = arith.constant 0 : index
    %9 = vector.load %arg2[%c0_3, %c0_4] : memref<3456x128xbf16, #tpu.memory_space<vmem>>, vector<3456x128xbf16>
    %cst = arith.constant dense<0.000000e+00> : vector<16x128xf32>
    %10 = tpu.matmul %8, %9, %cst {dimension_numbers = #tpu.dot_dimension_numbers<[1], [0], [0], [1], [0, 0, 1, 1], [], []>} : vector<16x3456xbf16>, vector<3456x128xbf16>, vector<16x128xf32> -> vector<16x128xf32>
    %11 = vector.broadcast %1 : vector<1x128xf32> to vector<16x128xf32>
    %12 = arith.addf %10, %11 : vector<16x128xf32>
    %cst_5 = arith.constant 0.000000e+00 : f32
    %13 = vector.broadcast %cst_5 : f32 to vector<16x128xf32>
    %14 = arith.maximumf %12, %13 : vector<16x128xf32>
    %15 = arith.truncf %14 : vector<16x128xf32> to vector<16x128xbf16>
    %c0_6 = arith.constant 0 : index
    %c0_7 = arith.constant 0 : index
    %16 = vector.load %arg3[%c0_6, %c0_7] : memref<128x128xbf16, #tpu.memory_space<vmem>>, vector<128x128xbf16>
    %cst_8 = arith.constant dense<0.000000e+00> : vector<16x128xf32>
    %17 = tpu.matmul %15, %16, %cst_8 {dimension_numbers = #tpu.dot_dimension_numbers<[1], [0], [0], [1], [0, 0, 1, 1], [], []>} : vector<16x128xbf16>, vector<128x128xbf16>, vector<16x128xf32> -> vector<16x128xf32>
    %18 = vector.broadcast %2 : vector<1x128xf32> to vector<16x128xf32>
    %19 = arith.addf %17, %18 : vector<16x128xf32>
    %cst_9 = arith.constant 0.000000e+00 : f32
    %20 = vector.broadcast %cst_9 : f32 to vector<16x128xf32>
    %21 = arith.maximumf %19, %20 : vector<16x128xf32>
    %22 = vector.broadcast %3 : vector<1x128xf32> to vector<16x128xf32>
    %23 = arith.mulf %21, %22 : vector<16x128xf32>
    %24 = vector.broadcast %4 : vector<1x128xf32> to vector<16x128xf32>
    %25 = arith.addf %23, %24 : vector<16x128xf32>
    %26 = arith.truncf %25 : vector<16x128xf32> to vector<16x128xbf16>
    %c0_10 = arith.constant 0 : index
    %c0_11 = arith.constant 0 : index
    %27 = vector.load %arg4[%c0_10, %c0_11] : memref<128x128xbf16, #tpu.memory_space<vmem>>, vector<128x128xbf16>
    %cst_12 = arith.constant dense<0.000000e+00> : vector<16x128xf32>
    %28 = tpu.matmul %26, %27, %cst_12 {dimension_numbers = #tpu.dot_dimension_numbers<[1], [0], [0], [1], [0, 0, 1, 1], [], []>} : vector<16x128xbf16>, vector<128x128xbf16>, vector<16x128xf32> -> vector<16x128xf32>
    %29 = vector.broadcast %5 : vector<1x128xf32> to vector<16x128xf32>
    %30 = arith.addf %28, %29 : vector<16x128xf32>
    %cst_13 = arith.constant 0.000000e+00 : f32
    %31 = vector.broadcast %cst_13 : f32 to vector<16x128xf32>
    %32 = arith.maximumf %30, %31 : vector<16x128xf32>
    %33 = vector.broadcast %6 : vector<1x128xf32> to vector<16x128xf32>
    %34 = arith.mulf %32, %33 : vector<16x128xf32>
    %35 = vector.broadcast %7 : vector<1x128xf32> to vector<16x128xf32>
    %36 = arith.addf %34, %35 : vector<16x128xf32>
    %37 = arith.truncf %36 : vector<16x128xf32> to vector<16x128xbf16>
    %c0_14 = arith.constant 0 : index
    %c0_15 = arith.constant 0 : index
    %38 = vector.load %arg6[%c0_14, %c0_15] : memref<16x128xbf16, #tpu.memory_space<vmem>>, vector<16x128xbf16>
    tpu.vector_store %arg6[%c0_14, %c0_15], %37 {strides = array<i32>} : memref<16x128xbf16, #tpu.memory_space<vmem>>, vector<16x128xbf16>,
    return
  }
  func.func @transform_0(%arg0: i32) -> (i32, i32) {
    %c0_i32 = arith.constant 0 : i32
    %c0_i32_0 = arith.constant 0 : i32
    return %arg0, %c0_i32 : i32, i32
  }
  func.func @transform_1(%arg0: i32) -> (i32, i32) {
    %c0_i32 = arith.constant 0 : i32
    %c0_i32_0 = arith.constant 0 : i32
    %c0_i32_1 = arith.constant 0 : i32
    return %c0_i32, %c0_i32_0 : i32, i32
  }
  func.func @transform_2(%arg0: i32) -> (i32, i32) {
    %c0_i32 = arith.constant 0 : i32
    %c0_i32_0 = arith.constant 0 : i32
    %c0_i32_1 = arith.constant 0 : i32
    return %c0_i32, %c0_i32_0 : i32, i32
  }
  func.func @transform_3(%arg0: i32) -> (i32, i32) {
    %c0_i32 = arith.constant 0 : i32
    %c0_i32_0 = arith.constant 0 : i32
    %c0_i32_1 = arith.constant 0 : i32
    return %c0_i32, %c0_i32_0 : i32, i32
  }
  func.func @transform_4(%arg0: i32) -> (i32, i32) {
    %c0_i32 = arith.constant 0 : i32
    %c0_i32_0 = arith.constant 0 : i32
    %c0_i32_1 = arith.constant 0 : i32
    return %c0_i32, %c0_i32_0 : i32, i32
  }
  func.func @transform_5(%arg0: i32) -> (i32, i32) {
    %c0_i32 = arith.constant 0 : i32
    %c0_i32_0 = arith.constant 0 : i32
    return %arg0, %c0_i32 : i32, i32
  }
}

</mosaic_0001>

<bundles_post_ra>
// kernel: nin_forward.4
= control target key start
LH: loop header
LB: loop body
LE: loop exit
PB: predicated region body
PF: predicated region fallthrough
CT: control target
= control target key end

     0   :  { %s2737_s18 = smov 0   ;;  %s3301_s0 = inlined_call_operand.vmem [shape: bf16[480,384], index: 0, kind: input, shape index: {}]   ;;  %s3302_s1 = inlined_call_operand.vmem [shape: bf16[384,128], index: 1, kind: input, shape index: {}]   ;;  %s3303_s2 = inlined_call_operand.vmem [shape: bf16[128,128], index: 2, kind: input, shape index: {}]   ;;  %s3304_s3 = inlined_call_operand.vmem [shape: bf16[128,128], index: 3, kind: input, shape index: {}]   ;;  %s3305_s4 = inlined_call_operand.vmem [shape: f32[8,128], index: 4, kind: input, shape index: {}]   ;;  %s3306_s5 = inlined_call_operand.vmem [shape: bf16[480,128], index: 5, kind: output, shape index: {}]  }
   0x1 LB: > { %s1939_s19 = sadd.s32 4294967295, %s2703_s18   ;;  %p1943_p0 = scmp.ge.s32.totalorder %s2703_s18, 1  ;;  %s2703_s18 = sphi %s2737_s18, %s15_s18  }
   0x2   : > { %p189_p1 = scmp.lt.s32.totalorder %s2703_s18, 3 }
   0x4   : > { %p190_p2 = pnand %p1943_p0, %p189_p1 }
   0x5   : > { %v2596_v0 = vld [vmem:[%s3302_s1 + $0x40] sm:$0xff] (!%p190_p2)   ;;  %v2705_v2 = vmov (!%p190_p2), 0.0   ;;  %v2599_v4 = vld [vmem:[%s3302_s1 + $0x48] sm:$0xff] (!%p190_p2)   ;;  %vm2706_vm0 = vmmov (!%p190_p2), 0   ;;  %s218_s7 = smul.u32 (!%p190_p2), 30, %s1939_s19  ;;  %v2602_v7 = vld [vmem:[%s3302_s1 + $0x50] sm:$0xff] (!%p190_p2)  }
   0x6   : > { %193 = sbr.rel (%p190_p2) target bundleno = 824 (0x338), region = 40  ;;  %v2597_v1 = vld [vmem:[%s3302_s1] sm:$0xff] (!%p190_p2)   ;;  %2357 = vmatprep.subr.bf16.mxu1 (!%p190_p2), %v2705_v2  ;;  %2182 = vmatprep.subr.bf16.mxu0 (!%p190_p2), %v2596_v0  ;;  %v2600_v5 = vld [vmem:[%s3302_s1 + $0x8] sm:$0xff] (!%p190_p2)   ;;  %v2603_v8 = vld [vmem:[%s3302_s1 + $0x10] sm:$0xff] (!%p190_p2)  }
   0x7   : > { %v2598_v3 = vld [vmem:[%s3302_s1 + $0x80] sm:$0xff] (!%p190_p2)   ;;  %2183 = vmatpush3.bf16.msra.mxu0 (!%p190_p2), %v2597_v1  ;;  %2373 = vmatprep.mubr.msk.bf16.mxu1 (!%p190_p2), %vm2706_vm0, %v2705_v2  ;;  %v2601_v6 = vld [vmem:[%s3302_s1 + $0x88] sm:$0xff] (!%p190_p2)   ;;  %v2604_v9 = vld [vmem:[%s3302_s1 + $0x90] sm:$0xff] (!%p190_p2)   ;;  %p219_p3 = scmp.lt.s32.totalorder (!%p190_p2), %s218_s7, 59 }
   0x8   : > { %2358 = vmatpush3.bf16.msra.mxu1 (!%p190_p2), %v2598_v3  ;;  %2184 = vmatprep.subr.bf16.mxu0 (!%p190_p2), %v2599_v4  ;;  %v2605_v10 = vld [vmem:[%s3302_s1 + $0x58] sm:$0xff] (!%p190_p2)   ;;  %v2608_v13 = vld [vmem:[%s3302_s1 + $0x60] sm:$0xff] (!%p190_p2)   ;;  %v2611_v16 = vld [vmem:[%s3302_s1 + $0x68] sm:$0xff] (!%p190_p2)  }
   0x9   : > { %2359 = vmatprep.subr.bf16.mxu1 (!%p190_p2), %v2705_v2  ;;  %v2606_v11 = vld [vmem:[%s3302_s1 + $0x18] sm:$0xff] (!%p190_p2)   ;;  %v2609_v14 = vld [vmem:[%s3302_s1 + $0x20] sm:$0xff] (!%p190_p2)   ;;  %v2612_v17 = vld [vmem:[%s3302_s1 + $0x28] sm:$0xff] (!%p190_p2)  }
   0xa   : > { %v2607_v12 = vld [vmem:[%s3302_s1 + $0x98] sm:$0xff] (!%p190_p2)   ;;  %v2610_v15 = vld [vmem:[%s3302_s1 + $0xa0] sm:$0xff] (!%p190_p2)   ;;  %v2613_v18 = vld [vmem:[%s3302_s1 + $0xa8] sm:$0xff] (!%p190_p2)  }
   0xb   : > { %2185 = vmatpush3.bf16.msra.mxu0 (!%p190_p2), %v2600_v5  ;;  %v2614_v19 = vld [vmem:[%s3302_s1 + $0x70] sm:$0xff] (!%p190_p2)   ;;  %v2617_v22 = vld [vmem:[%s3302_s1 + $0x78] sm:$0xff] (!%p190_p2)   ;;  %v2675_v38 = vld [vmem:[%s3303_s2] sm:$0xff] (!%p190_p2)  }
   0xc   : > { %2360 = vmatpush3.bf16.msra.mxu1 (!%p190_p2), %v2601_v6  ;;  %2186 = vmatprep.subr.bf16.mxu0 (!%p190_p2), %v2602_v7  ;;  %v2615_v20 = vld [vmem:[%s3302_s1 + $0x30] sm:$0xff] (!%p190_p2)   ;;  %v2618_v24 = vld [vmem:[%s3302_s1 + $0x38] sm:$0xff] (!%p190_p2)   ;;  %v2681_v39 = vld [vmem:[%s3303_s2 + $0x8] sm:$0xff] (!%p190_p2)  }
   0xd   : > { %2361 = vmatprep.subr.bf16.mxu1 %v2705_v2  ;;  %s3308_s7 = smov (!%p219_p3, %s218_s7), 59  ;;  %v2616_v21 = vld [vmem:[%s3302_s1 + $0xb0] sm:$0xff]   ;;  %v2622_v25 = vld [vmem:[%s3302_s1 + $0xb8] sm:$0xff]   ;;  %v2684_v48 = vld [vmem:[%s3303_s2 + $0x20] sm:$0xff]  }
   0xe   : > { %s2585_s29 = smul.u32 12, %s3308_s7  ;;  %v2682_v43 = vld [vmem:[%s3303_s2 + $0x10] sm:$0xff]   ;;  %v2683_v44 = vld [vmem:[%s3303_s2 + $0x18] sm:$0xff]   ;;  %v2685_v49 = vld [vmem:[%s3303_s2 + $0x28] sm:$0xff]   ;;  %s1945_s15 = sshll.u32 %s3308_s7, 2 }
   0xf   : > { %2187 = vmatpush3.bf16.msra.mxu0 %v2603_v8  ;;  %v2686_v53 = vld [vmem:[%s3303_s2 + $0x30] sm:$0xff]   ;;  %v2687_v54 = vld [vmem:[%s3303_s2 + $0x38] sm:$0xff]   ;;  %s3198_s20 = scalar_lea.vmem %s3306_s5, %s1945_s15 }
  0x10   : > { %2362 = vmatpush3.bf16.msra.mxu1 %v2604_v9  ;;  %2188 = vmatprep.subr.bf16.mxu0 %v2605_v10  ;;  %s2819_s16 = scalar_lea.vmem %s3301_s0, %s2585_s29 }
  0x11   : > { %2363 = vmatprep.subr.bf16.mxu1 %v2705_v2  ;;  %v2621_v23 = vld [vmem:[%s2819_s16 + $0x4] ss:$12 sps:$4 sm:$0xff]   ;;  %v2619_v26 = vld [vmem:[%s2819_s16] ss:$12 sps:$4 sm:$0xff]   ;;  %v2623_v27 = vld [vmem:[%s2819_s16 + $0x8] ss:$12 sps:$4 sm:$0xff]  }
  0x12   : > { %761 = vmatprep.mubr.bf16.mxu0 %v2621_v23  ;;  %v2624_v28 = vld [vmem:[%s2819_s16 + $0x1c] ss:$12 sps:$4 sm:$0xff]   ;;  %v2626_v29 = vld [vmem:[%s2819_s16 + $0x18] ss:$12 sps:$4 sm:$0xff]   ;;  %v2627_v30 = vld [vmem:[%s2819_s16 + $0x20] ss:$12 sps:$4 sm:$0xff]  }
  0x13   : > { %2189 = vmatpush3.bf16.msra.mxu0 %v2606_v11  ;;  %v2628_v31 = vld [vmem:[%s2819_s16 + $0x34] ss:$12 sps:$4 sm:$0xff]   ;;  %v2630_v32 = vld [vmem:[%s2819_s16 + $0x30] ss:$12 sps:$4 sm:$0xff]   ;;  %v2631_v33 = vld [vmem:[%s2819_s16 + $0x38] ss:$12 sps:$4 sm:$0xff]  }
  0x14   : > { %2364 = vmatpush3.bf16.msra.mxu1 %v2607_v12  ;;  %2190 = vmatprep.subr.bf16.mxu0 %v2608_v13  ;;  %v2632_v34 = vld [vmem:[%s2819_s16 + $0x4c] ss:$12 sps:$4 sm:$0xff]   ;;  %v2634_v35 = vld [vmem:[%s2819_s16 + $0x48] ss:$12 sps:$4 sm:$0xff]   ;;  %v2635_v36 = vld [vmem:[%s2819_s16 + $0x50] ss:$12 sps:$4 sm:$0xff]  }
  0x15   : > { %2365 = vmatprep.subr.bf16.mxu1 %v2705_v2  ;;  %v2636_v37 = vld [vmem:[%s2819_s16 + $0x64] ss:$12 sps:$4 sm:$0xff]   ;;  %v2638_v40 = vld [vmem:[%s2819_s16 + $0x60] ss:$12 sps:$4 sm:$0xff]   ;;  %v2639_v41 = vld [vmem:[%s2819_s16 + $0x68] ss:$12 sps:$4 sm:$0xff]  }
  0x16   : > { %v2640_v42 = vld [vmem:[%s2819_s16 + $0x7c] ss:$12 sps:$4 sm:$0xff]   ;;  %v2642_v45 = vld [vmem:[%s2819_s16 + $0x78] ss:$12 sps:$4 sm:$0xff]   ;;  %v2643_v46 = vld [vmem:[%s2819_s16 + $0x80] ss:$12 sps:$4 sm:$0xff]  }
  0x17   : > { %2191 = vmatpush3.bf16.msra.mxu0 %v2609_v14  ;;  %v2644_v47 = vld [vmem:[%s2819_s16 + $0x94] ss:$12 sps:$4 sm:$0xff]   ;;  %v2646_v50 = vld [vmem:[%s2819_s16 + $0x90] ss:$12 sps:$4 sm:$0xff]   ;;  %v2647_v51 = vld [vmem:[%s2819_s16 + $0x98] ss:$12 sps:$4 sm:$0xff]  }
  0x18   : > { %2366 = vmatpush3.bf16.msra.mxu1 %v2610_v15  ;;  %2192 = vmatprep.subr.bf16.mxu0 %v2611_v16  ;;  %v2648_v52 = vld [vmem:[%s2819_s16 + $0xac] ss:$12 sps:$4 sm:$0xff]   ;;  %v2650_v55 = vld [vmem:[%s2819_s16 + $0xa8] ss:$12 sps:$4 sm:$0xff]   ;;  %v2651_v56 = vld [vmem:[%s2819_s16 + $0xb0] ss:$12 sps:$4 sm:$0xff]   ;;  %v341_v15 = vlaneseq }
  0x19   : > { %2367 = vmatprep.subr.bf16.mxu1 %v2705_v2  ;;  %v2652_v57 = vld [vmem:[%s2819_s16 + $0xc4] ss:$12 sps:$4 sm:$0xff]   ;;  %v2654_v58 = vld [vmem:[%s2819_s16 + $0xc0] ss:$12 sps:$4 sm:$0xff]   ;;  %v2655_v59 = vld [vmem:[%s2819_s16 + $0xc8] ss:$12 sps:$4 sm:$0xff]  }
  0x1a   : > { %v2656_v60 = vld [vmem:[%s2819_s16 + $0xdc] ss:$12 sps:$4 sm:$0xff]   ;;  %v2658_v61 = vld [vmem:[%s2819_s16 + $0xd8] ss:$12 sps:$4 sm:$0xff]   ;;  %v2659_v62 = vld [vmem:[%s2819_s16 + $0xe0] ss:$12 sps:$4 sm:$0xff]  }
  0x1b   : > { %2193 = vmatpush3.bf16.msra.mxu0 %v2612_v17  ;;  %v2660_v63 = vld [vmem:[%s2819_s16 + $0xf4] ss:$12 sps:$4 sm:$0xff]   ;;  %v2662_v0 = vld [vmem:[%s2819_s16 + $0xf0] ss:$12 sps:$4 sm:$0xff]   ;;  %v2663_v1 = vld [vmem:[%s2819_s16 + $0xf8] ss:$12 sps:$4 sm:$0xff]  }
  0x1c   : > { %2368 = vmatpush3.bf16.msra.mxu1 %v2613_v18  ;;  %2194 = vmatprep.subr.bf16.mxu0 %v2614_v19  ;;  %v2664_v3 = vld [vmem:[%s2819_s16 + $0x10c] ss:$12 sps:$4 sm:$0xff]   ;;  %v2666_v4 = vld [vmem:[%s2819_s16 + $0x108] ss:$12 sps:$4 sm:$0xff]   ;;  %v2667_v5 = vld [vmem:[%s2819_s16 + $0x110] ss:$12 sps:$4 sm:$0xff]  }
  0x1d   : > { %2369 = vmatprep.subr.bf16.mxu1 %v2705_v2  ;;  %v2668_v6 = vld [vmem:[%s2819_s16 + $0x124] ss:$12 sps:$4 sm:$0xff]   ;;  %v2670_v7 = vld [vmem:[%s2819_s16 + $0x120] ss:$12 sps:$4 sm:$0xff]   ;;  %v2671_v8 = vld [vmem:[%s2819_s16 + $0x128] ss:$12 sps:$4 sm:$0xff]  }
  0x1e   : > { %v2672_v9 = vld [vmem:[%s2819_s16 + $0x13c] ss:$12 sps:$4 sm:$0xff]   ;;  %v2674_v10 = vld [vmem:[%s2819_s16 + $0x138] ss:$12 sps:$4 sm:$0xff]   ;;  %v2676_v11 = vld [vmem:[%s2819_s16 + $0x140] ss:$12 sps:$4 sm:$0xff]  }
  0x1f   : > { %2195 = vmatpush3.bf16.msra.mxu0 %v2615_v20  ;;  %v2677_v12 = vld [vmem:[%s2819_s16 + $0x154] ss:$12 sps:$4 sm:$0xff]   ;;  %v2679_v13 = vld [vmem:[%s2819_s16 + $0x150] ss:$12 sps:$4 sm:$0xff]   ;;  %v2680_v14 = vld [vmem:[%s2819_s16 + $0x158] ss:$12 sps:$4 sm:$0xff]  }
  0x20   : > { %2370 = vmatpush3.bf16.msra.mxu1 %v2616_v21  ;;  %2196 = vmatprep.subr.bf16.mxu0 %v2617_v22  ;;  %v2945_v16 = vshrl.u32 %v341_v15, 7  ;;  %v2688_v18 = vld [vmem:[%s3304_s3] sm:$0xff]   ;;  %v2689_v20 = vld [vmem:[%s3304_s3 + $0x8] sm:$0xff]  }
  0x21   : > { %2371 = vmatprep.subr.bf16.mxu1 %v2705_v2  ;;  %v2954_v19 = vld [vmem:[%s3305_s4] sm:$0xff] }
  0x22   : > { %v343_v17 = vsub.s32 0, %v2945_v16 }
  0x23   : > { %2197 = vmatpush3.bf16.msra.mxu0 %v2618_v24 }
  0x24   : > { %2372 = vmatpush3.bf16.msra.mxu1 %v2622_v25  ;;  %2433 = vmatprep.subr.bf16.mxu0 %v2705_v2  ;;  %v2961_v22 = vrot.slane %v2954_v19, %v343_v17 }
  0x25   : > { %2509 = vmatprep.subr.bf16.mxu1 %v2705_v2 }
  0x26   : > { %762 = vmatmul.mubr.bf16.vlgmr.msra.gmra.mrb[0].mxu0 %v2619_v26 }
  0x27   : > { %2374 = vmatmul.mubr.bf16.vlgmr.msra.gmra.mrb[0].mxu1 %v2623_v27  ;;  %769 = vmatprep.mubr.bf16.mxu0 %v2624_v28  ;;  %v2690_v28 = vld [vmem:[%s3304_s3 + $0x10] sm:$0xff]  }
  0x28   : > { %2377 = vmatprep.mubr.msk.bf16.mxu1 %vm2706_vm0, %v2705_v2  ;;  %2434 = vmatpush3.bf16.msra.mxu0 %v2675_v38 }
  0x29   : > { %2435 = vmatprep.subr.bf16.mxu0 %v2705_v2  ;;  %2510 = vmatpush3.bf16.msra.mxu1 %v2688_v18 }
  0x2a   : > { %2511 = vmatprep.subr.bf16.mxu1 %v2705_v2 }
  0x2c   : > { %2436 = vmatpush3.bf16.msra.mxu0 %v2681_v39 }
  0x2d   : > { %2437 = vmatprep.subr.bf16.mxu0 %v2705_v2  ;;  %2512 = vmatpush3.bf16.msra.mxu1 %v2689_v20 }
  0x2e   : > { %770 = vmatmul.mubr.bf16.gmra.mrb[4].mxu0 %v2626_v29  ;;  %2513 = vmatprep.subr.bf16.mxu1 %v2705_v2 }
  0x2f   : > { %2378 = vmatmul.mubr.bf16.gmra.mrb[4].mxu1 %v2627_v30  ;;  %777 = vmatprep.mubr.bf16.mxu0 %v2628_v31 }
  0x30   : > { %2381 = vmatprep.mubr.msk.bf16.mxu1 %vm2706_vm0, %v2705_v2  ;;  %2438 = vmatpush3.bf16.msra.mxu0 %v2682_v43 }
  0x31   : > { %2439 = vmatprep.subr.bf16.mxu0 %v2705_v2  ;;  %2514 = vmatpush3.bf16.msra.mxu1 %v2690_v28 }
  0x32   : > { %2515 = vmatprep.subr.bf16.mxu1 %v2705_v2 }
  0x34   : > { %2440 = vmatpush3.bf16.msra.mxu0 %v2683_v44 }
  0x35   : > { %2441 = vmatprep.subr.bf16.mxu0 %v2705_v2 }
  0x36   : > { %778 = vmatmul.mubr.bf16.gmra.mrb[8].mxu0 %v2630_v32 }
  0x37   : > { %2382 = vmatmul.mubr.bf16.gmra.mrb[8].mxu1 %v2631_v33  ;;  %785 = vmatprep.mubr.bf16.mxu0 %v2632_v34 }
  0x38   : > { %2385 = vmatprep.mubr.msk.bf16.mxu1 %vm2706_vm0, %v2705_v2  ;;  %2442 = vmatpush3.bf16.msra.mxu0 %v2684_v48 }
  0x39   : > { %2443 = vmatprep.subr.bf16.mxu0 %v2705_v2 }
  0x3c   : > { %2444 = vmatpush3.bf16.msra.mxu0 %v2685_v49 }
  0x3d   : > { %2445 = vmatprep.subr.bf16.mxu0 %v2705_v2 }
  0x3e   : > { %786 = vmatmul.mubr.bf16.gmra.mrb[12].mxu0 %v2634_v35 }
  0x3f   : > { %2386 = vmatmul.mubr.bf16.gmra.mrb[12].mxu1 %v2635_v36  ;;  %793 = vmatprep.mubr.bf16.mxu0 %v2636_v37  ;;  %v2691_v36 = vld [vmem:[%s3304_s3 + $0x18] sm:$0xff]  }
  0x40   : > { %2389 = vmatprep.mubr.msk.bf16.mxu1 %vm2706_vm0, %v2705_v2  ;;  %2446 = vmatpush3.bf16.msra.mxu0 %v2686_v53 }
  0x41   : > { %2447 = vmatprep.subr.bf16.mxu0 %v2705_v2  ;;  %2516 = vmatpush3.bf16.msra.mxu1 %v2691_v36 }
  0x42   : > { %2517 = vmatprep.subr.bf16.mxu1 %v2705_v2 }
  0x44   : > { %2448 = vmatpush3.bf16.msra.mxu0 %v2687_v54 }
  0x46   : > { %794 = vmatmul.mubr.bf16.gmra.mrb[16].mxu0 %v2638_v40 }
  0x47   : > { %2390 = vmatmul.mubr.bf16.gmra.mrb[16].mxu1 %v2639_v41  ;;  %801 = vmatprep.mubr.bf16.mxu0 %v2640_v42 }
  0x48   : > { %2393 = vmatprep.mubr.msk.bf16.mxu1 %vm2706_vm0, %v2705_v2 }
  0x4e   : > { %802 = vmatmul.mubr.bf16.gmra.mrb[20].mxu0 %v2642_v45 }
  0x4f   : > { %2394 = vmatmul.mubr.bf16.gmra.mrb[20].mxu1 %v2643_v46  ;;  %809 = vmatprep.mubr.bf16.mxu0 %v2644_v47  ;;  %v2692_v46 = vld [vmem:[%s3304_s3 + $0x20] sm:$0xff]  }
  0x50   : > { %2397 = vmatprep.mubr.msk.bf16.mxu1 %vm2706_vm0, %v2705_v2  ;;  %2518 = vmatpush3.bf16.msra.mxu1 %v2692_v46 }
  0x51   : > { %2519 = vmatprep.subr.bf16.mxu1 %v2705_v2 }
  0x56   : > { %810 = vmatmul.mubr.bf16.gmra.mrb[24].mxu0 %v2646_v50 }
  0x57   : > { %2398 = vmatmul.mubr.bf16.gmra.mrb[24].mxu1 %v2647_v51  ;;  %817 = vmatprep.mubr.bf16.mxu0 %v2648_v52 }
  0x58   : > { %2401 = vmatprep.mubr.msk.bf16.mxu1 %vm2706_vm0, %v2705_v2 }
  0x5e   : > { %818 = vmatmul.mubr.bf16.gmra.mrb[28].mxu0 %v2650_v55  ;;  %v2693_v55 = vld [vmem:[%s3304_s3 + $0x28] sm:$0xff]  }
  0x5f   : > { %2402 = vmatmul.mubr.bf16.gmra.mrb[28].mxu1 %v2651_v56  ;;  %825 = vmatprep.mubr.bf16.mxu0 %v2652_v57 }
  0x60   : > { %2405 = vmatprep.mubr.msk.bf16.mxu1 %vm2706_vm0, %v2705_v2  ;;  %2520 = vmatpush3.bf16.msra.mxu1 %v2693_v55 }
  0x61   : > { %2521 = vmatprep.subr.bf16.mxu1 %v2705_v2 }
  0x66   : > { %826 = vmatmul.mubr.bf16.gmra.mrb[32].mxu0 %v2654_v58 }
  0x67   : > { %2406 = vmatmul.mubr.bf16.gmra.mrb[32].mxu1 %v2655_v59  ;;  %833 = vmatprep.mubr.bf16.mxu0 %v2656_v60 }
  0x68   : > { %2409 = vmatprep.mubr.msk.bf16.mxu1 %vm2706_vm0, %v2705_v2 }
  0x6e   : > { %834 = vmatmul.mubr.bf16.gmra.mrb[36].mxu0 %v2658_v61 }
  0x6f   : > { %2410 = vmatmul.mubr.bf16.gmra.mrb[36].mxu1 %v2659_v62  ;;  %841 = vmatprep.mubr.bf16.mxu0 %v2660_v63 }
  0x70   : > { %2413 = vmatprep.mubr.msk.bf16.mxu1 %vm2706_vm0, %v2705_v2 }
  0x76   : > { %842 = vmatmul.mubr.bf16.gmra.mrb[40].mxu0 %v2662_v0 }
  0x77   : > { %2414 = vmatmul.mubr.bf16.gmra.mrb[40].mxu1 %v2663_v1  ;;  %849 = vmatprep.mubr.bf16.mxu0 %v2664_v3  ;;  %v2694_v1 = vld [vmem:[%s3304_s3 + $0x30] sm:$0xff]  }
  0x78   : > { %2417 = vmatprep.mubr.msk.bf16.mxu1 %vm2706_vm0, %v2705_v2  ;;  %2522 = vmatpush3.bf16.msra.mxu1 %v2694_v1 }
  0x79   : > { %2523 = vmatprep.subr.bf16.mxu1 %v2705_v2 }
  0x7e   : > { %850 = vmatmul.mubr.bf16.gmra.mrb[44].mxu0 %v2666_v4 }
  0x7f   : > { %2418 = vmatmul.mubr.bf16.gmra.mrb[44].mxu1 %v2667_v5  ;;  %857 = vmatprep.mubr.bf16.mxu0 %v2668_v6 }
  0x80   : > { %2421 = vmatprep.mubr.msk.bf16.mxu1 %vm2706_vm0, %v2705_v2 }
  0x86   : > { %858 = vmatmul.mubr.bf16.gmra.mrb[48].mxu0 %v2670_v7 }
  0x87   : > { %2422 = vmatmul.mubr.bf16.gmra.mrb[48].mxu1 %v2671_v8  ;;  %865 = vmatprep.mubr.bf16.mxu0 %v2672_v9 }
  0x88   : > { %2425 = vmatprep.mubr.msk.bf16.mxu1 %vm2706_vm0, %v2705_v2 }
  0x8e   : > { %866 = vmatmul.mubr.bf16.gmra.mrb[52].mxu0 %v2674_v10 }
  0x8f   : > { %2426 = vmatmul.mubr.bf16.gmra.mrb[52].mxu1 %v2676_v11  ;;  %873 = vmatprep.mubr.bf16.mxu0 %v2677_v12  ;;  %v2695_v11 = vld [vmem:[%s3304_s3 + $0x38] sm:$0xff]  }
  0x90   : > { %2429 = vmatprep.mubr.msk.bf16.mxu1 %vm2706_vm0, %v2705_v2  ;;  %2524 = vmatpush3.bf16.msra.mxu1 %v2695_v11 }
  0x96   : > { %874 = vmatmul.mubr.bf16.gmra.mrb[56].mxu0 %v2679_v13 }
  0x97   : > { %2430 = vmatmul.mubr.bf16.gmra.mrb[56].mxu1 %v2680_v14  ;;  %2449 = vmatprep.mubr.msk.bf16.mxu0 %vm2706_vm0, %v2705_v2 }
  0x98   : > { %2525 = vmatprep.mubr.msk.bf16.mxu1 %vm2706_vm0, %v2705_v2 }
  0xf9   : > { %v2198_v21 = vpop.f32.mrb[0].mxu0 }
  0xfa   : > { %v2199_v23 = vpop.f32.mrb[1].mxu0  ;;  %v916_v24 = vpop.f32.mrb[0].mxu1 }
  0xfb   : > { %v2200_v25 = vadd.f32 %v2199_v23, %v2198_v21  ;;  %v2201_v26 = vpop.f32.mrb[2].mxu0  ;;  %v2375_v27 = vpop.f32.mrb[1].mxu1 }
  0xfc   : > { %v2202_v29 = vpop.f32.mrb[3].mxu0  ;;  %v919_v30 = vpop.f32.mrb[2].mxu1 }
  0xfd   : > { %v764_v31 = vadd.f32 %v2200_v25, %v2961_v22  ;;  %v2203_v32 = vadd.f32 %v2202_v29, %v2201_v26  ;;  %v2376_v33 = vpop.f32.mrb[3].mxu1 }
  0xff   : > { %v917_v34 = vadd.f32 %v916_v24, %v764_v31  ;;  %v767_v35 = vadd.f32 %v2203_v32, %v2961_v22 }
 0x101   : > { %v920_v37 = vadd.f32 %v919_v30, %v767_v35  ;;  %v2204_v38 = vpop.f32.mrb[4].mxu0  ;;  %v1035_v41 = vmax.f32 %v917_v34, 0.0 }
 0x102   : > { %v2205_v39 = vpop.f32.mrb[5].mxu0  ;;  %v924_v40 = vpop.f32.mrb[4].mxu1 }
 0x103   : > { %v1036_v42 = vmax.f32 %v920_v37, 0.0  ;;  %v2206_v43 = vadd.f32 %v2205_v39, %v2204_v38  ;;  %v2207_v44 = vpop.f32.mrb[6].mxu0  ;;  %v2379_v45 = vpop.f32.mrb[5].mxu1 }
 0x104   : > { %v2208_v47 = vpop.f32.mrb[7].mxu0  ;;  %v927_v48 = vpop.f32.mrb[6].mxu1 }
 0x105   : > { %v1065_v49 = vpack.c.bf16 %v1036_v42, %v1035_v41  ;;  %v772_v50 = vadd.f32 %v2206_v43, %v2961_v22  ;;  %v2209_v51 = vadd.f32 %v2208_v47, %v2207_v44  ;;  %v2380_v52 = vpop.f32.mrb[7].mxu1 }
 0x107   : > { %v925_v53 = vadd.f32 %v924_v40, %v772_v50  ;;  %v775_v54 = vadd.f32 %v2209_v51, %v2961_v22  ;;  %2450 = vmatmul.mubr.bf16.vlgmr.msra.gmra.mrb[60].mxu0 %v1065_v49 }
 0x108   : > { %2453 = vmatprep.mubr.msk.bf16.mxu0 %vm2706_vm0, %v2705_v2 }
 0x109   : > { %v928_v56 = vadd.f32 %v927_v48, %v775_v54  ;;  %v2210_v57 = vpop.f32.mrb[8].mxu0  ;;  %v1037_v60 = vmax.f32 %v925_v53, 0.0 }
 0x10a   : > { %v2211_v58 = vpop.f32.mrb[9].mxu0  ;;  %v932_v59 = vpop.f32.mrb[8].mxu1 }
 0x10b   : > { %v1038_v61 = vmax.f32 %v928_v56, 0.0  ;;  %v2212_v62 = vadd.f32 %v2211_v58, %v2210_v57  ;;  %v2213_v63 = vpop.f32.mrb[10].mxu0  ;;  %v2383_v0 = vpop.f32.mrb[9].mxu1 }
 0x10c   : > { %v2214_v3 = vpop.f32.mrb[11].mxu0  ;;  %v935_v4 = vpop.f32.mrb[10].mxu1 }
 0x10d   : > { %v1066_v5 = vpack.c.bf16 %v1038_v61, %v1037_v60  ;;  %v780_v6 = vadd.f32 %v2212_v62, %v2961_v22  ;;  %v2215_v7 = vadd.f32 %v2214_v3, %v2213_v63  ;;  %v2384_v8 = vpop.f32.mrb[11].mxu1 }
 0x10f   : > { %v933_v9 = vadd.f32 %v932_v59, %v780_v6  ;;  %v783_v10 = vadd.f32 %v2215_v7, %v2961_v22  ;;  %2454 = vmatmul.mubr.bf16.gmra.mrb[64].mxu0 %v1066_v5 }
 0x110   : > { %2457 = vmatprep.mubr.msk.bf16.mxu0 %vm2706_vm0, %v2705_v2 }
 0x111   : > { %v936_v12 = vadd.f32 %v935_v4, %v783_v10  ;;  %v2216_v13 = vpop.f32.mrb[12].mxu0  ;;  %v1039_v17 = vmax.f32 %v933_v9, 0.0 }
 0x112   : > { %v2217_v14 = vpop.f32.mrb[13].mxu0  ;;  %v940_v15 = vpop.f32.mrb[12].mxu1 }
 0x113   : > { %v1040_v18 = vmax.f32 %v936_v12, 0.0  ;;  %v2218_v20 = vadd.f32 %v2217_v14, %v2216_v13  ;;  %v2219_v21 = vpop.f32.mrb[14].mxu0  ;;  %v2387_v23 = vpop.f32.mrb[13].mxu1 }
 0x114   : > { %v2220_v24 = vpop.f32.mrb[15].mxu0  ;;  %v943_v25 = vpop.f32.mrb[14].mxu1 }
 0x115   : > { %v1067_v26 = vpack.c.bf16 %v1040_v18, %v1039_v17  ;;  %v788_v27 = vadd.f32 %v2218_v20, %v2961_v22  ;;  %v2221_v28 = vadd.f32 %v2220_v24, %v2219_v21  ;;  %v2388_v29 = vpop.f32.mrb[15].mxu1 }
 0x117   : > { %v941_v30 = vadd.f32 %v940_v15, %v788_v27  ;;  %v791_v31 = vadd.f32 %v2221_v28, %v2961_v22  ;;  %2458 = vmatmul.mubr.bf16.gmra.mrb[68].mxu0 %v1067_v26 }
 0x118   : > { %2461 = vmatprep.mubr.msk.bf16.mxu0 %vm2706_vm0, %v2705_v2 }
 0x119   : > { %v944_v32 = vadd.f32 %v943_v25, %v791_v31  ;;  %v2222_v33 = vpop.f32.mrb[16].mxu0  ;;  %v1041_v36 = vmax.f32 %v941_v30, 0.0 }
 0x11a   : > { %v2223_v34 = vpop.f32.mrb[17].mxu0  ;;  %v948_v35 = vpop.f32.mrb[16].mxu1 }
 0x11b   : > { %v1042_v37 = vmax.f32 %v944_v32, 0.0  ;;  %v2224_v38 = vadd.f32 %v2223_v34, %v2222_v33  ;;  %v2225_v39 = vpop.f32.mrb[18].mxu0  ;;  %v2391_v40 = vpop.f32.mrb[17].mxu1 }
 0x11c   : > { %v2226_v41 = vpop.f32.mrb[19].mxu0  ;;  %v951_v42 = vpop.f32.mrb[18].mxu1 }
 0x11d   : > { %v1068_v43 = vpack.c.bf16 %v1042_v37, %v1041_v36  ;;  %v796_v44 = vadd.f32 %v2224_v38, %v2961_v22  ;;  %v2227_v45 = vadd.f32 %v2226_v41, %v2225_v39  ;;  %v2392_v46 = vpop.f32.mrb[19].mxu1 }
 0x11f   : > { %v949_v47 = vadd.f32 %v948_v35, %v796_v44  ;;  %v799_v48 = vadd.f32 %v2227_v45, %v2961_v22  ;;  %2462 = vmatmul.mubr.bf16.gmra.mrb[72].mxu0 %v1068_v43 }
 0x120   : > { %2465 = vmatprep.mubr.msk.bf16.mxu0 %vm2706_vm0, %v2705_v2 }
 0x121   : > { %v952_v49 = vadd.f32 %v951_v42, %v799_v48  ;;  %v2228_v50 = vpop.f32.mrb[20].mxu0  ;;  %v1043_v53 = vmax.f32 %v949_v47, 0.0 }
 0x122   : > { %v2229_v51 = vpop.f32.mrb[21].mxu0  ;;  %v956_v52 = vpop.f32.mrb[20].mxu1 }
 0x123   : > { %v1044_v54 = vmax.f32 %v952_v49, 0.0  ;;  %v2230_v55 = vadd.f32 %v2229_v51, %v2228_v50  ;;  %v2231_v56 = vpop.f32.mrb[22].mxu0  ;;  %v2395_v57 = vpop.f32.mrb[21].mxu1 }
 0x124   : > { %v2232_v58 = vpop.f32.mrb[23].mxu0  ;;  %v959_v59 = vpop.f32.mrb[22].mxu1 }
 0x125   : > { %v1069_v60 = vpack.c.bf16 %v1044_v54, %v1043_v53  ;;  %v804_v61 = vadd.f32 %v2230_v55, %v2961_v22  ;;  %v2233_v62 = vadd.f32 %v2232_v58, %v2231_v56  ;;  %v2396_v63 = vpop.f32.mrb[23].mxu1 }
 0x127   : > { %v957_v0 = vadd.f32 %v956_v52, %v804_v61  ;;  %v807_v1 = vadd.f32 %v2233_v62, %v2961_v22  ;;  %2466 = vmatmul.mubr.bf16.gmra.mrb[76].mxu0 %v1069_v60 }
 0x128   : > { %2469 = vmatprep.mubr.msk.bf16.mxu0 %vm2706_vm0, %v2705_v2 }
 0x129   : > { %v960_v3 = vadd.f32 %v959_v59, %v807_v1  ;;  %v2234_v4 = vpop.f32.mrb[24].mxu0  ;;  %v1045_v7 = vmax.f32 %v957_v0, 0.0 }
 0x12a   : > { %v2235_v5 = vpop.f32.mrb[25].mxu0  ;;  %v964_v6 = vpop.f32.mrb[24].mxu1 }
 0x12b   : > { %v1046_v8 = vmax.f32 %v960_v3, 0.0  ;;  %v2236_v9 = vadd.f32 %v2235_v5, %v2234_v4  ;;  %v2237_v10 = vpop.f32.mrb[26].mxu0  ;;  %v2399_v11 = vpop.f32.mrb[25].mxu1 }
 0x12c   : > { %v2238_v12 = vpop.f32.mrb[27].mxu0  ;;  %v967_v13 = vpop.f32.mrb[26].mxu1 }
 0x12d   : > { %v1070_v14 = vpack.c.bf16 %v1046_v8, %v1045_v7  ;;  %v812_v15 = vadd.f32 %v2236_v9, %v2961_v22  ;;  %v2239_v17 = vadd.f32 %v2238_v12, %v2237_v10  ;;  %v2400_v18 = vpop.f32.mrb[27].mxu1 }
 0x12f   : > { %v965_v20 = vadd.f32 %v964_v6, %v812_v15  ;;  %v815_v21 = vadd.f32 %v2239_v17, %v2961_v22  ;;  %2470 = vmatmul.mubr.bf16.gmra.mrb[80].mxu0 %v1070_v14 }
 0x130   : > { %2473 = vmatprep.mubr.msk.bf16.mxu0 %vm2706_vm0, %v2705_v2 }
 0x131   : > { %v968_v23 = vadd.f32 %v967_v13, %v815_v21  ;;  %v2240_v24 = vpop.f32.mrb[28].mxu0  ;;  %v1047_v27 = vmax.f32 %v965_v20, 0.0 }
 0x132   : > { %v2241_v25 = vpop.f32.mrb[29].mxu0  ;;  %v972_v26 = vpop.f32.mrb[28].mxu1 }
 0x133   : > { %v1048_v28 = vmax.f32 %v968_v23, 0.0  ;;  %v2242_v29 = vadd.f32 %v2241_v25, %v2240_v24  ;;  %v2243_v30 = vpop.f32.mrb[30].mxu0  ;;  %v2403_v31 = vpop.f32.mrb[29].mxu1 }
 0x134   : > { %v2244_v32 = vpop.f32.mrb[31].mxu0  ;;  %v975_v33 = vpop.f32.mrb[30].mxu1 }
 0x135   : > { %v1071_v34 = vpack.c.bf16 %v1048_v28, %v1047_v27  ;;  %v820_v35 = vadd.f32 %v2242_v29, %v2961_v22  ;;  %v2245_v36 = vadd.f32 %v2244_v32, %v2243_v30  ;;  %v2404_v37 = vpop.f32.mrb[31].mxu1 }
 0x137   : > { %v973_v38 = vadd.f32 %v972_v26, %v820_v35  ;;  %v823_v39 = vadd.f32 %v2245_v36, %v2961_v22  ;;  %2474 = vmatmul.mubr.bf16.gmra.mrb[84].mxu0 %v1071_v34 }
 0x138   : > { %2477 = vmatprep.mubr.msk.bf16.mxu0 %vm2706_vm0, %v2705_v2 }
 0x139   : > { %v976_v40 = vadd.f32 %v975_v33, %v823_v39  ;;  %v2246_v41 = vpop.f32.mrb[32].mxu0  ;;  %v1049_v44 = vmax.f32 %v973_v38, 0.0 }
 0x13a   : > { %v2247_v42 = vpop.f32.mrb[33].mxu0  ;;  %v980_v43 = vpop.f32.mrb[32].mxu1 }
 0x13b   : > { %v1050_v45 = vmax.f32 %v976_v40, 0.0  ;;  %v2248_v46 = vadd.f32 %v2247_v42, %v2246_v41  ;;  %v2249_v47 = vpop.f32.mrb[34].mxu0  ;;  %v2407_v48 = vpop.f32.mrb[33].mxu1 }
 0x13c   : > { %v2250_v49 = vpop.f32.mrb[35].mxu0  ;;  %v983_v50 = vpop.f32.mrb[34].mxu1 }
 0x13d   : > { %v1072_v51 = vpack.c.bf16 %v1050_v45, %v1049_v44  ;;  %v828_v52 = vadd.f32 %v2248_v46, %v2961_v22  ;;  %v2251_v53 = vadd.f32 %v2250_v49, %v2249_v47  ;;  %v2408_v54 = vpop.f32.mrb[35].mxu1 }
 0x13f   : > { %v981_v55 = vadd.f32 %v980_v43, %v828_v52  ;;  %v831_v56 = vadd.f32 %v2251_v53, %v2961_v22  ;;  %2478 = vmatmul.mubr.bf16.gmra.mrb[88].mxu0 %v1072_v51 }
 0x140   : > { %2481 = vmatprep.mubr.msk.bf16.mxu0 %vm2706_vm0, %v2705_v2 }
 0x141   : > { %v984_v57 = vadd.f32 %v983_v50, %v831_v56  ;;  %v2252_v58 = vpop.f32.mrb[36].mxu0  ;;  %v1051_v61 = vmax.f32 %v981_v55, 0.0 }
 0x142   : > { %v2253_v59 = vpop.f32.mrb[37].mxu0  ;;  %v988_v60 = vpop.f32.mrb[36].mxu1 }
 0x143   : > { %v1052_v62 = vmax.f32 %v984_v57, 0.0  ;;  %v2254_v63 = vadd.f32 %v2253_v59, %v2252_v58  ;;  %v2255_v0 = vpop.f32.mrb[38].mxu0  ;;  %v2411_v1 = vpop.f32.mrb[37].mxu1 }
 0x144   : > { %v2256_v3 = vpop.f32.mrb[39].mxu0  ;;  %v991_v4 = vpop.f32.mrb[38].mxu1 }
 0x145   : > { %v1073_v5 = vpack.c.bf16 %v1052_v62, %v1051_v61  ;;  %v836_v6 = vadd.f32 %v2254_v63, %v2961_v22  ;;  %v2257_v7 = vadd.f32 %v2256_v3, %v2255_v0  ;;  %v2412_v8 = vpop.f32.mrb[39].mxu1 }
 0x147   : > { %v989_v9 = vadd.f32 %v988_v60, %v836_v6  ;;  %v839_v10 = vadd.f32 %v2257_v7, %v2961_v22  ;;  %2482 = vmatmul.mubr.bf16.gmra.mrb[92].mxu0 %v1073_v5 }
 0x148   : > { %2485 = vmatprep.mubr.msk.bf16.mxu0 %vm2706_vm0, %v2705_v2 }
 0x149   : > { %v992_v11 = vadd.f32 %v991_v4, %v839_v10  ;;  %v2258_v12 = vpop.f32.mrb[40].mxu0  ;;  %v1053_v15 = vmax.f32 %v989_v9, 0.0 }
 0x14a   : > { %v2259_v13 = vpop.f32.mrb[41].mxu0  ;;  %v996_v14 = vpop.f32.mrb[40].mxu1 }
 0x14b   : > { %v1054_v17 = vmax.f32 %v992_v11, 0.0  ;;  %v2260_v18 = vadd.f32 %v2259_v13, %v2258_v12  ;;  %v2261_v20 = vpop.f32.mrb[42].mxu0  ;;  %v2415_v21 = vpop.f32.mrb[41].mxu1 }
 0x14c   : > { %v2262_v23 = vpop.f32.mrb[43].mxu0  ;;  %v999_v24 = vpop.f32.mrb[42].mxu1 }
 0x14d   : > { %v1074_v25 = vpack.c.bf16 %v1054_v17, %v1053_v15  ;;  %v844_v26 = vadd.f32 %v2260_v18, %v2961_v22  ;;  %v2263_v27 = vadd.f32 %v2262_v23, %v2261_v20  ;;  %v2416_v28 = vpop.f32.mrb[43].mxu1 }
 0x14f   : > { %v997_v29 = vadd.f32 %v996_v14, %v844_v26  ;;  %v847_v30 = vadd.f32 %v2263_v27, %v2961_v22  ;;  %2486 = vmatmul.mubr.bf16.gmra.mrb[96].mxu0 %v1074_v25 }
 0x150   : > { %2489 = vmatprep.mubr.msk.bf16.mxu0 %vm2706_vm0, %v2705_v2 }
 0x151   : > { %v1000_v31 = vadd.f32 %v999_v24, %v847_v30  ;;  %v2264_v32 = vpop.f32.mrb[44].mxu0  ;;  %v1055_v35 = vmax.f32 %v997_v29, 0.0 }
 0x152   : > { %v2265_v33 = vpop.f32.mrb[45].mxu0  ;;  %v1004_v34 = vpop.f32.mrb[44].mxu1 }
 0x153   : > { %v1056_v36 = vmax.f32 %v1000_v31, 0.0  ;;  %v2266_v37 = vadd.f32 %v2265_v33, %v2264_v32  ;;  %v2267_v38 = vpop.f32.mrb[46].mxu0  ;;  %v2419_v39 = vpop.f32.mrb[45].mxu1 }
 0x154   : > { %v2268_v40 = vpop.f32.mrb[47].mxu0  ;;  %v1007_v41 = vpop.f32.mrb[46].mxu1 }
 0x155   : > { %v1075_v42 = vpack.c.bf16 %v1056_v36, %v1055_v35  ;;  %v852_v43 = vadd.f32 %v2266_v37, %v2961_v22  ;;  %v2269_v44 = vadd.f32 %v2268_v40, %v2267_v38  ;;  %v2420_v45 = vpop.f32.mrb[47].mxu1 }
 0x156   : > { %v1333_v45 = vsub.s32 2, %v2945_v16 }
 0x157   : > { %v1005_v46 = vadd.f32 %v1004_v34, %v852_v43  ;;  %v855_v47 = vadd.f32 %v2269_v44, %v2961_v22  ;;  %2490 = vmatmul.mubr.bf16.gmra.mrb[100].mxu0 %v1075_v42  ;;  %v1098_v43 = vsub.s32 1, %v2945_v16 }
 0x158   : > { %2493 = vmatprep.mubr.msk.bf16.mxu0 %vm2706_vm0, %v2705_v2 }
 0x159   : > { %v1008_v48 = vadd.f32 %v1007_v41, %v855_v47  ;;  %v2270_v49 = vpop.f32.mrb[48].mxu0  ;;  %v1057_v52 = vmax.f32 %v1005_v46, 0.0  ;;  %v3047_v44 = vrot.slane %v2954_v19, %v1098_v43 }
 0x15a   : > { %v2271_v50 = vpop.f32.mrb[49].mxu0  ;;  %v1012_v51 = vpop.f32.mrb[48].mxu1 }
 0x15b   : > { %v1058_v53 = vmax.f32 %v1008_v48, 0.0  ;;  %v2272_v54 = vadd.f32 %v2271_v50, %v2270_v49  ;;  %v2273_v55 = vpop.f32.mrb[50].mxu0  ;;  %v2423_v56 = vpop.f32.mrb[49].mxu1  ;;  %v1367_v48 = vsub.s32 3, %v2945_v16 }
 0x15c   : > { %v2274_v57 = vpop.f32.mrb[51].mxu0  ;;  %v1015_v58 = vpop.f32.mrb[50].mxu1 }
 0x15d   : > { %v1076_v59 = vpack.c.bf16 %v1058_v53, %v1057_v52  ;;  %v860_v60 = vadd.f32 %v2272_v54, %v2961_v22  ;;  %v2275_v61 = vadd.f32 %v2274_v57, %v2273_v55  ;;  %v2424_v62 = vpop.f32.mrb[51].mxu1  ;;  %v3058_v55 = vrot.slane %v2954_v19, %v1367_v48 }
 0x15f   : > { %v1013_v63 = vadd.f32 %v1012_v51, %v860_v60  ;;  %v863_v0 = vadd.f32 %v2275_v61, %v2961_v22  ;;  %2494 = vmatmul.mubr.bf16.gmra.mrb[104].mxu0 %v1076_v59 }
 0x160   : > { %2497 = vmatprep.mubr.msk.bf16.mxu0 %vm2706_vm0, %v2705_v2 }
 0x161   : > { %v1016_v1 = vadd.f32 %v1015_v58, %v863_v0  ;;  %v2276_v3 = vpop.f32.mrb[52].mxu0  ;;  %v1059_v6 = vmax.f32 %v1013_v63, 0.0 }
 0x162   : > { %v2277_v4 = vpop.f32.mrb[53].mxu0  ;;  %v1020_v5 = vpop.f32.mrb[52].mxu1 }
 0x163   : > { %v1060_v7 = vmax.f32 %v1016_v1, 0.0  ;;  %v2278_v8 = vadd.f32 %v2277_v4, %v2276_v3  ;;  %v2279_v9 = vpop.f32.mrb[54].mxu0  ;;  %v2427_v10 = vpop.f32.mrb[53].mxu1 }
 0x164   : > { %v2280_v11 = vpop.f32.mrb[55].mxu0  ;;  %v1023_v12 = vpop.f32.mrb[54].mxu1 }
 0x165   : > { %v1077_v13 = vpack.c.bf16 %v1060_v7, %v1059_v6  ;;  %v868_v14 = vadd.f32 %v2278_v8, %v2961_v22  ;;  %v2281_v15 = vadd.f32 %v2280_v11, %v2279_v9  ;;  %v2428_v17 = vpop.f32.mrb[55].mxu1 }
 0x167   : > { %v1021_v18 = vadd.f32 %v1020_v5, %v868_v14  ;;  %v871_v20 = vadd.f32 %v2281_v15, %v2961_v22  ;;  %2498 = vmatmul.mubr.bf16.gmra.mrb[108].mxu0 %v1077_v13 }
 0x168   : > { %2501 = vmatprep.mubr.msk.bf16.mxu0 %vm2706_vm0, %v2705_v2 }
 0x169   : > { %v1024_v21 = vadd.f32 %v1023_v12, %v871_v20  ;;  %v2282_v23 = vpop.f32.mrb[56].mxu0  ;;  %v1061_v26 = vmax.f32 %v1021_v18, 0.0 }
 0x16a   : > { %v2283_v24 = vpop.f32.mrb[57].mxu0  ;;  %v1028_v25 = vpop.f32.mrb[56].mxu1 }
 0x16b   : > { %v1062_v27 = vmax.f32 %v1024_v21, 0.0  ;;  %v2284_v28 = vadd.f32 %v2283_v24, %v2282_v23  ;;  %v2285_v29 = vpop.f32.mrb[58].mxu0  ;;  %v2431_v30 = vpop.f32.mrb[57].mxu1 }
 0x16c   : > { %v2286_v31 = vpop.f32.mrb[59].mxu0  ;;  %v1031_v32 = vpop.f32.mrb[58].mxu1 }
 0x16d   : > { %v1078_v33 = vpack.c.bf16 %v1062_v27, %v1061_v26  ;;  %v876_v34 = vadd.f32 %v2284_v28, %v2961_v22  ;;  %v2287_v35 = vadd.f32 %v2286_v31, %v2285_v29  ;;  %v2432_v36 = vpop.f32.mrb[59].mxu1 }
 0x16f   : > { %v1029_v37 = vadd.f32 %v1028_v25, %v876_v34  ;;  %v879_v38 = vadd.f32 %v2287_v35, %v2961_v22  ;;  %2502 = vmatmul.mubr.bf16.gmra.mrb[112].mxu0 %v1078_v33  ;;  %v3052_v22 = vrot.slane %v2954_v19, %v1333_v45 }
 0x170   : > { %2505 = vmatprep.mubr.msk.bf16.mxu0 %vm2706_vm0, %v2705_v2 }
 0x171   : > { %v1032_v39 = vadd.f32 %v1031_v32, %v879_v38  ;;  %v1063_v40 = vmax.f32 %v1029_v37, 0.0 }
 0x173   : > { %v1064_v41 = vmax.f32 %v1032_v39, 0.0 }
 0x175   : > { %v1079_v42 = vpack.c.bf16 %v1064_v41, %v1063_v40 }
 0x177   : > { %2506 = vmatmul.mubr.bf16.gmra.mrb[116].mxu0 %v1079_v42 }
 0x1da   : > { %v1182_v46 = vpop.f32.mrb[60].mxu0 }
 0x1db   : > { %v1183_v47 = vadd.f32 %v1182_v46, %v3047_v44  ;;  %v2451_v49 = vpop.f32.mrb[61].mxu0 }
 0x1dc   : > { %v1185_v50 = vpop.f32.mrb[62].mxu0 }
 0x1dd   : > { %v1301_v51 = vmax.f32 %v1183_v47, 0.0  ;;  %v1186_v52 = vadd.f32 %v1185_v50, %v3047_v44  ;;  %v2452_v53 = vpop.f32.mrb[63].mxu0 }
 0x1df   : > { %v1335_v54 = vmul.f32 %v3052_v22, %v1301_v51  ;;  %v1302_v56 = vmax.f32 %v1186_v52, 0.0 }
 0x1e1   : > { %v1336_v57 = vmul.f32 %v3052_v22, %v1302_v56  ;;  %v1369_v59 = vadd.f32 %v3058_v55, %v1335_v54 }
 0x1e2   : > { %v1190_v58 = vpop.f32.mrb[64].mxu0 }
 0x1e3   : > { %v1370_v60 = vadd.f32 %v3058_v55, %v1336_v57  ;;  %v1191_v61 = vadd.f32 %v1190_v58, %v3047_v44  ;;  %v2455_v62 = vpop.f32.mrb[65].mxu0 }
 0x1e4   : > { %v1193_v63 = vpop.f32.mrb[66].mxu0 }
 0x1e5   : > { %v1399_v0 = vpack.c.bf16 %v1370_v60, %v1369_v59  ;;  %v1303_v1 = vmax.f32 %v1191_v61, 0.0  ;;  %v1194_v3 = vadd.f32 %v1193_v63, %v3047_v44  ;;  %v2456_v4 = vpop.f32.mrb[67].mxu0 }
 0x1e7   : > { %v1337_v19 = vmul.f32 %v3052_v22, %v1303_v1  ;;  %v1304_v5 = vmax.f32 %v1194_v3, 0.0  ;;  %2526 = vmatmul.mubr.bf16.vlgmr.msra.gmra.mrb[60].mxu1 %v1399_v0 }
 0x1e8   : > { %2529 = vmatprep.mubr.msk.bf16.mxu1 %vm2706_vm0, %v2705_v2 }
 0x1e9   : > { %v1338_v6 = vmul.f32 %v3052_v22, %v1304_v5  ;;  %v1371_v8 = vadd.f32 %v3058_v55, %v1337_v19 }
 0x1ea   : > { %v1198_v7 = vpop.f32.mrb[68].mxu0 }
 0x1eb   : > { %v1372_v9 = vadd.f32 %v3058_v55, %v1338_v6  ;;  %v1199_v10 = vadd.f32 %v1198_v7, %v3047_v44  ;;  %v2459_v11 = vpop.f32.mrb[69].mxu0 }
 0x1ec   : > { %v1201_v12 = vpop.f32.mrb[70].mxu0 }
 0x1ed   : > { %v1305_v13 = vmax.f32 %v1199_v10, 0.0  ;;  %v1202_v14 = vadd.f32 %v1201_v12, %v3047_v44  ;;  %v2460_v15 = vpop.f32.mrb[71].mxu0  ;;  %v1400_v17 = vpack.c.bf16 %v1372_v9, %v1371_v8 }
 0x1ef   : > { %v1339_v18 = vmul.f32 %v3052_v22, %v1305_v13  ;;  %v1306_v20 = vmax.f32 %v1202_v14, 0.0  ;;  %2530 = vmatmul.mubr.bf16.gmra.mrb[64].mxu1 %v1400_v17 }
 0x1f0   : > { %2533 = vmatprep.mubr.msk.bf16.mxu1 %vm2706_vm0, %v2705_v2 }
 0x1f1   : > { %v1340_v21 = vmul.f32 %v3052_v22, %v1306_v20  ;;  %v1373_v24 = vadd.f32 %v3058_v55, %v1339_v18 }
 0x1f2   : > { %v1206_v23 = vpop.f32.mrb[72].mxu0 }
 0x1f3   : > { %v1374_v25 = vadd.f32 %v3058_v55, %v1340_v21  ;;  %v1207_v26 = vadd.f32 %v1206_v23, %v3047_v44  ;;  %v2463_v27 = vpop.f32.mrb[73].mxu0 }
 0x1f4   : > { %v1209_v28 = vpop.f32.mrb[74].mxu0 }
 0x1f5   : > { %v1307_v29 = vmax.f32 %v1207_v26, 0.0  ;;  %v1210_v30 = vadd.f32 %v1209_v28, %v3047_v44  ;;  %v2464_v31 = vpop.f32.mrb[75].mxu0  ;;  %v1401_v32 = vpack.c.bf16 %v1374_v25, %v1373_v24 }
 0x1f7   : > { %v1341_v33 = vmul.f32 %v3052_v22, %v1307_v29  ;;  %v1308_v34 = vmax.f32 %v1210_v30, 0.0  ;;  %2534 = vmatmul.mubr.bf16.gmra.mrb[68].mxu1 %v1401_v32 }
 0x1f8   : > { %2537 = vmatprep.mubr.msk.bf16.mxu1 %vm2706_vm0, %v2705_v2 }
 0x1f9   : > { %v1342_v35 = vmul.f32 %v3052_v22, %v1308_v34  ;;  %v1375_v37 = vadd.f32 %v3058_v55, %v1341_v33 }
 0x1fa   : > { %v1214_v36 = vpop.f32.mrb[76].mxu0 }
 0x1fb   : > { %v1376_v38 = vadd.f32 %v3058_v55, %v1342_v35  ;;  %v1215_v39 = vadd.f32 %v1214_v36, %v3047_v44  ;;  %v2467_v40 = vpop.f32.mrb[77].mxu0 }
 0x1fc   : > { %v1217_v41 = vpop.f32.mrb[78].mxu0 }
 0x1fd   : > { %v1309_v42 = vmax.f32 %v1215_v39, 0.0  ;;  %v1218_v43 = vadd.f32 %v1217_v41, %v3047_v44  ;;  %v2468_v45 = vpop.f32.mrb[79].mxu0  ;;  %v1402_v46 = vpack.c.bf16 %v1376_v38, %v1375_v37 }
 0x1ff   : > { %v1343_v47 = vmul.f32 %v3052_v22, %v1309_v42  ;;  %v1310_v48 = vmax.f32 %v1218_v43, 0.0  ;;  %2538 = vmatmul.mubr.bf16.gmra.mrb[72].mxu1 %v1402_v46 }
 0x200   : > { %2541 = vmatprep.mubr.msk.bf16.mxu1 %vm2706_vm0, %v2705_v2 }
 0x201   : > { %v1344_v49 = vmul.f32 %v3052_v22, %v1310_v48  ;;  %v1377_v51 = vadd.f32 %v3058_v55, %v1343_v47 }
 0x202   : > { %v1222_v50 = vpop.f32.mrb[80].mxu0 }
 0x203   : > { %v1378_v52 = vadd.f32 %v3058_v55, %v1344_v49  ;;  %v1223_v53 = vadd.f32 %v1222_v50, %v3047_v44  ;;  %v2471_v54 = vpop.f32.mrb[81].mxu0 }
 0x204   : > { %v1225_v56 = vpop.f32.mrb[82].mxu0 }
 0x205   : > { %v1311_v57 = vmax.f32 %v1223_v53, 0.0  ;;  %v1226_v58 = vadd.f32 %v1225_v56, %v3047_v44  ;;  %v2472_v59 = vpop.f32.mrb[83].mxu0  ;;  %v1403_v60 = vpack.c.bf16 %v1378_v52, %v1377_v51 }
 0x207   : > { %v1345_v61 = vmul.f32 %v3052_v22, %v1311_v57  ;;  %v1312_v62 = vmax.f32 %v1226_v58, 0.0  ;;  %2542 = vmatmul.mubr.bf16.gmra.mrb[76].mxu1 %v1403_v60 }
 0x208   : > { %2545 = vmatprep.mubr.msk.bf16.mxu1 %vm2706_vm0, %v2705_v2 }
 0x209   : > { %v1346_v63 = vmul.f32 %v3052_v22, %v1312_v62  ;;  %v1379_v1 = vadd.f32 %v3058_v55, %v1345_v61 }
 0x20a   : > { %v1230_v0 = vpop.f32.mrb[84].mxu0 }
 0x20b   : > { %v1380_v3 = vadd.f32 %v3058_v55, %v1346_v63  ;;  %v1231_v4 = vadd.f32 %v1230_v0, %v3047_v44  ;;  %v2475_v19 = vpop.f32.mrb[85].mxu0 }
 0x20c   : > { %v1233_v5 = vpop.f32.mrb[86].mxu0 }
 0x20d   : > { %v1313_v6 = vmax.f32 %v1231_v4, 0.0  ;;  %v1234_v7 = vadd.f32 %v1233_v5, %v3047_v44  ;;  %v2476_v8 = vpop.f32.mrb[87].mxu0  ;;  %v1404_v9 = vpack.c.bf16 %v1380_v3, %v1379_v1 }
 0x20f   : > { %v1347_v10 = vmul.f32 %v3052_v22, %v1313_v6  ;;  %v1314_v11 = vmax.f32 %v1234_v7, 0.0  ;;  %2546 = vmatmul.mubr.bf16.gmra.mrb[80].mxu1 %v1404_v9 }
 0x210   : > { %2549 = vmatprep.mubr.msk.bf16.mxu1 %vm2706_vm0, %v2705_v2 }
 0x211   : > { %v1348_v12 = vmul.f32 %v3052_v22, %v1314_v11  ;;  %v1381_v14 = vadd.f32 %v3058_v55, %v1347_v10 }
 0x212   : > { %v1238_v13 = vpop.f32.mrb[88].mxu0 }
 0x213   : > { %v1382_v15 = vadd.f32 %v3058_v55, %v1348_v12  ;;  %v1239_v17 = vadd.f32 %v1238_v13, %v3047_v44  ;;  %v2479_v18 = vpop.f32.mrb[89].mxu0 }
 0x214   : > { %v1241_v20 = vpop.f32.mrb[90].mxu0 }
 0x215   : > { %v1315_v21 = vmax.f32 %v1239_v17, 0.0  ;;  %v1242_v23 = vadd.f32 %v1241_v20, %v3047_v44  ;;  %v2480_v24 = vpop.f32.mrb[91].mxu0  ;;  %v1405_v25 = vpack.c.bf16 %v1382_v15, %v1381_v14 }
 0x217   : > { %v1349_v26 = vmul.f32 %v3052_v22, %v1315_v21  ;;  %v1316_v27 = vmax.f32 %v1242_v23, 0.0  ;;  %2550 = vmatmul.mubr.bf16.gmra.mrb[84].mxu1 %v1405_v25 }
 0x218   : > { %2553 = vmatprep.mubr.msk.bf16.mxu1 %vm2706_vm0, %v2705_v2 }
 0x219   : > { %v1350_v28 = vmul.f32 %v3052_v22, %v1316_v27  ;;  %v1383_v30 = vadd.f32 %v3058_v55, %v1349_v26 }
 0x21a   : > { %v1246_v29 = vpop.f32.mrb[92].mxu0 }
 0x21b   : > { %v1384_v31 = vadd.f32 %v3058_v55, %v1350_v28  ;;  %v1247_v32 = vadd.f32 %v1246_v29, %v3047_v44  ;;  %v2483_v33 = vpop.f32.mrb[93].mxu0 }
 0x21c   : > { %v1249_v34 = vpop.f32.mrb[94].mxu0 }
 0x21d   : > { %v1317_v35 = vmax.f32 %v1247_v32, 0.0  ;;  %v1250_v36 = vadd.f32 %v1249_v34, %v3047_v44  ;;  %v2484_v37 = vpop.f32.mrb[95].mxu0  ;;  %v1406_v38 = vpack.c.bf16 %v1384_v31, %v1383_v30 }
 0x21f   : > { %v1351_v39 = vmul.f32 %v3052_v22, %v1317_v35  ;;  %v1318_v40 = vmax.f32 %v1250_v36, 0.0  ;;  %2554 = vmatmul.mubr.bf16.gmra.mrb[88].mxu1 %v1406_v38 }
 0x220   : > { %2557 = vmatprep.mubr.msk.bf16.mxu1 %vm2706_vm0, %v2705_v2 }
 0x221   : > { %v1352_v41 = vmul.f32 %v3052_v22, %v1318_v40  ;;  %v1385_v43 = vadd.f32 %v3058_v55, %v1351_v39 }
 0x222   : > { %v1254_v42 = vpop.f32.mrb[96].mxu0 }
 0x223   : > { %v1386_v45 = vadd.f32 %v3058_v55, %v1352_v41  ;;  %v1255_v46 = vadd.f32 %v1254_v42, %v3047_v44  ;;  %v2487_v47 = vpop.f32.mrb[97].mxu0 }
 0x224   : > { %v1257_v48 = vpop.f32.mrb[98].mxu0 }
 0x225   : > { %v1319_v49 = vmax.f32 %v1255_v46, 0.0  ;;  %v1258_v50 = vadd.f32 %v1257_v48, %v3047_v44  ;;  %v2488_v51 = vpop.f32.mrb[99].mxu0  ;;  %v1407_v52 = vpack.c.bf16 %v1386_v45, %v1385_v43 }
 0x227   : > { %v1353_v53 = vmul.f32 %v3052_v22, %v1319_v49  ;;  %v1320_v54 = vmax.f32 %v1258_v50, 0.0  ;;  %2558 = vmatmul.mubr.bf16.gmra.mrb[92].mxu1 %v1407_v52 }
 0x228   : > { %2561 = vmatprep.mubr.msk.bf16.mxu1 %vm2706_vm0, %v2705_v2 }
 0x229   : > { %v1354_v56 = vmul.f32 %v3052_v22, %v1320_v54  ;;  %v1387_v58 = vadd.f32 %v3058_v55, %v1353_v53 }
 0x22a   : > { %v1262_v57 = vpop.f32.mrb[100].mxu0 }
 0x22b   : > { %v1388_v59 = vadd.f32 %v3058_v55, %v1354_v56  ;;  %v1263_v60 = vadd.f32 %v1262_v57, %v3047_v44  ;;  %v2491_v61 = vpop.f32.mrb[101].mxu0 }
 0x22c   : > { %v1265_v62 = vpop.f32.mrb[102].mxu0 }
 0x22d   : > { %v1321_v63 = vmax.f32 %v1263_v60, 0.0  ;;  %v1266_v0 = vadd.f32 %v1265_v62, %v3047_v44  ;;  %v2492_v1 = vpop.f32.mrb[103].mxu0  ;;  %v1408_v3 = vpack.c.bf16 %v1388_v59, %v1387_v58 }
 0x22f   : > { %v1355_v4 = vmul.f32 %v3052_v22, %v1321_v63  ;;  %v1322_v19 = vmax.f32 %v1266_v0, 0.0  ;;  %2562 = vmatmul.mubr.bf16.gmra.mrb[96].mxu1 %v1408_v3  ;;  %v1432_v3 = vsub.s32 4, %v2945_v16 }
 0x230   : > { %2565 = vmatprep.mubr.msk.bf16.mxu1 %vm2706_vm0, %v2705_v2 }
 0x231   : > { %v1356_v5 = vmul.f32 %v3052_v22, %v1322_v19  ;;  %v1389_v7 = vadd.f32 %v3058_v55, %v1355_v4  ;;  %v1667_v19 = vsub.s32 5, %v2945_v16 }
 0x232   : > { %v1270_v6 = vpop.f32.mrb[104].mxu0 }
 0x233   : > { %v1390_v8 = vadd.f32 %v3058_v55, %v1356_v5  ;;  %v1271_v9 = vadd.f32 %v1270_v6, %v3047_v44  ;;  %v2495_v10 = vpop.f32.mrb[105].mxu0 }
 0x234   : > { %v1273_v11 = vpop.f32.mrb[106].mxu0 }
 0x235   : > { %v1323_v12 = vmax.f32 %v1271_v9, 0.0  ;;  %v1274_v13 = vadd.f32 %v1273_v11, %v3047_v44  ;;  %v2496_v14 = vpop.f32.mrb[107].mxu0  ;;  %v1409_v15 = vpack.c.bf16 %v1390_v8, %v1389_v7 }
 0x237   : > { %v1357_v17 = vmul.f32 %v3052_v22, %v1323_v12  ;;  %v1324_v18 = vmax.f32 %v1274_v13, 0.0  ;;  %2566 = vmatmul.mubr.bf16.gmra.mrb[100].mxu1 %v1409_v15 }
 0x238   : > { %2569 = vmatprep.mubr.msk.bf16.mxu1 %vm2706_vm0, %v2705_v2 }
 0x239   : > { %v1358_v20 = vmul.f32 %v3052_v22, %v1324_v18  ;;  %v1391_v23 = vadd.f32 %v3058_v55, %v1357_v17 }
 0x23a   : > { %v1278_v21 = vpop.f32.mrb[108].mxu0 }
 0x23b   : > { %v1392_v24 = vadd.f32 %v3058_v55, %v1358_v20  ;;  %v1279_v25 = vadd.f32 %v1278_v21, %v3047_v44  ;;  %v2499_v26 = vpop.f32.mrb[109].mxu0 }
 0x23c   : > { %v1281_v27 = vpop.f32.mrb[110].mxu0 }
 0x23d   : > { %v1325_v28 = vmax.f32 %v1279_v25, 0.0  ;;  %v1282_v29 = vadd.f32 %v1281_v27, %v3047_v44  ;;  %v2500_v30 = vpop.f32.mrb[111].mxu0  ;;  %v1410_v31 = vpack.c.bf16 %v1392_v24, %v1391_v23 }
 0x23f   : > { %v1359_v32 = vmul.f32 %v3052_v22, %v1325_v28  ;;  %v1326_v33 = vmax.f32 %v1282_v29, 0.0  ;;  %2570 = vmatmul.mubr.bf16.gmra.mrb[104].mxu1 %v1410_v31 }
 0x240   : > { %2573 = vmatprep.mubr.msk.bf16.mxu1 %vm2706_vm0, %v2705_v2 }
 0x241   : > { %v1360_v34 = vmul.f32 %v3052_v22, %v1326_v33  ;;  %v1393_v36 = vadd.f32 %v3058_v55, %v1359_v32 }
 0x242   : > { %v1286_v35 = vpop.f32.mrb[112].mxu0 }
 0x243   : > { %v1394_v37 = vadd.f32 %v3058_v55, %v1360_v34  ;;  %v1287_v38 = vadd.f32 %v1286_v35, %v3047_v44  ;;  %v2503_v39 = vpop.f32.mrb[113].mxu0 }
 0x244   : > { %v1289_v40 = vpop.f32.mrb[114].mxu0 }
 0x245   : > { %v1327_v41 = vmax.f32 %v1287_v38, 0.0  ;;  %v1290_v42 = vadd.f32 %v1289_v40, %v3047_v44  ;;  %v2504_v43 = vpop.f32.mrb[115].mxu0  ;;  %v1411_v45 = vpack.c.bf16 %v1394_v37, %v1393_v36 }
 0x247   : > { %v1361_v46 = vmul.f32 %v3052_v22, %v1327_v41  ;;  %v1328_v47 = vmax.f32 %v1290_v42, 0.0  ;;  %2574 = vmatmul.mubr.bf16.gmra.mrb[108].mxu1 %v1411_v45 }
 0x248   : > { %2577 = vmatprep.mubr.msk.bf16.mxu1 %vm2706_vm0, %v2705_v2 }
 0x249   : > { %v1362_v48 = vmul.f32 %v3052_v22, %v1328_v47  ;;  %v1395_v50 = vadd.f32 %v3058_v55, %v1361_v46 }
 0x24a   : > { %v1294_v49 = vpop.f32.mrb[116].mxu0 }
 0x24b   : > { %v1396_v51 = vadd.f32 %v3058_v55, %v1362_v48  ;;  %v1295_v52 = vadd.f32 %v1294_v49, %v3047_v44  ;;  %v2507_v53 = vpop.f32.mrb[117].mxu0 }
 0x24c   : > { %v1297_v54 = vpop.f32.mrb[118].mxu0 }
 0x24d   : > { %v1329_v56 = vmax.f32 %v1295_v52, 0.0  ;;  %v1298_v57 = vadd.f32 %v1297_v54, %v3047_v44  ;;  %v2508_v58 = vpop.f32.mrb[119].mxu0  ;;  %v1412_v59 = vpack.c.bf16 %v1396_v51, %v1395_v50  ;;  %v2696_v44 = vld [vmem:[%s3305_s4] sm:$0xff] }
 0x24e   : > { %v3179_v4 = vrot.slane %v2696_v44, %v1432_v3  ;;  %v3183_v5 = vrot.slane %v2696_v44, %v1667_v19 }
 0x24f   : > { %v1363_v60 = vmul.f32 %v3052_v22, %v1329_v56  ;;  %v1330_v61 = vmax.f32 %v1298_v57, 0.0  ;;  %2578 = vmatmul.mubr.bf16.gmra.mrb[112].mxu1 %v1412_v59 }
 0x250   : > { %2581 = vmatprep.mubr.msk.bf16.mxu1 %vm2706_vm0, %v2705_v2 }
 0x251   : > { %v1364_v62 = vmul.f32 %v3052_v22, %v1330_v61  ;;  %v1397_v63 = vadd.f32 %v3058_v55, %v1363_v60 }
 0x253   : > { %v1398_v0 = vadd.f32 %v3058_v55, %v1364_v62  ;;  %v1701_v55 = vsub.s32 6, %v2945_v16 }
 0x255   : > { %v1413_v1 = vpack.c.bf16 %v1398_v0, %v1397_v63  ;;  %v3188_v12 = vrot.slane %v2696_v44, %v1701_v55 }
 0x257   : > { %2582 = vmatmul.mubr.bf16.gmra.mrb[116].mxu1 %v1413_v1 }
 0x2ba   : > { %v1516_v2 = vpop.f32.mrb[60].mxu1 }
 0x2bb   : > { %v1517_v22 = vadd.f32 %v1516_v2, %v3179_v4  ;;  %v2527_v6 = vpop.f32.mrb[61].mxu1 }
 0x2bc   : > { %v1519_v7 = vpop.f32.mrb[62].mxu1 }
 0x2bd   : > { %v1635_v8 = vmax.f32 %v1517_v22, 0.0  ;;  %v1520_v9 = vadd.f32 %v1519_v7, %v3179_v4  ;;  %v2528_v10 = vpop.f32.mrb[63].mxu1 }
 0x2bf   : > { %v1669_v11 = vmul.f32 %v3183_v5, %v1635_v8  ;;  %v1636_v13 = vmax.f32 %v1520_v9, 0.0 }
 0x2c1   : > { %v1670_v14 = vmul.f32 %v3183_v5, %v1636_v13  ;;  %v1703_v17 = vadd.f32 %v3188_v12, %v1669_v11 }
 0x2c2   : > { %v1524_v15 = vpop.f32.mrb[64].mxu1 }
 0x2c3   : > { %v1704_v18 = vadd.f32 %v3188_v12, %v1670_v14  ;;  %v1525_v16 = vadd.f32 %v1524_v15, %v3179_v4  ;;  %v2531_v20 = vpop.f32.mrb[65].mxu1 }
 0x2c4   : > { %v1527_v21 = vpop.f32.mrb[66].mxu1 }
 0x2c5   : > { %v2096_v23 = vpack.c.bf16 %v1704_v18, %v1703_v17  ;;  %v1637_v24 = vmax.f32 %v1525_v16, 0.0  ;;  %v1528_v25 = vadd.f32 %v1527_v21, %v3179_v4  ;;  %v2532_v26 = vpop.f32.mrb[67].mxu1 }
 0x2c7   : > { %2097 = vst [vmem:[%s3198_s20] sm:$0xff] %v2096_v23   ;;  %v1671_v27 = vmul.f32 %v3183_v5, %v1637_v24  ;;  %v1638_v28 = vmax.f32 %v1528_v25, 0.0 }
 0x2c9   : > { %v1672_v29 = vmul.f32 %v3183_v5, %v1638_v28  ;;  %v1705_v31 = vadd.f32 %v3188_v12, %v1671_v27 }
 0x2ca   : > { %v1532_v30 = vpop.f32.mrb[68].mxu1 }
 0x2cb   : > { %v1706_v32 = vadd.f32 %v3188_v12, %v1672_v29  ;;  %v1533_v33 = vadd.f32 %v1532_v30, %v3179_v4  ;;  %v2535_v34 = vpop.f32.mrb[69].mxu1 }
 0x2cc   : > { %v1535_v35 = vpop.f32.mrb[70].mxu1 }
 0x2cd   : > { %v2101_v36 = vpack.c.bf16 %v1706_v32, %v1705_v31  ;;  %v1639_v37 = vmax.f32 %v1533_v33, 0.0  ;;  %v1536_v38 = vadd.f32 %v1535_v35, %v3179_v4  ;;  %v2536_v39 = vpop.f32.mrb[71].mxu1 }
 0x2cf   : > { %2168 = vst [vmem:[%s3198_s20 + $0x8] sm:$0xff] %v2101_v36   ;;  %v1673_v40 = vmul.f32 %v3183_v5, %v1639_v37  ;;  %v1640_v41 = vmax.f32 %v1536_v38, 0.0 }
 0x2d1   : > { %v1674_v42 = vmul.f32 %v3183_v5, %v1640_v41  ;;  %v1707_v45 = vadd.f32 %v3188_v12, %v1673_v40 }
 0x2d2   : > { %v1540_v43 = vpop.f32.mrb[72].mxu1 }
 0x2d3   : > { %v1708_v46 = vadd.f32 %v3188_v12, %v1674_v42  ;;  %v1541_v47 = vadd.f32 %v1540_v43, %v3179_v4  ;;  %v2539_v48 = vpop.f32.mrb[73].mxu1 }
 0x2d4   : > { %v1543_v49 = vpop.f32.mrb[74].mxu1 }
 0x2d5   : > { %v2106_v50 = vpack.c.bf16 %v1708_v46, %v1707_v45  ;;  %v1641_v51 = vmax.f32 %v1541_v47, 0.0  ;;  %v1544_v52 = vadd.f32 %v1543_v49, %v3179_v4  ;;  %v2540_v53 = vpop.f32.mrb[75].mxu1 }
 0x2d7   : > { %2169 = vst [vmem:[%s3198_s20 + $0x10] sm:$0xff] %v2106_v50   ;;  %v1675_v54 = vmul.f32 %v3183_v5, %v1641_v51  ;;  %v1642_v56 = vmax.f32 %v1544_v52, 0.0 }
 0x2d9   : > { %v1676_v57 = vmul.f32 %v3183_v5, %v1642_v56  ;;  %v1709_v59 = vadd.f32 %v3188_v12, %v1675_v54 }
 0x2da   : > { %v1548_v58 = vpop.f32.mrb[76].mxu1 }
 0x2db   : > { %v1710_v60 = vadd.f32 %v3188_v12, %v1676_v57  ;;  %v1549_v61 = vadd.f32 %v1548_v58, %v3179_v4  ;;  %v2543_v62 = vpop.f32.mrb[77].mxu1 }
 0x2dc   : > { %v1551_v63 = vpop.f32.mrb[78].mxu1 }
 0x2dd   : > { %v2111_v0 = vpack.c.bf16 %v1710_v60, %v1709_v59  ;;  %v1643_v1 = vmax.f32 %v1549_v61, 0.0  ;;  %v1552_v3 = vadd.f32 %v1551_v63, %v3179_v4  ;;  %v2544_v44 = vpop.f32.mrb[79].mxu1 }
 0x2df   : > { %2170 = vst [vmem:[%s3198_s20 + $0x18] sm:$0xff] %v2111_v0   ;;  %v1677_v19 = vmul.f32 %v3183_v5, %v1643_v1  ;;  %v1644_v2 = vmax.f32 %v1552_v3, 0.0 }
 0x2e1   : > { %v1678_v22 = vmul.f32 %v3183_v5, %v1644_v2  ;;  %v1711_v6 = vadd.f32 %v3188_v12, %v1677_v19 }
 0x2e2   : > { %v1556_v55 = vpop.f32.mrb[80].mxu1 }
 0x2e3   : > { %v1712_v7 = vadd.f32 %v3188_v12, %v1678_v22  ;;  %v1557_v8 = vadd.f32 %v1556_v55, %v3179_v4  ;;  %v2547_v9 = vpop.f32.mrb[81].mxu1 }
 0x2e4   : > { %v1559_v10 = vpop.f32.mrb[82].mxu1 }
 0x2e5   : > { %v2116_v11 = vpack.c.bf16 %v1712_v7, %v1711_v6  ;;  %v1645_v13 = vmax.f32 %v1557_v8, 0.0  ;;  %v1560_v14 = vadd.f32 %v1559_v10, %v3179_v4  ;;  %v2548_v15 = vpop.f32.mrb[83].mxu1 }
 0x2e7   : > { %2171 = vst [vmem:[%s3198_s20 + $0x20] sm:$0xff] %v2116_v11   ;;  %v1679_v17 = vmul.f32 %v3183_v5, %v1645_v13  ;;  %v1646_v18 = vmax.f32 %v1560_v14, 0.0 }
 0x2e9   : > { %v1680_v16 = vmul.f32 %v3183_v5, %v1646_v18  ;;  %v1713_v21 = vadd.f32 %v3188_v12, %v1679_v17 }
 0x2ea   : > { %v1564_v20 = vpop.f32.mrb[84].mxu1 }
 0x2eb   : > { %v1714_v23 = vadd.f32 %v3188_v12, %v1680_v16  ;;  %v1565_v24 = vadd.f32 %v1564_v20, %v3179_v4  ;;  %v2551_v25 = vpop.f32.mrb[85].mxu1 }
 0x2ec   : > { %v1567_v26 = vpop.f32.mrb[86].mxu1 }
 0x2ed   : > { %v2121_v27 = vpack.c.bf16 %v1714_v23, %v1713_v21  ;;  %v1647_v28 = vmax.f32 %v1565_v24, 0.0  ;;  %v1568_v29 = vadd.f32 %v1567_v26, %v3179_v4  ;;  %v2552_v30 = vpop.f32.mrb[87].mxu1 }
 0x2ef   : > { %2172 = vst [vmem:[%s3198_s20 + $0x28] sm:$0xff] %v2121_v27   ;;  %v1681_v31 = vmul.f32 %v3183_v5, %v1647_v28  ;;  %v1648_v32 = vmax.f32 %v1568_v29, 0.0 }
 0x2f1   : > { %v1682_v33 = vmul.f32 %v3183_v5, %v1648_v32  ;;  %v1715_v35 = vadd.f32 %v3188_v12, %v1681_v31 }
 0x2f2   : > { %v1572_v34 = vpop.f32.mrb[88].mxu1 }
 0x2f3   : > { %v1716_v36 = vadd.f32 %v3188_v12, %v1682_v33  ;;  %v1573_v37 = vadd.f32 %v1572_v34, %v3179_v4  ;;  %v2555_v38 = vpop.f32.mrb[89].mxu1 }
 0x2f4   : > { %v1575_v39 = vpop.f32.mrb[90].mxu1 }
 0x2f5   : > { %v2126_v40 = vpack.c.bf16 %v1716_v36, %v1715_v35  ;;  %v1649_v41 = vmax.f32 %v1573_v37, 0.0  ;;  %v1576_v42 = vadd.f32 %v1575_v39, %v3179_v4  ;;  %v2556_v43 = vpop.f32.mrb[91].mxu1 }
 0x2f7   : > { %2173 = vst [vmem:[%s3198_s20 + $0x30] sm:$0xff] %v2126_v40   ;;  %v1683_v45 = vmul.f32 %v3183_v5, %v1649_v41  ;;  %v1650_v46 = vmax.f32 %v1576_v42, 0.0 }
 0x2f9   : > { %v1684_v47 = vmul.f32 %v3183_v5, %v1650_v46  ;;  %v1717_v49 = vadd.f32 %v3188_v12, %v1683_v45 }
 0x2fa   : > { %v1580_v48 = vpop.f32.mrb[92].mxu1 }
 0x2fb   : > { %v1718_v50 = vadd.f32 %v3188_v12, %v1684_v47  ;;  %v1581_v51 = vadd.f32 %v1580_v48, %v3179_v4  ;;  %v2559_v52 = vpop.f32.mrb[93].mxu1 }
 0x2fc   : > { %v1583_v53 = vpop.f32.mrb[94].mxu1 }
 0x2fd   : > { %v2131_v54 = vpack.c.bf16 %v1718_v50, %v1717_v49  ;;  %v1651_v56 = vmax.f32 %v1581_v51, 0.0  ;;  %v1584_v57 = vadd.f32 %v1583_v53, %v3179_v4  ;;  %v2560_v58 = vpop.f32.mrb[95].mxu1 }
 0x2ff   : > { %2174 = vst [vmem:[%s3198_s20 + $0x38] sm:$0xff] %v2131_v54   ;;  %v1685_v59 = vmul.f32 %v3183_v5, %v1651_v56  ;;  %v1652_v60 = vmax.f32 %v1584_v57, 0.0 }
 0x301   : > { %v1686_v61 = vmul.f32 %v3183_v5, %v1652_v60  ;;  %v1719_v63 = vadd.f32 %v3188_v12, %v1685_v59 }
 0x302   : > { %v1588_v62 = vpop.f32.mrb[96].mxu1 }
 0x303   : > { %v1720_v0 = vadd.f32 %v3188_v12, %v1686_v61  ;;  %v1589_v1 = vadd.f32 %v1588_v62, %v3179_v4  ;;  %v2563_v3 = vpop.f32.mrb[97].mxu1 }
 0x304   : > { %v1591_v44 = vpop.f32.mrb[98].mxu1 }
 0x305   : > { %v2136_v19 = vpack.c.bf16 %v1720_v0, %v1719_v63  ;;  %v1653_v2 = vmax.f32 %v1589_v1, 0.0  ;;  %v1592_v22 = vadd.f32 %v1591_v44, %v3179_v4  ;;  %v2564_v55 = vpop.f32.mrb[99].mxu1 }
 0x307   : > { %2175 = vst [vmem:[%s3198_s20 + $0x40] sm:$0xff] %v2136_v19   ;;  %v1687_v6 = vmul.f32 %v3183_v5, %v1653_v2  ;;  %v1654_v7 = vmax.f32 %v1592_v22, 0.0 }
 0x309   : > { %v1688_v8 = vmul.f32 %v3183_v5, %v1654_v7  ;;  %v1721_v10 = vadd.f32 %v3188_v12, %v1687_v6 }
 0x30a   : > { %v1596_v9 = vpop.f32.mrb[100].mxu1 }
 0x30b   : > { %v1722_v11 = vadd.f32 %v3188_v12, %v1688_v8  ;;  %v1597_v13 = vadd.f32 %v1596_v9, %v3179_v4  ;;  %v2567_v14 = vpop.f32.mrb[101].mxu1 }
 0x30c   : > { %v1599_v15 = vpop.f32.mrb[102].mxu1 }
 0x30d   : > { %v2141_v17 = vpack.c.bf16 %v1722_v11, %v1721_v10  ;;  %v1655_v18 = vmax.f32 %v1597_v13, 0.0  ;;  %v1600_v16 = vadd.f32 %v1599_v15, %v3179_v4  ;;  %v2568_v20 = vpop.f32.mrb[103].mxu1 }
 0x30f   : > { %2176 = vst [vmem:[%s3198_s20 + $0x48] sm:$0xff] %v2141_v17   ;;  %v1689_v21 = vmul.f32 %v3183_v5, %v1655_v18  ;;  %v1656_v23 = vmax.f32 %v1600_v16, 0.0 }
 0x311   : > { %v1690_v24 = vmul.f32 %v3183_v5, %v1656_v23  ;;  %v1723_v26 = vadd.f32 %v3188_v12, %v1689_v21 }
 0x312   : > { %v1604_v25 = vpop.f32.mrb[104].mxu1 }
 0x313   : > { %v1724_v27 = vadd.f32 %v3188_v12, %v1690_v24  ;;  %v1605_v28 = vadd.f32 %v1604_v25, %v3179_v4  ;;  %v2571_v29 = vpop.f32.mrb[105].mxu1 }
 0x314   : > { %v1607_v30 = vpop.f32.mrb[106].mxu1 }
 0x315   : > { %v2146_v31 = vpack.c.bf16 %v1724_v27, %v1723_v26  ;;  %v1657_v32 = vmax.f32 %v1605_v28, 0.0  ;;  %v1608_v33 = vadd.f32 %v1607_v30, %v3179_v4  ;;  %v2572_v34 = vpop.f32.mrb[107].mxu1 }
 0x317   : > { %2177 = vst [vmem:[%s3198_s20 + $0x50] sm:$0xff] %v2146_v31   ;;  %v1691_v35 = vmul.f32 %v3183_v5, %v1657_v32  ;;  %v1658_v36 = vmax.f32 %v1608_v33, 0.0 }
 0x319   : > { %v1692_v37 = vmul.f32 %v3183_v5, %v1658_v36  ;;  %v1725_v39 = vadd.f32 %v3188_v12, %v1691_v35 }
 0x31a   : > { %v1612_v38 = vpop.f32.mrb[108].mxu1 }
 0x31b   : > { %v1726_v40 = vadd.f32 %v3188_v12, %v1692_v37  ;;  %v1613_v41 = vadd.f32 %v1612_v38, %v3179_v4  ;;  %v2575_v42 = vpop.f32.mrb[109].mxu1 }
 0x31c   : > { %v1615_v43 = vpop.f32.mrb[110].mxu1 }
 0x31d   : > { %v2151_v45 = vpack.c.bf16 %v1726_v40, %v1725_v39  ;;  %v1659_v46 = vmax.f32 %v1613_v41, 0.0  ;;  %v1616_v47 = vadd.f32 %v1615_v43, %v3179_v4  ;;  %v2576_v48 = vpop.f32.mrb[111].mxu1 }
 0x31f   : > { %2178 = vst [vmem:[%s3198_s20 + $0x58] sm:$0xff] %v2151_v45   ;;  %v1693_v49 = vmul.f32 %v3183_v5, %v1659_v46  ;;  %v1660_v50 = vmax.f32 %v1616_v47, 0.0 }
 0x321   : > { %v1694_v51 = vmul.f32 %v3183_v5, %v1660_v50  ;;  %v1727_v53 = vadd.f32 %v3188_v12, %v1693_v49 }
 0x322   : > { %v1620_v52 = vpop.f32.mrb[112].mxu1 }
 0x323   : > { %v1728_v54 = vadd.f32 %v3188_v12, %v1694_v51  ;;  %v1621_v56 = vadd.f32 %v1620_v52, %v3179_v4  ;;  %v2579_v57 = vpop.f32.mrb[113].mxu1 }
 0x324   : > { %v1623_v58 = vpop.f32.mrb[114].mxu1 }
 0x325   : > { %v2156_v59 = vpack.c.bf16 %v1728_v54, %v1727_v53  ;;  %v1661_v60 = vmax.f32 %v1621_v56, 0.0  ;;  %v1624_v61 = vadd.f32 %v1623_v58, %v3179_v4  ;;  %v2580_v62 = vpop.f32.mrb[115].mxu1 }
 0x327   : > { %2179 = vst [vmem:[%s3198_s20 + $0x60] sm:$0xff] %v2156_v59   ;;  %v1695_v63 = vmul.f32 %v3183_v5, %v1661_v60  ;;  %v1662_v0 = vmax.f32 %v1624_v61, 0.0 }
 0x329   : > { %v1696_v1 = vmul.f32 %v3183_v5, %v1662_v0  ;;  %v1729_v44 = vadd.f32 %v3188_v12, %v1695_v63 }
 0x32a   : > { %v1628_v3 = vpop.f32.mrb[116].mxu1 }
 0x32b   : > { %v1730_v19 = vadd.f32 %v3188_v12, %v1696_v1  ;;  %v1629_v2 = vadd.f32 %v1628_v3, %v3179_v4  ;;  %v2583_v22 = vpop.f32.mrb[117].mxu1 }
 0x32c   : > { %v1631_v55 = vpop.f32.mrb[118].mxu1 }
 0x32d   : > { %v2161_v6 = vpack.c.bf16 %v1730_v19, %v1729_v44  ;;  %v1663_v7 = vmax.f32 %v1629_v2, 0.0  ;;  %v1632_v8 = vadd.f32 %v1631_v55, %v3179_v4  ;;  %v2584_v9 = vpop.f32.mrb[119].mxu1 }
 0x32f   : > { %2180 = vst [vmem:[%s3198_s20 + $0x68] sm:$0xff] %v2161_v6   ;;  %v1697_v10 = vmul.f32 %v3183_v5, %v1663_v7  ;;  %v1664_v11 = vmax.f32 %v1632_v8, 0.0 }
 0x331   : > { %v1698_v13 = vmul.f32 %v3183_v5, %v1664_v11  ;;  %v1731_v14 = vadd.f32 %v3188_v12, %v1697_v10 }
 0x333   : > { %v1732_v15 = vadd.f32 %v3188_v12, %v1698_v13 }
 0x335   : > { %v2166_v17 = vpack.c.bf16 %v1732_v15, %v1731_v14 }
 0x337   : > { %2181 = vst [vmem:[%s3198_s20 + $0x70] sm:$0xff] %v2166_v17  }
 0x338 PF: > { %s15_s18 = sadd.s32 1, %s2703_s18  }
 0x339   : > { %p12_p4 = scmp.ge.s32.totalorder %s15_s18, 4  }
 0x33b   :  { %14 = sbr.rel (!%p12_p4) target bundleno = 1 (0x1), region = 70 }

// kernel: nin_forward.5
= control target key start
LH: loop header
LB: loop body
LE: loop exit
PB: predicated region body
PF: predicated region fallthrough
CT: control target
= control target key end

     0   :  { %s6715_s18 = smov 0   ;;  %s8439_s0 = inlined_call_operand.vmem [shape: bf16[128,3200], index: 0, kind: input, shape index: {}]   ;;  %s8440_s1 = inlined_call_operand.vmem [shape: bf16[3200,256], index: 1, kind: input, shape index: {}]   ;;  %s8441_s2 = inlined_call_operand.vmem [shape: bf16[256,256], index: 2, kind: input, shape index: {}]   ;;  %s8442_s3 = inlined_call_operand.vmem [shape: bf16[256,256], index: 3, kind: input, shape index: {}]   ;;  %s8443_s4 = inlined_call_operand.vmem [shape: f32[8,256], index: 4, kind: input, shape index: {}]   ;;  %s8444_s5 = inlined_call_operand.vmem [shape: bf16[128,256], index: 5, kind: output, shape index: {}]  }
   0x1 LB: > { %s5021_s19 = sadd.s32 4294967295, %s6682_s18   ;;  %p5025_p0 = scmp.ge.s32.totalorder %s6682_s18, 1  ;;  %s6682_s18 = sphi %s6715_s18, %s15_s18  }
   0x2   : > { %p189_p1 = scmp.lt.s32.totalorder %s6682_s18, 3 }
   0x4   : > { %p190_p2 = pnand %p5025_p0, %p189_p1 }
   0x5   : > { %v5832_v0 = vld [vmem:[%s8440_s1 + $0x4] ss:$8 sps:$4 sm:$0xff] (!%p190_p2)   ;;  %v5836_v2 = vld [vmem:[%s8440_s1] ss:$8 sps:$4 sm:$0xff] (!%p190_p2)   ;;  %v5838_v4 = vld [vmem:[%s8440_s1 + $0x14] ss:$8 sps:$4 sm:$0xff] (!%p190_p2)  }
   0x6   : > { %193 = sbr.rel (%p190_p2) target bundleno = 1185 (0x4a1), region = 40  ;;  %v5834_v1 = vld [vmem:[%s8440_s1 + $0x504] ss:$8 sps:$4 sm:$0xff] (!%p190_p2)   ;;  %3252 = vmatprep.subr.bf16.mxu1 (!%p190_p2), %v5832_v0  ;;  %v5837_v3 = vld [vmem:[%s8440_s1 + $0x500] ss:$8 sps:$4 sm:$0xff] (!%p190_p2)   ;;  %s5026_s9 = sshll.u32 (!%p190_p2), %s5021_s19, 3 }
   0x7   : > { %3617 = vmatprep.subr.bf16.mxu0 (!%p190_p2), %v5834_v1  ;;  %3253 = vmatpush1.bf16.msra.mxu1 (!%p190_p2), %v5836_v2  ;;  %v5840_v5 = vld [vmem:[%s8440_s1 + $0x514] ss:$8 sps:$4 sm:$0xff] (!%p190_p2)   ;;  %v5842_v6 = vld [vmem:[%s8440_s1 + $0x10] ss:$8 sps:$4 sm:$0xff] (!%p190_p2)   ;;  %v5844_v8 = vld [vmem:[%s8440_s1 + $0x24] ss:$8 sps:$4 sm:$0xff] (!%p190_p2)  }
   0x8   : > { %3618 = vmatpush1.bf16.msra.mxu0 (!%p190_p2), %v5837_v3  ;;  %3254 = vmatprep.subr.bf16.mxu1 (!%p190_p2), %v5838_v4  ;;  %v5843_v7 = vld [vmem:[%s8440_s1 + $0x510] ss:$8 sps:$4 sm:$0xff] (!%p190_p2)   ;;  %v5846_v9 = vld [vmem:[%s8440_s1 + $0x524] ss:$8 sps:$4 sm:$0xff] (!%p190_p2)   ;;  %v5848_v10 = vld [vmem:[%s8440_s1 + $0x20] ss:$8 sps:$4 sm:$0xff] (!%p190_p2)  }
   0x9   : > { %3619 = vmatprep.subr.bf16.mxu0 (!%p190_p2), %v5840_v5  ;;  %v5849_v11 = vld [vmem:[%s8440_s1 + $0x520] ss:$8 sps:$4 sm:$0xff] (!%p190_p2)   ;;  %v5850_v12 = vld [vmem:[%s8440_s1 + $0x34] ss:$8 sps:$4 sm:$0xff] (!%p190_p2)   ;;  %v5854_v14 = vld [vmem:[%s8440_s1 + $0x30] ss:$8 sps:$4 sm:$0xff] (!%p190_p2)  }
   0xa   : > { %v5852_v13 = vld [vmem:[%s8440_s1 + $0x534] ss:$8 sps:$4 sm:$0xff] (!%p190_p2)   ;;  %v5855_v15 = vld [vmem:[%s8440_s1 + $0x530] ss:$8 sps:$4 sm:$0xff] (!%p190_p2)   ;;  %v5856_v16 = vld [vmem:[%s8440_s1 + $0x44] ss:$8 sps:$4 sm:$0xff] (!%p190_p2)  }
   0xb   : > { %3255 = vmatpush1.bf16.msra.mxu1 (!%p190_p2), %v5842_v6  ;;  %v5858_v17 = vld [vmem:[%s8440_s1 + $0x544] ss:$8 sps:$4 sm:$0xff] (!%p190_p2)   ;;  %v5860_v18 = vld [vmem:[%s8440_s1 + $0x40] ss:$8 sps:$4 sm:$0xff] (!%p190_p2)   ;;  %v5862_v20 = vld [vmem:[%s8440_s1 + $0x54] ss:$8 sps:$4 sm:$0xff] (!%p190_p2)  }
   0xc   : > { %3620 = vmatpush1.bf16.msra.mxu0 (!%p190_p2), %v5843_v7  ;;  %3256 = vmatprep.subr.bf16.mxu1 (!%p190_p2), %v5844_v8  ;;  %v5861_v19 = vld [vmem:[%s8440_s1 + $0x540] ss:$8 sps:$4 sm:$0xff] (!%p190_p2)   ;;  %v5864_v21 = vld [vmem:[%s8440_s1 + $0x554] ss:$8 sps:$4 sm:$0xff] (!%p190_p2)   ;;  %v5866_v22 = vld [vmem:[%s8440_s1 + $0x50] ss:$8 sps:$4 sm:$0xff] (!%p190_p2)  }
   0xd   : > { %3621 = vmatprep.subr.bf16.mxu0 %v5846_v9  ;;  %v5867_v23 = vld [vmem:[%s8440_s1 + $0x550] ss:$8 sps:$4 sm:$0xff]   ;;  %v5868_v24 = vld [vmem:[%s8440_s1 + $0x64] ss:$8 sps:$4 sm:$0xff]   ;;  %v5872_v26 = vld [vmem:[%s8440_s1 + $0x60] ss:$8 sps:$4 sm:$0xff]  }
   0xe   : > { %v5870_v25 = vld [vmem:[%s8440_s1 + $0x564] ss:$8 sps:$4 sm:$0xff]   ;;  %v5873_v27 = vld [vmem:[%s8440_s1 + $0x560] ss:$8 sps:$4 sm:$0xff]   ;;  %v5874_v28 = vld [vmem:[%s8440_s1 + $0x74] ss:$8 sps:$4 sm:$0xff]  }
   0xf   : > { %3257 = vmatpush1.bf16.msra.mxu1 %v5848_v10  ;;  %v5876_v29 = vld [vmem:[%s8440_s1 + $0x574] ss:$8 sps:$4 sm:$0xff]   ;;  %v5878_v30 = vld [vmem:[%s8440_s1 + $0x70] ss:$8 sps:$4 sm:$0xff]   ;;  %v5880_v32 = vld [vmem:[%s8440_s1 + $0x84] ss:$8 sps:$4 sm:$0xff]  }
  0x10   : > { %3622 = vmatpush1.bf16.msra.mxu0 %v5849_v11  ;;  %3258 = vmatprep.subr.bf16.mxu1 %v5850_v12  ;;  %v5879_v31 = vld [vmem:[%s8440_s1 + $0x570] ss:$8 sps:$4 sm:$0xff]   ;;  %p220_p3 = scmp.lt.s32.totalorder %s5026_s9, 15  ;;  %v5882_v33 = vld [vmem:[%s8440_s1 + $0x584] ss:$8 sps:$4 sm:$0xff]  }
  0x11   : > { %3623 = vmatprep.subr.bf16.mxu0 %v5852_v13  ;;  %v5884_v34 = vld [vmem:[%s8440_s1 + $0x80] ss:$8 sps:$4 sm:$0xff]   ;;  %v5886_v36 = vld [vmem:[%s8440_s1 + $0x94] ss:$8 sps:$4 sm:$0xff]   ;;  %v5890_v38 = vld [vmem:[%s8440_s1 + $0x90] ss:$8 sps:$4 sm:$0xff]  }
  0x12   : > { %v5885_v35 = vld [vmem:[%s8440_s1 + $0x580] ss:$8 sps:$4 sm:$0xff]   ;;  %s8446_s9 = smov (!%p220_p3, %s5026_s9), 15  ;;  %v5888_v37 = vld [vmem:[%s8440_s1 + $0x594] ss:$8 sps:$4 sm:$0xff]  }
  0x13   : > { %3259 = vmatpush1.bf16.msra.mxu1 %v5854_v14  ;;  %v5891_v39 = vld [vmem:[%s8440_s1 + $0x590] ss:$8 sps:$4 sm:$0xff]   ;;  %v5892_v40 = vld [vmem:[%s8440_s1 + $0xa4] ss:$8 sps:$4 sm:$0xff]   ;;  %s5822_s8 = smul.u32 100, %s8446_s9  ;;  %s5605_s24 = sshll.u32 %s8446_s9, 3 }
  0x14   : > { %3624 = vmatpush1.bf16.msra.mxu0 %v5855_v15  ;;  %3260 = vmatprep.subr.bf16.mxu1 %v5856_v16  ;;  %v5894_v41 = vld [vmem:[%s8440_s1 + $0x5a4] ss:$8 sps:$4 sm:$0xff]   ;;  %v5896_v42 = vld [vmem:[%s8440_s1 + $0xa0] ss:$8 sps:$4 sm:$0xff]   ;;  %v5898_v44 = vld [vmem:[%s8440_s1 + $0xb4] ss:$8 sps:$4 sm:$0xff]   ;;  %s8388_s27 = scalar_lea.vmem %s8444_s5, %s5605_s24 }
  0x15   : > { %3625 = vmatprep.subr.bf16.mxu0 %v5858_v17  ;;  %v5897_v43 = vld [vmem:[%s8440_s1 + $0x5a0] ss:$8 sps:$4 sm:$0xff]   ;;  %s6866_s21 = scalar_lea.vmem %s8439_s0, %s5822_s8  ;;  %v5900_v45 = vld [vmem:[%s8440_s1 + $0x5b4] ss:$8 sps:$4 sm:$0xff]   ;;  %v5902_v46 = vld [vmem:[%s8440_s1 + $0xb0] ss:$8 sps:$4 sm:$0xff]  }
  0x16   : > { %v5903_v47 = vld [vmem:[%s8440_s1 + $0x5b0] ss:$8 sps:$4 sm:$0xff]   ;;  %v5930_v48 = vld [vmem:[%s6866_s21 + $0x4] ss:$100 sps:$4 sm:$0xff]   ;;  %v5910_v54 = vld [vmem:[%s8440_s1 + $0xd4] ss:$8 sps:$4 sm:$0xff]  }
  0x17   : > { %3261 = vmatpush1.bf16.msra.mxu1 %v5860_v18  ;;  %v5904_v49 = vld [vmem:[%s8440_s1 + $0xc4] ss:$8 sps:$4 sm:$0xff]   ;;  %3284 = vmatprep.mubr.bf16.mxu1 %v5930_v48  ;;  %v5908_v52 = vld [vmem:[%s8440_s1 + $0xc0] ss:$8 sps:$4 sm:$0xff]   ;;  %v5912_v55 = vld [vmem:[%s8440_s1 + $0x5d4] ss:$8 sps:$4 sm:$0xff]  }
  0x18   : > { %3626 = vmatpush1.bf16.msra.mxu0 %v5861_v19  ;;  %3262 = vmatprep.subr.bf16.mxu1 %v5862_v20  ;;  %v5906_v50 = vld [vmem:[%s8440_s1 + $0x5c4] ss:$8 sps:$4 sm:$0xff]   ;;  %v5909_v53 = vld [vmem:[%s8440_s1 + $0x5c0] ss:$8 sps:$4 sm:$0xff]   ;;  %v5914_v56 = vld [vmem:[%s8440_s1 + $0xd0] ss:$8 sps:$4 sm:$0xff]  }
  0x19   : > { %3627 = vmatprep.subr.bf16.mxu0 %v5864_v21  ;;  %v5936_v51 = vld [vmem:[%s6866_s21 + $0x2c] ss:$100 sps:$4 sm:$0xff]   ;;  %v5920_v60 = vld [vmem:[%s8440_s1 + $0xe0] ss:$8 sps:$4 sm:$0xff]   ;;  %v5922_v62 = vld [vmem:[%s8440_s1 + $0xf4] ss:$8 sps:$4 sm:$0xff]  }
  0x1a   : > { %3649 = vmatprep.mubr.bf16.mxu0 %v5936_v51  ;;  %v5915_v57 = vld [vmem:[%s8440_s1 + $0x5d0] ss:$8 sps:$4 sm:$0xff]   ;;  %v5916_v58 = vld [vmem:[%s8440_s1 + $0xe4] ss:$8 sps:$4 sm:$0xff]   ;;  %v5921_v61 = vld [vmem:[%s8440_s1 + $0x5e0] ss:$8 sps:$4 sm:$0xff]  }
  0x1b   : > { %3263 = vmatpush1.bf16.msra.mxu1 %v5866_v22  ;;  %v5918_v59 = vld [vmem:[%s8440_s1 + $0x5e4] ss:$8 sps:$4 sm:$0xff]   ;;  %v5924_v63 = vld [vmem:[%s8440_s1 + $0x5f4] ss:$8 sps:$4 sm:$0xff]   ;;  %v5926_v0 = vld [vmem:[%s8440_s1 + $0xf0] ss:$8 sps:$4 sm:$0xff]  }
  0x1c   : > { %3628 = vmatpush1.bf16.msra.mxu0 %v5867_v23  ;;  %3264 = vmatprep.subr.bf16.mxu1 %v5868_v24  ;;  %v5927_v1 = vld [vmem:[%s8440_s1 + $0x5f0] ss:$8 sps:$4 sm:$0xff]   ;;  %v5933_v2 = vld [vmem:[%s8440_s1 + $0x104] ss:$8 sps:$4 sm:$0xff]   ;;  %v5931_v5 = vld [vmem:[%s8440_s1 + $0x100] ss:$8 sps:$4 sm:$0xff]  }
  0x1d   : > { %3629 = vmatprep.subr.bf16.mxu0 %v5870_v25  ;;  %v5939_v3 = vld [vmem:[%s8440_s1 + $0x604] ss:$8 sps:$4 sm:$0xff]   ;;  %v5937_v7 = vld [vmem:[%s8440_s1 + $0x600] ss:$8 sps:$4 sm:$0xff]   ;;  %v5942_v8 = vld [vmem:[%s8440_s1 + $0x114] ss:$8 sps:$4 sm:$0xff]  }
  0x1e   : > { %v5928_v4 = vld [vmem:[%s6866_s21] ss:$100 sps:$4 sm:$0xff]   ;;  %v5934_v6 = vld [vmem:[%s6866_s21 + $0x28] ss:$100 sps:$4 sm:$0xff]   ;;  %v5945_v9 = vld [vmem:[%s8440_s1 + $0x614] ss:$8 sps:$4 sm:$0xff]  }
  0x1f   : > { %3265 = vmatpush1.bf16.msra.mxu1 %v5872_v26  ;;  %v5940_v10 = vld [vmem:[%s8440_s1 + $0x110] ss:$8 sps:$4 sm:$0xff]   ;;  %v5948_v12 = vld [vmem:[%s8440_s1 + $0x124] ss:$8 sps:$4 sm:$0xff]   ;;  %v5946_v14 = vld [vmem:[%s8440_s1 + $0x120] ss:$8 sps:$4 sm:$0xff]  }
  0x20   : > { %3630 = vmatpush1.bf16.msra.mxu0 %v5873_v27  ;;  %3266 = vmatprep.subr.bf16.mxu1 %v5874_v28  ;;  %v5943_v11 = vld [vmem:[%s8440_s1 + $0x610] ss:$8 sps:$4 sm:$0xff]   ;;  %v5951_v13 = vld [vmem:[%s8440_s1 + $0x624] ss:$8 sps:$4 sm:$0xff]   ;;  %v5949_v15 = vld [vmem:[%s8440_s1 + $0x620] ss:$8 sps:$4 sm:$0xff]  }
  0x21   : > { %3631 = vmatprep.subr.bf16.mxu0 %v5876_v29  ;;  %v5954_v16 = vld [vmem:[%s8440_s1 + $0x134] ss:$8 sps:$4 sm:$0xff]   ;;  %v5994_v17 = vld [vmem:[%s6866_s21 + $0xcc] ss:$100 sps:$4 sm:$0xff]   ;;  %v5958_v26 = vld [vmem:[%s8440_s1 + $0x140] ss:$8 sps:$4 sm:$0xff]  }
  0x22   : > { %v5957_v18 = vld [vmem:[%s8440_s1 + $0x634] ss:$8 sps:$4 sm:$0xff]   ;;  %v5952_v19 = vld [vmem:[%s8440_s1 + $0x130] ss:$8 sps:$4 sm:$0xff]   ;;  %v5960_v22 = vld [vmem:[%s8440_s1 + $0x144] ss:$8 sps:$4 sm:$0xff]  }
  0x23   : > { %3267 = vmatpush1.bf16.msra.mxu1 %v5878_v30  ;;  %v5955_v20 = vld [vmem:[%s8440_s1 + $0x630] ss:$8 sps:$4 sm:$0xff]   ;;  %v5963_v23 = vld [vmem:[%s8440_s1 + $0x644] ss:$8 sps:$4 sm:$0xff]   ;;  %v5961_v27 = vld [vmem:[%s8440_s1 + $0x640] ss:$8 sps:$4 sm:$0xff]  }
  0x24   : > { %3632 = vmatpush1.bf16.msra.mxu0 %v5879_v31  ;;  %3268 = vmatprep.subr.bf16.mxu1 %v5880_v32  ;;  %v5999_v21 = vld [vmem:[%s6866_s21 + $0xf4] ss:$100 sps:$4 sm:$0xff]   ;;  %v6004_v24 = vld [vmem:[%s6866_s21 + $0xc8] ss:$100 sps:$4 sm:$0xff]  }
  0x25   : > { %3633 = vmatprep.subr.bf16.mxu0 %v5882_v33  ;;  %v6005_v25 = vld [vmem:[%s6866_s21 + $0xf0] ss:$100 sps:$4 sm:$0xff]   ;;  %v6017_v33 = vld [vmem:[%s6866_s21 + $0x1bc] ss:$100 sps:$4 sm:$0xff]  }
  0x26   : > { %v5966_v28 = vld [vmem:[%s8440_s1 + $0x154] ss:$8 sps:$4 sm:$0xff]   ;;  %v5964_v31 = vld [vmem:[%s8440_s1 + $0x150] ss:$8 sps:$4 sm:$0xff]   ;;  %v5985_v51 = vld [vmem:[%s8440_s1 + $0x680] ss:$8 sps:$4 sm:$0xff]  }
  0x27   : > { %3269 = vmatpush1.bf16.msra.mxu1 %v5884_v34  ;;  %v6012_v29 = vld [vmem:[%s6866_s21 + $0x194] ss:$100 sps:$4 sm:$0xff]   ;;  %v5972_v34 = vld [vmem:[%s8440_s1 + $0x164] ss:$8 sps:$4 sm:$0xff]  }
  0x28   : > { %3634 = vmatpush1.bf16.msra.mxu0 %v5885_v35  ;;  %3270 = vmatprep.subr.bf16.mxu1 %v5886_v36  ;;  %v5969_v30 = vld [vmem:[%s8440_s1 + $0x654] ss:$8 sps:$4 sm:$0xff]   ;;  %v5967_v32 = vld [vmem:[%s8440_s1 + $0x650] ss:$8 sps:$4 sm:$0xff]   ;;  %v5975_v35 = vld [vmem:[%s8440_s1 + $0x664] ss:$8 sps:$4 sm:$0xff]  }
  0x29   : > { %3635 = vmatprep.subr.bf16.mxu0 %v5888_v37  ;;  %v6022_v36 = vld [vmem:[%s6866_s21 + $0x190] ss:$100 sps:$4 sm:$0xff]   ;;  %v6023_v37 = vld [vmem:[%s6866_s21 + $0x1b8] ss:$100 sps:$4 sm:$0xff]  }
  0x2a   : > { %v6040_v48 = vld [vmem:[%s6866_s21 + $0x258] ss:$100 sps:$4 sm:$0xff]  }
  0x2b   : > { %3271 = vmatpush1.bf16.msra.mxu1 %v5890_v38  ;;  %v5970_v38 = vld [vmem:[%s8440_s1 + $0x160] ss:$8 sps:$4 sm:$0xff]  }
  0x2c   : > { %3636 = vmatpush1.bf16.msra.mxu0 %v5891_v39  ;;  %3272 = vmatprep.subr.bf16.mxu1 %v5892_v40  ;;  %v5973_v39 = vld [vmem:[%s8440_s1 + $0x660] ss:$8 sps:$4 sm:$0xff]   ;;  %v5978_v40 = vld [vmem:[%s8440_s1 + $0x174] ss:$8 sps:$4 sm:$0xff]  }
  0x2d   : > { %3637 = vmatprep.subr.bf16.mxu0 %v5894_v41  ;;  %v6030_v41 = vld [vmem:[%s6866_s21 + $0x25c] ss:$100 sps:$4 sm:$0xff]  }
  0x2f   : > { %3273 = vmatpush1.bf16.msra.mxu1 %v5896_v42  ;;  %v5981_v42 = vld [vmem:[%s8440_s1 + $0x674] ss:$8 sps:$4 sm:$0xff]  }
  0x30   : > { %3638 = vmatpush1.bf16.msra.mxu0 %v5897_v43  ;;  %3274 = vmatprep.subr.bf16.mxu1 %v5898_v44  ;;  %v5976_v43 = vld [vmem:[%s8440_s1 + $0x170] ss:$8 sps:$4 sm:$0xff]  }
  0x31   : > { %3639 = vmatprep.subr.bf16.mxu0 %v5900_v45  ;;  %v5979_v44 = vld [vmem:[%s8440_s1 + $0x670] ss:$8 sps:$4 sm:$0xff]   ;;  %v6035_v45 = vld [vmem:[%s6866_s21 + $0x284] ss:$100 sps:$4 sm:$0xff]  }
  0x33   : > { %3275 = vmatpush1.bf16.msra.mxu1 %v5902_v46  ;;  %v5984_v46 = vld [vmem:[%s8440_s1 + $0x184] ss:$8 sps:$4 sm:$0xff]  }
  0x34   : > { %3640 = vmatpush1.bf16.msra.mxu0 %v5903_v47  ;;  %3276 = vmatprep.subr.bf16.mxu1 %v5904_v49  ;;  %v5987_v47 = vld [vmem:[%s8440_s1 + $0x684] ss:$8 sps:$4 sm:$0xff]  }
  0x35   : > { %3641 = vmatprep.subr.bf16.mxu0 %v5906_v50  ;;  %v6041_v49 = vld [vmem:[%s6866_s21 + $0x280] ss:$100 sps:$4 sm:$0xff]  }
  0x36   : > { %v5982_v50 = vld [vmem:[%s8440_s1 + $0x180] ss:$8 sps:$4 sm:$0xff]  }
  0x37   : > { %3277 = vmatpush1.bf16.msra.mxu1 %v5908_v52  ;;  %v5990_v52 = vld [vmem:[%s8440_s1 + $0x194] ss:$8 sps:$4 sm:$0xff]  }
  0x38   : > { %3642 = vmatpush1.bf16.msra.mxu0 %v5909_v53  ;;  %3278 = vmatprep.subr.bf16.mxu1 %v5910_v54  ;;  %v5993_v53 = vld [vmem:[%s8440_s1 + $0x694] ss:$8 sps:$4 sm:$0xff]   ;;  %v6050_v54 = vld [vmem:[%s6866_s21 + $0xc] ss:$100 sps:$4 sm:$0xff]  }
  0x39   : > { %3643 = vmatprep.subr.bf16.mxu0 %v5912_v55  ;;  %v5988_v55 = vld [vmem:[%s8440_s1 + $0x190] ss:$8 sps:$4 sm:$0xff]  }
  0x3b   : > { %3279 = vmatpush1.bf16.msra.mxu1 %v5914_v56  ;;  %v5991_v56 = vld [vmem:[%s8440_s1 + $0x690] ss:$8 sps:$4 sm:$0xff]  }
  0x3c   : > { %3644 = vmatpush1.bf16.msra.mxu0 %v5915_v57  ;;  %3280 = vmatprep.subr.bf16.mxu1 %v5916_v58  ;;  %v6056_v57 = vld [vmem:[%s6866_s21 + $0x34] ss:$100 sps:$4 sm:$0xff]   ;;  %v5998_v58 = vld [vmem:[%s8440_s1 + $0x1a4] ss:$8 sps:$4 sm:$0xff]  }
  0x3d   : > { %3645 = vmatprep.subr.bf16.mxu0 %v5918_v59  ;;  %v6003_v59 = vld [vmem:[%s8440_s1 + $0x6a4] ss:$8 sps:$4 sm:$0xff]  }
  0x3f   : > { %3281 = vmatpush1.bf16.msra.mxu1 %v5920_v60  ;;  %v5996_v60 = vld [vmem:[%s8440_s1 + $0x1a0] ss:$8 sps:$4 sm:$0xff]  }
  0x40   : > { %3646 = vmatpush1.bf16.msra.mxu0 %v5921_v61  ;;  %3282 = vmatprep.subr.bf16.mxu1 %v5922_v62  ;;  %v6001_v61 = vld [vmem:[%s8440_s1 + $0x6a0] ss:$8 sps:$4 sm:$0xff]   ;;  %v6008_v62 = vld [vmem:[%s8440_s1 + $0x1b4] ss:$8 sps:$4 sm:$0xff]  }
  0x41   : > { %3647 = vmatprep.subr.bf16.mxu0 %v5924_v63  ;;  %v6011_v63 = vld [vmem:[%s8440_s1 + $0x6b4] ss:$8 sps:$4 sm:$0xff]  }
  0x43   : > { %3283 = vmatpush1.bf16.msra.mxu1 %v5926_v0  ;;  %v6006_v0 = vld [vmem:[%s8440_s1 + $0x1b0] ss:$8 sps:$4 sm:$0xff]  }
  0x44   : > { %3648 = vmatpush1.bf16.msra.mxu0 %v5927_v1  ;;  %3325 = vmatprep.subr.bf16.mxu1 %v5933_v2  ;;  %v6009_v1 = vld [vmem:[%s8440_s1 + $0x6b0] ss:$8 sps:$4 sm:$0xff]   ;;  %v6016_v2 = vld [vmem:[%s8440_s1 + $0x1c4] ss:$8 sps:$4 sm:$0xff]  }
  0x45   : > { %3690 = vmatprep.subr.bf16.mxu0 %v5939_v3  ;;  %v6021_v3 = vld [vmem:[%s8440_s1 + $0x6c4] ss:$8 sps:$4 sm:$0xff]  }
  0x46   : > { %3285 = vmatmul.mubr.bf16.vlgmr.msra.gmra.mrb[0].mxu1 %v5928_v4  ;;  %v6014_v4 = vld [vmem:[%s8440_s1 + $0x1c0] ss:$8 sps:$4 sm:$0xff]  }
  0x47   : > { %3650 = vmatmul.mubr.bf16.vlgmr.msra.gmra.mrb[0].mxu0 %v5934_v6  ;;  %3326 = vmatpush1.bf16.msra.mxu1 %v5931_v5  ;;  %v6019_v5 = vld [vmem:[%s8440_s1 + $0x6c0] ss:$8 sps:$4 sm:$0xff]   ;;  %v6026_v6 = vld [vmem:[%s8440_s1 + $0x1d4] ss:$8 sps:$4 sm:$0xff]  }
  0x48   : > { %3691 = vmatpush1.bf16.msra.mxu0 %v5937_v7  ;;  %3327 = vmatprep.subr.bf16.mxu1 %v5942_v8  ;;  %v6029_v7 = vld [vmem:[%s8440_s1 + $0x6d4] ss:$8 sps:$4 sm:$0xff]   ;;  %v6024_v8 = vld [vmem:[%s8440_s1 + $0x1d0] ss:$8 sps:$4 sm:$0xff]  }
  0x49   : > { %3692 = vmatprep.subr.bf16.mxu0 %v5945_v9  ;;  %3294 = vmatprep.mubr.bf16.mxu1 %v5994_v17  ;;  %v6027_v9 = vld [vmem:[%s8440_s1 + $0x6d0] ss:$8 sps:$4 sm:$0xff]  }
  0x4a   : > { %3659 = vmatprep.mubr.bf16.mxu0 %v5999_v21  ;;  %v6045_v17 = vld [vmem:[%s8440_s1 + $0x6f0] ss:$8 sps:$4 sm:$0xff]   ;;  %v6051_v21 = vld [vmem:[%s8440_s1 + $0x200] ss:$8 sps:$4 sm:$0xff]  }
  0x4b   : > { %3328 = vmatpush1.bf16.msra.mxu1 %v5940_v10  ;;  %v6034_v10 = vld [vmem:[%s8440_s1 + $0x1e4] ss:$8 sps:$4 sm:$0xff]  }
  0x4c   : > { %3693 = vmatpush1.bf16.msra.mxu0 %v5943_v11  ;;  %3329 = vmatprep.subr.bf16.mxu1 %v5948_v12  ;;  %v6039_v11 = vld [vmem:[%s8440_s1 + $0x6e4] ss:$8 sps:$4 sm:$0xff]   ;;  %v6032_v12 = vld [vmem:[%s8440_s1 + $0x1e0] ss:$8 sps:$4 sm:$0xff]  }
  0x4d   : > { %3694 = vmatprep.subr.bf16.mxu0 %v5951_v13  ;;  %v6037_v13 = vld [vmem:[%s8440_s1 + $0x6e0] ss:$8 sps:$4 sm:$0xff]  }
  0x4e   : > { %3295 = vmatmul.mubr.bf16.gmra.mrb[4].mxu1 %v6004_v24  ;;  %v6062_v24 = vld [vmem:[%s8440_s1 + $0x214] ss:$8 sps:$4 sm:$0xff]  }
  0x4f   : > { %3330 = vmatpush1.bf16.msra.mxu1 %v5946_v14  ;;  %3660 = vmatmul.mubr.bf16.gmra.mrb[4].mxu0 %v6005_v25  ;;  %v6044_v14 = vld [vmem:[%s8440_s1 + $0x1f4] ss:$8 sps:$4 sm:$0xff]  }
  0x50   : > { %3695 = vmatpush1.bf16.msra.mxu0 %v5949_v15  ;;  %3331 = vmatprep.subr.bf16.mxu1 %v5954_v16  ;;  %v6047_v15 = vld [vmem:[%s8440_s1 + $0x6f4] ss:$8 sps:$4 sm:$0xff]   ;;  %v6042_v16 = vld [vmem:[%s8440_s1 + $0x1f0] ss:$8 sps:$4 sm:$0xff]  }
  0x51   : > { %3696 = vmatprep.subr.bf16.mxu0 %v5957_v18  ;;  %3304 = vmatprep.mubr.bf16.mxu1 %v6012_v29  ;;  %v6053_v18 = vld [vmem:[%s8440_s1 + $0x204] ss:$8 sps:$4 sm:$0xff]   ;;  %v6065_v25 = vld [vmem:[%s8440_s1 + $0x714] ss:$8 sps:$4 sm:$0xff]   ;;  %v6063_v29 = vld [vmem:[%s8440_s1 + $0x710] ss:$8 sps:$4 sm:$0xff]  }
  0x52   : > { %3669 = vmatprep.mubr.bf16.mxu0 %v6017_v33  ;;  %v6124_v33 = vld [vmem:[%s6866_s21 + $0xd0] ss:$100 sps:$4 sm:$0xff]  }
  0x53   : > { %3332 = vmatpush1.bf16.msra.mxu1 %v5952_v19  ;;  %v6059_v19 = vld [vmem:[%s8440_s1 + $0x704] ss:$8 sps:$4 sm:$0xff]  }
  0x54   : > { %3697 = vmatpush1.bf16.msra.mxu0 %v5955_v20  ;;  %3333 = vmatprep.subr.bf16.mxu1 %v5960_v22  ;;  %v6048_v20 = vld [vmem:[%s6866_s21 + $0x8] ss:$100 sps:$4 sm:$0xff]   ;;  %v6054_v22 = vld [vmem:[%s6866_s21 + $0x30] ss:$100 sps:$4 sm:$0xff]  }
  0x55   : > { %3698 = vmatprep.subr.bf16.mxu0 %v5963_v23  ;;  %v6057_v23 = vld [vmem:[%s8440_s1 + $0x700] ss:$8 sps:$4 sm:$0xff]  }
  0x56   : > { %3305 = vmatmul.mubr.bf16.gmra.mrb[8].mxu1 %v6022_v36  ;;  %v6074_v36 = vld [vmem:[%s8440_s1 + $0x234] ss:$8 sps:$4 sm:$0xff]  }
  0x57   : > { %3334 = vmatpush1.bf16.msra.mxu1 %v5958_v26  ;;  %3670 = vmatmul.mubr.bf16.gmra.mrb[8].mxu0 %v6023_v37  ;;  %v6114_v26 = vld [vmem:[%s6866_s21 + $0xd4] ss:$100 sps:$4 sm:$0xff]  }
  0x58   : > { %3699 = vmatpush1.bf16.msra.mxu0 %v5961_v27  ;;  %3335 = vmatprep.subr.bf16.mxu1 %v5966_v28  ;;  %v6119_v27 = vld [vmem:[%s6866_s21 + $0xfc] ss:$100 sps:$4 sm:$0xff]   ;;  %v6060_v28 = vld [vmem:[%s8440_s1 + $0x210] ss:$8 sps:$4 sm:$0xff]  }
  0x59   : > { %3700 = vmatprep.subr.bf16.mxu0 %v5969_v30  ;;  %3314 = vmatprep.mubr.bf16.mxu1 %v6030_v41  ;;  %v6068_v30 = vld [vmem:[%s8440_s1 + $0x224] ss:$8 sps:$4 sm:$0xff]   ;;  %v6077_v37 = vld [vmem:[%s8440_s1 + $0x734] ss:$8 sps:$4 sm:$0xff]   ;;  %v6075_v41 = vld [vmem:[%s8440_s1 + $0x730] ss:$8 sps:$4 sm:$0xff]  }
  0x5a   : > { %3679 = vmatprep.mubr.bf16.mxu0 %v6035_v45  ;;  %v6142_v45 = vld [vmem:[%s6866_s21 + $0x198] ss:$100 sps:$4 sm:$0xff]  }
  0x5b   : > { %3336 = vmatpush1.bf16.msra.mxu1 %v5964_v31  ;;  %v6071_v31 = vld [vmem:[%s8440_s1 + $0x724] ss:$8 sps:$4 sm:$0xff]  }
  0x5c   : > { %3701 = vmatpush1.bf16.msra.mxu0 %v5967_v32  ;;  %3337 = vmatprep.subr.bf16.mxu1 %v5972_v34  ;;  %v6066_v32 = vld [vmem:[%s8440_s1 + $0x220] ss:$8 sps:$4 sm:$0xff]   ;;  %v6125_v34 = vld [vmem:[%s6866_s21 + $0xf8] ss:$100 sps:$4 sm:$0xff]  }
  0x5d   : > { %3702 = vmatprep.subr.bf16.mxu0 %v5975_v35  ;;  %v6069_v35 = vld [vmem:[%s8440_s1 + $0x720] ss:$8 sps:$4 sm:$0xff]  }
  0x5e   : > { %3315 = vmatmul.mubr.bf16.gmra.mrb[12].mxu1 %v6040_v48  ;;  %v6086_v48 = vld [vmem:[%s8440_s1 + $0x254] ss:$8 sps:$4 sm:$0xff]  }
  0x5f   : > { %3338 = vmatpush1.bf16.msra.mxu1 %v5970_v38  ;;  %3680 = vmatmul.mubr.bf16.gmra.mrb[12].mxu0 %v6041_v49  ;;  %v6132_v38 = vld [vmem:[%s6866_s21 + $0x19c] ss:$100 sps:$4 sm:$0xff]  }
  0x60   : > { %3703 = vmatpush1.bf16.msra.mxu0 %v5973_v39  ;;  %3339 = vmatprep.subr.bf16.mxu1 %v5978_v40  ;;  %v6137_v39 = vld [vmem:[%s6866_s21 + $0x1c4] ss:$100 sps:$4 sm:$0xff]   ;;  %v6072_v40 = vld [vmem:[%s8440_s1 + $0x230] ss:$8 sps:$4 sm:$0xff]   ;;  %v6089_v49 = vld [vmem:[%s8440_s1 + $0x754] ss:$8 sps:$4 sm:$0xff]  }
  0x61   : > { %3704 = vmatprep.subr.bf16.mxu0 %v5981_v42  ;;  %3357 = vmatprep.mubr.bf16.mxu1 %v6050_v54  ;;  %v6080_v42 = vld [vmem:[%s8440_s1 + $0x244] ss:$8 sps:$4 sm:$0xff]  }
  0x62   : > { %3722 = vmatprep.mubr.bf16.mxu0 %v6056_v57  ;;  %v6092_v54 = vld [vmem:[%s8440_s1 + $0x264] ss:$8 sps:$4 sm:$0xff]   ;;  %v6093_v57 = vld [vmem:[%s8440_s1 + $0x760] ss:$8 sps:$4 sm:$0xff]  }
  0x63   : > { %3340 = vmatpush1.bf16.msra.mxu1 %v5976_v43  ;;  %v6083_v43 = vld [vmem:[%s8440_s1 + $0x744] ss:$8 sps:$4 sm:$0xff]  }
  0x64   : > { %3705 = vmatpush1.bf16.msra.mxu0 %v5979_v44  ;;  %3341 = vmatprep.subr.bf16.mxu1 %v5984_v46  ;;  %v6078_v44 = vld [vmem:[%s8440_s1 + $0x240] ss:$8 sps:$4 sm:$0xff]  }
  0x65   : > { %3706 = vmatprep.subr.bf16.mxu0 %v5987_v47  ;;  %v6143_v46 = vld [vmem:[%s6866_s21 + $0x1c0] ss:$100 sps:$4 sm:$0xff]  }
  0x66   : > { %v6081_v47 = vld [vmem:[%s8440_s1 + $0x740] ss:$8 sps:$4 sm:$0xff]  }
  0x67   : > { %3342 = vmatpush1.bf16.msra.mxu1 %v5982_v50  ;;  %v6150_v50 = vld [vmem:[%s6866_s21 + $0x264] ss:$100 sps:$4 sm:$0xff]  }
  0x68   : > { %3707 = vmatpush1.bf16.msra.mxu0 %v5985_v51  ;;  %3343 = vmatprep.subr.bf16.mxu1 %v5990_v52  ;;  %v6155_v51 = vld [vmem:[%s6866_s21 + $0x28c] ss:$100 sps:$4 sm:$0xff]  }
  0x69   : > { %3708 = vmatprep.subr.bf16.mxu0 %v5993_v53  ;;  %v6084_v52 = vld [vmem:[%s8440_s1 + $0x250] ss:$8 sps:$4 sm:$0xff]  }
  0x6a   : > { %v6087_v53 = vld [vmem:[%s8440_s1 + $0x750] ss:$8 sps:$4 sm:$0xff]  }
  0x6b   : > { %3344 = vmatpush1.bf16.msra.mxu1 %v5988_v55  ;;  %v6095_v55 = vld [vmem:[%s8440_s1 + $0x764] ss:$8 sps:$4 sm:$0xff]  }
  0x6c   : > { %3709 = vmatpush1.bf16.msra.mxu0 %v5991_v56  ;;  %3345 = vmatprep.subr.bf16.mxu1 %v5998_v58  ;;  %v6090_v56 = vld [vmem:[%s8440_s1 + $0x260] ss:$8 sps:$4 sm:$0xff]  }
  0x6d   : > { %3710 = vmatprep.subr.bf16.mxu0 %v6003_v59  ;;  %v6160_v58 = vld [vmem:[%s6866_s21 + $0x260] ss:$100 sps:$4 sm:$0xff]   ;;  %v6161_v59 = vld [vmem:[%s6866_s21 + $0x288] ss:$100 sps:$4 sm:$0xff]  }
  0x6f   : > { %3346 = vmatpush1.bf16.msra.mxu1 %v5996_v60  ;;  %v6098_v60 = vld [vmem:[%s8440_s1 + $0x274] ss:$8 sps:$4 sm:$0xff]  }
  0x70   : > { %3711 = vmatpush1.bf16.msra.mxu0 %v6001_v61  ;;  %3347 = vmatprep.subr.bf16.mxu1 %v6008_v62  ;;  %v6101_v61 = vld [vmem:[%s8440_s1 + $0x774] ss:$8 sps:$4 sm:$0xff]  }
  0x71   : > { %3712 = vmatprep.subr.bf16.mxu0 %v6011_v63  ;;  %v6170_v62 = vld [vmem:[%s6866_s21 + $0x14] ss:$100 sps:$4 sm:$0xff]   ;;  %v6176_v63 = vld [vmem:[%s6866_s21 + $0x3c] ss:$100 sps:$4 sm:$0xff]  }
  0x73   : > { %3348 = vmatpush1.bf16.msra.mxu1 %v6006_v0  ;;  %v6096_v0 = vld [vmem:[%s8440_s1 + $0x270] ss:$8 sps:$4 sm:$0xff]  }
  0x74   : > { %3713 = vmatpush1.bf16.msra.mxu0 %v6009_v1  ;;  %3349 = vmatprep.subr.bf16.mxu1 %v6016_v2  ;;  %v6099_v1 = vld [vmem:[%s8440_s1 + $0x770] ss:$8 sps:$4 sm:$0xff]   ;;  %v6104_v2 = vld [vmem:[%s8440_s1 + $0x284] ss:$8 sps:$4 sm:$0xff]  }
  0x75   : > { %3714 = vmatprep.subr.bf16.mxu0 %v6021_v3  ;;  %v6107_v3 = vld [vmem:[%s8440_s1 + $0x784] ss:$8 sps:$4 sm:$0xff]  }
  0x77   : > { %3350 = vmatpush1.bf16.msra.mxu1 %v6014_v4  ;;  %v6102_v4 = vld [vmem:[%s8440_s1 + $0x280] ss:$8 sps:$4 sm:$0xff]  }
  0x78   : > { %3715 = vmatpush1.bf16.msra.mxu0 %v6019_v5  ;;  %3351 = vmatprep.subr.bf16.mxu1 %v6026_v6  ;;  %v6105_v5 = vld [vmem:[%s8440_s1 + $0x780] ss:$8 sps:$4 sm:$0xff]   ;;  %v6110_v6 = vld [vmem:[%s8440_s1 + $0x294] ss:$8 sps:$4 sm:$0xff]  }
  0x79   : > { %3716 = vmatprep.subr.bf16.mxu0 %v6029_v7  ;;  %v6113_v7 = vld [vmem:[%s8440_s1 + $0x794] ss:$8 sps:$4 sm:$0xff]  }
  0x7b   : > { %3352 = vmatpush1.bf16.msra.mxu1 %v6024_v8  ;;  %v6108_v8 = vld [vmem:[%s8440_s1 + $0x290] ss:$8 sps:$4 sm:$0xff]  }
  0x7c   : > { %3717 = vmatpush1.bf16.msra.mxu0 %v6027_v9  ;;  %3353 = vmatprep.subr.bf16.mxu1 %v6034_v10  ;;  %v6111_v9 = vld [vmem:[%s8440_s1 + $0x790] ss:$8 sps:$4 sm:$0xff]   ;;  %v6118_v10 = vld [vmem:[%s8440_s1 + $0x2a4] ss:$8 sps:$4 sm:$0xff]  }
  0x7d   : > { %3718 = vmatprep.subr.bf16.mxu0 %v6039_v11  ;;  %v6123_v11 = vld [vmem:[%s8440_s1 + $0x7a4] ss:$8 sps:$4 sm:$0xff]  }
  0x7f   : > { %3354 = vmatpush1.bf16.msra.mxu1 %v6032_v12  ;;  %v6116_v12 = vld [vmem:[%s8440_s1 + $0x2a0] ss:$8 sps:$4 sm:$0xff]  }
  0x80   : > { %3719 = vmatpush1.bf16.msra.mxu0 %v6037_v13  ;;  %3355 = vmatprep.subr.bf16.mxu1 %v6044_v14  ;;  %v6121_v13 = vld [vmem:[%s8440_s1 + $0x7a0] ss:$8 sps:$4 sm:$0xff]   ;;  %v6128_v14 = vld [vmem:[%s8440_s1 + $0x2b4] ss:$8 sps:$4 sm:$0xff]  }
  0x81   : > { %3720 = vmatprep.subr.bf16.mxu0 %v6047_v15  ;;  %v6131_v15 = vld [vmem:[%s8440_s1 + $0x7b4] ss:$8 sps:$4 sm:$0xff]  }
  0x83   : > { %3356 = vmatpush1.bf16.msra.mxu1 %v6042_v16  ;;  %v6126_v16 = vld [vmem:[%s8440_s1 + $0x2b0] ss:$8 sps:$4 sm:$0xff]  }
  0x84   : > { %3721 = vmatpush1.bf16.msra.mxu0 %v6045_v17  ;;  %3398 = vmatprep.subr.bf16.mxu1 %v6053_v18  ;;  %v6129_v17 = vld [vmem:[%s8440_s1 + $0x7b0] ss:$8 sps:$4 sm:$0xff]   ;;  %v6136_v18 = vld [vmem:[%s8440_s1 + $0x2c4] ss:$8 sps:$4 sm:$0xff]  }
  0x85   : > { %3763 = vmatprep.subr.bf16.mxu0 %v6059_v19  ;;  %v6141_v19 = vld [vmem:[%s8440_s1 + $0x7c4] ss:$8 sps:$4 sm:$0xff]  }
  0x86   : > { %3358 = vmatmul.mubr.bf16.vlgmr.msra.gmra.mrb[0].mxu1 %v6048_v20  ;;  %v6134_v20 = vld [vmem:[%s8440_s1 + $0x2c0] ss:$8 sps:$4 sm:$0xff]  }
  0x87   : > { %3723 = vmatmul.mubr.bf16.vlgmr.msra.gmra.mrb[0].mxu0 %v6054_v22  ;;  %3399 = vmatpush1.bf16.msra.mxu1 %v6051_v21  ;;  %v6139_v21 = vld [vmem:[%s8440_s1 + $0x7c0] ss:$8 sps:$4 sm:$0xff]   ;;  %v6146_v22 = vld [vmem:[%s8440_s1 + $0x2d4] ss:$8 sps:$4 sm:$0xff]  }
  0x88   : > { %3764 = vmatpush1.bf16.msra.mxu0 %v6057_v23  ;;  %3400 = vmatprep.subr.bf16.mxu1 %v6062_v24  ;;  %v6149_v23 = vld [vmem:[%s8440_s1 + $0x7d4] ss:$8 sps:$4 sm:$0xff]   ;;  %v6144_v24 = vld [vmem:[%s8440_s1 + $0x2d0] ss:$8 sps:$4 sm:$0xff]  }
  0x89   : > { %3765 = vmatprep.subr.bf16.mxu0 %v6065_v25  ;;  %3367 = vmatprep.mubr.bf16.mxu1 %v6114_v26  ;;  %v6147_v25 = vld [vmem:[%s8440_s1 + $0x7d0] ss:$8 sps:$4 sm:$0xff]   ;;  %v6154_v26 = vld [vmem:[%s8440_s1 + $0x2e4] ss:$8 sps:$4 sm:$0xff]  }
  0x8a   : > { %3732 = vmatprep.mubr.bf16.mxu0 %v6119_v27  ;;  %v6159_v27 = vld [vmem:[%s8440_s1 + $0x7e4] ss:$8 sps:$4 sm:$0xff]  }
  0x8b   : > { %3401 = vmatpush1.bf16.msra.mxu1 %v6060_v28  ;;  %v6152_v28 = vld [vmem:[%s8440_s1 + $0x2e0] ss:$8 sps:$4 sm:$0xff]  }
  0x8c   : > { %3766 = vmatpush1.bf16.msra.mxu0 %v6063_v29  ;;  %3402 = vmatprep.subr.bf16.mxu1 %v6068_v30  ;;  %v6157_v29 = vld [vmem:[%s8440_s1 + $0x7e0] ss:$8 sps:$4 sm:$0xff]   ;;  %v6164_v30 = vld [vmem:[%s8440_s1 + $0x2f4] ss:$8 sps:$4 sm:$0xff]  }
  0x8d   : > { %3767 = vmatprep.subr.bf16.mxu0 %v6071_v31  ;;  %v6167_v31 = vld [vmem:[%s8440_s1 + $0x7f4] ss:$8 sps:$4 sm:$0xff]  }
  0x8e   : > { %3368 = vmatmul.mubr.bf16.gmra.mrb[4].mxu1 %v6124_v33  ;;  %v6165_v33 = vld [vmem:[%s8440_s1 + $0x7f0] ss:$8 sps:$4 sm:$0xff]  }
  0x8f   : > { %3733 = vmatmul.mubr.bf16.gmra.mrb[4].mxu0 %v6125_v34  ;;  %3403 = vmatpush1.bf16.msra.mxu1 %v6066_v32  ;;  %v6162_v32 = vld [vmem:[%s8440_s1 + $0x2f0] ss:$8 sps:$4 sm:$0xff]   ;;  %v6173_v34 = vld [vmem:[%s8440_s1 + $0x304] ss:$8 sps:$4 sm:$0xff]  }
  0x90   : > { %3768 = vmatpush1.bf16.msra.mxu0 %v6069_v35  ;;  %3404 = vmatprep.subr.bf16.mxu1 %v6074_v36  ;;  %v6179_v35 = vld [vmem:[%s8440_s1 + $0x804] ss:$8 sps:$4 sm:$0xff]   ;;  %v6168_v36 = vld [vmem:[%s6866_s21 + $0x10] ss:$100 sps:$4 sm:$0xff]  }
  0x91   : > { %3769 = vmatprep.subr.bf16.mxu0 %v6077_v37  ;;  %3377 = vmatprep.mubr.bf16.mxu1 %v6132_v38  ;;  %v6171_v37 = vld [vmem:[%s8440_s1 + $0x300] ss:$8 sps:$4 sm:$0xff]   ;;  %v6174_v38 = vld [vmem:[%s6866_s21 + $0x38] ss:$100 sps:$4 sm:$0xff]  }
  0x92   : > { %3742 = vmatprep.mubr.bf16.mxu0 %v6137_v39  ;;  %v6177_v39 = vld [vmem:[%s8440_s1 + $0x800] ss:$8 sps:$4 sm:$0xff]  }
  0x93   : > { %3405 = vmatpush1.bf16.msra.mxu1 %v6072_v40  ;;  %v6182_v40 = vld [vmem:[%s8440_s1 + $0x314] ss:$8 sps:$4 sm:$0xff]  }
  0x94   : > { %3770 = vmatpush1.bf16.msra.mxu0 %v6075_v41  ;;  %3406 = vmatprep.subr.bf16.mxu1 %v6080_v42  ;;  %v6185_v41 = vld [vmem:[%s8440_s1 + $0x814] ss:$8 sps:$4 sm:$0xff]  }
  0x95   : > { %3771 = vmatprep.subr.bf16.mxu0 %v6083_v43  ;;  %v6234_v42 = vld [vmem:[%s6866_s21 + $0xdc] ss:$100 sps:$4 sm:$0xff]   ;;  %v6239_v43 = vld [vmem:[%s6866_s21 + $0x104] ss:$100 sps:$4 sm:$0xff]  }
  0x96   : > { %3378 = vmatmul.mubr.bf16.gmra.mrb[8].mxu1 %v6142_v45  ;;  %v6183_v45 = vld [vmem:[%s8440_s1 + $0x810] ss:$8 sps:$4 sm:$0xff]  }
  0x97   : > { %3743 = vmatmul.mubr.bf16.gmra.mrb[8].mxu0 %v6143_v46  ;;  %3407 = vmatpush1.bf16.msra.mxu1 %v6078_v44  ;;  %v6180_v44 = vld [vmem:[%s8440_s1 + $0x310] ss:$8 sps:$4 sm:$0xff]   ;;  %v6188_v46 = vld [vmem:[%s8440_s1 + $0x324] ss:$8 sps:$4 sm:$0xff]  }
  0x98   : > { %3772 = vmatpush1.bf16.msra.mxu0 %v6081_v47  ;;  %3408 = vmatprep.subr.bf16.mxu1 %v6086_v48  ;;  %v6191_v47 = vld [vmem:[%s8440_s1 + $0x824] ss:$8 sps:$4 sm:$0xff]   ;;  %v6186_v48 = vld [vmem:[%s8440_s1 + $0x320] ss:$8 sps:$4 sm:$0xff]  }
  0x99   : > { %3773 = vmatprep.subr.bf16.mxu0 %v6089_v49  ;;  %3387 = vmatprep.mubr.bf16.mxu1 %v6150_v50  ;;  %v6189_v49 = vld [vmem:[%s8440_s1 + $0x820] ss:$8 sps:$4 sm:$0xff]   ;;  %v6244_v50 = vld [vmem:[%s6866_s21 + $0xd8] ss:$100 sps:$4 sm:$0xff]  }
  0x9a   : > { %3752 = vmatprep.mubr.bf16.mxu0 %v6155_v51  ;;  %v6245_v51 = vld [vmem:[%s6866_s21 + $0x100] ss:$100 sps:$4 sm:$0xff]  }
  0x9b   : > { %3409 = vmatpush1.bf16.msra.mxu1 %v6084_v52  ;;  %v6194_v52 = vld [vmem:[%s8440_s1 + $0x334] ss:$8 sps:$4 sm:$0xff]  }
  0x9c   : > { %3774 = vmatpush1.bf16.msra.mxu0 %v6087_v53  ;;  %3410 = vmatprep.subr.bf16.mxu1 %v6092_v54  ;;  %v6197_v53 = vld [vmem:[%s8440_s1 + $0x834] ss:$8 sps:$4 sm:$0xff]   ;;  %v6252_v54 = vld [vmem:[%s6866_s21 + $0x1a4] ss:$100 sps:$4 sm:$0xff]  }
  0x9d   : > { %3775 = vmatprep.subr.bf16.mxu0 %v6095_v55  ;;  %v6257_v55 = vld [vmem:[%s6866_s21 + $0x1cc] ss:$100 sps:$4 sm:$0xff]  }
  0x9e   : > { %3388 = vmatmul.mubr.bf16.gmra.mrb[12].mxu1 %v6160_v58  ;;  %v6200_v58 = vld [vmem:[%s8440_s1 + $0x344] ss:$8 sps:$4 sm:$0xff]  }
  0x9f   : > { %3753 = vmatmul.mubr.bf16.gmra.mrb[12].mxu0 %v6161_v59  ;;  %3411 = vmatpush1.bf16.msra.mxu1 %v6090_v56  ;;  %v6192_v56 = vld [vmem:[%s8440_s1 + $0x330] ss:$8 sps:$4 sm:$0xff]   ;;  %v6203_v59 = vld [vmem:[%s8440_s1 + $0x844] ss:$8 sps:$4 sm:$0xff]  }
  0xa0   : > { %3776 = vmatpush1.bf16.msra.mxu0 %v6093_v57  ;;  %3412 = vmatprep.subr.bf16.mxu1 %v6098_v60  ;;  %v6195_v57 = vld [vmem:[%s8440_s1 + $0x830] ss:$8 sps:$4 sm:$0xff]   ;;  %v6198_v60 = vld [vmem:[%s8440_s1 + $0x340] ss:$8 sps:$4 sm:$0xff]  }
  0xa1   : > { %3777 = vmatprep.subr.bf16.mxu0 %v6101_v61  ;;  %3430 = vmatprep.mubr.bf16.mxu1 %v6170_v62  ;;  %v6201_v61 = vld [vmem:[%s8440_s1 + $0x840] ss:$8 sps:$4 sm:$0xff]  }
  0xa2   : > { %3795 = vmatprep.mubr.bf16.mxu0 %v6176_v63  ;;  %v6262_v62 = vld [vmem:[%s6866_s21 + $0x1a0] ss:$100 sps:$4 sm:$0xff]   ;;  %v6263_v63 = vld [vmem:[%s6866_s21 + $0x1c8] ss:$100 sps:$4 sm:$0xff]  }
  0xa3   : > { %3413 = vmatpush1.bf16.msra.mxu1 %v6096_v0  ;;  %v6206_v0 = vld [vmem:[%s8440_s1 + $0x354] ss:$8 sps:$4 sm:$0xff]  }
  0xa4   : > { %3778 = vmatpush1.bf16.msra.mxu0 %v6099_v1  ;;  %3414 = vmatprep.subr.bf16.mxu1 %v6104_v2  ;;  %v6209_v1 = vld [vmem:[%s8440_s1 + $0x854] ss:$8 sps:$4 sm:$0xff]   ;;  %v6270_v2 = vld [vmem:[%s6866_s21 + $0x26c] ss:$100 sps:$4 sm:$0xff]  }
  0xa5   : > { %3779 = vmatprep.subr.bf16.mxu0 %v6107_v3  ;;  %v6275_v3 = vld [vmem:[%s6866_s21 + $0x294] ss:$100 sps:$4 sm:$0xff]  }
  0xa7   : > { %3415 = vmatpush1.bf16.msra.mxu1 %v6102_v4  ;;  %v6204_v4 = vld [vmem:[%s8440_s1 + $0x350] ss:$8 sps:$4 sm:$0xff]  }
  0xa8   : > { %3780 = vmatpush1.bf16.msra.mxu0 %v6105_v5  ;;  %3416 = vmatprep.subr.bf16.mxu1 %v6110_v6  ;;  %v6207_v5 = vld [vmem:[%s8440_s1 + $0x850] ss:$8 sps:$4 sm:$0xff]   ;;  %v6212_v6 = vld [vmem:[%s8440_s1 + $0x364] ss:$8 sps:$4 sm:$0xff]  }
  0xa9   : > { %3781 = vmatprep.subr.bf16.mxu0 %v6113_v7  ;;  %v6215_v7 = vld [vmem:[%s8440_s1 + $0x864] ss:$8 sps:$4 sm:$0xff]  }
  0xab   : > { %3417 = vmatpush1.bf16.msra.mxu1 %v6108_v8  ;;  %v6210_v8 = vld [vmem:[%s8440_s1 + $0x360] ss:$8 sps:$4 sm:$0xff]  }
  0xac   : > { %3782 = vmatpush1.bf16.msra.mxu0 %v6111_v9  ;;  %3418 = vmatprep.subr.bf16.mxu1 %v6118_v10  ;;  %v6213_v9 = vld [vmem:[%s8440_s1 + $0x860] ss:$8 sps:$4 sm:$0xff]  }
  0xad   : > { %3783 = vmatprep.subr.bf16.mxu0 %v6123_v11  ;;  %v6280_v10 = vld [vmem:[%s6866_s21 + $0x268] ss:$100 sps:$4 sm:$0xff]   ;;  %v6281_v11 = vld [vmem:[%s6866_s21 + $0x290] ss:$100 sps:$4 sm:$0xff]  }
  0xaf   : > { %3419 = vmatpush1.bf16.msra.mxu1 %v6116_v12  ;;  %v6218_v12 = vld [vmem:[%s8440_s1 + $0x374] ss:$8 sps:$4 sm:$0xff]  }
  0xb0   : > { %3784 = vmatpush1.bf16.msra.mxu0 %v6121_v13  ;;  %3420 = vmatprep.subr.bf16.mxu1 %v6128_v14  ;;  %v6221_v13 = vld [vmem:[%s8440_s1 + $0x874] ss:$8 sps:$4 sm:$0xff]  }
  0xb1   : > { %3785 = vmatprep.subr.bf16.mxu0 %v6131_v15  ;;  %v6290_v14 = vld [vmem:[%s6866_s21 + $0x1c] ss:$100 sps:$4 sm:$0xff]   ;;  %v6296_v15 = vld [vmem:[%s6866_s21 + $0x44] ss:$100 sps:$4 sm:$0xff]  }
  0xb3   : > { %3421 = vmatpush1.bf16.msra.mxu1 %v6126_v16  ;;  %v6216_v16 = vld [vmem:[%s8440_s1 + $0x370] ss:$8 sps:$4 sm:$0xff]  }
  0xb4   : > { %3786 = vmatpush1.bf16.msra.mxu0 %v6129_v17  ;;  %3422 = vmatprep.subr.bf16.mxu1 %v6136_v18  ;;  %v6219_v17 = vld [vmem:[%s8440_s1 + $0x870] ss:$8 sps:$4 sm:$0xff]   ;;  %v6224_v18 = vld [vmem:[%s8440_s1 + $0x384] ss:$8 sps:$4 sm:$0xff]  }
  0xb5   : > { %3787 = vmatprep.subr.bf16.mxu0 %v6141_v19  ;;  %v6227_v19 = vld [vmem:[%s8440_s1 + $0x884] ss:$8 sps:$4 sm:$0xff]  }
  0xb7   : > { %3423 = vmatpush1.bf16.msra.mxu1 %v6134_v20  ;;  %v6222_v20 = vld [vmem:[%s8440_s1 + $0x380] ss:$8 sps:$4 sm:$0xff]  }
  0xb8   : > { %3788 = vmatpush1.bf16.msra.mxu0 %v6139_v21  ;;  %3424 = vmatprep.subr.bf16.mxu1 %v6146_v22  ;;  %v6225_v21 = vld [vmem:[%s8440_s1 + $0x880] ss:$8 sps:$4 sm:$0xff]   ;;  %v6230_v22 = vld [vmem:[%s8440_s1 + $0x394] ss:$8 sps:$4 sm:$0xff]  }
  0xb9   : > { %3789 = vmatprep.subr.bf16.mxu0 %v6149_v23  ;;  %v6233_v23 = vld [vmem:[%s8440_s1 + $0x894] ss:$8 sps:$4 sm:$0xff]  }
  0xbb   : > { %3425 = vmatpush1.bf16.msra.mxu1 %v6144_v24  ;;  %v6228_v24 = vld [vmem:[%s8440_s1 + $0x390] ss:$8 sps:$4 sm:$0xff]  }
  0xbc   : > { %3790 = vmatpush1.bf16.msra.mxu0 %v6147_v25  ;;  %3426 = vmatprep.subr.bf16.mxu1 %v6154_v26  ;;  %v6231_v25 = vld [vmem:[%s8440_s1 + $0x890] ss:$8 sps:$4 sm:$0xff]   ;;  %v6238_v26 = vld [vmem:[%s8440_s1 + $0x3a4] ss:$8 sps:$4 sm:$0xff]  }
  0xbd   : > { %3791 = vmatprep.subr.bf16.mxu0 %v6159_v27  ;;  %v6243_v27 = vld [vmem:[%s8440_s1 + $0x8a4] ss:$8 sps:$4 sm:$0xff]  }
  0xbf   : > { %3427 = vmatpush1.bf16.msra.mxu1 %v6152_v28  ;;  %v6236_v28 = vld [vmem:[%s8440_s1 + $0x3a0] ss:$8 sps:$4 sm:$0xff]  }
  0xc0   : > { %3792 = vmatpush1.bf16.msra.mxu0 %v6157_v29  ;;  %3428 = vmatprep.subr.bf16.mxu1 %v6164_v30  ;;  %v6241_v29 = vld [vmem:[%s8440_s1 + $0x8a0] ss:$8 sps:$4 sm:$0xff]   ;;  %v6248_v30 = vld [vmem:[%s8440_s1 + $0x3b4] ss:$8 sps:$4 sm:$0xff]  }
  0xc1   : > { %3793 = vmatprep.subr.bf16.mxu0 %v6167_v31  ;;  %v6251_v31 = vld [vmem:[%s8440_s1 + $0x8b4] ss:$8 sps:$4 sm:$0xff]  }
  0xc3   : > { %3429 = vmatpush1.bf16.msra.mxu1 %v6162_v32  ;;  %v6246_v32 = vld [vmem:[%s8440_s1 + $0x3b0] ss:$8 sps:$4 sm:$0xff]  }
  0xc4   : > { %3794 = vmatpush1.bf16.msra.mxu0 %v6165_v33  ;;  %3471 = vmatprep.subr.bf16.mxu1 %v6173_v34  ;;  %v6249_v33 = vld [vmem:[%s8440_s1 + $0x8b0] ss:$8 sps:$4 sm:$0xff]   ;;  %v6256_v34 = vld [vmem:[%s8440_s1 + $0x3c4] ss:$8 sps:$4 sm:$0xff]  }
  0xc5   : > { %3836 = vmatprep.subr.bf16.mxu0 %v6179_v35  ;;  %v6261_v35 = vld [vmem:[%s8440_s1 + $0x8c4] ss:$8 sps:$4 sm:$0xff]  }
  0xc6   : > { %3431 = vmatmul.mubr.bf16.vlgmr.msra.gmra.mrb[0].mxu1 %v6168_v36  ;;  %v6254_v36 = vld [vmem:[%s8440_s1 + $0x3c0] ss:$8 sps:$4 sm:$0xff]  }
  0xc7   : > { %3796 = vmatmul.mubr.bf16.vlgmr.msra.gmra.mrb[0].mxu0 %v6174_v38  ;;  %3472 = vmatpush1.bf16.msra.mxu1 %v6171_v37  ;;  %v6259_v37 = vld [vmem:[%s8440_s1 + $0x8c0] ss:$8 sps:$4 sm:$0xff]   ;;  %v6266_v38 = vld [vmem:[%s8440_s1 + $0x3d4] ss:$8 sps:$4 sm:$0xff]  }
  0xc8   : > { %3837 = vmatpush1.bf16.msra.mxu0 %v6177_v39  ;;  %3473 = vmatprep.subr.bf16.mxu1 %v6182_v40  ;;  %v6269_v39 = vld [vmem:[%s8440_s1 + $0x8d4] ss:$8 sps:$4 sm:$0xff]   ;;  %v6264_v40 = vld [vmem:[%s8440_s1 + $0x3d0] ss:$8 sps:$4 sm:$0xff]  }
  0xc9   : > { %3838 = vmatprep.subr.bf16.mxu0 %v6185_v41  ;;  %3440 = vmatprep.mubr.bf16.mxu1 %v6234_v42  ;;  %v6267_v41 = vld [vmem:[%s8440_s1 + $0x8d0] ss:$8 sps:$4 sm:$0xff]   ;;  %v6274_v42 = vld [vmem:[%s8440_s1 + $0x3e4] ss:$8 sps:$4 sm:$0xff]  }
  0xca   : > { %3805 = vmatprep.mubr.bf16.mxu0 %v6239_v43  ;;  %v6279_v43 = vld [vmem:[%s8440_s1 + $0x8e4] ss:$8 sps:$4 sm:$0xff]  }
  0xcb   : > { %3474 = vmatpush1.bf16.msra.mxu1 %v6180_v44  ;;  %v6272_v44 = vld [vmem:[%s8440_s1 + $0x3e0] ss:$8 sps:$4 sm:$0xff]  }
  0xcc   : > { %3839 = vmatpush1.bf16.msra.mxu0 %v6183_v45  ;;  %3475 = vmatprep.subr.bf16.mxu1 %v6188_v46  ;;  %v6277_v45 = vld [vmem:[%s8440_s1 + $0x8e0] ss:$8 sps:$4 sm:$0xff]   ;;  %v6284_v46 = vld [vmem:[%s8440_s1 + $0x3f4] ss:$8 sps:$4 sm:$0xff]  }
  0xcd   : > { %3840 = vmatprep.subr.bf16.mxu0 %v6191_v47  ;;  %v6287_v47 = vld [vmem:[%s8440_s1 + $0x8f4] ss:$8 sps:$4 sm:$0xff]  }
  0xce   : > { %3441 = vmatmul.mubr.bf16.gmra.mrb[4].mxu1 %v6244_v50  ;;  %v6293_v50 = vld [vmem:[%s8440_s1 + $0x404] ss:$8 sps:$4 sm:$0xff]  }
  0xcf   : > { %3806 = vmatmul.mubr.bf16.gmra.mrb[4].mxu0 %v6245_v51  ;;  %3476 = vmatpush1.bf16.msra.mxu1 %v6186_v48  ;;  %v6282_v48 = vld [vmem:[%s8440_s1 + $0x3f0] ss:$8 sps:$4 sm:$0xff]   ;;  %v6299_v51 = vld [vmem:[%s8440_s1 + $0x904] ss:$8 sps:$4 sm:$0xff]  }
  0xd0   : > { %3841 = vmatpush1.bf16.msra.mxu0 %v6189_v49  ;;  %3477 = vmatprep.subr.bf16.mxu1 %v6194_v52  ;;  %v6285_v49 = vld [vmem:[%s8440_s1 + $0x8f0] ss:$8 sps:$4 sm:$0xff]  }
  0xd1   : > { %3842 = vmatprep.subr.bf16.mxu0 %v6197_v53  ;;  %3450 = vmatprep.mubr.bf16.mxu1 %v6252_v54  ;;  %v6288_v52 = vld [vmem:[%s6866_s21 + $0x18] ss:$100 sps:$4 sm:$0xff]   ;;  %v6291_v53 = vld [vmem:[%s8440_s1 + $0x400] ss:$8 sps:$4 sm:$0xff]  }
  0xd2   : > { %3815 = vmatprep.mubr.bf16.mxu0 %v6257_v55  ;;  %v6294_v54 = vld [vmem:[%s6866_s21 + $0x40] ss:$100 sps:$4 sm:$0xff]  }
  0xd3   : > { %3478 = vmatpush1.bf16.msra.mxu1 %v6192_v56  ;;  %v6297_v55 = vld [vmem:[%s8440_s1 + $0x900] ss:$8 sps:$4 sm:$0xff]   ;;  %v6302_v56 = vld [vmem:[%s8440_s1 + $0x414] ss:$8 sps:$4 sm:$0xff]  }
  0xd4   : > { %3843 = vmatpush1.bf16.msra.mxu0 %v6195_v57  ;;  %3479 = vmatprep.subr.bf16.mxu1 %v6200_v58  ;;  %v6305_v57 = vld [vmem:[%s8440_s1 + $0x914] ss:$8 sps:$4 sm:$0xff]   ;;  %v6354_v58 = vld [vmem:[%s6866_s21 + $0xe4] ss:$100 sps:$4 sm:$0xff]  }
  0xd5   : > { %3844 = vmatprep.subr.bf16.mxu0 %v6203_v59  ;;  %v6360_v59 = vld [vmem:[%s6866_s21 + $0x10c] ss:$100 sps:$4 sm:$0xff]  }
  0xd6   : > { %3451 = vmatmul.mubr.bf16.gmra.mrb[8].mxu1 %v6262_v62  ;;  %v6308_v62 = vld [vmem:[%s8440_s1 + $0x424] ss:$8 sps:$4 sm:$0xff]  }
  0xd7   : > { %3816 = vmatmul.mubr.bf16.gmra.mrb[8].mxu0 %v6263_v63  ;;  %3480 = vmatpush1.bf16.msra.mxu1 %v6198_v60  ;;  %v6300_v60 = vld [vmem:[%s8440_s1 + $0x410] ss:$8 sps:$4 sm:$0xff]   ;;  %v6311_v63 = vld [vmem:[%s8440_s1 + $0x924] ss:$8 sps:$4 sm:$0xff]  }
  0xd8   : > { %3845 = vmatpush1.bf16.msra.mxu0 %v6201_v61  ;;  %3481 = vmatprep.subr.bf16.mxu1 %v6206_v0  ;;  %v6303_v61 = vld [vmem:[%s8440_s1 + $0x910] ss:$8 sps:$4 sm:$0xff]   ;;  %v6306_v0 = vld [vmem:[%s8440_s1 + $0x420] ss:$8 sps:$4 sm:$0xff]  }
  0xd9   : > { %3846 = vmatprep.subr.bf16.mxu0 %v6209_v1  ;;  %3460 = vmatprep.mubr.bf16.mxu1 %v6270_v2  ;;  %v6309_v1 = vld [vmem:[%s8440_s1 + $0x920] ss:$8 sps:$4 sm:$0xff]  }
  0xda   : > { %3825 = vmatprep.mubr.bf16.mxu0 %v6275_v3  ;;  %v6356_v2 = vld [vmem:[%s6866_s21 + $0xe0] ss:$100 sps:$4 sm:$0xff]   ;;  %v6365_v3 = vld [vmem:[%s6866_s21 + $0x108] ss:$100 sps:$4 sm:$0xff]  }
  0xdb   : > { %3482 = vmatpush1.bf16.msra.mxu1 %v6204_v4  ;;  %v6314_v4 = vld [vmem:[%s8440_s1 + $0x434] ss:$8 sps:$4 sm:$0xff]  }
  0xdc   : > { %3847 = vmatpush1.bf16.msra.mxu0 %v6207_v5  ;;  %3483 = vmatprep.subr.bf16.mxu1 %v6212_v6  ;;  %v6317_v5 = vld [vmem:[%s8440_s1 + $0x934] ss:$8 sps:$4 sm:$0xff]   ;;  %v6372_v6 = vld [vmem:[%s6866_s21 + $0x1ac] ss:$100 sps:$4 sm:$0xff]  }
  0xdd   : > { %3848 = vmatprep.subr.bf16.mxu0 %v6215_v7  ;;  %v6378_v7 = vld [vmem:[%s6866_s21 + $0x1d4] ss:$100 sps:$4 sm:$0xff]  }
  0xde   : > { %3461 = vmatmul.mubr.bf16.gmra.mrb[12].mxu1 %v6280_v10  ;;  %v6320_v10 = vld [vmem:[%s8440_s1 + $0x444] ss:$8 sps:$4 sm:$0xff]  }
  0xdf   : > { %3826 = vmatmul.mubr.bf16.gmra.mrb[12].mxu0 %v6281_v11  ;;  %3484 = vmatpush1.bf16.msra.mxu1 %v6210_v8  ;;  %v6312_v8 = vld [vmem:[%s8440_s1 + $0x430] ss:$8 sps:$4 sm:$0xff]   ;;  %v6323_v11 = vld [vmem:[%s8440_s1 + $0x944] ss:$8 sps:$4 sm:$0xff]  }
  0xe0   : > { %3849 = vmatpush1.bf16.msra.mxu0 %v6213_v9  ;;  %3485 = vmatprep.subr.bf16.mxu1 %v6218_v12  ;;  %v6315_v9 = vld [vmem:[%s8440_s1 + $0x930] ss:$8 sps:$4 sm:$0xff]   ;;  %v6318_v12 = vld [vmem:[%s8440_s1 + $0x440] ss:$8 sps:$4 sm:$0xff]  }
  0xe1   : > { %3850 = vmatprep.subr.bf16.mxu0 %v6221_v13  ;;  %3503 = vmatprep.mubr.bf16.mxu1 %v6290_v14  ;;  %v6321_v13 = vld [vmem:[%s8440_s1 + $0x940] ss:$8 sps:$4 sm:$0xff]  }
  0xe2   : > { %3868 = vmatprep.mubr.bf16.mxu0 %v6296_v15  ;;  %v6374_v14 = vld [vmem:[%s6866_s21 + $0x1a8] ss:$100 sps:$4 sm:$0xff]   ;;  %v6383_v15 = vld [vmem:[%s6866_s21 + $0x1d0] ss:$100 sps:$4 sm:$0xff]  }
  0xe3   : > { %3486 = vmatpush1.bf16.msra.mxu1 %v6216_v16  ;;  %v6326_v16 = vld [vmem:[%s8440_s1 + $0x454] ss:$8 sps:$4 sm:$0xff]  }
  0xe4   : > { %3851 = vmatpush1.bf16.msra.mxu0 %v6219_v17  ;;  %3487 = vmatprep.subr.bf16.mxu1 %v6224_v18  ;;  %v6329_v17 = vld [vmem:[%s8440_s1 + $0x954] ss:$8 sps:$4 sm:$0xff]  }
  0xe5   : > { %3852 = vmatprep.subr.bf16.mxu0 %v6227_v19  ;;  %v6390_v18 = vld [vmem:[%s6866_s21 + $0x274] ss:$100 sps:$4 sm:$0xff]   ;;  %v6396_v19 = vld [vmem:[%s6866_s21 + $0x29c] ss:$100 sps:$4 sm:$0xff]  }
  0xe7   : > { %3488 = vmatpush1.bf16.msra.mxu1 %v6222_v20  ;;  %v6324_v20 = vld [vmem:[%s8440_s1 + $0x450] ss:$8 sps:$4 sm:$0xff]  }
  0xe8   : > { %3853 = vmatpush1.bf16.msra.mxu0 %v6225_v21  ;;  %3489 = vmatprep.subr.bf16.mxu1 %v6230_v22  ;;  %v6327_v21 = vld [vmem:[%s8440_s1 + $0x950] ss:$8 sps:$4 sm:$0xff]   ;;  %v6332_v22 = vld [vmem:[%s8440_s1 + $0x464] ss:$8 sps:$4 sm:$0xff]  }
  0xe9   : > { %3854 = vmatprep.subr.bf16.mxu0 %v6233_v23  ;;  %v6335_v23 = vld [vmem:[%s8440_s1 + $0x964] ss:$8 sps:$4 sm:$0xff]  }
  0xeb   : > { %3490 = vmatpush1.bf16.msra.mxu1 %v6228_v24  ;;  %v6330_v24 = vld [vmem:[%s8440_s1 + $0x460] ss:$8 sps:$4 sm:$0xff]  }
  0xec   : > { %3855 = vmatpush1.bf16.msra.mxu0 %v6231_v25  ;;  %3491 = vmatprep.subr.bf16.mxu1 %v6238_v26  ;;  %v6333_v25 = vld [vmem:[%s8440_s1 + $0x960] ss:$8 sps:$4 sm:$0xff]   ;;  %v6392_v26 = vld [vmem:[%s6866_s21 + $0x270] ss:$100 sps:$4 sm:$0xff]  }
  0xed   : > { %3856 = vmatprep.subr.bf16.mxu0 %v6243_v27  ;;  %v6401_v27 = vld [vmem:[%s6866_s21 + $0x298] ss:$100 sps:$4 sm:$0xff]  }
  0xef   : > { %3492 = vmatpush1.bf16.msra.mxu1 %v6236_v28  ;;  %v6338_v28 = vld [vmem:[%s8440_s1 + $0x474] ss:$8 sps:$4 sm:$0xff]  }
  0xf0   : > { %3857 = vmatpush1.bf16.msra.mxu0 %v6241_v29  ;;  %3493 = vmatprep.subr.bf16.mxu1 %v6248_v30  ;;  %v6341_v29 = vld [vmem:[%s8440_s1 + $0x974] ss:$8 sps:$4 sm:$0xff]   ;;  %v6410_v30 = vld [vmem:[%s6866_s21 + $0x24] ss:$100 sps:$4 sm:$0xff]  }
  0xf1   : > { %3858 = vmatprep.subr.bf16.mxu0 %v6251_v31  ;;  %v6413_v31 = vld [vmem:[%s6866_s21 + $0x4c] ss:$100 sps:$4 sm:$0xff]  }
  0xf3   : > { %3494 = vmatpush1.bf16.msra.mxu1 %v6246_v32  ;;  %v6336_v32 = vld [vmem:[%s8440_s1 + $0x470] ss:$8 sps:$4 sm:$0xff]  }
  0xf4   : > { %3859 = vmatpush1.bf16.msra.mxu0 %v6249_v33  ;;  %3495 = vmatprep.subr.bf16.mxu1 %v6256_v34  ;;  %v6339_v33 = vld [vmem:[%s8440_s1 + $0x970] ss:$8 sps:$4 sm:$0xff]   ;;  %v6344_v34 = vld [vmem:[%s8440_s1 + $0x484] ss:$8 sps:$4 sm:$0xff]  }
  0xf5   : > { %3860 = vmatprep.subr.bf16.mxu0 %v6261_v35  ;;  %v6347_v35 = vld [vmem:[%s8440_s1 + $0x984] ss:$8 sps:$4 sm:$0xff]  }
  0xf7   : > { %3496 = vmatpush1.bf16.msra.mxu1 %v6254_v36  ;;  %v6342_v36 = vld [vmem:[%s8440_s1 + $0x480] ss:$8 sps:$4 sm:$0xff]  }
  0xf8   : > { %3861 = vmatpush1.bf16.msra.mxu0 %v6259_v37  ;;  %3497 = vmatprep.subr.bf16.mxu1 %v6266_v38  ;;  %v6345_v37 = vld [vmem:[%s8440_s1 + $0x980] ss:$8 sps:$4 sm:$0xff]   ;;  %v6350_v38 = vld [vmem:[%s8440_s1 + $0x494] ss:$8 sps:$4 sm:$0xff]  }
  0xf9   : > { %3862 = vmatprep.subr.bf16.mxu0 %v6269_v39  ;;  %v6353_v39 = vld [vmem:[%s8440_s1 + $0x994] ss:$8 sps:$4 sm:$0xff]  }
  0xfb   : > { %3498 = vmatpush1.bf16.msra.mxu1 %v6264_v40  ;;  %v6348_v40 = vld [vmem:[%s8440_s1 + $0x490] ss:$8 sps:$4 sm:$0xff]  }
  0xfc   : > { %3863 = vmatpush1.bf16.msra.mxu0 %v6267_v41  ;;  %3499 = vmatprep.subr.bf16.mxu1 %v6274_v42  ;;  %v6351_v41 = vld [vmem:[%s8440_s1 + $0x990] ss:$8 sps:$4 sm:$0xff]   ;;  %v6359_v42 = vld [vmem:[%s8440_s1 + $0x4a4] ss:$8 sps:$4 sm:$0xff]  }
  0xfd   : > { %3864 = vmatprep.subr.bf16.mxu0 %v6279_v43  ;;  %v6364_v43 = vld [vmem:[%s8440_s1 + $0x9a4] ss:$8 sps:$4 sm:$0xff]  }
  0xff   : > { %3500 = vmatpush1.bf16.msra.mxu1 %v6272_v44  ;;  %v6357_v44 = vld [vmem:[%s8440_s1 + $0x4a0] ss:$8 sps:$4 sm:$0xff]  }
 0x100   : > { %3865 = vmatpush1.bf16.msra.mxu0 %v6277_v45  ;;  %3501 = vmatprep.subr.bf16.mxu1 %v6284_v46  ;;  %v6362_v45 = vld [vmem:[%s8440_s1 + $0x9a0] ss:$8 sps:$4 sm:$0xff]   ;;  %v6368_v46 = vld [vmem:[%s8440_s1 + $0x4b4] ss:$8 sps:$4 sm:$0xff]  }
 0x101   : > { %3866 = vmatprep.subr.bf16.mxu0 %v6287_v47  ;;  %v6371_v47 = vld [vmem:[%s8440_s1 + $0x9b4] ss:$8 sps:$4 sm:$0xff]  }
 0x103   : > { %3502 = vmatpush1.bf16.msra.mxu1 %v6282_v48  ;;  %v6366_v48 = vld [vmem:[%s8440_s1 + $0x4b0] ss:$8 sps:$4 sm:$0xff]  }
 0x104   : > { %3867 = vmatpush1.bf16.msra.mxu0 %v6285_v49  ;;  %3544 = vmatprep.subr.bf16.mxu1 %v6293_v50  ;;  %v6369_v49 = vld [vmem:[%s8440_s1 + $0x9b0] ss:$8 sps:$4 sm:$0xff]   ;;  %v6377_v50 = vld [vmem:[%s8440_s1 + $0x4c4] ss:$8 sps:$4 sm:$0xff]  }
 0x105   : > { %3909 = vmatprep.subr.bf16.mxu0 %v6299_v51  ;;  %v6382_v51 = vld [vmem:[%s8440_s1 + $0x9c4] ss:$8 sps:$4 sm:$0xff]  }
 0x106   : > { %3504 = vmatmul.mubr.bf16.vlgmr.msra.gmra.mrb[0].mxu1 %v6288_v52  ;;  %v6375_v52 = vld [vmem:[%s8440_s1 + $0x4c0] ss:$8 sps:$4 sm:$0xff]  }
 0x107   : > { %3869 = vmatmul.mubr.bf16.vlgmr.msra.gmra.mrb[0].mxu0 %v6294_v54  ;;  %3545 = vmatpush1.bf16.msra.mxu1 %v6291_v53  ;;  %v6380_v53 = vld [vmem:[%s8440_s1 + $0x9c0] ss:$8 sps:$4 sm:$0xff]   ;;  %v6386_v54 = vld [vmem:[%s8440_s1 + $0x4d4] ss:$8 sps:$4 sm:$0xff]  }
 0x108   : > { %3910 = vmatpush1.bf16.msra.mxu0 %v6297_v55  ;;  %3546 = vmatprep.subr.bf16.mxu1 %v6302_v56  ;;  %v6389_v55 = vld [vmem:[%s8440_s1 + $0x9d4] ss:$8 sps:$4 sm:$0xff]   ;;  %v6384_v56 = vld [vmem:[%s8440_s1 + $0x4d0] ss:$8 sps:$4 sm:$0xff]  }
 0x109   : > { %3911 = vmatprep.subr.bf16.mxu0 %v6305_v57  ;;  %3513 = vmatprep.mubr.bf16.mxu1 %v6354_v58  ;;  %v6387_v57 = vld [vmem:[%s8440_s1 + $0x9d0] ss:$8 sps:$4 sm:$0xff]   ;;  %v6395_v58 = vld [vmem:[%s8440_s1 + $0x4e4] ss:$8 sps:$4 sm:$0xff]  }
 0x10a   : > { %3878 = vmatprep.mubr.bf16.mxu0 %v6360_v59  ;;  %v6400_v59 = vld [vmem:[%s8440_s1 + $0x9e4] ss:$8 sps:$4 sm:$0xff]  }
 0x10b   : > { %3547 = vmatpush1.bf16.msra.mxu1 %v6300_v60  ;;  %v6393_v60 = vld [vmem:[%s8440_s1 + $0x4e0] ss:$8 sps:$4 sm:$0xff]  }
 0x10c   : > { %3912 = vmatpush1.bf16.msra.mxu0 %v6303_v61  ;;  %3548 = vmatprep.subr.bf16.mxu1 %v6308_v62  ;;  %v6398_v61 = vld [vmem:[%s8440_s1 + $0x9e0] ss:$8 sps:$4 sm:$0xff]   ;;  %v6404_v62 = vld [vmem:[%s8440_s1 + $0x4f4] ss:$8 sps:$4 sm:$0xff]  }
 0x10d   : > { %3913 = vmatprep.subr.bf16.mxu0 %v6311_v63  ;;  %v6407_v63 = vld [vmem:[%s8440_s1 + $0x9f4] ss:$8 sps:$4 sm:$0xff]  }
 0x10e   : > { %3514 = vmatmul.mubr.bf16.gmra.mrb[4].mxu1 %v6356_v2  ;;  %v6416_v2 = vld [vmem:[%s8440_s1 + $0xa04] ss:$8 sps:$4 sm:$0xff]  }
 0x10f   : > { %3879 = vmatmul.mubr.bf16.gmra.mrb[4].mxu0 %v6365_v3  ;;  %3549 = vmatpush1.bf16.msra.mxu1 %v6306_v0  ;;  %v6402_v0 = vld [vmem:[%s8440_s1 + $0x4f0] ss:$8 sps:$4 sm:$0xff]   ;;  %v6408_v3 = vld [vmem:[%s6866_s21 + $0x20] ss:$100 sps:$4 sm:$0xff]  }
 0x110   : > { %3914 = vmatpush1.bf16.msra.mxu0 %v6309_v1  ;;  %3550 = vmatprep.subr.bf16.mxu1 %v6314_v4  ;;  %v6405_v1 = vld [vmem:[%s8440_s1 + $0x9f0] ss:$8 sps:$4 sm:$0xff]   ;;  %v6411_v4 = vld [vmem:[%s6866_s21 + $0x48] ss:$100 sps:$4 sm:$0xff]  }
 0x111   : > { %3915 = vmatprep.subr.bf16.mxu0 %v6317_v5  ;;  %3523 = vmatprep.mubr.bf16.mxu1 %v6372_v6  ;;  %v6414_v5 = vld [vmem:[%s8440_s1 + $0xa00] ss:$8 sps:$4 sm:$0xff]   ;;  %v6419_v6 = vld [vmem:[%s8440_s1 + $0xa14] ss:$8 sps:$4 sm:$0xff]  }
 0x112   : > { %3888 = vmatprep.mubr.bf16.mxu0 %v6378_v7  ;;  %v6420_v7 = vld [vmem:[%s6866_s21 + $0xec] ss:$100 sps:$4 sm:$0xff]  }
 0x113   : > { %3551 = vmatpush1.bf16.msra.mxu1 %v6312_v8  ;;  %v6453_v8 = vld [vmem:[%s6866_s21 + $0x114] ss:$100 sps:$4 sm:$0xff]  }
 0x114   : > { %3916 = vmatpush1.bf16.msra.mxu0 %v6315_v9  ;;  %3552 = vmatprep.subr.bf16.mxu1 %v6320_v10  ;;  %v6417_v9 = vld [vmem:[%s8440_s1 + $0xa10] ss:$8 sps:$4 sm:$0xff]   ;;  %v6425_v10 = vld [vmem:[%s8440_s1 + $0xa24] ss:$8 sps:$4 sm:$0xff]  }
 0x115   : > { %3917 = vmatprep.subr.bf16.mxu0 %v6323_v11  ;;  %v6422_v11 = vld [vmem:[%s6866_s21 + $0xe8] ss:$100 sps:$4 sm:$0xff]  }
 0x116   : > { %3524 = vmatmul.mubr.bf16.gmra.mrb[8].mxu1 %v6374_v14  ;;  %v6428_v14 = vld [vmem:[%s8440_s1 + $0xa34] ss:$8 sps:$4 sm:$0xff]  }
 0x117   : > { %3889 = vmatmul.mubr.bf16.gmra.mrb[8].mxu0 %v6383_v15  ;;  %3553 = vmatpush1.bf16.msra.mxu1 %v6318_v12  ;;  %v6458_v12 = vld [vmem:[%s6866_s21 + $0x110] ss:$100 sps:$4 sm:$0xff]  }
 0x118   : > { %3918 = vmatpush1.bf16.msra.mxu0 %v6321_v13  ;;  %3554 = vmatprep.subr.bf16.mxu1 %v6326_v16  ;;  %v6423_v13 = vld [vmem:[%s8440_s1 + $0xa20] ss:$8 sps:$4 sm:$0xff]   ;;  %v6429_v15 = vld [vmem:[%s6866_s21 + $0x1b4] ss:$100 sps:$4 sm:$0xff]  }
 0x119   : > { %3919 = vmatprep.subr.bf16.mxu0 %v6329_v17  ;;  %3533 = vmatprep.mubr.bf16.mxu1 %v6390_v18  ;;  %v6462_v16 = vld [vmem:[%s6866_s21 + $0x1dc] ss:$100 sps:$4 sm:$0xff]   ;;  %v6426_v17 = vld [vmem:[%s8440_s1 + $0xa30] ss:$8 sps:$4 sm:$0xff]   ;;  %v6434_v18 = vld [vmem:[%s8440_s1 + $0xa44] ss:$8 sps:$4 sm:$0xff]  }
 0x11a   : > { %3898 = vmatprep.mubr.bf16.mxu0 %v6396_v19  ;;  %v6431_v19 = vld [vmem:[%s6866_s21 + $0x1b0] ss:$100 sps:$4 sm:$0xff]  }
 0x11b   : > { %3555 = vmatpush1.bf16.msra.mxu1 %v6324_v20  ;;  %v6467_v20 = vld [vmem:[%s6866_s21 + $0x1d8] ss:$100 sps:$4 sm:$0xff]  }
 0x11c   : > { %3920 = vmatpush1.bf16.msra.mxu0 %v6327_v21  ;;  %3556 = vmatprep.subr.bf16.mxu1 %v6332_v22  ;;  %v6432_v21 = vld [vmem:[%s8440_s1 + $0xa40] ss:$8 sps:$4 sm:$0xff]   ;;  %v6437_v22 = vld [vmem:[%s8440_s1 + $0xa54] ss:$8 sps:$4 sm:$0xff]  }
 0x11d   : > { %3921 = vmatprep.subr.bf16.mxu0 %v6335_v23  ;;  %v6438_v23 = vld [vmem:[%s6866_s21 + $0x27c] ss:$100 sps:$4 sm:$0xff]  }
 0x11e   : > { %3534 = vmatmul.mubr.bf16.gmra.mrb[12].mxu1 %v6392_v26  ;;  %v6443_v26 = vld [vmem:[%s8440_s1 + $0xa64] ss:$8 sps:$4 sm:$0xff]  }
 0x11f   : > { %3899 = vmatmul.mubr.bf16.gmra.mrb[12].mxu0 %v6401_v27  ;;  %3557 = vmatpush1.bf16.msra.mxu1 %v6330_v24  ;;  %v6471_v24 = vld [vmem:[%s6866_s21 + $0x2a4] ss:$100 sps:$4 sm:$0xff]   ;;  %v6440_v27 = vld [vmem:[%s6866_s21 + $0x278] ss:$100 sps:$4 sm:$0xff]  }
 0x120   : > { %3922 = vmatpush1.bf16.msra.mxu0 %v6333_v25  ;;  %3558 = vmatprep.subr.bf16.mxu1 %v6338_v28  ;;  %v6435_v25 = vld [vmem:[%s8440_s1 + $0xa50] ss:$8 sps:$4 sm:$0xff]   ;;  %v6476_v28 = vld [vmem:[%s6866_s21 + $0x2a0] ss:$100 sps:$4 sm:$0xff]  }
 0x121   : > { %3923 = vmatprep.subr.bf16.mxu0 %v6341_v29  ;;  %3576 = vmatprep.mubr.bf16.mxu1 %v6410_v30  ;;  %v6441_v29 = vld [vmem:[%s8440_s1 + $0xa60] ss:$8 sps:$4 sm:$0xff]   ;;  %v6482_v30 = vld [vmem:[%s6866_s21 + $0x54] ss:$100 sps:$4 sm:$0xff]  }
 0x122   : > { %3941 = vmatprep.mubr.bf16.mxu0 %v6413_v31  ;;  %v6446_v31 = vld [vmem:[%s8440_s1 + $0xa74] ss:$8 sps:$4 sm:$0xff]  }
 0x123   : > { %3559 = vmatpush1.bf16.msra.mxu1 %v6336_v32  ;;  %v6444_v32 = vld [vmem:[%s8440_s1 + $0xa70] ss:$8 sps:$4 sm:$0xff]  }
 0x124   : > { %3924 = vmatpush1.bf16.msra.mxu0 %v6339_v33  ;;  %3560 = vmatprep.subr.bf16.mxu1 %v6344_v34  ;;  %v6449_v33 = vld [vmem:[%s8440_s1 + $0xa84] ss:$8 sps:$4 sm:$0xff]   ;;  %v6447_v34 = vld [vmem:[%s8440_s1 + $0xa80] ss:$8 sps:$4 sm:$0xff]  }
 0x125   : > { %3925 = vmatprep.subr.bf16.mxu0 %v6347_v35  ;;  %v6452_v35 = vld [vmem:[%s8440_s1 + $0xa94] ss:$8 sps:$4 sm:$0xff]  }
 0x127   : > { %3561 = vmatpush1.bf16.msra.mxu1 %v6342_v36  ;;  %v6450_v36 = vld [vmem:[%s8440_s1 + $0xa90] ss:$8 sps:$4 sm:$0xff]  }
 0x128   : > { %3926 = vmatpush1.bf16.msra.mxu0 %v6345_v37  ;;  %3562 = vmatprep.subr.bf16.mxu1 %v6350_v38  ;;  %v6457_v37 = vld [vmem:[%s8440_s1 + $0xaa4] ss:$8 sps:$4 sm:$0xff]   ;;  %v6455_v38 = vld [vmem:[%s8440_s1 + $0xaa0] ss:$8 sps:$4 sm:$0xff]  }
 0x129   : > { %3927 = vmatprep.subr.bf16.mxu0 %v6353_v39  ;;  %v6461_v39 = vld [vmem:[%s8440_s1 + $0xab4] ss:$8 sps:$4 sm:$0xff]  }
 0x12b   : > { %3563 = vmatpush1.bf16.msra.mxu1 %v6348_v40  ;;  %v6459_v40 = vld [vmem:[%s8440_s1 + $0xab0] ss:$8 sps:$4 sm:$0xff]  }
 0x12c   : > { %3928 = vmatpush1.bf16.msra.mxu0 %v6351_v41  ;;  %3564 = vmatprep.subr.bf16.mxu1 %v6359_v42  ;;  %v6466_v41 = vld [vmem:[%s8440_s1 + $0xac4] ss:$8 sps:$4 sm:$0xff]   ;;  %v6464_v42 = vld [vmem:[%s8440_s1 + $0xac0] ss:$8 sps:$4 sm:$0xff]  }
 0x12d   : > { %3929 = vmatprep.subr.bf16.mxu0 %v6364_v43  ;;  %v6470_v43 = vld [vmem:[%s8440_s1 + $0xad4] ss:$8 sps:$4 sm:$0xff]  }
 0x12f   : > { %3565 = vmatpush1.bf16.msra.mxu1 %v6357_v44  ;;  %v6468_v44 = vld [vmem:[%s8440_s1 + $0xad0] ss:$8 sps:$4 sm:$0xff]  }
 0x130   : > { %3930 = vmatpush1.bf16.msra.mxu0 %v6362_v45  ;;  %3566 = vmatprep.subr.bf16.mxu1 %v6368_v46  ;;  %v6475_v45 = vld [vmem:[%s8440_s1 + $0xae4] ss:$8 sps:$4 sm:$0xff]   ;;  %v6473_v46 = vld [vmem:[%s8440_s1 + $0xae0] ss:$8 sps:$4 sm:$0xff]  }
 0x131   : > { %3931 = vmatprep.subr.bf16.mxu0 %v6371_v47  ;;  %v6479_v47 = vld [vmem:[%s8440_s1 + $0xaf4] ss:$8 sps:$4 sm:$0xff]  }
 0x133   : > { %3567 = vmatpush1.bf16.msra.mxu1 %v6366_v48  ;;  %v6477_v48 = vld [vmem:[%s8440_s1 + $0xaf0] ss:$8 sps:$4 sm:$0xff]  }
 0x134   : > { %3932 = vmatpush1.bf16.msra.mxu0 %v6369_v49  ;;  %3568 = vmatprep.subr.bf16.mxu1 %v6377_v50  ;;  %v6485_v49 = vld [vmem:[%s8440_s1 + $0xb04] ss:$8 sps:$4 sm:$0xff]   ;;  %v6480_v50 = vld [vmem:[%s6866_s21 + $0x50] ss:$100 sps:$4 sm:$0xff]  }
 0x135   : > { %3933 = vmatprep.subr.bf16.mxu0 %v6382_v51  ;;  %v6483_v51 = vld [vmem:[%s8440_s1 + $0xb00] ss:$8 sps:$4 sm:$0xff]  }
 0x137   : > { %3569 = vmatpush1.bf16.msra.mxu1 %v6375_v52  ;;  %v6513_v52 = vld [vmem:[%s6866_s21 + $0x11c] ss:$100 sps:$4 sm:$0xff]  }
 0x138   : > { %3934 = vmatpush1.bf16.msra.mxu0 %v6380_v53  ;;  %3570 = vmatprep.subr.bf16.mxu1 %v6386_v54  ;;  %v6488_v53 = vld [vmem:[%s8440_s1 + $0xb14] ss:$8 sps:$4 sm:$0xff]   ;;  %v6486_v54 = vld [vmem:[%s8440_s1 + $0xb10] ss:$8 sps:$4 sm:$0xff]  }
 0x139   : > { %3935 = vmatprep.subr.bf16.mxu0 %v6389_v55  ;;  %v6491_v55 = vld [vmem:[%s8440_s1 + $0xb24] ss:$8 sps:$4 sm:$0xff]  }
 0x13b   : > { %3571 = vmatpush1.bf16.msra.mxu1 %v6384_v56  ;;  %v6515_v56 = vld [vmem:[%s6866_s21 + $0x118] ss:$100 sps:$4 sm:$0xff]  }
 0x13c   : > { %3936 = vmatpush1.bf16.msra.mxu0 %v6387_v57  ;;  %3572 = vmatprep.subr.bf16.mxu1 %v6395_v58  ;;  %v6489_v57 = vld [vmem:[%s8440_s1 + $0xb20] ss:$8 sps:$4 sm:$0xff]  }
 0x13d   : > { %3937 = vmatprep.subr.bf16.mxu0 %v6400_v59  ;;  %v6522_v58 = vld [vmem:[%s6866_s21 + $0x1e4] ss:$100 sps:$4 sm:$0xff]   ;;  %v6494_v59 = vld [vmem:[%s8440_s1 + $0xb34] ss:$8 sps:$4 sm:$0xff]  }
 0x13f   : > { %3573 = vmatpush1.bf16.msra.mxu1 %v6393_v60  ;;  %v6492_v60 = vld [vmem:[%s8440_s1 + $0xb30] ss:$8 sps:$4 sm:$0xff]  }
 0x140   : > { %3938 = vmatpush1.bf16.msra.mxu0 %v6398_v61  ;;  %3574 = vmatprep.subr.bf16.mxu1 %v6404_v62  ;;  %v6497_v61 = vld [vmem:[%s8440_s1 + $0xb44] ss:$8 sps:$4 sm:$0xff]  }
 0x141   : > { %3939 = vmatprep.subr.bf16.mxu0 %v6407_v63  ;;  %v6524_v62 = vld [vmem:[%s6866_s21 + $0x1e0] ss:$100 sps:$4 sm:$0xff]  }
 0x142   : > { %v6495_v63 = vld [vmem:[%s8440_s1 + $0xb40] ss:$8 sps:$4 sm:$0xff]  }
 0x143   : > { %3575 = vmatpush1.bf16.msra.mxu1 %v6402_v0  ;;  %v6531_v0 = vld [vmem:[%s6866_s21 + $0x2ac] ss:$100 sps:$4 sm:$0xff]  }
 0x144   : > { %3940 = vmatpush1.bf16.msra.mxu0 %v6405_v1  ;;  %v6500_v1 = vld [vmem:[%s8440_s1 + $0xb54] ss:$8 sps:$4 sm:$0xff]  }
 0x145   : > { %3982 = vmatprep.subr.bf16.mxu0 %v6416_v2  ;;  %v6498_v2 = vld [vmem:[%s8440_s1 + $0xb50] ss:$8 sps:$4 sm:$0xff]  }
 0x146   : > { %3577 = vmatmul.mubr.bf16.vlgmr.msra.gmra.mrb[0].mxu1 %v6408_v3  ;;  %v6503_v3 = vld [vmem:[%s8440_s1 + $0xb64] ss:$8 sps:$4 sm:$0xff]  }
 0x147   : > { %3942 = vmatmul.mubr.bf16.vlgmr.msra.gmra.mrb[0].mxu0 %v6411_v4  ;;  %3586 = vmatprep.mubr.bf16.mxu1 %v6420_v7  ;;  %v6533_v4 = vld [vmem:[%s6866_s21 + $0x2a8] ss:$100 sps:$4 sm:$0xff]   ;;  %v6506_v7 = vld [vmem:[%s8440_s1 + $0xb74] ss:$8 sps:$4 sm:$0xff]  }
 0x148   : > { %3983 = vmatpush1.bf16.msra.mxu0 %v6414_v5  ;;  %3951 = vmatprep.mubr.bf16.mxu0 %v6453_v8  ;;  %v6501_v5 = vld [vmem:[%s8440_s1 + $0xb60] ss:$8 sps:$4 sm:$0xff]   ;;  %v6504_v8 = vld [vmem:[%s8440_s1 + $0xb70] ss:$8 sps:$4 sm:$0xff]  }
 0x149   : > { %3984 = vmatprep.subr.bf16.mxu0 %v6419_v6  ;;  %v6542_v6 = vld [vmem:[%s6866_s21 + $0x5c] ss:$100 sps:$4 sm:$0xff]  }
 0x14c   : > { %3985 = vmatpush1.bf16.msra.mxu0 %v6417_v9  ;;  %v6509_v9 = vld [vmem:[%s8440_s1 + $0xb84] ss:$8 sps:$4 sm:$0xff]  }
 0x14d   : > { %3986 = vmatprep.subr.bf16.mxu0 %v6425_v10  ;;  %v6507_v10 = vld [vmem:[%s8440_s1 + $0xb80] ss:$8 sps:$4 sm:$0xff]  }
 0x14e   : > { %3587 = vmatmul.mubr.bf16.gmra.mrb[4].mxu1 %v6422_v11  ;;  %v6512_v11 = vld [vmem:[%s8440_s1 + $0xb94] ss:$8 sps:$4 sm:$0xff]  }
 0x14f   : > { %3952 = vmatmul.mubr.bf16.gmra.mrb[4].mxu0 %v6458_v12  ;;  %3596 = vmatprep.mubr.bf16.mxu1 %v6429_v15  ;;  %v6510_v12 = vld [vmem:[%s8440_s1 + $0xb90] ss:$8 sps:$4 sm:$0xff]   ;;  %v6521_v15 = vld [vmem:[%s8440_s1 + $0xbb4] ss:$8 sps:$4 sm:$0xff]  }
 0x150   : > { %3987 = vmatpush1.bf16.msra.mxu0 %v6423_v13  ;;  %3961 = vmatprep.mubr.bf16.mxu0 %v6462_v16  ;;  %v6518_v13 = vld [vmem:[%s8440_s1 + $0xba4] ss:$8 sps:$4 sm:$0xff]   ;;  %v6519_v16 = vld [vmem:[%s8440_s1 + $0xbb0] ss:$8 sps:$4 sm:$0xff]  }
 0x151   : > { %3988 = vmatprep.subr.bf16.mxu0 %v6428_v14  ;;  %v6516_v14 = vld [vmem:[%s8440_s1 + $0xba0] ss:$8 sps:$4 sm:$0xff]  }
 0x154   : > { %3989 = vmatpush1.bf16.msra.mxu0 %v6426_v17  ;;  %v6527_v17 = vld [vmem:[%s8440_s1 + $0xbc4] ss:$8 sps:$4 sm:$0xff]  }
 0x155   : > { %3990 = vmatprep.subr.bf16.mxu0 %v6434_v18  ;;  %v6525_v18 = vld [vmem:[%s8440_s1 + $0xbc0] ss:$8 sps:$4 sm:$0xff]  }
 0x156   : > { %3597 = vmatmul.mubr.bf16.gmra.mrb[8].mxu1 %v6431_v19  ;;  %v6530_v19 = vld [vmem:[%s8440_s1 + $0xbd4] ss:$8 sps:$4 sm:$0xff]  }
 0x157   : > { %3962 = vmatmul.mubr.bf16.gmra.mrb[8].mxu0 %v6467_v20  ;;  %3606 = vmatprep.mubr.bf16.mxu1 %v6438_v23  ;;  %v6580_v20 = vld [vmem:[%s8441_s2] ss:$8 sps:$4 sm:$0xff]   ;;  %v6528_v23 = vld [vmem:[%s8440_s1 + $0xbd0] ss:$8 sps:$4 sm:$0xff]  }
 0x158   : > { %3991 = vmatpush1.bf16.msra.mxu0 %v6432_v21  ;;  %3971 = vmatprep.mubr.bf16.mxu0 %v6471_v24  ;;  %v6582_v21 = vld [vmem:[%s8441_s2 + $0x4] ss:$8 sps:$4 sm:$0xff]  }
 0x159   : > { %3992 = vmatprep.subr.bf16.mxu0 %v6437_v22  ;;  %v6585_v22 = vld [vmem:[%s8441_s2 + $0x14] ss:$8 sps:$4 sm:$0xff]   ;;  %4425 = vmatprep.subr.bf16.mxu1 %v6582_v21  ;;  %v6536_v24 = vld [vmem:[%s8440_s1 + $0xbe4] ss:$8 sps:$4 sm:$0xff]  }
 0x15a   : > { %4426 = vmatpush1.bf16.msra.mxu1 %v6580_v20 }
 0x15b   : > { %4427 = vmatprep.subr.bf16.mxu1 %v6585_v22 }
 0x15c   : > { %3993 = vmatpush1.bf16.msra.mxu0 %v6435_v25  ;;  %v6583_v25 = vld [vmem:[%s8441_s2 + $0x10] ss:$8 sps:$4 sm:$0xff]  }
 0x15d   : > { %3994 = vmatprep.subr.bf16.mxu0 %v6443_v26  ;;  %v6588_v26 = vld [vmem:[%s8441_s2 + $0x24] ss:$8 sps:$4 sm:$0xff]  }
 0x15e   : > { %3607 = vmatmul.mubr.bf16.gmra.mrb[12].mxu1 %v6440_v27  ;;  %v6534_v27 = vld [vmem:[%s8440_s1 + $0xbe0] ss:$8 sps:$4 sm:$0xff]  }
 0x15f   : > { %3972 = vmatmul.mubr.bf16.gmra.mrb[12].mxu0 %v6476_v28  ;;  %v6539_v28 = vld [vmem:[%s8440_s1 + $0xbf4] ss:$8 sps:$4 sm:$0xff]   ;;  %4428 = vmatpush1.bf16.msra.mxu1 %v6583_v25 }
 0x160   : > { %3995 = vmatpush1.bf16.msra.mxu0 %v6441_v29  ;;  %4014 = vmatprep.mubr.bf16.mxu0 %v6482_v30  ;;  %v6586_v29 = vld [vmem:[%s8441_s2 + $0x20] ss:$8 sps:$4 sm:$0xff]   ;;  %v6591_v30 = vld [vmem:[%s8441_s2 + $0x34] ss:$8 sps:$4 sm:$0xff]  }
 0x161   : > { %3996 = vmatprep.subr.bf16.mxu0 %v6446_v31  ;;  %4429 = vmatprep.subr.bf16.mxu1 %v6588_v26  ;;  %v6537_v31 = vld [vmem:[%s8440_s1 + $0xbf0] ss:$8 sps:$4 sm:$0xff]  }
 0x163   : > { %4430 = vmatpush1.bf16.msra.mxu1 %v6586_v29 }
 0x164   : > { %3997 = vmatpush1.bf16.msra.mxu0 %v6444_v32  ;;  %v6545_v32 = vld [vmem:[%s8440_s1 + $0xc04] ss:$8 sps:$4 sm:$0xff]   ;;  %4431 = vmatprep.subr.bf16.mxu1 %v6591_v30 }
 0x165   : > { %3998 = vmatprep.subr.bf16.mxu0 %v6449_v33  ;;  %v6589_v33 = vld [vmem:[%s8441_s2 + $0x30] ss:$8 sps:$4 sm:$0xff]  }
 0x167   : > { %4432 = vmatpush1.bf16.msra.mxu1 %v6589_v33  ;;  %v6624_v33 = vld [vmem:[%s8441_s2 + $0xe4] ss:$8 sps:$4 sm:$0xff]  }
 0x168   : > { %3999 = vmatpush1.bf16.msra.mxu0 %v6447_v34  ;;  %v6594_v34 = vld [vmem:[%s8441_s2 + $0x44] ss:$8 sps:$4 sm:$0xff]  }
 0x169   : > { %4000 = vmatprep.subr.bf16.mxu0 %v6452_v35  ;;  %v6540_v35 = vld [vmem:[%s6866_s21 + $0x58] ss:$100 sps:$4 sm:$0xff]   ;;  %4433 = vmatprep.subr.bf16.mxu1 %v6594_v34  ;;  %v6622_v34 = vld [vmem:[%s8441_s2 + $0xe0] ss:$8 sps:$4 sm:$0xff]  }
 0x16c   : > { %4001 = vmatpush1.bf16.msra.mxu0 %v6450_v36  ;;  %v6543_v36 = vld [vmem:[%s8440_s1 + $0xc00] ss:$8 sps:$4 sm:$0xff]  }
 0x16d   : > { %4002 = vmatprep.subr.bf16.mxu0 %v6457_v37  ;;  %v6549_v37 = vld [vmem:[%s6866_s21 + $0x124] ss:$100 sps:$4 sm:$0xff]  }
 0x170   : > { %4003 = vmatpush1.bf16.msra.mxu0 %v6455_v38  ;;  %v6548_v38 = vld [vmem:[%s8440_s1 + $0xc14] ss:$8 sps:$4 sm:$0xff]  }
 0x171   : > { %4004 = vmatprep.subr.bf16.mxu0 %v6461_v39  ;;  %v6592_v39 = vld [vmem:[%s8441_s2 + $0x40] ss:$8 sps:$4 sm:$0xff]  }
 0x172   : > { %4434 = vmatpush1.bf16.msra.mxu1 %v6592_v39 }
 0x174   : > { %4005 = vmatpush1.bf16.msra.mxu0 %v6459_v40  ;;  %v6597_v40 = vld [vmem:[%s8441_s2 + $0x54] ss:$8 sps:$4 sm:$0xff]  }
 0x175   : > { %4006 = vmatprep.subr.bf16.mxu0 %v6466_v41  ;;  %v6546_v41 = vld [vmem:[%s8440_s1 + $0xc10] ss:$8 sps:$4 sm:$0xff]   ;;  %4435 = vmatprep.subr.bf16.mxu1 %v6597_v40 }
 0x178   : > { %4007 = vmatpush1.bf16.msra.mxu0 %v6464_v42  ;;  %v6554_v42 = vld [vmem:[%s8440_s1 + $0xc24] ss:$8 sps:$4 sm:$0xff]  }
 0x179   : > { %4008 = vmatprep.subr.bf16.mxu0 %v6470_v43  ;;  %v6595_v43 = vld [vmem:[%s8441_s2 + $0x50] ss:$8 sps:$4 sm:$0xff]  }
 0x17a   : > { %4436 = vmatpush1.bf16.msra.mxu1 %v6595_v43 }
 0x17c   : > { %4009 = vmatpush1.bf16.msra.mxu0 %v6468_v44  ;;  %v6600_v44 = vld [vmem:[%s8441_s2 + $0x64] ss:$8 sps:$4 sm:$0xff]  }
 0x17d   : > { %4010 = vmatprep.subr.bf16.mxu0 %v6475_v45  ;;  %v6551_v45 = vld [vmem:[%s6866_s21 + $0x120] ss:$100 sps:$4 sm:$0xff]   ;;  %4437 = vmatprep.subr.bf16.mxu1 %v6600_v44 }
 0x180   : > { %4011 = vmatpush1.bf16.msra.mxu0 %v6473_v46  ;;  %v6552_v46 = vld [vmem:[%s8440_s1 + $0xc20] ss:$8 sps:$4 sm:$0xff]  }
 0x181   : > { %4012 = vmatprep.subr.bf16.mxu0 %v6479_v47  ;;  %v6558_v47 = vld [vmem:[%s6866_s21 + $0x1ec] ss:$100 sps:$4 sm:$0xff]  }
 0x184   : > { %4013 = vmatpush1.bf16.msra.mxu0 %v6477_v48  ;;  %v6557_v48 = vld [vmem:[%s8440_s1 + $0xc34] ss:$8 sps:$4 sm:$0xff]  }
 0x185   : > { %4055 = vmatprep.subr.bf16.mxu0 %v6485_v49  ;;  %v6598_v49 = vld [vmem:[%s8441_s2 + $0x60] ss:$8 sps:$4 sm:$0xff]  }
 0x186   : > { %4438 = vmatpush1.bf16.msra.mxu1 %v6598_v49 }
 0x187   : > { %4015 = vmatmul.mubr.bf16.vlgmr.msra.gmra.mrb[0].mxu0 %v6480_v50  ;;  %v6603_v50 = vld [vmem:[%s8441_s2 + $0x74] ss:$8 sps:$4 sm:$0xff]  }
 0x188   : > { %4056 = vmatpush1.bf16.msra.mxu0 %v6483_v51  ;;  %4024 = vmatprep.mubr.bf16.mxu0 %v6513_v52  ;;  %v6555_v51 = vld [vmem:[%s8440_s1 + $0xc30] ss:$8 sps:$4 sm:$0xff]   ;;  %v6563_v52 = vld [vmem:[%s8440_s1 + $0xc44] ss:$8 sps:$4 sm:$0xff]  }
 0x189   : > { %4057 = vmatprep.subr.bf16.mxu0 %v6488_v53  ;;  %v6601_v53 = vld [vmem:[%s8441_s2 + $0x70] ss:$8 sps:$4 sm:$0xff]   ;;  %4439 = vmatprep.subr.bf16.mxu1 %v6603_v50 }
 0x18a   : > { %4440 = vmatpush1.bf16.msra.mxu1 %v6601_v53 }
 0x18c   : > { %4058 = vmatpush1.bf16.msra.mxu0 %v6486_v54  ;;  %v6606_v54 = vld [vmem:[%s8441_s2 + $0x84] ss:$8 sps:$4 sm:$0xff]  }
 0x18d   : > { %4059 = vmatprep.subr.bf16.mxu0 %v6491_v55  ;;  %v6560_v55 = vld [vmem:[%s6866_s21 + $0x1e8] ss:$100 sps:$4 sm:$0xff]   ;;  %4441 = vmatprep.subr.bf16.mxu1 %v6606_v54 }
 0x18f   : > { %4025 = vmatmul.mubr.bf16.gmra.mrb[4].mxu0 %v6515_v56  ;;  %v6561_v56 = vld [vmem:[%s8440_s1 + $0xc40] ss:$8 sps:$4 sm:$0xff]  }
 0x190   : > { %4060 = vmatpush1.bf16.msra.mxu0 %v6489_v57  ;;  %4034 = vmatprep.mubr.bf16.mxu0 %v6522_v58  ;;  %v6567_v57 = vld [vmem:[%s6866_s21 + $0x2b4] ss:$100 sps:$4 sm:$0xff]  }
 0x191   : > { %4061 = vmatprep.subr.bf16.mxu0 %v6494_v59  ;;  %v6566_v58 = vld [vmem:[%s8440_s1 + $0xc54] ss:$8 sps:$4 sm:$0xff]   ;;  %v6604_v59 = vld [vmem:[%s8441_s2 + $0x80] ss:$8 sps:$4 sm:$0xff]  }
 0x192   : > { %4442 = vmatpush1.bf16.msra.mxu1 %v6604_v59 }
 0x194   : > { %4062 = vmatpush1.bf16.msra.mxu0 %v6492_v60  ;;  %v6609_v60 = vld [vmem:[%s8441_s2 + $0x94] ss:$8 sps:$4 sm:$0xff]  }
 0x195   : > { %4063 = vmatprep.subr.bf16.mxu0 %v6497_v61  ;;  %v6564_v61 = vld [vmem:[%s8440_s1 + $0xc50] ss:$8 sps:$4 sm:$0xff]   ;;  %4443 = vmatprep.subr.bf16.mxu1 %v6609_v60 }
 0x197   : > { %4035 = vmatmul.mubr.bf16.gmra.mrb[8].mxu0 %v6524_v62  ;;  %v6572_v62 = vld [vmem:[%s8440_s1 + $0xc64] ss:$8 sps:$4 sm:$0xff]  }
 0x198   : > { %4064 = vmatpush1.bf16.msra.mxu0 %v6495_v63  ;;  %4044 = vmatprep.mubr.bf16.mxu0 %v6531_v0  ;;  %v6607_v63 = vld [vmem:[%s8441_s2 + $0x90] ss:$8 sps:$4 sm:$0xff]   ;;  %v6612_v0 = vld [vmem:[%s8441_s2 + $0xa4] ss:$8 sps:$4 sm:$0xff]  }
 0x199   : > { %4065 = vmatprep.subr.bf16.mxu0 %v6500_v1  ;;  %v6569_v1 = vld [vmem:[%s6866_s21 + $0x2b0] ss:$100 sps:$4 sm:$0xff]   ;;  %4444 = vmatpush1.bf16.msra.mxu1 %v6607_v63 }
 0x19a   : > { %4445 = vmatprep.subr.bf16.mxu1 %v6612_v0 }
 0x19c   : > { %4066 = vmatpush1.bf16.msra.mxu0 %v6498_v2  ;;  %v6570_v2 = vld [vmem:[%s8440_s1 + $0xc60] ss:$8 sps:$4 sm:$0xff]  }
 0x19d   : > { %4067 = vmatprep.subr.bf16.mxu0 %v6503_v3  ;;  %v6575_v3 = vld [vmem:[%s8440_s1 + $0xc74] ss:$8 sps:$4 sm:$0xff]  }
 0x19f   : > { %4045 = vmatmul.mubr.bf16.gmra.mrb[12].mxu0 %v6533_v4  ;;  %v6610_v4 = vld [vmem:[%s8441_s2 + $0xa0] ss:$8 sps:$4 sm:$0xff]  }
 0x1a0   : > { %4068 = vmatpush1.bf16.msra.mxu0 %v6501_v5  ;;  %4087 = vmatprep.mubr.bf16.mxu0 %v6542_v6  ;;  %v6615_v5 = vld [vmem:[%s8441_s2 + $0xb4] ss:$8 sps:$4 sm:$0xff]   ;;  %v6573_v6 = vld [vmem:[%s8440_s1 + $0xc70] ss:$8 sps:$4 sm:$0xff]  }
 0x1a1   : > { %4069 = vmatprep.subr.bf16.mxu0 %v6506_v7  ;;  %v6684_v7 = vmov 0   ;;  %4446 = vmatpush1.bf16.msra.mxu1 %v6610_v4 }
 0x1a2   : > { %4447 = vmatprep.subr.bf16.mxu1 %v6615_v5 }
 0x1a4   : > { %4070 = vmatpush1.bf16.msra.mxu0 %v6504_v8  ;;  %v6613_v8 = vld [vmem:[%s8441_s2 + $0xb0] ss:$8 sps:$4 sm:$0xff]  }
 0x1a5   : > { %4071 = vmatprep.subr.bf16.mxu0 %v6509_v9  ;;  %v6618_v9 = vld [vmem:[%s8441_s2 + $0xc4] ss:$8 sps:$4 sm:$0xff]   ;;  %4448 = vmatpush1.bf16.msra.mxu1 %v6613_v8 }
 0x1a6   : > { %4449 = vmatprep.subr.bf16.mxu1 %v6618_v9 }
 0x1a8   : > { %4072 = vmatpush1.bf16.msra.mxu0 %v6507_v10  ;;  %v6576_v10 = vld [vmem:[%s6866_s21 + $0x60] ss:$100 sps:$4 sm:$0xff]  }
 0x1a9   : > { %4073 = vmatprep.subr.bf16.mxu0 %v6512_v11  ;;  %v6616_v11 = vld [vmem:[%s8441_s2 + $0xc0] ss:$8 sps:$4 sm:$0xff]  }
 0x1aa   : > { %4450 = vmatpush1.bf16.msra.mxu1 %v6616_v11 }
 0x1ac   : > { %4074 = vmatpush1.bf16.msra.mxu0 %v6510_v12  ;;  %v6621_v12 = vld [vmem:[%s8441_s2 + $0xd4] ss:$8 sps:$4 sm:$0xff]  }
 0x1ad   : > { %4075 = vmatprep.subr.bf16.mxu0 %v6518_v13  ;;  %v6619_v13 = vld [vmem:[%s8441_s2 + $0xd0] ss:$8 sps:$4 sm:$0xff]   ;;  %4451 = vmatprep.subr.bf16.mxu1 %v6621_v12 }
 0x1ae   : > { %4452 = vmatpush1.bf16.msra.mxu1 %v6619_v13  ;;  %v6631_v13 = vld [vmem:[%s8442_s3 + $0x10] ss:$8 sps:$4 sm:$0xff]  }
 0x1af   : > { %4453 = vmatprep.subr.bf16.mxu1 %v6624_v33 }
 0x1b0   : > { %4076 = vmatpush1.bf16.msra.mxu0 %v6516_v14  ;;  %v6577_v14 = vld [vmem:[%s6866_s21 + $0x128] ss:$100 sps:$4 sm:$0xff]  }
 0x1b1   : > { %4077 = vmatprep.subr.bf16.mxu0 %v6521_v15  ;;  %v6578_v15 = vld [vmem:[%s6866_s21 + $0x1f0] ss:$100 sps:$4 sm:$0xff]  }
 0x1b2   : > { %4454 = vmatpush1.bf16.msra.mxu1 %v6622_v34 }
 0x1b4   : > { %4078 = vmatpush1.bf16.msra.mxu0 %v6519_v16  ;;  %v6579_v16 = vld [vmem:[%s6866_s21 + $0x2b8] ss:$100 sps:$4 sm:$0xff]  }
 0x1b5   : > { %4079 = vmatprep.subr.bf16.mxu0 %v6527_v17 }
 0x1b8   : > { %4080 = vmatpush1.bf16.msra.mxu0 %v6525_v18 }
 0x1b9   : > { %4081 = vmatprep.subr.bf16.mxu0 %v6530_v19 }
 0x1bc   : > { %4082 = vmatpush1.bf16.msra.mxu0 %v6528_v23 }
 0x1bd   : > { %4083 = vmatprep.subr.bf16.mxu0 %v6536_v24 }
 0x1c0   : > { %4084 = vmatpush1.bf16.msra.mxu0 %v6534_v27 }
 0x1c1   : > { %4085 = vmatprep.subr.bf16.mxu0 %v6539_v28 }
 0x1c4   : > { %4086 = vmatpush1.bf16.msra.mxu0 %v6537_v31 }
 0x1c5   : > { %4128 = vmatprep.subr.bf16.mxu0 %v6545_v32 }
 0x1c7   : > { %4088 = vmatmul.mubr.bf16.vlgmr.msra.gmra.mrb[0].mxu0 %v6540_v35  ;;  %v6627_v35 = vld [vmem:[%s8441_s2 + $0xf4] ss:$8 sps:$4 sm:$0xff]  }
 0x1c8   : > { %4129 = vmatpush1.bf16.msra.mxu0 %v6543_v36  ;;  %4097 = vmatprep.mubr.bf16.mxu0 %v6549_v37  ;;  %v6625_v36 = vld [vmem:[%s8441_s2 + $0xf0] ss:$8 sps:$4 sm:$0xff]   ;;  %v6630_v37 = vld [vmem:[%s8442_s3 + $0x4] ss:$8 sps:$4 sm:$0xff]  }
 0x1c9   : > { %4130 = vmatprep.subr.bf16.mxu0 %v6548_v38  ;;  %4455 = vmatprep.subr.bf16.mxu1 %v6627_v35  ;;  %v740_v38 = vlaneseq }
 0x1ca   : > { %4456 = vmatpush1.bf16.msra.mxu1 %v6625_v36 }
 0x1cb   : > { %4770 = vmatprep.subr.bf16.mxu1 %v6630_v37  ;;  %v8148_v39 = vshrl.u32 %v740_v38, 7 }
 0x1cc   : > { %4131 = vmatpush1.bf16.msra.mxu0 %v6546_v41  ;;  %v8154_v41 = vld [vmem:[%s8443_s4] sm:$0xff] }
 0x1cd   : > { %4132 = vmatprep.subr.bf16.mxu0 %v6554_v42  ;;  %v742_v40 = vsub.s32 0, %v8148_v39  ;;  %v8159_v42 = vld [vmem:[%s8443_s4 + $0x8] sm:$0xff] }
 0x1cf   : > { %4098 = vmatmul.mubr.bf16.gmra.mrb[4].mxu0 %v6551_v45  ;;  %v8162_v43 = vrot.slane %v8154_v41, %v742_v40  ;;  %v8165_v44 = vrot.slane %v8159_v42, %v742_v40 }
 0x1d0   : > { %4133 = vmatpush1.bf16.msra.mxu0 %v6552_v46  ;;  %4107 = vmatprep.mubr.bf16.mxu0 %v6558_v47 }
 0x1d1   : > { %4134 = vmatprep.subr.bf16.mxu0 %v6557_v48 }
 0x1d4   : > { %4135 = vmatpush1.bf16.msra.mxu0 %v6555_v51 }
 0x1d5   : > { %4136 = vmatprep.subr.bf16.mxu0 %v6563_v52 }
 0x1d7   : > { %4108 = vmatmul.mubr.bf16.gmra.mrb[8].mxu0 %v6560_v55 }
 0x1d8   : > { %4137 = vmatpush1.bf16.msra.mxu0 %v6561_v56  ;;  %4117 = vmatprep.mubr.bf16.mxu0 %v6567_v57 }
 0x1d9   : > { %4138 = vmatprep.subr.bf16.mxu0 %v6566_v58 }
 0x1dc   : > { %4139 = vmatpush1.bf16.msra.mxu0 %v6564_v61 }
 0x1dd   : > { %4140 = vmatprep.subr.bf16.mxu0 %v6572_v62 }
 0x1df   : > { %4118 = vmatmul.mubr.bf16.gmra.mrb[12].mxu0 %v6569_v1 }
 0x1e0   : > { %4141 = vmatpush1.bf16.msra.mxu0 %v6570_v2  ;;  %4160 = vmatprep.mubr.bf16.mxu0 %v6684_v7  ;;  %v6628_v2 = vld [vmem:[%s8442_s3] ss:$8 sps:$4 sm:$0xff]  }
 0x1e1   : > { %4142 = vmatprep.subr.bf16.mxu0 %v6575_v3 }
 0x1e4   : > { %4143 = vmatpush1.bf16.msra.mxu0 %v6573_v6  ;;  %v6633_v6 = vld [vmem:[%s8442_s3 + $0x14] ss:$8 sps:$4 sm:$0xff]  }
 0x1e7   : > { %4161 = vmatmul.mubr.bf16.vlgmr.msra.gmra.mrb[0].mxu0 %v6576_v10 }
 0x1e8   : > { %4170 = vmatprep.mubr.bf16.mxu0 %v6684_v7 }
 0x1ef   : > { %4171 = vmatmul.mubr.bf16.gmra.mrb[4].mxu0 %v6577_v14 }
 0x1f0   : > { %4180 = vmatprep.mubr.bf16.mxu0 %v6684_v7 }
 0x1f7   : > { %4181 = vmatmul.mubr.bf16.gmra.mrb[8].mxu0 %v6578_v15 }
 0x1f8   : > { %4190 = vmatprep.mubr.bf16.mxu0 %v6684_v7 }
 0x1ff   : > { %4191 = vmatmul.mubr.bf16.gmra.mrb[12].mxu0 %v6579_v16  ;;  %v6636_v16 = vld [vmem:[%s8442_s3 + $0x24] ss:$8 sps:$4 sm:$0xff]  }
 0x219   : > { %v3578_v17 = vpop.f32.mrb[0].mxu1 }
 0x21a   : > { %v3580_v18 = vpop.f32.mrb[1].mxu1  ;;  %v5614_v45 = vadd.f32 %v3578_v17, %v8162_v43 }
 0x21b   : > { %v3582_v19 = vpop.f32.mrb[2].mxu1  ;;  %v5616_v46 = vadd.f32 %v3580_v18, %v8165_v44 }
 0x21c   : > { %v3584_v20 = vpop.f32.mrb[3].mxu1  ;;  %v5618_v48 = vadd.f32 %v3582_v19, %v8162_v43 }
 0x21d   : > { %v5620_v51 = vadd.f32 %v3584_v20, %v8165_v44 }
 0x221   : > { %v3588_v21 = vpop.f32.mrb[4].mxu1 }
 0x222   : > { %v3590_v22 = vpop.f32.mrb[5].mxu1  ;;  %v5622_v61 = vadd.f32 %v3588_v21, %v8162_v43 }
 0x223   : > { %v3592_v23 = vpop.f32.mrb[6].mxu1  ;;  %v5624_v63 = vadd.f32 %v3590_v22, %v8165_v44 }
 0x224   : > { %v3594_v24 = vpop.f32.mrb[7].mxu1  ;;  %v5626_v3 = vadd.f32 %v3592_v23, %v8162_v43 }
 0x225   : > { %v5628_v7 = vadd.f32 %v3594_v24, %v8165_v44  ;;  %v6634_v24 = vld [vmem:[%s8442_s3 + $0x20] ss:$8 sps:$4 sm:$0xff]  }
 0x229   : > { %v8117_v25 = vpop.f32.mrb[8].mxu1 }
 0x22a   : > { %v8119_v26 = vpop.f32.mrb[9].mxu1  ;;  %v5630_v19 = vadd.f32 %v8117_v25, %v8162_v43  ;;  %v6639_v25 = vld [vmem:[%s8442_s3 + $0x34] ss:$8 sps:$4 sm:$0xff]  }
 0x22b   : > { %v8121_v27 = vpop.f32.mrb[10].mxu1  ;;  %v5632_v21 = vadd.f32 %v8119_v26, %v8165_v44 }
 0x22c   : > { %v8123_v28 = vpop.f32.mrb[11].mxu1  ;;  %v5634_v33 = vadd.f32 %v8121_v27, %v8162_v43  ;;  %v6637_v27 = vld [vmem:[%s8442_s3 + $0x30] ss:$8 sps:$4 sm:$0xff]  }
 0x22d   : > { %v5636_v26 = vadd.f32 %v8123_v28, %v8165_v44 }
 0x231   : > { %v8125_v29 = vpop.f32.mrb[12].mxu1 }
 0x232   : > { %v8127_v30 = vpop.f32.mrb[13].mxu1 }
 0x233   : > { %v8129_v31 = vpop.f32.mrb[14].mxu1 }
 0x234   : > { %v8131_v32 = vpop.f32.mrb[15].mxu1 }
 0x2ba   : > { %v4162_v47 = vpop.f32.mrb[0].mxu0 }
 0x2bb   : > { %v5615_v49 = vadd.f32 %v5614_v45, %v4162_v47  ;;  %v4164_v50 = vpop.f32.mrb[1].mxu0 }
 0x2bc   : > { %v5617_v52 = vadd.f32 %v5616_v46, %v4164_v50  ;;  %v4166_v53 = vpop.f32.mrb[2].mxu0  ;;  %v5638_v50 = vadd.f32 %v8125_v29, %v8162_v43  ;;  %v6645_v29 = vld [vmem:[%s8442_s3 + $0x54] ss:$8 sps:$4 sm:$0xff]  }
 0x2bd   : > { %v5619_v54 = vadd.f32 %v5618_v48, %v4166_v53  ;;  %v4168_v55 = vpop.f32.mrb[3].mxu0  ;;  %v4201_v57 = vmax.f32 %v5615_v49, 0.0  ;;  %v6642_v48 = vld [vmem:[%s8442_s3 + $0x44] ss:$8 sps:$4 sm:$0xff]  }
 0x2be   : > { %v5621_v56 = vadd.f32 %v5620_v51, %v4168_v55  ;;  %v4202_v59 = vmax.f32 %v5617_v52, 0.0  ;;  %v5640_v52 = vadd.f32 %v8127_v30, %v8165_v44  ;;  %v6640_v55 = vld [vmem:[%s8442_s3 + $0x40] ss:$8 sps:$4 sm:$0xff]   ;;  %v5644_v30 = vadd.f32 %v8131_v32, %v8165_v44 }
 0x2bf   : > { %v4203_v58 = vmax.f32 %v5619_v54, 0.0 }
 0x2c0   : > { %v4204_v60 = vmax.f32 %v5621_v56, 0.0  ;;  %v5642_v56 = vadd.f32 %v8129_v31, %v8162_v43  ;;  %v6643_v31 = vld [vmem:[%s8442_s3 + $0x50] ss:$8 sps:$4 sm:$0xff]  }
 0x2c1   : > { %v4217_v62 = vpack.c.bf16 %v4203_v58, %v4201_v57 }
 0x2c2   : > { %v4218_v0 = vpack.c.bf16 %v4204_v60, %v4202_v59  ;;  %v4172_v1 = vpop.f32.mrb[4].mxu0 }
 0x2c3   : > { %v5623_v4 = vadd.f32 %v5622_v61, %v4172_v1  ;;  %v4174_v5 = vpop.f32.mrb[5].mxu0  ;;  %v6648_v1 = vld [vmem:[%s8442_s3 + $0x64] ss:$8 sps:$4 sm:$0xff]  }
 0x2c4   : > { %v5625_v8 = vadd.f32 %v5624_v63, %v4174_v5  ;;  %v4176_v9 = vpop.f32.mrb[6].mxu0  ;;  %4457 = vmatprep.mubr.bf16.mxu1 %v4218_v0  ;;  %v6651_v5 = vld [vmem:[%s8442_s3 + $0x74] ss:$8 sps:$4 sm:$0xff]  }
 0x2c5   : > { %v5627_v10 = vadd.f32 %v5626_v3, %v4176_v9  ;;  %v4178_v11 = vpop.f32.mrb[7].mxu0  ;;  %4458 = vmatmul.mubr.bf16.vlgmr.msra.gmra.mrb[16].mxu1 %v4217_v62  ;;  %v4205_v14 = vmax.f32 %v5623_v4, 0.0  ;;  %v6646_v4 = vld [vmem:[%s8442_s3 + $0x60] ss:$8 sps:$4 sm:$0xff]   ;;  %v6657_v9 = vld [vmem:[%s8442_s3 + $0x94] ss:$8 sps:$4 sm:$0xff]  }
 0x2c6   : > { %v5629_v12 = vadd.f32 %v5628_v7, %v4178_v11  ;;  %4771 = vmatpush1.bf16.msra.mxu1 %v6628_v2  ;;  %v4206_v17 = vmax.f32 %v5625_v8, 0.0  ;;  %v6654_v7 = vld [vmem:[%s8442_s3 + $0x84] ss:$8 sps:$4 sm:$0xff]   ;;  %v6652_v8 = vld [vmem:[%s8442_s3 + $0x80] ss:$8 sps:$4 sm:$0xff]  }
 0x2c7   : > { %v4207_v15 = vmax.f32 %v5627_v10, 0.0  ;;  %4772 = vmatprep.subr.bf16.mxu1 %v6633_v6  ;;  %v6649_v6 = vld [vmem:[%s8442_s3 + $0x70] ss:$8 sps:$4 sm:$0xff]   ;;  %v6660_v11 = vld [vmem:[%s8442_s3 + $0xa4] ss:$8 sps:$4 sm:$0xff]  }
 0x2c8   : > { %v4208_v18 = vmax.f32 %v5629_v12, 0.0  ;;  %v6655_v10 = vld [vmem:[%s8442_s3 + $0x90] ss:$8 sps:$4 sm:$0xff]   ;;  %v6658_v12 = vld [vmem:[%s8442_s3 + $0xa0] ss:$8 sps:$4 sm:$0xff]  }
 0x2c9   : > { %v4219_v20 = vpack.c.bf16 %v4207_v15, %v4205_v14  ;;  %v6661_v14 = vld [vmem:[%s8442_s3 + $0xb0] ss:$8 sps:$4 sm:$0xff]   ;;  %v6666_v15 = vld [vmem:[%s8442_s3 + $0xc4] ss:$8 sps:$4 sm:$0xff]  }
 0x2ca   : > { %v4220_v22 = vpack.c.bf16 %v4208_v18, %v4206_v17  ;;  %v4182_v23 = vpop.f32.mrb[8].mxu0  ;;  %4773 = vmatpush1.bf16.msra.mxu1 %v6631_v13  ;;  %v6663_v13 = vld [vmem:[%s8442_s3 + $0xb4] ss:$8 sps:$4 sm:$0xff]   ;;  %v6667_v18 = vld [vmem:[%s8442_s3 + $0xd0] ss:$8 sps:$4 sm:$0xff]  }
 0x2cb   : > { %v5631_v34 = vadd.f32 %v5630_v19, %v4182_v23  ;;  %v4184_v35 = vpop.f32.mrb[9].mxu0  ;;  %4774 = vmatprep.subr.bf16.mxu1 %v6636_v16  ;;  %v6664_v16 = vld [vmem:[%s8442_s3 + $0xc0] ss:$8 sps:$4 sm:$0xff]   ;;  %v6669_v17 = vld [vmem:[%s8442_s3 + $0xd4] ss:$8 sps:$4 sm:$0xff]   ;;  %v4259_v23 = vsub.s32 1, %v8148_v39 }
 0x2cc   : > { %v5633_v36 = vadd.f32 %v5632_v21, %v4184_v35  ;;  %v4186_v37 = vpop.f32.mrb[10].mxu0  ;;  %4467 = vmatprep.mubr.bf16.mxu1 %v4220_v22  ;;  %v6672_v19 = vld [vmem:[%s8442_s3 + $0xe4] ss:$8 sps:$4 sm:$0xff]   ;;  %v6675_v21 = vld [vmem:[%s8442_s3 + $0xf4] ss:$8 sps:$4 sm:$0xff]  }
 0x2cd   : > { %v5635_v38 = vadd.f32 %v5634_v33, %v4186_v37  ;;  %v4188_v40 = vpop.f32.mrb[11].mxu0  ;;  %4468 = vmatmul.mubr.bf16.gmra.mrb[20].mxu1 %v4219_v20  ;;  %v4209_v46 = vmax.f32 %v5631_v34, 0.0  ;;  %v6670_v20 = vld [vmem:[%s8442_s3 + $0xe0] ss:$8 sps:$4 sm:$0xff]   ;;  %v6673_v22 = vld [vmem:[%s8442_s3 + $0xf0] ss:$8 sps:$4 sm:$0xff]   ;;  %v8290_v34 = vrot.slane %v8159_v42, %v4259_v23 }
 0x2ce   : > { %v5637_v45 = vadd.f32 %v5636_v26, %v4188_v40  ;;  %4775 = vmatpush1.bf16.msra.mxu1 %v6634_v24  ;;  %v4210_v28 = vmax.f32 %v5633_v36, 0.0  ;;  %v8286_v24 = vrot.slane %v8154_v41, %v4259_v23  ;;  %v4516_v33 = vsub.s32 2, %v8148_v39 }
 0x2cf   : > { %v4211_v47 = vmax.f32 %v5635_v38, 0.0  ;;  %4776 = vmatprep.subr.bf16.mxu1 %v6639_v25  ;;  %v4540_v36 = vsub.s32 3, %v8148_v39 }
 0x2d0   : > { %v4212_v49 = vmax.f32 %v5637_v45, 0.0  ;;  %v8294_v26 = vrot.slane %v8154_v41, %v4516_v33  ;;  %v8299_v40 = vrot.slane %v8159_v42, %v4516_v33 }
 0x2d1   : > { %v4221_v51 = vpack.c.bf16 %v4211_v47, %v4209_v46 }
 0x2d2   : > { %v4222_v53 = vpack.c.bf16 %v4212_v49, %v4210_v28  ;;  %v4192_v54 = vpop.f32.mrb[12].mxu0  ;;  %4777 = vmatpush1.bf16.msra.mxu1 %v6637_v27 }
 0x2d3   : > { %v5639_v57 = vadd.f32 %v5638_v50, %v4192_v54  ;;  %v4194_v58 = vpop.f32.mrb[13].mxu0  ;;  %4778 = vmatprep.subr.bf16.mxu1 %v6642_v48  ;;  %v8305_v50 = vrot.slane %v8154_v41, %v4540_v36 }
 0x2d4   : > { %v5641_v59 = vadd.f32 %v5640_v52, %v4194_v58  ;;  %v4196_v60 = vpop.f32.mrb[14].mxu0  ;;  %4477 = vmatprep.mubr.bf16.mxu1 %v4222_v53  ;;  %v8309_v53 = vrot.slane %v8159_v42, %v4540_v36 }
 0x2d5   : > { %v5643_v61 = vadd.f32 %v5642_v56, %v4196_v60  ;;  %v4198_v62 = vpop.f32.mrb[15].mxu0  ;;  %4478 = vmatmul.mubr.bf16.gmra.mrb[24].mxu1 %v4221_v51  ;;  %v4213_v43 = vmax.f32 %v5639_v57, 0.0 }
 0x2d6   : > { %v5645_v63 = vadd.f32 %v5644_v30, %v4198_v62  ;;  %4779 = vmatpush1.bf16.msra.mxu1 %v6640_v55  ;;  %v4214_v32 = vmax.f32 %v5641_v59, 0.0 }
 0x2d7   : > { %v4215_v0 = vmax.f32 %v5643_v61, 0.0  ;;  %4780 = vmatprep.subr.bf16.mxu1 %v6645_v29 }
 0x2d8   : > { %v4216_v44 = vmax.f32 %v5645_v63, 0.0 }
 0x2d9   : > { %v4223_v2 = vpack.c.bf16 %v4215_v0, %v4213_v43 }
 0x2da   : > { %v4224_v3 = vpack.c.bf16 %v4216_v44, %v4214_v32  ;;  %4781 = vmatpush1.bf16.msra.mxu1 %v6643_v31 }
 0x2db   : > { %4782 = vmatprep.subr.bf16.mxu1 %v6648_v1 }
 0x2dc   : > { %4487 = vmatprep.mubr.bf16.mxu1 %v4224_v3 }
 0x2dd   : > { %4488 = vmatmul.mubr.bf16.gmra.mrb[28].mxu1 %v4223_v2 }
 0x2de   : > { %4783 = vmatpush1.bf16.msra.mxu1 %v6646_v4 }
 0x2df   : > { %4784 = vmatprep.subr.bf16.mxu1 %v6651_v5 }
 0x2e2   : > { %4785 = vmatpush1.bf16.msra.mxu1 %v6649_v6 }
 0x2e3   : > { %4786 = vmatprep.subr.bf16.mxu1 %v6654_v7 }
 0x2e6   : > { %4787 = vmatpush1.bf16.msra.mxu1 %v6652_v8 }
 0x2e7   : > { %4788 = vmatprep.subr.bf16.mxu1 %v6657_v9 }
 0x2ea   : > { %4789 = vmatpush1.bf16.msra.mxu1 %v6655_v10 }
 0x2eb   : > { %4790 = vmatprep.subr.bf16.mxu1 %v6660_v11 }
 0x2ee   : > { %4791 = vmatpush1.bf16.msra.mxu1 %v6658_v12 }
 0x2ef   : > { %4792 = vmatprep.subr.bf16.mxu1 %v6663_v13 }
 0x2f2   : > { %4793 = vmatpush1.bf16.msra.mxu1 %v6661_v14 }
 0x2f3   : > { %4794 = vmatprep.subr.bf16.mxu1 %v6666_v15 }
 0x2f6   : > { %4795 = vmatpush1.bf16.msra.mxu1 %v6664_v16 }
 0x2f7   : > { %4796 = vmatprep.subr.bf16.mxu1 %v6669_v17 }
 0x2fa   : > { %4797 = vmatpush1.bf16.msra.mxu1 %v6667_v18 }
 0x2fb   : > { %4798 = vmatprep.subr.bf16.mxu1 %v6672_v19 }
 0x2fe   : > { %4799 = vmatpush1.bf16.msra.mxu1 %v6670_v20 }
 0x2ff   : > { %4800 = vmatprep.subr.bf16.mxu1 %v6675_v21 }
 0x302   : > { %4801 = vmatpush1.bf16.msra.mxu1 %v6673_v22 }
 0x398   : > { %v4459_v35 = vpop.f32.mrb[16].mxu1 }
 0x399   : > { %v4460_v25 = vadd.f32 %v4459_v35, %v8286_v24  ;;  %v4461_v37 = vpop.f32.mrb[17].mxu1 }
 0x39a   : > { %v4462_v38 = vadd.f32 %v4461_v37, %v8290_v34  ;;  %v4463_v45 = vpop.f32.mrb[18].mxu1 }
 0x39b   : > { %v4498_v27 = vmax.f32 %v4460_v25, 0.0  ;;  %v4464_v46 = vadd.f32 %v4463_v45, %v8286_v24  ;;  %v4465_v47 = vpop.f32.mrb[19].mxu1 }
 0x39c   : > { %v4499_v48 = vmax.f32 %v4462_v38, 0.0  ;;  %v4466_v28 = vadd.f32 %v4465_v47, %v8290_v34 }
 0x39d   : > { %v4522_v49 = vmul.f32 %v8294_v26, %v4498_v27  ;;  %v4500_v51 = vmax.f32 %v4464_v46, 0.0 }
 0x39e   : > { %v4523_v52 = vmul.f32 %v8299_v40, %v4499_v48  ;;  %v4501_v54 = vmax.f32 %v4466_v28, 0.0 }
 0x39f   : > { %v4524_v55 = vmul.f32 %v8294_v26, %v4500_v51  ;;  %v4546_v58 = vadd.f32 %v8305_v50, %v4522_v49 }
 0x3a0   : > { %v4525_v56 = vmul.f32 %v8299_v40, %v4501_v54  ;;  %v4469_v57 = vpop.f32.mrb[20].mxu1  ;;  %v4547_v60 = vadd.f32 %v8309_v53, %v4523_v52 }
 0x3a1   : > { %v4548_v29 = vadd.f32 %v8305_v50, %v4524_v55  ;;  %v4470_v30 = vadd.f32 %v4469_v57, %v8286_v24  ;;  %v4471_v59 = vpop.f32.mrb[21].mxu1 }
 0x3a2   : > { %v4549_v61 = vadd.f32 %v8309_v53, %v4525_v56  ;;  %v4472_v62 = vadd.f32 %v4471_v59, %v8290_v34  ;;  %v4473_v63 = vpop.f32.mrb[22].mxu1 }
 0x3a3   : > { %v4562_v31 = vpack.c.bf16 %v4548_v29, %v4546_v58  ;;  %v4502_v43 = vmax.f32 %v4470_v30, 0.0  ;;  %v4474_v0 = vadd.f32 %v4473_v63, %v8286_v24  ;;  %v4475_v1 = vpop.f32.mrb[23].mxu1 }
 0x3a4   : > { %v4503_v32 = vmax.f32 %v4472_v62, 0.0  ;;  %v4476_v44 = vadd.f32 %v4475_v1, %v8290_v34  ;;  %v4563_v2 = vpack.c.bf16 %v4549_v61, %v4547_v60 }
 0x3a5   : > { %v4526_v3 = vmul.f32 %v8294_v26, %v4502_v43  ;;  %v4504_v4 = vmax.f32 %v4474_v0, 0.0 }
 0x3a6   : > { %v4527_v5 = vmul.f32 %v8299_v40, %v4503_v32  ;;  %v4505_v6 = vmax.f32 %v4476_v44, 0.0  ;;  %4802 = vmatprep.mubr.bf16.mxu1 %v4563_v2  ;;  %v4604_v2 = vsub.s32 4, %v8148_v39 }
 0x3a7   : > { %v4528_v7 = vmul.f32 %v8294_v26, %v4504_v4  ;;  %4803 = vmatmul.mubr.bf16.vlgmr.msra.gmra.mrb[32].mxu1 %v4562_v31  ;;  %v4550_v10 = vadd.f32 %v8305_v50, %v4526_v3 }
 0x3a8   : > { %v4529_v8 = vmul.f32 %v8299_v40, %v4505_v6  ;;  %v4479_v9 = vpop.f32.mrb[24].mxu1  ;;  %v4551_v14 = vadd.f32 %v8309_v53, %v4527_v5  ;;  %v8355_v3 = vrot.slane %v8154_v41, %v4604_v2 }
 0x3a9   : > { %v4552_v11 = vadd.f32 %v8305_v50, %v4528_v7  ;;  %v4480_v12 = vadd.f32 %v4479_v9, %v8286_v24  ;;  %v4481_v13 = vpop.f32.mrb[25].mxu1 }
 0x3aa   : > { %v4553_v15 = vadd.f32 %v8309_v53, %v4529_v8  ;;  %v4482_v16 = vadd.f32 %v4481_v13, %v8290_v34  ;;  %v4483_v17 = vpop.f32.mrb[26].mxu1 }
 0x3ab   : > { %v4506_v18 = vmax.f32 %v4480_v12, 0.0  ;;  %v4484_v19 = vadd.f32 %v4483_v17, %v8286_v24  ;;  %v4485_v20 = vpop.f32.mrb[27].mxu1  ;;  %v4564_v21 = vpack.c.bf16 %v4552_v11, %v4550_v10 }
 0x3ac   : > { %v4507_v22 = vmax.f32 %v4482_v16, 0.0  ;;  %v4486_v23 = vadd.f32 %v4485_v20, %v8290_v34  ;;  %v4565_v33 = vpack.c.bf16 %v4553_v15, %v4551_v14 }
 0x3ad   : > { %v4530_v35 = vmul.f32 %v8294_v26, %v4506_v18  ;;  %v4508_v25 = vmax.f32 %v4484_v19, 0.0 }
 0x3ae   : > { %v4531_v36 = vmul.f32 %v8299_v40, %v4507_v22  ;;  %v4509_v37 = vmax.f32 %v4486_v23, 0.0  ;;  %4812 = vmatprep.mubr.bf16.mxu1 %v4565_v33 }
 0x3af   : > { %v4532_v38 = vmul.f32 %v8294_v26, %v4508_v25  ;;  %4813 = vmatmul.mubr.bf16.gmra.mrb[36].mxu1 %v4564_v21  ;;  %v4554_v46 = vadd.f32 %v8305_v50, %v4530_v35 }
 0x3b0   : > { %v4533_v45 = vmul.f32 %v8299_v40, %v4509_v37  ;;  %v4489_v27 = vpop.f32.mrb[28].mxu1  ;;  %v4555_v49 = vadd.f32 %v8309_v53, %v4531_v36 }
 0x3b1   : > { %v4556_v47 = vadd.f32 %v8305_v50, %v4532_v38  ;;  %v4490_v48 = vadd.f32 %v4489_v27, %v8286_v24  ;;  %v4491_v28 = vpop.f32.mrb[29].mxu1 }
 0x3b2   : > { %v4557_v51 = vadd.f32 %v8309_v53, %v4533_v45  ;;  %v4492_v52 = vadd.f32 %v4491_v28, %v8290_v34  ;;  %v4493_v54 = vpop.f32.mrb[30].mxu1 }
 0x3b3   : > { %v4510_v55 = vmax.f32 %v4490_v48, 0.0  ;;  %v4494_v56 = vadd.f32 %v4493_v54, %v8286_v24  ;;  %v4495_v57 = vpop.f32.mrb[31].mxu1  ;;  %v4566_v58 = vpack.c.bf16 %v4556_v47, %v4554_v46 }
 0x3b4   : > { %v4511_v29 = vmax.f32 %v4492_v52, 0.0  ;;  %v4496_v30 = vadd.f32 %v4495_v57, %v8290_v34  ;;  %v4567_v59 = vpack.c.bf16 %v4557_v51, %v4555_v49 }
 0x3b5   : > { %v4534_v60 = vmul.f32 %v8294_v26, %v4510_v55  ;;  %v4512_v61 = vmax.f32 %v4494_v56, 0.0 }
 0x3b6   : > { %v4535_v62 = vmul.f32 %v8299_v40, %v4511_v29  ;;  %v4513_v63 = vmax.f32 %v4496_v30, 0.0  ;;  %4822 = vmatprep.mubr.bf16.mxu1 %v4567_v59 }
 0x3b7   : > { %v4536_v31 = vmul.f32 %v8294_v26, %v4512_v61  ;;  %4823 = vmatmul.mubr.bf16.gmra.mrb[40].mxu1 %v4566_v58  ;;  %v4558_v24 = vadd.f32 %v8305_v50, %v4534_v60  ;;  %v4861_v26 = vsub.s32 5, %v8148_v39 }
 0x3b8   : > { %v4537_v43 = vmul.f32 %v8299_v40, %v4513_v63  ;;  %v4559_v1 = vadd.f32 %v8309_v53, %v4535_v62  ;;  %v8359_v40 = vrot.slane %v8159_v42, %v4604_v2 }
 0x3b9   : > { %v4560_v0 = vadd.f32 %v8305_v50, %v4536_v31  ;;  %v4885_v50 = vsub.s32 6, %v8148_v39  ;;  %v8364_v5 = vrot.slane %v8154_v41, %v4861_v26  ;;  %v8368_v8 = vrot.slane %v8159_v42, %v4861_v26 }
 0x3ba   : > { %v4561_v34 = vadd.f32 %v8309_v53, %v4537_v43 }
 0x3bb   : > { %v4568_v32 = vpack.c.bf16 %v4560_v0, %v4558_v24  ;;  %v8371_v11 = vrot.slane %v8154_v41, %v4885_v50  ;;  %v8375_v14 = vrot.slane %v8159_v42, %v4885_v50 }
 0x3bc   : > { %v4569_v44 = vpack.c.bf16 %v4561_v34, %v4559_v1 }
 0x3be   : > { %4832 = vmatprep.mubr.bf16.mxu1 %v4569_v44 }
 0x3bf   : > { %4833 = vmatmul.mubr.bf16.gmra.mrb[44].mxu1 %v4568_v32 }
 0x47a   : > { %v4804_v4 = vpop.f32.mrb[32].mxu1 }
 0x47b   : > { %v4805_v53 = vadd.f32 %v4804_v4, %v8355_v3  ;;  %v4806_v6 = vpop.f32.mrb[33].mxu1 }
 0x47c   : > { %v4807_v7 = vadd.f32 %v4806_v6, %v8359_v40  ;;  %v4808_v9 = vpop.f32.mrb[34].mxu1 }
 0x47d   : > { %v4843_v10 = vmax.f32 %v4805_v53, 0.0  ;;  %v4809_v39 = vadd.f32 %v4808_v9, %v8355_v3  ;;  %v4810_v12 = vpop.f32.mrb[35].mxu1 }
 0x47e   : > { %v4844_v13 = vmax.f32 %v4807_v7, 0.0  ;;  %v4811_v15 = vadd.f32 %v4810_v12, %v8359_v40 }
 0x47f   : > { %v4867_v16 = vmul.f32 %v8364_v5, %v4843_v10  ;;  %v4845_v17 = vmax.f32 %v4809_v39, 0.0 }
 0x480   : > { %v4868_v18 = vmul.f32 %v8368_v8, %v4844_v13  ;;  %v4846_v19 = vmax.f32 %v4811_v15, 0.0 }
 0x481   : > { %v4891_v20 = vadd.f32 %v8371_v11, %v4867_v16  ;;  %v4869_v41 = vmul.f32 %v8364_v5, %v4845_v17 }
 0x482   : > { %v4892_v21 = vadd.f32 %v8375_v14, %v4868_v18  ;;  %v4870_v22 = vmul.f32 %v8368_v8, %v4846_v19  ;;  %v4814_v23 = vpop.f32.mrb[36].mxu1 }
 0x483   : > { %v4893_v42 = vadd.f32 %v8371_v11, %v4869_v41  ;;  %v4815_v33 = vadd.f32 %v4814_v23, %v8355_v3  ;;  %v4816_v35 = vpop.f32.mrb[37].mxu1 }
 0x484   : > { %v5606_v25 = vpack.c.bf16 %v4892_v21, %v4891_v20  ;;  %v4894_v36 = vadd.f32 %v8375_v14, %v4870_v22  ;;  %v4817_v37 = vadd.f32 %v4816_v35, %v8359_v40  ;;  %v4818_v38 = vpop.f32.mrb[38].mxu1 }
 0x485   : > { %v4847_v45 = vmax.f32 %v4815_v33, 0.0  ;;  %v4819_v27 = vadd.f32 %v4818_v38, %v8355_v3  ;;  %v4820_v46 = vpop.f32.mrb[39].mxu1 }
 0x486   : > { %4955 = vst [vmem:[%s8388_s27] sm:$0xff] %v5606_v25  ;;  %v5607_v47 = vpack.c.bf16 %v4894_v36, %v4893_v42  ;;  %v4848_v48 = vmax.f32 %v4817_v37, 0.0  ;;  %v4821_v28 = vadd.f32 %v4820_v46, %v8359_v40 }
 0x487   : > { %v4871_v49 = vmul.f32 %v8364_v5, %v4847_v45  ;;  %v4849_v51 = vmax.f32 %v4819_v27, 0.0 }
 0x488   : > { %4956 = vst [vmem:[%s8388_s27 + $0x8] sm:$0xff] %v5607_v47  ;;  %v4872_v52 = vmul.f32 %v8368_v8, %v4848_v48  ;;  %v4850_v54 = vmax.f32 %v4821_v28, 0.0 }
 0x489   : > { %v4895_v55 = vadd.f32 %v8371_v11, %v4871_v49  ;;  %v4873_v56 = vmul.f32 %v8364_v5, %v4849_v51 }
 0x48a   : > { %v4896_v57 = vadd.f32 %v8375_v14, %v4872_v52  ;;  %v4874_v58 = vmul.f32 %v8368_v8, %v4850_v54  ;;  %v4824_v29 = vpop.f32.mrb[40].mxu1 }
 0x48b   : > { %v4897_v30 = vadd.f32 %v8371_v11, %v4873_v56  ;;  %v4825_v59 = vadd.f32 %v4824_v29, %v8355_v3  ;;  %v4826_v60 = vpop.f32.mrb[41].mxu1 }
 0x48c   : > { %v5608_v61 = vpack.c.bf16 %v4896_v57, %v4895_v55  ;;  %v4898_v62 = vadd.f32 %v8375_v14, %v4874_v58  ;;  %v4827_v63 = vadd.f32 %v4826_v60, %v8359_v40  ;;  %v4828_v31 = vpop.f32.mrb[42].mxu1 }
 0x48d   : > { %v4851_v43 = vmax.f32 %v4825_v59, 0.0  ;;  %v4829_v24 = vadd.f32 %v4828_v31, %v8355_v3  ;;  %v4830_v0 = vpop.f32.mrb[43].mxu1 }
 0x48e   : > { %4957 = vst [vmem:[%s8388_s27 + $0x10] sm:$0xff] %v5608_v61  ;;  %v5609_v1 = vpack.c.bf16 %v4898_v62, %v4897_v30  ;;  %v4852_v34 = vmax.f32 %v4827_v63, 0.0  ;;  %v4831_v32 = vadd.f32 %v4830_v0, %v8359_v40 }
 0x48f   : > { %v4875_v44 = vmul.f32 %v8364_v5, %v4851_v43  ;;  %v4853_v2 = vmax.f32 %v4829_v24, 0.0 }
 0x490   : > { %4958 = vst [vmem:[%s8388_s27 + $0x18] sm:$0xff] %v5609_v1  ;;  %v4876_v26 = vmul.f32 %v8368_v8, %v4852_v34  ;;  %v4854_v50 = vmax.f32 %v4831_v32, 0.0 }
 0x491   : > { %v4899_v4 = vadd.f32 %v8371_v11, %v4875_v44  ;;  %v4877_v53 = vmul.f32 %v8364_v5, %v4853_v2 }
 0x492   : > { %v4900_v6 = vadd.f32 %v8375_v14, %v4876_v26  ;;  %v4878_v7 = vmul.f32 %v8368_v8, %v4854_v50  ;;  %v4834_v9 = vpop.f32.mrb[44].mxu1 }
 0x493   : > { %v4901_v10 = vadd.f32 %v8371_v11, %v4877_v53  ;;  %v4835_v39 = vadd.f32 %v4834_v9, %v8355_v3  ;;  %v4836_v12 = vpop.f32.mrb[45].mxu1 }
 0x494   : > { %v5610_v13 = vpack.c.bf16 %v4900_v6, %v4899_v4  ;;  %v4902_v15 = vadd.f32 %v8375_v14, %v4878_v7  ;;  %v4837_v16 = vadd.f32 %v4836_v12, %v8359_v40  ;;  %v4838_v17 = vpop.f32.mrb[46].mxu1 }
 0x495   : > { %v4855_v18 = vmax.f32 %v4835_v39, 0.0  ;;  %v4839_v19 = vadd.f32 %v4838_v17, %v8355_v3  ;;  %v4840_v20 = vpop.f32.mrb[47].mxu1 }
 0x496   : > { %4959 = vst [vmem:[%s8388_s27 + $0x20] sm:$0xff] %v5610_v13  ;;  %v5611_v41 = vpack.c.bf16 %v4902_v15, %v4901_v10  ;;  %v4856_v21 = vmax.f32 %v4837_v16, 0.0  ;;  %v4841_v22 = vadd.f32 %v4840_v20, %v8359_v40 }
 0x497   : > { %v4879_v23 = vmul.f32 %v8364_v5, %v4855_v18  ;;  %v4857_v42 = vmax.f32 %v4839_v19, 0.0 }
 0x498   : > { %4960 = vst [vmem:[%s8388_s27 + $0x28] sm:$0xff] %v5611_v41  ;;  %v4880_v33 = vmul.f32 %v8368_v8, %v4856_v21  ;;  %v4858_v35 = vmax.f32 %v4841_v22, 0.0 }
 0x499   : > { %v4903_v25 = vadd.f32 %v8371_v11, %v4879_v23  ;;  %v4881_v36 = vmul.f32 %v8364_v5, %v4857_v42 }
 0x49a   : > { %v4904_v3 = vadd.f32 %v8375_v14, %v4880_v33  ;;  %v4882_v37 = vmul.f32 %v8368_v8, %v4858_v35 }
 0x49b   : > { %v4905_v38 = vadd.f32 %v8371_v11, %v4881_v36 }
 0x49c   : > { %v5612_v45 = vpack.c.bf16 %v4904_v3, %v4903_v25  ;;  %v4906_v40 = vadd.f32 %v8375_v14, %v4882_v37 }
 0x49e   : > { %4961 = vst [vmem:[%s8388_s27 + $0x30] sm:$0xff] %v5612_v45  ;;  %v5613_v27 = vpack.c.bf16 %v4906_v40, %v4905_v38 }
 0x4a0   : > { %4962 = vst [vmem:[%s8388_s27 + $0x38] sm:$0xff] %v5613_v27 }
 0x4a1 PF: > { %s15_s18 = sadd.s32 1, %s6682_s18  }
 0x4a2   : > { %p12_p4 = scmp.ge.s32.totalorder %s15_s18, 4  }
 0x4a4   :  { %14 = sbr.rel (!%p12_p4) target bundleno = 1 (0x1), region = 70 }

// kernel: nin_forward.6
= control target key start
LH: loop header
LB: loop body
LE: loop exit
PB: predicated region body
PF: predicated region fallthrough
CT: control target
= control target key end

     0   :  { %s7314_s18 = smov 0   ;;  %s9226_s0 = inlined_call_operand.vmem [shape: bf16[32,2304], index: 0, kind: input, shape index: {}]   ;;  %s9227_s1 = inlined_call_operand.vmem [shape: bf16[2304,384], index: 1, kind: input, shape index: {}]   ;;  %s9228_s2 = inlined_call_operand.vmem [shape: bf16[384,384], index: 2, kind: input, shape index: {}]   ;;  %s9229_s3 = inlined_call_operand.vmem [shape: bf16[384,384], index: 3, kind: input, shape index: {}]   ;;  %s9230_s4 = inlined_call_operand.vmem [shape: f32[8,384], index: 4, kind: input, shape index: {}]   ;;  %s9231_s5 = inlined_call_operand.vmem [shape: bf16[32,384], index: 5, kind: output, shape index: {}]  }
   0x1 LB: > { %s5491_s19 = sadd.s32 4294967295, %s7279_s18   ;;  %p5495_p0 = scmp.ge.s32.totalorder %s7279_s18, 1  ;;  %s7279_s18 = sphi %s7314_s18, %s15_s18  }
   0x2   : > { %p189_p1 = scmp.lt.s32.totalorder %s7279_s18, 3 }
   0x4   : > { %p190_p2 = pnand %p5495_p0, %p189_p1 }
   0x5   : > { %v6469_v0 = vld [vmem:[%s9227_s1 + $0x4] ss:$12 sps:$4 sm:$0xff] (!%p190_p2)   ;;  %v6471_v1 = vld [vmem:[%s9227_s1] ss:$12 sps:$4 sm:$0xff] (!%p190_p2)   ;;  %v6472_v2 = vld [vmem:[%s9227_s1 + $0x1c] ss:$12 sps:$4 sm:$0xff] (!%p190_p2)  }
   0x6   : > { %193 = sbr.rel (%p190_p2) target bundleno = 1386 (0x56a), region = 40  ;;  %3237 = vmatprep.subr.bf16.mxu0 (!%p190_p2), %v6469_v0  ;;  %v6474_v3 = vld [vmem:[%s9227_s1 + $0x18] ss:$12 sps:$4 sm:$0xff] (!%p190_p2)   ;;  %v6475_v4 = vld [vmem:[%s9227_s1 + $0x34] ss:$12 sps:$4 sm:$0xff] (!%p190_p2)   ;;  %s5496_s30 = sshll.u32 (!%p190_p2), %s5491_s19, 1 }
   0x7   : > { %3238 = vmatpush1.bf16.msra.mxu0 (!%p190_p2), %v6471_v1  ;;  %v6477_v5 = vld [vmem:[%s9227_s1 + $0x30] ss:$12 sps:$4 sm:$0xff] (!%p190_p2)   ;;  %p220_p3 = scmp.lt.s32.totalorder (!%p190_p2), %s5496_s30, 3  ;;  %v6478_v6 = vld [vmem:[%s9227_s1 + $0x4c] ss:$12 sps:$4 sm:$0xff] (!%p190_p2)   ;;  %vm7282_vm0 = vmmov (!%p190_p2), 0  }
   0x8   : > { %3239 = vmatprep.subr.bf16.mxu0 (!%p190_p2), %v6472_v2  ;;  %v6480_v7 = vld [vmem:[%s9227_s1 + $0x48] ss:$12 sps:$4 sm:$0xff] (!%p190_p2)   ;;  %v6481_v8 = vld [vmem:[%s9227_s1 + $0x64] ss:$12 sps:$4 sm:$0xff] (!%p190_p2)   ;;  %v6483_v9 = vld [vmem:[%s9227_s1 + $0x60] ss:$12 sps:$4 sm:$0xff] (!%p190_p2)  }
   0x9   : > { %v6484_v10 = vld [vmem:[%s9227_s1 + $0x7c] ss:$12 sps:$4 sm:$0xff] (!%p190_p2)   ;;  %v6486_v11 = vld [vmem:[%s9227_s1 + $0x78] ss:$12 sps:$4 sm:$0xff] (!%p190_p2)   ;;  %v6487_v12 = vld [vmem:[%s9227_s1 + $0x94] ss:$12 sps:$4 sm:$0xff] (!%p190_p2)  }
   0xa   : > { %v6489_v14 = vld [vmem:[%s9227_s1 + $0x90] ss:$12 sps:$4 sm:$0xff] (!%p190_p2)   ;;  %v6490_v15 = vld [vmem:[%s9227_s1 + $0xac] ss:$12 sps:$4 sm:$0xff] (!%p190_p2)   ;;  %v6492_v16 = vld [vmem:[%s9227_s1 + $0xa8] ss:$12 sps:$4 sm:$0xff] (!%p190_p2)  }
   0xb   : > { %3240 = vmatpush1.bf16.msra.mxu0 (!%p190_p2), %v6474_v3  ;;  %v6493_v17 = vld [vmem:[%s9227_s1 + $0xc4] ss:$12 sps:$4 sm:$0xff] (!%p190_p2)   ;;  %v6532_v18 = vld [vmem:[%s9227_s1 + $0xc8] ss:$12 sps:$4 sm:$0xff] (!%p190_p2)   ;;  %v6495_v20 = vld [vmem:[%s9227_s1 + $0xc0] ss:$12 sps:$4 sm:$0xff] (!%p190_p2)  }
   0xc   : > { %3241 = vmatprep.subr.bf16.mxu0 (!%p190_p2), %v6475_v4  ;;  %v6533_v19 = vld [vmem:[%s9227_s1 + $0x8] ss:$12 sps:$4 sm:$0xff] (!%p190_p2)   ;;  %6104 = vmatprep.subr.bf16.mxu1 (!%p190_p2), %v6532_v18  ;;  %v6537_v22 = vld [vmem:[%s9227_s1 + $0xe0] ss:$12 sps:$4 sm:$0xff] (!%p190_p2)   ;;  %v6498_v24 = vld [vmem:[%s9227_s1 + $0xd8] ss:$12 sps:$4 sm:$0xff] (!%p190_p2)  }
   0xd   : > { %s9233_s30 = smov (!%p220_p3, %s5496_s30), 3  ;;  %v6496_v21 = vld [vmem:[%s9227_s1 + $0xdc] ss:$12 sps:$4 sm:$0xff]   ;;  %6105 = vmatpush3.bf16.msra.mxu1 %v6533_v19  ;;  %v6538_v23 = vld [vmem:[%s9227_s1 + $0x20] ss:$12 sps:$4 sm:$0xff]  }
   0xe   : > { %s6456_s16 = smul.u32 72, %s9233_s30  ;;  %v6499_v25 = vld [vmem:[%s9227_s1 + $0xf4] ss:$12 sps:$4 sm:$0xff]   ;;  %6106 = vmatprep.subr.bf16.mxu1 %v6537_v22  ;;  %v6542_v26 = vld [vmem:[%s9227_s1 + $0xf8] ss:$12 sps:$4 sm:$0xff]  }
   0xf   : > { %3242 = vmatpush1.bf16.msra.mxu0 %v6477_v5  ;;  %v6543_v27 = vld [vmem:[%s9227_s1 + $0x38] ss:$12 sps:$4 sm:$0xff]   ;;  %v6501_v28 = vld [vmem:[%s9227_s1 + $0xf0] ss:$12 sps:$4 sm:$0xff]   ;;  %v6504_v32 = vld [vmem:[%s9227_s1 + $0x108] ss:$12 sps:$4 sm:$0xff]  }
  0x10   : > { %3243 = vmatprep.subr.bf16.mxu0 %v6478_v6  ;;  %s7364_s24 = scalar_lea.vmem %s9226_s0, %s6456_s16  ;;  %v6547_v29 = vld [vmem:[%s9227_s1 + $0x110] ss:$12 sps:$4 sm:$0xff]   ;;  %v6502_v31 = vld [vmem:[%s9227_s1 + $0x10c] ss:$12 sps:$4 sm:$0xff]   ;;  %v6552_v33 = vld [vmem:[%s9227_s1 + $0x128] ss:$12 sps:$4 sm:$0xff]  }
  0x11   : > { %v6519_v13 = vld [vmem:[%s7364_s24 + $0x4] ss:$72 sps:$4 sm:$0xff]   ;;  %6107 = vmatpush3.bf16.msra.mxu1 %v6538_v23  ;;  %v6548_v30 = vld [vmem:[%s9227_s1 + $0x50] ss:$12 sps:$4 sm:$0xff]   ;;  %v6553_v34 = vld [vmem:[%s9227_s1 + $0x68] ss:$12 sps:$4 sm:$0xff]  }
  0x12   : > { %3269 = vmatprep.mubr.bf16.mxu0 %v6519_v13  ;;  %3656 = vmatprep.mubr.bf16.mxu1 %v6519_v13  ;;  %v6505_v35 = vld [vmem:[%s9227_s1 + $0x124] ss:$12 sps:$4 sm:$0xff]   ;;  %v6557_v36 = vld [vmem:[%s9227_s1 + $0x140] ss:$12 sps:$4 sm:$0xff]   ;;  %v6508_v38 = vld [vmem:[%s9227_s1 + $0x13c] ss:$12 sps:$4 sm:$0xff]  }
  0x13   : > { %3244 = vmatpush1.bf16.msra.mxu0 %v6480_v7  ;;  %6108 = vmatprep.subr.bf16.mxu1 %v6542_v26  ;;  %v6507_v37 = vld [vmem:[%s9227_s1 + $0x120] ss:$12 sps:$4 sm:$0xff]   ;;  %v6562_v40 = vld [vmem:[%s9227_s1 + $0x158] ss:$12 sps:$4 sm:$0xff]   ;;  %v6567_v44 = vld [vmem:[%s9227_s1 + $0x170] ss:$12 sps:$4 sm:$0xff]  }
  0x14   : > { %3245 = vmatprep.subr.bf16.mxu0 %v6481_v8  ;;  %v6558_v39 = vld [vmem:[%s9227_s1 + $0x80] ss:$12 sps:$4 sm:$0xff]   ;;  %v6510_v41 = vld [vmem:[%s9227_s1 + $0x138] ss:$12 sps:$4 sm:$0xff]   ;;  %v6513_v45 = vld [vmem:[%s9227_s1 + $0x150] ss:$12 sps:$4 sm:$0xff]  }
  0x15   : > { %6109 = vmatpush3.bf16.msra.mxu1 %v6543_v27  ;;  %v6511_v42 = vld [vmem:[%s9227_s1 + $0x154] ss:$12 sps:$4 sm:$0xff]   ;;  %v6563_v43 = vld [vmem:[%s9227_s1 + $0x98] ss:$12 sps:$4 sm:$0xff]   ;;  %v6568_v47 = vld [vmem:[%s9227_s1 + $0xb0] ss:$12 sps:$4 sm:$0xff]  }
  0x16   : > { %6110 = vmatprep.subr.bf16.mxu1 %v6547_v29  ;;  %v6514_v46 = vld [vmem:[%s9227_s1 + $0x16c] ss:$12 sps:$4 sm:$0xff]   ;;  %v6572_v48 = vld [vmem:[%s9227_s1 + $0x248] ss:$12 sps:$4 sm:$0xff]   ;;  %v6522_v51 = vld [vmem:[%s9227_s1 + $0x184] ss:$12 sps:$4 sm:$0xff]  }
  0x17   : > { %3246 = vmatpush1.bf16.msra.mxu0 %v6483_v9  ;;  %v6516_v49 = vld [vmem:[%s9227_s1 + $0x168] ss:$12 sps:$4 sm:$0xff]   ;;  %v6577_v53 = vld [vmem:[%s9227_s1 + $0x260] ss:$12 sps:$4 sm:$0xff]   ;;  %v6582_v57 = vld [vmem:[%s9227_s1 + $0x278] ss:$12 sps:$4 sm:$0xff]  }
  0x18   : > { %3247 = vmatprep.subr.bf16.mxu0 %v6484_v10  ;;  %v6517_v50 = vld [vmem:[%s7364_s24] ss:$72 sps:$4 sm:$0xff]   ;;  %v6523_v58 = vld [vmem:[%s9227_s1 + $0x198] ss:$12 sps:$4 sm:$0xff]   ;;  %v6587_v61 = vld [vmem:[%s9227_s1 + $0x290] ss:$12 sps:$4 sm:$0xff]  }
  0x19   : > { %6111 = vmatpush3.bf16.msra.mxu1 %v6548_v30  ;;  %v6573_v52 = vld [vmem:[%s9227_s1 + $0x188] ss:$12 sps:$4 sm:$0xff]   ;;  %v6520_v54 = vld [vmem:[%s9227_s1 + $0x180] ss:$12 sps:$4 sm:$0xff]   ;;  %v6583_v60 = vld [vmem:[%s9227_s1 + $0x1b8] ss:$12 sps:$4 sm:$0xff]  }
  0x1a   : > { %6112 = vmatprep.subr.bf16.mxu1 %v6552_v33  ;;  %v6578_v55 = vld [vmem:[%s9227_s1 + $0x1a0] ss:$12 sps:$4 sm:$0xff]   ;;  %v6525_v56 = vld [vmem:[%s9227_s1 + $0x19c] ss:$12 sps:$4 sm:$0xff]   ;;  %v6536_v4 = vld [vmem:[%s9227_s1 + $0x1e4] ss:$12 sps:$4 sm:$0xff]  }
  0x1b   : > { %3248 = vmatpush1.bf16.msra.mxu0 %v6486_v11  ;;  %v6528_v59 = vld [vmem:[%s9227_s1 + $0x1b4] ss:$12 sps:$4 sm:$0xff]   ;;  %v6526_v62 = vld [vmem:[%s9227_s1 + $0x1b0] ss:$12 sps:$4 sm:$0xff]   ;;  %v6531_v1 = vld [vmem:[%s9227_s1 + $0x1cc] ss:$12 sps:$4 sm:$0xff]  }
  0x1c   : > { %3249 = vmatprep.subr.bf16.mxu0 %v6487_v12  ;;  %v6588_v63 = vld [vmem:[%s9227_s1 + $0x1d0] ss:$12 sps:$4 sm:$0xff]   ;;  %v6596_v0 = vld [vmem:[%s7364_s24 + $0xc] ss:$72 sps:$4 sm:$0xff]   ;;  %v6605_v10 = vld [vmem:[%s9227_s1 + $0x2d8] ss:$12 sps:$4 sm:$0xff]  }
  0x1d   : > { %6113 = vmatpush3.bf16.msra.mxu1 %v6553_v34  ;;  %v6592_v2 = vld [vmem:[%s9227_s1 + $0x2a8] ss:$12 sps:$4 sm:$0xff]   ;;  %v6600_v6 = vld [vmem:[%s9227_s1 + $0x2c0] ss:$12 sps:$4 sm:$0xff]   ;;  %v6539_v11 = vld [vmem:[%s9227_s1 + $0x1f8] ss:$12 sps:$4 sm:$0xff]  }
  0x1e   : > { %6114 = vmatprep.subr.bf16.mxu1 %v6557_v36  ;;  %v6529_v3 = vld [vmem:[%s9227_s1 + $0x1c8] ss:$12 sps:$4 sm:$0xff]   ;;  %v6534_v7 = vld [vmem:[%s9227_s1 + $0x1e0] ss:$12 sps:$4 sm:$0xff]   ;;  %v6606_v13 = vld [vmem:[%s9227_s1 + $0x218] ss:$12 sps:$4 sm:$0xff]  }
  0x1f   : > { %3250 = vmatpush1.bf16.msra.mxu0 %v6489_v14  ;;  %v6593_v5 = vld [vmem:[%s9227_s1 + $0x1e8] ss:$12 sps:$4 sm:$0xff]   ;;  %v6601_v9 = vld [vmem:[%s9227_s1 + $0x200] ss:$12 sps:$4 sm:$0xff]   ;;  %v6610_v14 = vld [vmem:[%s9227_s1 + $0x2f0] ss:$12 sps:$4 sm:$0xff]  }
  0x20   : > { %3251 = vmatprep.subr.bf16.mxu0 %v6490_v15  ;;  %v6541_v8 = vld [vmem:[%s9227_s1 + $0x1fc] ss:$12 sps:$4 sm:$0xff]   ;;  %v6546_v12 = vld [vmem:[%s9227_s1 + $0x214] ss:$12 sps:$4 sm:$0xff]   ;;  %v6625_v27 = vld [vmem:[%s9227_s1 + $0x3f8] ss:$12 sps:$4 sm:$0xff]  }
  0x21   : > { %6115 = vmatpush3.bf16.msra.mxu1 %v6558_v39  ;;  %v6544_v15 = vld [vmem:[%s9227_s1 + $0x210] ss:$12 sps:$4 sm:$0xff]   ;;  %v6615_v18 = vld [vmem:[%s9227_s1 + $0x3c8] ss:$12 sps:$4 sm:$0xff]   ;;  %v6620_v23 = vld [vmem:[%s9227_s1 + $0x3e0] ss:$12 sps:$4 sm:$0xff]  }
  0x22   : > { %6116 = vmatprep.subr.bf16.mxu1 %v6562_v40  ;;  %v6549_v19 = vld [vmem:[%s9227_s1 + $0x228] ss:$12 sps:$4 sm:$0xff]   ;;  %v6621_v26 = vld [vmem:[%s9227_s1 + $0x320] ss:$12 sps:$4 sm:$0xff]   ;;  %v6626_v30 = vld [vmem:[%s9227_s1 + $0x338] ss:$12 sps:$4 sm:$0xff]  }
  0x23   : > { %3252 = vmatpush1.bf16.msra.mxu0 %v6492_v16  ;;  %v6551_v16 = vld [vmem:[%s9227_s1 + $0x22c] ss:$12 sps:$4 sm:$0xff]   ;;  %v7583_v22 = vld [vmem:[%s7364_s24 + $0x8] ss:$72 sps:$4 sm:$0xff]   ;;  %v6566_v29 = vld [vmem:[%s9227_s1 + $0x274] ss:$12 sps:$4 sm:$0xff]  }
  0x24   : > { %3253 = vmatprep.subr.bf16.mxu0 %v6493_v17  ;;  %v6611_v17 = vld [vmem:[%s9227_s1 + $0x230] ss:$12 sps:$4 sm:$0xff]   ;;  %v6571_v33 = vld [vmem:[%s9227_s1 + $0x28c] ss:$12 sps:$4 sm:$0xff]   ;;  %v6569_v36 = vld [vmem:[%s9227_s1 + $0x288] ss:$12 sps:$4 sm:$0xff]  }
  0x25   : > { %6117 = vmatpush3.bf16.msra.mxu1 %v6563_v43  ;;  %v6631_v34 = vld [vmem:[%s9227_s1 + $0x350] ss:$12 sps:$4 sm:$0xff]   ;;  %v6640_v39 = vld [vmem:[%s9227_s1 + $0x440] ss:$12 sps:$4 sm:$0xff]  }
  0x26   : > { %6118 = vmatprep.subr.bf16.mxu1 %v6567_v44  ;;  %v6574_v40 = vld [vmem:[%s9227_s1 + $0x2a0] ss:$12 sps:$4 sm:$0xff]   ;;  %v6645_v44 = vld [vmem:[%s9227_s1 + $0x458] ss:$12 sps:$4 sm:$0xff]  }
  0x27   : > { %3254 = vmatpush1.bf16.msra.mxu0 %v6495_v20  ;;  %v6556_v20 = vld [vmem:[%s9227_s1 + $0x244] ss:$12 sps:$4 sm:$0xff]   ;;  %v6641_v43 = vld [vmem:[%s9227_s1 + $0x380] ss:$12 sps:$4 sm:$0xff]  }
  0x28   : > { %3255 = vmatprep.subr.bf16.mxu0 %v6496_v21  ;;  %v6616_v21 = vld [vmem:[%s9227_s1 + $0x308] ss:$12 sps:$4 sm:$0xff]  }
  0x29   : > { %6119 = vmatpush3.bf16.msra.mxu1 %v6568_v47  ;;  %v6646_v47 = vld [vmem:[%s9227_s1 + $0x398] ss:$12 sps:$4 sm:$0xff]  }
  0x2a   : > { %6126 = vmatprep.subr.bf16.mxu1 %v6572_v48  ;;  %v6650_v48 = vld [vmem:[%s9227_s1 + $0x470] ss:$12 sps:$4 sm:$0xff]  }
  0x2b   : > { %3256 = vmatpush1.bf16.msra.mxu0 %v6498_v24  ;;  %v6554_v24 = vld [vmem:[%s9227_s1 + $0x240] ss:$12 sps:$4 sm:$0xff]  }
  0x2c   : > { %3257 = vmatprep.subr.bf16.mxu0 %v6499_v25  ;;  %3657 = vmatmul.mubr.bf16.vlgmr.msra.gmra.mrb[0].mxu1 %v6517_v50  ;;  %v6561_v25 = vld [vmem:[%s9227_s1 + $0x25c] ss:$12 sps:$4 sm:$0xff]  }
  0x2d   : > { %6127 = vmatpush3.bf16.msra.mxu1 %v6573_v52  ;;  %3697 = vmatprep.mubr.bf16.mxu1 %v6596_v0  ;;  %v6658_v52 = vld [vmem:[%s9227_s1 + $0x548] ss:$12 sps:$4 sm:$0xff]  }
  0x2e   : > { %6128 = vmatprep.subr.bf16.mxu1 %v6577_v53  ;;  %v6589_v53 = vld [vmem:[%s9227_s1 + $0x2e8] ss:$12 sps:$4 sm:$0xff]  }
  0x2f   : > { %3258 = vmatpush1.bf16.msra.mxu0 %v6501_v28  ;;  %v6559_v28 = vld [vmem:[%s9227_s1 + $0x258] ss:$12 sps:$4 sm:$0xff]  }
  0x30   : > { %3259 = vmatprep.subr.bf16.mxu0 %v6502_v31  ;;  %v6630_v31 = vld [vmem:[%s9227_s1 + $0x410] ss:$12 sps:$4 sm:$0xff]  }
  0x31   : > { %6129 = vmatpush3.bf16.msra.mxu1 %v6578_v55  ;;  %v6599_v55 = vld [vmem:[%s9227_s1 + $0x304] ss:$12 sps:$4 sm:$0xff]  }
  0x32   : > { %6130 = vmatprep.subr.bf16.mxu1 %v6582_v57  ;;  %v6663_v57 = vld [vmem:[%s9227_s1 + $0x560] ss:$12 sps:$4 sm:$0xff]  }
  0x33   : > { %3260 = vmatpush1.bf16.msra.mxu0 %v6504_v32  ;;  %v6564_v32 = vld [vmem:[%s9227_s1 + $0x270] ss:$12 sps:$4 sm:$0xff]  }
  0x34   : > { %3261 = vmatprep.subr.bf16.mxu0 %v6505_v35  ;;  %v6635_v35 = vld [vmem:[%s9227_s1 + $0x428] ss:$12 sps:$4 sm:$0xff]  }
  0x35   : > { %6131 = vmatpush3.bf16.msra.mxu1 %v6583_v60  ;;  %v6664_v60 = vld [vmem:[%s9227_s1 + $0x4a0] ss:$12 sps:$4 sm:$0xff]  }
  0x36   : > { %6132 = vmatprep.subr.bf16.mxu1 %v6587_v61  ;;  %v6668_v61 = vld [vmem:[%s9227_s1 + $0x578] ss:$12 sps:$4 sm:$0xff]  }
  0x37   : > { %3262 = vmatpush1.bf16.msra.mxu0 %v6507_v37  ;;  %v6576_v37 = vld [vmem:[%s9227_s1 + $0x2a4] ss:$12 sps:$4 sm:$0xff]  }
  0x38   : > { %3263 = vmatprep.subr.bf16.mxu0 %v6508_v38  ;;  %v6636_v38 = vld [vmem:[%s9227_s1 + $0x368] ss:$12 sps:$4 sm:$0xff]  }
  0x39   : > { %6133 = vmatpush3.bf16.msra.mxu1 %v6588_v63  ;;  %v6609_v63 = vld [vmem:[%s9227_s1 + $0x334] ss:$12 sps:$4 sm:$0xff]  }
  0x3a   : > { %6134 = vmatprep.subr.bf16.mxu1 %v6592_v2  ;;  %v6607_v2 = vld [vmem:[%s9227_s1 + $0x330] ss:$12 sps:$4 sm:$0xff]  }
  0x3b   : > { %3264 = vmatpush1.bf16.msra.mxu0 %v6510_v41  ;;  %v6581_v41 = vld [vmem:[%s9227_s1 + $0x2bc] ss:$12 sps:$4 sm:$0xff]  }
  0x3c   : > { %3265 = vmatprep.subr.bf16.mxu0 %v6511_v42  ;;  %v6657_v42 = vld [vmem:[%s7364_s24 + $0x14] ss:$72 sps:$4 sm:$0xff]  }
  0x3d   : > { %6135 = vmatpush3.bf16.msra.mxu1 %v6593_v5  ;;  %v6678_v5 = vld [vmem:[%s9227_s1 + $0x5a8] ss:$12 sps:$4 sm:$0xff]  }
  0x3e   : > { %6136 = vmatprep.subr.bf16.mxu1 %v6600_v6  ;;  %v6612_v6 = vld [vmem:[%s9227_s1 + $0x348] ss:$12 sps:$4 sm:$0xff]  }
  0x3f   : > { %3266 = vmatpush1.bf16.msra.mxu0 %v6513_v45  ;;  %v6579_v45 = vld [vmem:[%s9227_s1 + $0x2b8] ss:$12 sps:$4 sm:$0xff]  }
  0x40   : > { %3267 = vmatprep.subr.bf16.mxu0 %v6514_v46  ;;  %v6586_v46 = vld [vmem:[%s9227_s1 + $0x2d4] ss:$12 sps:$4 sm:$0xff]  }
  0x41   : > { %6137 = vmatpush3.bf16.msra.mxu1 %v6601_v9  ;;  %v6679_v9 = vld [vmem:[%s9227_s1 + $0x4e8] ss:$12 sps:$4 sm:$0xff]  }
  0x42   : > { %6138 = vmatprep.subr.bf16.mxu1 %v6605_v10  ;;  %v6683_v10 = vld [vmem:[%s9227_s1 + $0x5c0] ss:$12 sps:$4 sm:$0xff]  }
  0x43   : > { %3268 = vmatpush1.bf16.msra.mxu0 %v6516_v49  ;;  %v6584_v49 = vld [vmem:[%s9227_s1 + $0x2d0] ss:$12 sps:$4 sm:$0xff]  }
  0x44   : > { %3280 = vmatprep.subr.bf16.mxu0 %v6522_v51  ;;  %v6591_v51 = vld [vmem:[%s9227_s1 + $0x2ec] ss:$12 sps:$4 sm:$0xff]  }
  0x45   : > { %6139 = vmatpush3.bf16.msra.mxu1 %v6606_v13  ;;  %v6684_v13 = vld [vmem:[%s9227_s1 + $0x500] ss:$12 sps:$4 sm:$0xff]  }
  0x46   : > { %3270 = vmatmul.mubr.bf16.vlgmr.msra.gmra.mrb[0].mxu0 %v6517_v50  ;;  %6140 = vmatprep.subr.bf16.mxu1 %v6610_v14  ;;  %v6651_v50 = vld [vmem:[%s9227_s1 + $0x3b0] ss:$12 sps:$4 sm:$0xff]   ;;  %v6688_v14 = vld [vmem:[%s9227_s1 + $0x5d8] ss:$12 sps:$4 sm:$0xff]  }
  0x47   : > { %3281 = vmatpush1.bf16.msra.mxu0 %v6520_v54  ;;  %3312 = vmatprep.mubr.bf16.mxu0 %v6596_v0  ;;  %v7678_v54 = vld [vmem:[%s7364_s24 + $0x10] ss:$72 sps:$4 sm:$0xff]  }
  0x48   : > { %3282 = vmatprep.subr.bf16.mxu0 %v6525_v56  ;;  %v6659_v56 = vld [vmem:[%s9227_s1 + $0x488] ss:$12 sps:$4 sm:$0xff]   ;;  %v6669_v0 = vld [vmem:[%s9227_s1 + $0x4b8] ss:$12 sps:$4 sm:$0xff]  }
  0x49   : > { %6141 = vmatpush3.bf16.msra.mxu1 %v6611_v17  ;;  %v6629_v17 = vld [vmem:[%s9227_s1 + $0x394] ss:$12 sps:$4 sm:$0xff]  }
  0x4a   : > { %6148 = vmatprep.subr.bf16.mxu1 %v6615_v18  ;;  %v6693_v18 = vld [vmem:[%s9227_s1 + $0x5f0] ss:$12 sps:$4 sm:$0xff]  }
  0x4b   : > { %3283 = vmatpush1.bf16.msra.mxu0 %v6523_v58  ;;  %v6597_v58 = vld [vmem:[%s9227_s1 + $0x300] ss:$12 sps:$4 sm:$0xff]  }
  0x4c   : > { %3284 = vmatprep.subr.bf16.mxu0 %v6528_v59  ;;  %3698 = vmatmul.mubr.bf16.vlgmr.msra.gmra.mrb[4].mxu1 %v7583_v22  ;;  %v6604_v59 = vld [vmem:[%s9227_s1 + $0x31c] ss:$12 sps:$4 sm:$0xff]  }
  0x4d   : > { %6149 = vmatpush3.bf16.msra.mxu1 %v6616_v21  ;;  %3738 = vmatprep.mubr.bf16.mxu1 %v6657_v42  ;;  %v6694_v21 = vld [vmem:[%s9227_s1 + $0x530] ss:$12 sps:$4 sm:$0xff]  }
  0x4e   : > { %6150 = vmatprep.subr.bf16.mxu1 %v6620_v23  ;;  %v6632_v23 = vld [vmem:[%s9227_s1 + $0x3a8] ss:$12 sps:$4 sm:$0xff]  }
  0x4f   : > { %3285 = vmatpush1.bf16.msra.mxu0 %v6526_v62  ;;  %v6602_v62 = vld [vmem:[%s9227_s1 + $0x318] ss:$12 sps:$4 sm:$0xff]  }
  0x50   : > { %3286 = vmatprep.subr.bf16.mxu0 %v6531_v1  ;;  %v6673_v1 = vld [vmem:[%s9227_s1 + $0x590] ss:$12 sps:$4 sm:$0xff]  }
  0x51   : > { %6151 = vmatpush3.bf16.msra.mxu1 %v6621_v26  ;;  %v6702_v26 = vld [vmem:[%s9227_s1 + $0x608] ss:$12 sps:$4 sm:$0xff]  }
  0x52   : > { %6152 = vmatprep.subr.bf16.mxu1 %v6625_v27  ;;  %v6706_v27 = vld [vmem:[%s9227_s1 + $0x6e0] ss:$12 sps:$4 sm:$0xff]  }
  0x53   : > { %3287 = vmatpush1.bf16.msra.mxu0 %v6529_v3  ;;  %v6614_v3 = vld [vmem:[%s9227_s1 + $0x34c] ss:$12 sps:$4 sm:$0xff]  }
  0x54   : > { %3288 = vmatprep.subr.bf16.mxu0 %v6536_v4  ;;  %v6674_v4 = vld [vmem:[%s9227_s1 + $0x4d0] ss:$12 sps:$4 sm:$0xff]  }
  0x55   : > { %6153 = vmatpush3.bf16.msra.mxu1 %v6626_v30  ;;  %v6707_v30 = vld [vmem:[%s9227_s1 + $0x620] ss:$12 sps:$4 sm:$0xff]  }
  0x56   : > { %6154 = vmatprep.subr.bf16.mxu1 %v6630_v31  ;;  %v6711_v31 = vld [vmem:[%s9227_s1 + $0x6f8] ss:$12 sps:$4 sm:$0xff]  }
  0x57   : > { %3289 = vmatpush1.bf16.msra.mxu0 %v6534_v7  ;;  %v6619_v7 = vld [vmem:[%s9227_s1 + $0x364] ss:$12 sps:$4 sm:$0xff]  }
  0x58   : > { %3290 = vmatprep.subr.bf16.mxu0 %v6541_v8  ;;  %v7734_v8 = vld [vmem:[%s7364_s24 + $0x1c] ss:$72 sps:$4 sm:$0xff]  }
  0x59   : > { %6155 = vmatpush3.bf16.msra.mxu1 %v6631_v34  ;;  %v6712_v34 = vld [vmem:[%s9227_s1 + $0x638] ss:$12 sps:$4 sm:$0xff]  }
  0x5a   : > { %6156 = vmatprep.subr.bf16.mxu1 %v6635_v35  ;;  %v6716_v35 = vld [vmem:[%s9227_s1 + $0x710] ss:$12 sps:$4 sm:$0xff]  }
  0x5b   : > { %3291 = vmatpush1.bf16.msra.mxu0 %v6539_v11  ;;  %v6617_v11 = vld [vmem:[%s9227_s1 + $0x360] ss:$12 sps:$4 sm:$0xff]  }
  0x5c   : > { %3292 = vmatprep.subr.bf16.mxu0 %v6546_v12  ;;  %v6624_v12 = vld [vmem:[%s9227_s1 + $0x37c] ss:$12 sps:$4 sm:$0xff]  }
  0x5d   : > { %6157 = vmatpush3.bf16.msra.mxu1 %v6636_v38  ;;  %v7826_v38 = vld [vmem:[%s7364_s24 + $0x24] ss:$72 sps:$4 sm:$0xff]  }
  0x5e   : > { %6158 = vmatprep.subr.bf16.mxu1 %v6640_v39  ;;  %v6717_v39 = vld [vmem:[%s9227_s1 + $0x650] ss:$12 sps:$4 sm:$0xff]  }
  0x5f   : > { %3293 = vmatpush1.bf16.msra.mxu0 %v6544_v15  ;;  %v6622_v15 = vld [vmem:[%s9227_s1 + $0x378] ss:$12 sps:$4 sm:$0xff]  }
  0x60   : > { %3294 = vmatprep.subr.bf16.mxu0 %v6551_v16  ;;  %v6689_v16 = vld [vmem:[%s9227_s1 + $0x518] ss:$12 sps:$4 sm:$0xff]  }
  0x61   : > { %6159 = vmatpush3.bf16.msra.mxu1 %v6641_v43  ;;  %v6722_v43 = vld [vmem:[%s9227_s1 + $0x668] ss:$12 sps:$4 sm:$0xff]  }
  0x62   : > { %6160 = vmatprep.subr.bf16.mxu1 %v6645_v44  ;;  %v6726_v44 = vld [vmem:[%s9227_s1 + $0x740] ss:$12 sps:$4 sm:$0xff]  }
  0x63   : > { %3295 = vmatpush1.bf16.msra.mxu0 %v6549_v19  ;;  %v6627_v19 = vld [vmem:[%s9227_s1 + $0x390] ss:$12 sps:$4 sm:$0xff]  }
  0x64   : > { %3296 = vmatprep.subr.bf16.mxu0 %v6556_v20  ;;  %v6634_v20 = vld [vmem:[%s9227_s1 + $0x3ac] ss:$12 sps:$4 sm:$0xff]  }
  0x65   : > { %6161 = vmatpush3.bf16.msra.mxu1 %v6646_v47  ;;  %v6667_v47 = vld [vmem:[%s9227_s1 + $0x43c] ss:$12 sps:$4 sm:$0xff]  }
  0x66   : > { %6162 = vmatprep.subr.bf16.mxu1 %v6650_v48  ;;  %v6731_v48 = vld [vmem:[%s9227_s1 + $0x758] ss:$12 sps:$4 sm:$0xff]  }
  0x67   : > { %3297 = vmatpush1.bf16.msra.mxu0 %v6554_v24  ;;  %v6639_v24 = vld [vmem:[%s9227_s1 + $0x3c4] ss:$12 sps:$4 sm:$0xff]  }
  0x68   : > { %3298 = vmatprep.subr.bf16.mxu0 %v6561_v25  ;;  %v7786_v25 = vld [vmem:[%s7364_s24 + $0x18] ss:$72 sps:$4 sm:$0xff]  }
  0x69   : > { %6163 = vmatpush3.bf16.msra.mxu1 %v6651_v50  ;;  %v6672_v50 = vld [vmem:[%s9227_s1 + $0x454] ss:$12 sps:$4 sm:$0xff]  }
  0x6a   : > { %6170 = vmatprep.subr.bf16.mxu1 %v6658_v52  ;;  %v6736_v52 = vld [vmem:[%s9227_s1 + $0x770] ss:$12 sps:$4 sm:$0xff]  }
  0x6b   : > { %3299 = vmatpush1.bf16.msra.mxu0 %v6559_v28  ;;  %v6637_v28 = vld [vmem:[%s9227_s1 + $0x3c0] ss:$12 sps:$4 sm:$0xff]  }
  0x6c   : > { %3300 = vmatprep.subr.bf16.mxu0 %v6566_v29  ;;  %3739 = vmatmul.mubr.bf16.vlgmr.msra.gmra.mrb[8].mxu1 %v7678_v54  ;;  %v6644_v29 = vld [vmem:[%s9227_s1 + $0x3dc] ss:$12 sps:$4 sm:$0xff]  }
  0x6d   : > { %6171 = vmatpush3.bf16.msra.mxu1 %v6659_v56  ;;  %3779 = vmatprep.mubr.bf16.mxu1 %v7734_v8  ;;  %v6737_v56 = vld [vmem:[%s9227_s1 + $0x6b0] ss:$12 sps:$4 sm:$0xff]  }
  0x6e   : > { %6172 = vmatprep.subr.bf16.mxu1 %v6663_v57  ;;  %v6744_v57 = vld [vmem:[%s9227_s1 + $0x848] ss:$12 sps:$4 sm:$0xff]  }
  0x6f   : > { %3301 = vmatpush1.bf16.msra.mxu0 %v6564_v32  ;;  %v6642_v32 = vld [vmem:[%s9227_s1 + $0x3d8] ss:$12 sps:$4 sm:$0xff]  }
  0x70   : > { %3302 = vmatprep.subr.bf16.mxu0 %v6571_v33  ;;  %v6649_v33 = vld [vmem:[%s9227_s1 + $0x3f4] ss:$12 sps:$4 sm:$0xff]  }
  0x71   : > { %6173 = vmatpush3.bf16.msra.mxu1 %v6664_v60  ;;  %v6741_v60 = vld [vmem:[%s7364_s24 + $0x20] ss:$72 sps:$4 sm:$0xff]  }
  0x72   : > { %6174 = vmatprep.subr.bf16.mxu1 %v6668_v61  ;;  %v6745_v61 = vld [vmem:[%s9227_s1 + $0x788] ss:$12 sps:$4 sm:$0xff]  }
  0x73   : > { %3303 = vmatpush1.bf16.msra.mxu0 %v6569_v36  ;;  %v6647_v36 = vld [vmem:[%s9227_s1 + $0x3f0] ss:$12 sps:$4 sm:$0xff]  }
  0x74   : > { %3304 = vmatprep.subr.bf16.mxu0 %v6576_v37  ;;  %v6654_v37 = vld [vmem:[%s9227_s1 + $0x40c] ss:$12 sps:$4 sm:$0xff]  }
  0x75   : > { %6175 = vmatpush3.bf16.msra.mxu1 %v6669_v0  ;;  %v6687_v0 = vld [vmem:[%s9227_s1 + $0x49c] ss:$12 sps:$4 sm:$0xff]  }
  0x76   : > { %6176 = vmatprep.subr.bf16.mxu1 %v6673_v1  ;;  %v6750_v1 = vld [vmem:[%s9227_s1 + $0x7a0] ss:$12 sps:$4 sm:$0xff]  }
  0x77   : > { %3305 = vmatpush1.bf16.msra.mxu0 %v6574_v40  ;;  %v6721_v40 = vld [vmem:[%s9227_s1 + $0x728] ss:$12 sps:$4 sm:$0xff]  }
  0x78   : > { %3306 = vmatprep.subr.bf16.mxu0 %v6581_v41  ;;  %v6652_v41 = vld [vmem:[%s9227_s1 + $0x408] ss:$12 sps:$4 sm:$0xff]  }
  0x79   : > { %6177 = vmatpush3.bf16.msra.mxu1 %v6674_v4  ;;  %v6692_v4 = vld [vmem:[%s9227_s1 + $0x4b4] ss:$12 sps:$4 sm:$0xff]  }
  0x7a   : > { %6178 = vmatprep.subr.bf16.mxu1 %v6678_v5  ;;  %v7916_v5 = vld [vmem:[%s7364_s24 + $0x2c] ss:$72 sps:$4 sm:$0xff]  }
  0x7b   : > { %3307 = vmatpush1.bf16.msra.mxu0 %v6579_v45  ;;  %v6660_v45 = vld [vmem:[%s9227_s1 + $0x420] ss:$12 sps:$4 sm:$0xff]  }
  0x7c   : > { %3308 = vmatprep.subr.bf16.mxu0 %v6586_v46  ;;  %v6727_v46 = vld [vmem:[%s9227_s1 + $0x680] ss:$12 sps:$4 sm:$0xff]  }
  0x7d   : > { %6179 = vmatpush3.bf16.msra.mxu1 %v6679_v9  ;;  %v6697_v9 = vld [vmem:[%s9227_s1 + $0x4cc] ss:$12 sps:$4 sm:$0xff]  }
  0x7e   : > { %6180 = vmatprep.subr.bf16.mxu1 %v6683_v10  ;;  %v6760_v10 = vld [vmem:[%s9227_s1 + $0x7d0] ss:$12 sps:$4 sm:$0xff]  }
  0x7f   : > { %3309 = vmatpush1.bf16.msra.mxu0 %v6584_v49  ;;  %v6665_v49 = vld [vmem:[%s9227_s1 + $0x438] ss:$12 sps:$4 sm:$0xff]  }
  0x80   : > { %3310 = vmatprep.subr.bf16.mxu0 %v6591_v51  ;;  %v6732_v51 = vld [vmem:[%s9227_s1 + $0x698] ss:$12 sps:$4 sm:$0xff]  }
  0x81   : > { %6181 = vmatpush3.bf16.msra.mxu1 %v6684_v13  ;;  %v6705_v13 = vld [vmem:[%s9227_s1 + $0x4e4] ss:$12 sps:$4 sm:$0xff]  }
  0x82   : > { %6182 = vmatprep.subr.bf16.mxu1 %v6688_v14  ;;  %v6769_v14 = vld [vmem:[%s9227_s1 + $0x8c0] ss:$12 sps:$4 sm:$0xff]  }
  0x83   : > { %3311 = vmatpush1.bf16.msra.mxu0 %v6589_v53  ;;  %v6670_v53 = vld [vmem:[%s9227_s1 + $0x450] ss:$12 sps:$4 sm:$0xff]  }
  0x84   : > { %3323 = vmatprep.subr.bf16.mxu0 %v6599_v55  ;;  %v6677_v55 = vld [vmem:[%s9227_s1 + $0x46c] ss:$12 sps:$4 sm:$0xff]  }
  0x85   : > { %6183 = vmatpush3.bf16.msra.mxu1 %v6689_v16  ;;  %v6710_v16 = vld [vmem:[%s9227_s1 + $0x4fc] ss:$12 sps:$4 sm:$0xff]  }
  0x86   : > { %3313 = vmatmul.mubr.bf16.vlgmr.msra.gmra.mrb[0].mxu0 %v7583_v22  ;;  %6184 = vmatprep.subr.bf16.mxu1 %v6693_v18  ;;  %v6701_v22 = vld [vmem:[%s9227_s1 + $0x6c8] ss:$12 sps:$4 sm:$0xff]   ;;  %v6774_v18 = vld [vmem:[%s9227_s1 + $0x8d8] ss:$12 sps:$4 sm:$0xff]  }
  0x87   : > { %3324 = vmatpush1.bf16.msra.mxu0 %v6597_v58  ;;  %3355 = vmatprep.mubr.bf16.mxu0 %v6657_v42  ;;  %v6662_v42 = vld [vmem:[%s9227_s1 + $0x424] ss:$12 sps:$4 sm:$0xff]   ;;  %v6675_v58 = vld [vmem:[%s9227_s1 + $0x468] ss:$12 sps:$4 sm:$0xff]  }
  0x88   : > { %3325 = vmatprep.subr.bf16.mxu0 %v6604_v59  ;;  %v6682_v59 = vld [vmem:[%s9227_s1 + $0x484] ss:$12 sps:$4 sm:$0xff]  }
  0x89   : > { %6185 = vmatpush3.bf16.msra.mxu1 %v6694_v21  ;;  %v6775_v21 = vld [vmem:[%s9227_s1 + $0x818] ss:$12 sps:$4 sm:$0xff]  }
  0x8a   : > { %6192 = vmatprep.subr.bf16.mxu1 %v6701_v22  ;;  %v6779_v22 = vld [vmem:[%s9227_s1 + $0x8f0] ss:$12 sps:$4 sm:$0xff]  }
  0x8b   : > { %3326 = vmatpush1.bf16.msra.mxu0 %v6602_v62  ;;  %v6749_v62 = vld [vmem:[%s9227_s1 + $0x860] ss:$12 sps:$4 sm:$0xff]  }
  0x8c   : > { %3327 = vmatprep.subr.bf16.mxu0 %v6609_v63  ;;  %3780 = vmatmul.mubr.bf16.vlgmr.msra.gmra.mrb[12].mxu1 %v7786_v25  ;;  %v6680_v63 = vld [vmem:[%s9227_s1 + $0x480] ss:$12 sps:$4 sm:$0xff]  }
  0x8d   : > { %6193 = vmatpush3.bf16.msra.mxu1 %v6702_v26  ;;  %3820 = vmatprep.mubr.bf16.mxu1 %v7826_v38  ;;  %v6780_v26 = vld [vmem:[%s9227_s1 + $0x830] ss:$12 sps:$4 sm:$0xff]  }
  0x8e   : > { %6194 = vmatprep.subr.bf16.mxu1 %v6706_v27  ;;  %v6787_v27 = vld [vmem:[%s9227_s1 + $0x9c8] ss:$12 sps:$4 sm:$0xff]  }
  0x8f   : > { %3328 = vmatpush1.bf16.msra.mxu0 %v6607_v2  ;;  %v6754_v2 = vld [vmem:[%s9227_s1 + $0x878] ss:$12 sps:$4 sm:$0xff]  }
  0x90   : > { %3329 = vmatprep.subr.bf16.mxu0 %v6614_v3  ;;  %v6685_v3 = vld [vmem:[%s9227_s1 + $0x498] ss:$12 sps:$4 sm:$0xff]  }
  0x91   : > { %6195 = vmatpush3.bf16.msra.mxu1 %v6707_v30  ;;  %v6784_v30 = vld [vmem:[%s7364_s24 + $0x28] ss:$72 sps:$4 sm:$0xff]  }
  0x92   : > { %6196 = vmatprep.subr.bf16.mxu1 %v6711_v31  ;;  %v6788_v31 = vld [vmem:[%s9227_s1 + $0x908] ss:$12 sps:$4 sm:$0xff]  }
  0x93   : > { %3330 = vmatpush1.bf16.msra.mxu0 %v6612_v6  ;;  %v6755_v6 = vld [vmem:[%s9227_s1 + $0x7b8] ss:$12 sps:$4 sm:$0xff]  }
  0x94   : > { %3331 = vmatprep.subr.bf16.mxu0 %v6619_v7  ;;  %v6759_v7 = vld [vmem:[%s9227_s1 + $0x890] ss:$12 sps:$4 sm:$0xff]  }
  0x95   : > { %6197 = vmatpush3.bf16.msra.mxu1 %v6712_v34  ;;  %v6730_v34 = vld [vmem:[%s9227_s1 + $0x55c] ss:$12 sps:$4 sm:$0xff]  }
  0x96   : > { %6198 = vmatprep.subr.bf16.mxu1 %v6716_v35  ;;  %v6829_v35 = vld [vmem:[%s7364_s24 + $0x34] ss:$72 sps:$4 sm:$0xff]  }
  0x97   : > { %3332 = vmatpush1.bf16.msra.mxu0 %v6617_v11  ;;  %v6764_v11 = vld [vmem:[%s9227_s1 + $0x8a8] ss:$12 sps:$4 sm:$0xff]  }
  0x98   : > { %3333 = vmatprep.subr.bf16.mxu0 %v6624_v12  ;;  %v6765_v12 = vld [vmem:[%s9227_s1 + $0x7e8] ss:$12 sps:$4 sm:$0xff]  }
  0x99   : > { %6199 = vmatpush3.bf16.msra.mxu1 %v6717_v39  ;;  %v6728_v39 = vld [vmem:[%s9227_s1 + $0x558] ss:$12 sps:$4 sm:$0xff]  }
  0x9a   : > { %6200 = vmatprep.subr.bf16.mxu1 %v6721_v40  ;;  %v6735_v40 = vld [vmem:[%s9227_s1 + $0x574] ss:$12 sps:$4 sm:$0xff]  }
  0x9b   : > { %3334 = vmatpush1.bf16.msra.mxu0 %v6622_v15  ;;  %v6703_v15 = vld [vmem:[%s9227_s1 + $0x4e0] ss:$12 sps:$4 sm:$0xff]  }
  0x9c   : > { %3335 = vmatprep.subr.bf16.mxu0 %v6629_v17  ;;  %v6770_v17 = vld [vmem:[%s9227_s1 + $0x800] ss:$12 sps:$4 sm:$0xff]  }
  0x9d   : > { %6201 = vmatpush3.bf16.msra.mxu1 %v6722_v43  ;;  %v6733_v43 = vld [vmem:[%s9227_s1 + $0x570] ss:$12 sps:$4 sm:$0xff]  }
  0x9e   : > { %6202 = vmatprep.subr.bf16.mxu1 %v6726_v44  ;;  %v6803_v44 = vld [vmem:[%s9227_s1 + $0x950] ss:$12 sps:$4 sm:$0xff]  }
  0x9f   : > { %3336 = vmatpush1.bf16.msra.mxu0 %v6627_v19  ;;  %v6708_v19 = vld [vmem:[%s9227_s1 + $0x4f8] ss:$12 sps:$4 sm:$0xff]  }
  0xa0   : > { %3337 = vmatprep.subr.bf16.mxu0 %v6634_v20  ;;  %v6715_v20 = vld [vmem:[%s9227_s1 + $0x514] ss:$12 sps:$4 sm:$0xff]  }
  0xa1   : > { %6203 = vmatpush3.bf16.msra.mxu1 %v6727_v46  ;;  %v6807_v46 = vld [vmem:[%s9227_s1 + $0xa28] ss:$12 sps:$4 sm:$0xff]  }
  0xa2   : > { %6204 = vmatprep.subr.bf16.mxu1 %v6731_v48  ;;  %v6748_v48 = vld [vmem:[%s9227_s1 + $0x5a4] ss:$12 sps:$4 sm:$0xff]  }
  0xa3   : > { %3338 = vmatpush1.bf16.msra.mxu0 %v6632_v23  ;;  %v6713_v23 = vld [vmem:[%s9227_s1 + $0x510] ss:$12 sps:$4 sm:$0xff]  }
  0xa4   : > { %3339 = vmatprep.subr.bf16.mxu0 %v6639_v24  ;;  %v6720_v24 = vld [vmem:[%s9227_s1 + $0x52c] ss:$12 sps:$4 sm:$0xff]  }
  0xa5   : > { %6205 = vmatpush3.bf16.msra.mxu1 %v6732_v51  ;;  %v6746_v51 = vld [vmem:[%s9227_s1 + $0x5a0] ss:$12 sps:$4 sm:$0xff]  }
  0xa6   : > { %6206 = vmatprep.subr.bf16.mxu1 %v6736_v52  ;;  %v6753_v52 = vld [vmem:[%s9227_s1 + $0x5bc] ss:$12 sps:$4 sm:$0xff]  }
  0xa7   : > { %3340 = vmatpush1.bf16.msra.mxu0 %v6637_v28  ;;  %v6718_v28 = vld [vmem:[%s9227_s1 + $0x528] ss:$12 sps:$4 sm:$0xff]  }
  0xa8   : > { %3341 = vmatprep.subr.bf16.mxu0 %v6644_v29  ;;  %v6725_v29 = vld [vmem:[%s9227_s1 + $0x544] ss:$12 sps:$4 sm:$0xff]  }
  0xa9   : > { %6207 = vmatpush3.bf16.msra.mxu1 %v6737_v56  ;;  %v6751_v56 = vld [vmem:[%s9227_s1 + $0x5b8] ss:$12 sps:$4 sm:$0xff]  }
  0xaa   : > { %6214 = vmatprep.subr.bf16.mxu1 %v6744_v57  ;;  %v6758_v57 = vld [vmem:[%s9227_s1 + $0x5d4] ss:$12 sps:$4 sm:$0xff]  }
  0xab   : > { %3342 = vmatpush1.bf16.msra.mxu0 %v6642_v32  ;;  %v6792_v32 = vld [vmem:[%s9227_s1 + $0x9e0] ss:$12 sps:$4 sm:$0xff]  }
  0xac   : > { %3343 = vmatprep.subr.bf16.mxu0 %v6649_v33  ;;  %3821 = vmatmul.mubr.bf16.vlgmr.msra.gmra.mrb[16].mxu1 %v6741_v60  ;;  %v6723_v33 = vld [vmem:[%s9227_s1 + $0x540] ss:$12 sps:$4 sm:$0xff]   ;;  %v6756_v60 = vld [vmem:[%s9227_s1 + $0x5d0] ss:$12 sps:$4 sm:$0xff]  }
  0xad   : > { %6215 = vmatpush3.bf16.msra.mxu1 %v6745_v61  ;;  %3861 = vmatprep.mubr.bf16.mxu1 %v7916_v5  ;;  %v6763_v61 = vld [vmem:[%s9227_s1 + $0x5ec] ss:$12 sps:$4 sm:$0xff]  }
  0xae   : > { %6216 = vmatprep.subr.bf16.mxu1 %v6749_v62  ;;  %v6823_v62 = vld [vmem:[%s9227_s1 + $0x9b0] ss:$12 sps:$4 sm:$0xff]  }
  0xaf   : > { %3344 = vmatpush1.bf16.msra.mxu0 %v6647_v36  ;;  %v6793_v36 = vld [vmem:[%s9227_s1 + $0x920] ss:$12 sps:$4 sm:$0xff]  }
  0xb0   : > { %3345 = vmatprep.subr.bf16.mxu0 %v6654_v37  ;;  %v6797_v37 = vld [vmem:[%s9227_s1 + $0x9f8] ss:$12 sps:$4 sm:$0xff]  }
  0xb1   : > { %6217 = vmatpush3.bf16.msra.mxu1 %v6750_v1  ;;  %v6768_v1 = vld [vmem:[%s9227_s1 + $0x604] ss:$12 sps:$4 sm:$0xff]  }
  0xb2   : > { %6218 = vmatprep.subr.bf16.mxu1 %v6754_v2  ;;  %v6827_v2 = vld [vmem:[%s7364_s24 + $0x30] ss:$72 sps:$4 sm:$0xff]  }
  0xb3   : > { %3346 = vmatpush1.bf16.msra.mxu0 %v6652_v41  ;;  %v6798_v41 = vld [vmem:[%s9227_s1 + $0x938] ss:$12 sps:$4 sm:$0xff]  }
  0xb4   : > { %3347 = vmatprep.subr.bf16.mxu0 %v6662_v42  ;;  %v6802_v42 = vld [vmem:[%s9227_s1 + $0xa10] ss:$12 sps:$4 sm:$0xff]  }
  0xb5   : > { %6219 = vmatpush3.bf16.msra.mxu1 %v6755_v6  ;;  %v6766_v6 = vld [vmem:[%s9227_s1 + $0x600] ss:$12 sps:$4 sm:$0xff]  }
  0xb6   : > { %6220 = vmatprep.subr.bf16.mxu1 %v6759_v7  ;;  %v6872_v7 = vld [vmem:[%s7364_s24 + $0x3c] ss:$72 sps:$4 sm:$0xff]  }
  0xb7   : > { %3348 = vmatpush1.bf16.msra.mxu0 %v6660_v45  ;;  %v6740_v45 = vld [vmem:[%s9227_s1 + $0x58c] ss:$12 sps:$4 sm:$0xff]  }
  0xb8   : > { %3349 = vmatprep.subr.bf16.mxu0 %v6667_v47  ;;  %v6738_v47 = vld [vmem:[%s9227_s1 + $0x588] ss:$12 sps:$4 sm:$0xff]  }
  0xb9   : > { %6221 = vmatpush3.bf16.msra.mxu1 %v6760_v10  ;;  %v6840_v10 = vld [vmem:[%s9227_s1 + $0xb78] ss:$12 sps:$4 sm:$0xff]  }
  0xba   : > { %6222 = vmatprep.subr.bf16.mxu1 %v6764_v11  ;;  %v6771_v11 = vld [vmem:[%s9227_s1 + $0x618] ss:$12 sps:$4 sm:$0xff]  }
  0xbb   : > { %3350 = vmatpush1.bf16.msra.mxu0 %v6665_v49  ;;  %v6808_v49 = vld [vmem:[%s9227_s1 + $0x968] ss:$12 sps:$4 sm:$0xff]  }
  0xbc   : > { %3351 = vmatprep.subr.bf16.mxu0 %v6672_v50  ;;  %v6812_v50 = vld [vmem:[%s9227_s1 + $0xa40] ss:$12 sps:$4 sm:$0xff]  }
  0xbd   : > { %6223 = vmatpush3.bf16.msra.mxu1 %v6765_v12  ;;  %v6778_v12 = vld [vmem:[%s9227_s1 + $0x634] ss:$12 sps:$4 sm:$0xff]  }
  0xbe   : > { %6224 = vmatprep.subr.bf16.mxu1 %v6769_v14  ;;  %v6783_v14 = vld [vmem:[%s9227_s1 + $0x64c] ss:$12 sps:$4 sm:$0xff]  }
  0xbf   : > { %3352 = vmatpush1.bf16.msra.mxu0 %v6670_v53  ;;  %v6813_v53 = vld [vmem:[%s9227_s1 + $0x980] ss:$12 sps:$4 sm:$0xff]  }
  0xc0   : > { %3353 = vmatprep.subr.bf16.mxu0 %v6677_v55  ;;  %v6817_v55 = vld [vmem:[%s9227_s1 + $0xa58] ss:$12 sps:$4 sm:$0xff]  }
  0xc1   : > { %6225 = vmatpush3.bf16.msra.mxu1 %v6770_v17  ;;  %v6791_v17 = vld [vmem:[%s9227_s1 + $0x664] ss:$12 sps:$4 sm:$0xff]  }
  0xc2   : > { %6226 = vmatprep.subr.bf16.mxu1 %v6774_v18  ;;  %v6851_v18 = vld [vmem:[%s9227_s1 + $0xae8] ss:$12 sps:$4 sm:$0xff]  }
  0xc3   : > { %3354 = vmatpush1.bf16.msra.mxu0 %v6675_v58  ;;  %v6818_v58 = vld [vmem:[%s9227_s1 + $0x998] ss:$12 sps:$4 sm:$0xff]  }
  0xc4   : > { %3366 = vmatprep.subr.bf16.mxu0 %v6682_v59  ;;  %v6822_v59 = vld [vmem:[%s9227_s1 + $0xa70] ss:$12 sps:$4 sm:$0xff]  }
  0xc5   : > { %6227 = vmatpush3.bf16.msra.mxu1 %v6775_v21  ;;  %v6796_v21 = vld [vmem:[%s9227_s1 + $0x67c] ss:$12 sps:$4 sm:$0xff]  }
  0xc6   : > { %3356 = vmatmul.mubr.bf16.vlgmr.msra.gmra.mrb[0].mxu0 %v7678_v54  ;;  %v6690_v54 = vld [vmem:[%s9227_s1 + $0x4b0] ss:$12 sps:$4 sm:$0xff]   ;;  %6228 = vmatprep.subr.bf16.mxu1 %v6779_v22  ;;  %v6856_v22 = vld [vmem:[%s9227_s1 + $0xb00] ss:$12 sps:$4 sm:$0xff]  }
  0xc7   : > { %3367 = vmatpush1.bf16.msra.mxu0 %v6680_v63  ;;  %3398 = vmatprep.mubr.bf16.mxu0 %v7734_v8  ;;  %v6695_v8 = vld [vmem:[%s9227_s1 + $0x4c8] ss:$12 sps:$4 sm:$0xff]  }
  0xc8   : > { %3368 = vmatprep.subr.bf16.mxu0 %v6687_v0  ;;  %v6830_v63 = vld [vmem:[%s9227_s1 + $0xb48] ss:$12 sps:$4 sm:$0xff]  }
  0xc9   : > { %6229 = vmatpush3.bf16.msra.mxu1 %v6780_v26  ;;  %v6761_v0 = vld [vmem:[%s9227_s1 + $0x5e8] ss:$12 sps:$4 sm:$0xff]  }
  0xca   : > { %6236 = vmatprep.subr.bf16.mxu1 %v6787_v27  ;;  %v6801_v26 = vld [vmem:[%s9227_s1 + $0x694] ss:$12 sps:$4 sm:$0xff]   ;;  %v6861_v27 = vld [vmem:[%s9227_s1 + $0xb18] ss:$12 sps:$4 sm:$0xff]  }
  0xcb   : > { %3369 = vmatpush1.bf16.msra.mxu0 %v6685_v3  ;;  %v6831_v3 = vld [vmem:[%s9227_s1 + $0xa88] ss:$12 sps:$4 sm:$0xff]  }
  0xcc   : > { %3370 = vmatprep.subr.bf16.mxu0 %v6692_v4  ;;  %3862 = vmatmul.mubr.bf16.vlgmr.msra.gmra.mrb[20].mxu1 %v6784_v30  ;;  %v6835_v4 = vld [vmem:[%s9227_s1 + $0xb60] ss:$12 sps:$4 sm:$0xff]  }
  0xcd   : > { %6237 = vmatpush3.bf16.msra.mxu1 %v6788_v31  ;;  %3902 = vmatprep.mubr.bf16.mxu1 %v6829_v35  ;;  %v6806_v30 = vld [vmem:[%s9227_s1 + $0x6ac] ss:$12 sps:$4 sm:$0xff]   ;;  %v6866_v31 = vld [vmem:[%s9227_s1 + $0xb30] ss:$12 sps:$4 sm:$0xff]  }
  0xce   : > { %6238 = vmatprep.subr.bf16.mxu1 %v6792_v32  ;;  %v6873_v32 = vld [vmem:[%s9227_s1 + $0xcc8] ss:$12 sps:$4 sm:$0xff]   ;;  %v6811_v35 = vld [vmem:[%s9227_s1 + $0x6c4] ss:$12 sps:$4 sm:$0xff]  }
  0xcf   : > { %3371 = vmatpush1.bf16.msra.mxu0 %v6690_v54  ;;  %v6773_v54 = vld [vmem:[%s9227_s1 + $0x61c] ss:$12 sps:$4 sm:$0xff]  }
  0xd0   : > { %3372 = vmatprep.subr.bf16.mxu0 %v6697_v9  ;;  %v6836_v9 = vld [vmem:[%s9227_s1 + $0xaa0] ss:$12 sps:$4 sm:$0xff]  }
  0xd1   : > { %6239 = vmatpush3.bf16.msra.mxu1 %v6793_v36  ;;  %v6874_v36 = vld [vmem:[%s9227_s1 + $0xc08] ss:$12 sps:$4 sm:$0xff]  }
  0xd2   : > { %6240 = vmatprep.subr.bf16.mxu1 %v6797_v37  ;;  %v6878_v37 = vld [vmem:[%s9227_s1 + $0xce0] ss:$12 sps:$4 sm:$0xff]  }
  0xd3   : > { %3373 = vmatpush1.bf16.msra.mxu0 %v6695_v8  ;;  %v6841_v8 = vld [vmem:[%s9227_s1 + $0xab8] ss:$12 sps:$4 sm:$0xff]  }
  0xd4   : > { %3374 = vmatprep.subr.bf16.mxu0 %v6705_v13  ;;  %v6776_v13 = vld [vmem:[%s9227_s1 + $0x630] ss:$12 sps:$4 sm:$0xff]  }
  0xd5   : > { %6241 = vmatpush3.bf16.msra.mxu1 %v6798_v41  ;;  %v6816_v41 = vld [vmem:[%s9227_s1 + $0x6dc] ss:$12 sps:$4 sm:$0xff]  }
  0xd6   : > { %6242 = vmatprep.subr.bf16.mxu1 %v6802_v42  ;;  %v6879_v42 = vld [vmem:[%s9227_s1 + $0xc20] ss:$12 sps:$4 sm:$0xff]  }
  0xd7   : > { %3375 = vmatpush1.bf16.msra.mxu0 %v6703_v15  ;;  %v6846_v15 = vld [vmem:[%s9227_s1 + $0xad0] ss:$12 sps:$4 sm:$0xff]  }
  0xd8   : > { %3376 = vmatprep.subr.bf16.mxu0 %v6710_v16  ;;  %v6781_v16 = vld [vmem:[%s9227_s1 + $0x648] ss:$12 sps:$4 sm:$0xff]  }
  0xd9   : > { %6243 = vmatpush3.bf16.msra.mxu1 %v6803_v44  ;;  %v6814_v44 = vld [vmem:[%s9227_s1 + $0x6d8] ss:$12 sps:$4 sm:$0xff]  }
  0xda   : > { %6244 = vmatprep.subr.bf16.mxu1 %v6807_v46  ;;  %v6884_v46 = vld [vmem:[%s9227_s1 + $0xc38] ss:$12 sps:$4 sm:$0xff]  }
  0xdb   : > { %3377 = vmatpush1.bf16.msra.mxu0 %v6708_v19  ;;  %v6855_v19 = vld [vmem:[%s9227_s1 + $0xbc0] ss:$12 sps:$4 sm:$0xff]  }
  0xdc   : > { %3378 = vmatprep.subr.bf16.mxu0 %v6715_v20  ;;  %v6789_v20 = vld [vmem:[%s9227_s1 + $0x660] ss:$12 sps:$4 sm:$0xff]  }
  0xdd   : > { %6245 = vmatpush3.bf16.msra.mxu1 %v6808_v49  ;;  %v6826_v49 = vld [vmem:[%s9227_s1 + $0x70c] ss:$12 sps:$4 sm:$0xff]  }
  0xde   : > { %6246 = vmatprep.subr.bf16.mxu1 %v6812_v50  ;;  %v6889_v50 = vld [vmem:[%s9227_s1 + $0xc50] ss:$12 sps:$4 sm:$0xff]  }
  0xdf   : > { %3379 = vmatpush1.bf16.msra.mxu0 %v6713_v23  ;;  %v6860_v23 = vld [vmem:[%s9227_s1 + $0xbd8] ss:$12 sps:$4 sm:$0xff]  }
  0xe0   : > { %3380 = vmatprep.subr.bf16.mxu0 %v6720_v24  ;;  %v6794_v24 = vld [vmem:[%s9227_s1 + $0x678] ss:$12 sps:$4 sm:$0xff]  }
  0xe1   : > { %6247 = vmatpush3.bf16.msra.mxu1 %v6813_v53  ;;  %v6834_v53 = vld [vmem:[%s9227_s1 + $0x724] ss:$12 sps:$4 sm:$0xff]  }
  0xe2   : > { %6248 = vmatprep.subr.bf16.mxu1 %v6817_v55  ;;  %v6894_v55 = vld [vmem:[%s9227_s1 + $0xc68] ss:$12 sps:$4 sm:$0xff]  }
  0xe3   : > { %3381 = vmatpush1.bf16.msra.mxu0 %v6718_v28  ;;  %v6865_v28 = vld [vmem:[%s9227_s1 + $0xbf0] ss:$12 sps:$4 sm:$0xff]  }
  0xe4   : > { %3382 = vmatprep.subr.bf16.mxu0 %v6725_v29  ;;  %v6799_v29 = vld [vmem:[%s9227_s1 + $0x690] ss:$12 sps:$4 sm:$0xff]  }
  0xe5   : > { %6249 = vmatpush3.bf16.msra.mxu1 %v6818_v58  ;;  %v6839_v58 = vld [vmem:[%s9227_s1 + $0x73c] ss:$12 sps:$4 sm:$0xff]  }
  0xe6   : > { %6250 = vmatprep.subr.bf16.mxu1 %v6822_v59  ;;  %v6899_v59 = vld [vmem:[%s9227_s1 + $0xc80] ss:$12 sps:$4 sm:$0xff]  }
  0xe7   : > { %3383 = vmatpush1.bf16.msra.mxu0 %v6723_v33  ;;  %v6804_v33 = vld [vmem:[%s9227_s1 + $0x6a8] ss:$12 sps:$4 sm:$0xff]  }
  0xe8   : > { %3384 = vmatprep.subr.bf16.mxu0 %v6730_v34  ;;  %v6870_v34 = vld [vmem:[%s7364_s24 + $0x38] ss:$72 sps:$4 sm:$0xff]  }
  0xe9   : > { %6251 = vmatpush3.bf16.msra.mxu1 %v6823_v62  ;;  %v6844_v62 = vld [vmem:[%s9227_s1 + $0x754] ss:$12 sps:$4 sm:$0xff]  }
  0xea   : > { %6258 = vmatprep.subr.bf16.mxu1 %v6830_v63  ;;  %v6904_v63 = vld [vmem:[%s9227_s1 + $0xc98] ss:$12 sps:$4 sm:$0xff]  }
  0xeb   : > { %3385 = vmatpush1.bf16.msra.mxu0 %v6728_v39  ;;  %v6915_v39 = vld [vmem:[%s7364_s24 + $0x44] ss:$72 sps:$4 sm:$0xff]  }
  0xec   : > { %3386 = vmatprep.subr.bf16.mxu0 %v6735_v40  ;;  %3903 = vmatmul.mubr.bf16.vlgmr.msra.gmra.mrb[24].mxu1 %v6827_v2  ;;  %v6809_v40 = vld [vmem:[%s9227_s1 + $0x6c0] ss:$12 sps:$4 sm:$0xff]  }
  0xed   : > { %6259 = vmatpush3.bf16.msra.mxu1 %v6831_v3  ;;  %3943 = vmatprep.mubr.bf16.mxu1 %v6872_v7  ;;  %v6849_v2 = vld [vmem:[%s9227_s1 + $0x76c] ss:$12 sps:$4 sm:$0xff]   ;;  %v6909_v3 = vld [vmem:[%s9227_s1 + $0xcb0] ss:$12 sps:$4 sm:$0xff]  }
  0xee   : > { %6260 = vmatprep.subr.bf16.mxu1 %v6835_v4  ;;  %v6913_v4 = vld [vmem:[%s7364_s24 + $0x40] ss:$72 sps:$4 sm:$0xff]   ;;  %v6854_v7 = vld [vmem:[%s9227_s1 + $0x784] ss:$12 sps:$4 sm:$0xff]  }
  0xef   : > { %3387 = vmatpush1.bf16.msra.mxu0 %v6733_v43  ;;  %v6883_v43 = vld [vmem:[%s9227_s1 + $0xcf8] ss:$12 sps:$4 sm:$0xff]  }
  0xf0   : > { %3388 = vmatprep.subr.bf16.mxu0 %v6740_v45  ;;  %v6821_v45 = vld [vmem:[%s9227_s1 + $0x6f4] ss:$12 sps:$4 sm:$0xff]  }
  0xf1   : > { %6261 = vmatpush3.bf16.msra.mxu1 %v6836_v9  ;;  %v6859_v9 = vld [vmem:[%s9227_s1 + $0x79c] ss:$12 sps:$4 sm:$0xff]  }
  0xf2   : > { %6262 = vmatprep.subr.bf16.mxu1 %v6840_v10  ;;  %v7264_v10 = vld [vmem:[%s7364_s24 + $0x20] ss:$72 sps:$4 sm:$0xff]  }
  0xf3   : > { %3389 = vmatpush1.bf16.msra.mxu0 %v6738_v47  ;;  %v6888_v47 = vld [vmem:[%s9227_s1 + $0xd10] ss:$12 sps:$4 sm:$0xff]  }
  0xf4   : > { %3390 = vmatprep.subr.bf16.mxu0 %v6748_v48  ;;  %v6819_v48 = vld [vmem:[%s9227_s1 + $0x6f0] ss:$12 sps:$4 sm:$0xff]  }
  0xf5   : > { %6263 = vmatpush3.bf16.msra.mxu1 %v6841_v8  ;;  %v6864_v8 = vld [vmem:[%s9227_s1 + $0x7b4] ss:$12 sps:$4 sm:$0xff]  }
  0xf7   : > { %3391 = vmatpush1.bf16.msra.mxu0 %v6746_v51  ;;  %v6893_v51 = vld [vmem:[%s9227_s1 + $0xd28] ss:$12 sps:$4 sm:$0xff]  }
  0xf8   : > { %3392 = vmatprep.subr.bf16.mxu0 %v6753_v52  ;;  %v6824_v52 = vld [vmem:[%s9227_s1 + $0x708] ss:$12 sps:$4 sm:$0xff]  }
  0xfb   : > { %3393 = vmatpush1.bf16.msra.mxu0 %v6751_v56  ;;  %v6898_v56 = vld [vmem:[%s9227_s1 + $0xd40] ss:$12 sps:$4 sm:$0xff]  }
  0xfc   : > { %3394 = vmatprep.subr.bf16.mxu0 %v6758_v57  ;;  %v6832_v57 = vld [vmem:[%s9227_s1 + $0x720] ss:$12 sps:$4 sm:$0xff]  }
  0xff   : > { %3395 = vmatpush1.bf16.msra.mxu0 %v6756_v60  ;;  %v6903_v60 = vld [vmem:[%s9227_s1 + $0xd58] ss:$12 sps:$4 sm:$0xff]  }
 0x100   : > { %3396 = vmatprep.subr.bf16.mxu0 %v6763_v61  ;;  %v6837_v61 = vld [vmem:[%s9227_s1 + $0x738] ss:$12 sps:$4 sm:$0xff]  }
 0x103   : > { %3397 = vmatpush1.bf16.msra.mxu0 %v6761_v0  ;;  %v6908_v0 = vld [vmem:[%s9227_s1 + $0xd70] ss:$12 sps:$4 sm:$0xff]  }
 0x104   : > { %3409 = vmatprep.subr.bf16.mxu0 %v6768_v1  ;;  %v6842_v1 = vld [vmem:[%s9227_s1 + $0x750] ss:$12 sps:$4 sm:$0xff]  }
 0x106   : > { %3399 = vmatmul.mubr.bf16.vlgmr.msra.gmra.mrb[0].mxu0 %v7786_v25  ;;  %v6845_v25 = vld [vmem:[%s9227_s1 + $0xb90] ss:$12 sps:$4 sm:$0xff]  }
 0x107   : > { %3410 = vmatpush1.bf16.msra.mxu0 %v6766_v6  ;;  %3441 = vmatprep.mubr.bf16.mxu0 %v7826_v38  ;;  %v6850_v38 = vld [vmem:[%s9227_s1 + $0xba8] ss:$12 sps:$4 sm:$0xff]  }
 0x108   : > { %3411 = vmatprep.subr.bf16.mxu0 %v6773_v54  ;;  %6264 = vmatprep.subr.bf16.mxu1 %v6845_v25  ;;  %v6847_v6 = vld [vmem:[%s9227_s1 + $0x768] ss:$12 sps:$4 sm:$0xff]   ;;  %v6852_v54 = vld [vmem:[%s9227_s1 + $0x780] ss:$12 sps:$4 sm:$0xff]  }
 0x109   : > { %6265 = vmatpush3.bf16.msra.mxu1 %v6846_v15  ;;  %v6869_v25 = vld [vmem:[%s9227_s1 + $0x7cc] ss:$12 sps:$4 sm:$0xff]   ;;  %v6882_v15 = vld [vmem:[%s9227_s1 + $0x7fc] ss:$12 sps:$4 sm:$0xff]  }
 0x10a   : > { %6266 = vmatprep.subr.bf16.mxu1 %v6850_v38  ;;  %v6880_v38 = vld [vmem:[%s9227_s1 + $0x7f8] ss:$12 sps:$4 sm:$0xff]  }
 0x10b   : > { %3412 = vmatpush1.bf16.msra.mxu0 %v6771_v11  ;;  %v6857_v11 = vld [vmem:[%s9227_s1 + $0x798] ss:$12 sps:$4 sm:$0xff]  }
 0x10c   : > { %3413 = vmatprep.subr.bf16.mxu0 %v6778_v12  ;;  %v6862_v12 = vld [vmem:[%s9227_s1 + $0x7b0] ss:$12 sps:$4 sm:$0xff]  }
 0x10d   : > { %6267 = vmatpush3.bf16.msra.mxu1 %v6851_v18  ;;  %v6892_v18 = vld [vmem:[%s9227_s1 + $0x82c] ss:$12 sps:$4 sm:$0xff]  }
 0x10e   : > { %6268 = vmatprep.subr.bf16.mxu1 %v6855_v19  ;;  %v6890_v19 = vld [vmem:[%s9227_s1 + $0x828] ss:$12 sps:$4 sm:$0xff]  }
 0x10f   : > { %3414 = vmatpush1.bf16.msra.mxu0 %v6776_v13  ;;  %v6867_v13 = vld [vmem:[%s9227_s1 + $0x7c8] ss:$12 sps:$4 sm:$0xff]  }
 0x110   : > { %3415 = vmatprep.subr.bf16.mxu0 %v6783_v14  ;;  %v6875_v14 = vld [vmem:[%s9227_s1 + $0x7e0] ss:$12 sps:$4 sm:$0xff]  }
 0x111   : > { %6269 = vmatpush3.bf16.msra.mxu1 %v6856_v22  ;;  %v6902_v22 = vld [vmem:[%s9227_s1 + $0x85c] ss:$12 sps:$4 sm:$0xff]  }
 0x112   : > { %6270 = vmatprep.subr.bf16.mxu1 %v6860_v23  ;;  %v6900_v23 = vld [vmem:[%s9227_s1 + $0x858] ss:$12 sps:$4 sm:$0xff]  }
 0x113   : > { %3416 = vmatpush1.bf16.msra.mxu0 %v6781_v16  ;;  %v6887_v16 = vld [vmem:[%s9227_s1 + $0x814] ss:$12 sps:$4 sm:$0xff]  }
 0x114   : > { %3417 = vmatprep.subr.bf16.mxu0 %v6791_v17  ;;  %v6885_v17 = vld [vmem:[%s9227_s1 + $0x810] ss:$12 sps:$4 sm:$0xff]  }
 0x115   : > { %6271 = vmatpush3.bf16.msra.mxu1 %v6861_v27  ;;  %v6912_v27 = vld [vmem:[%s9227_s1 + $0x88c] ss:$12 sps:$4 sm:$0xff]  }
 0x116   : > { %6272 = vmatprep.subr.bf16.mxu1 %v6865_v28  ;;  %v6910_v28 = vld [vmem:[%s9227_s1 + $0x888] ss:$12 sps:$4 sm:$0xff]  }
 0x117   : > { %3418 = vmatpush1.bf16.msra.mxu0 %v6789_v20  ;;  %v6897_v20 = vld [vmem:[%s9227_s1 + $0x844] ss:$12 sps:$4 sm:$0xff]  }
 0x118   : > { %3419 = vmatprep.subr.bf16.mxu0 %v6796_v21  ;;  %v6895_v21 = vld [vmem:[%s9227_s1 + $0x840] ss:$12 sps:$4 sm:$0xff]  }
 0x119   : > { %6273 = vmatpush3.bf16.msra.mxu1 %v6866_v31  ;;  %v6921_v31 = vld [vmem:[%s9227_s1 + $0x8bc] ss:$12 sps:$4 sm:$0xff]  }
 0x11a   : > { %6280 = vmatprep.subr.bf16.mxu1 %v6873_v32  ;;  %v6919_v32 = vld [vmem:[%s9227_s1 + $0x8b8] ss:$12 sps:$4 sm:$0xff]  }
 0x11b   : > { %3420 = vmatpush1.bf16.msra.mxu0 %v6794_v24  ;;  %v6907_v24 = vld [vmem:[%s9227_s1 + $0x874] ss:$12 sps:$4 sm:$0xff]  }
 0x11c   : > { %3421 = vmatprep.subr.bf16.mxu0 %v6801_v26  ;;  %3944 = vmatmul.mubr.bf16.vlgmr.msra.gmra.mrb[28].mxu1 %v6870_v34  ;;  %v6905_v26 = vld [vmem:[%s9227_s1 + $0x870] ss:$12 sps:$4 sm:$0xff]  }
 0x11d   : > { %6281 = vmatpush3.bf16.msra.mxu1 %v6874_v36  ;;  %3984 = vmatprep.mubr.bf16.mxu1 %v6915_v39  ;;  %v6922_v34 = vld [vmem:[%s9227_s1 + $0x8d0] ss:$12 sps:$4 sm:$0xff]   ;;  %v6925_v36 = vld [vmem:[%s9227_s1 + $0x8e8] ss:$12 sps:$4 sm:$0xff]   ;;  %v6928_v39 = vld [vmem:[%s9227_s1 + $0x900] ss:$12 sps:$4 sm:$0xff]  }
 0x11e   : > { %6282 = vmatprep.subr.bf16.mxu1 %v6878_v37  ;;  %v6930_v37 = vld [vmem:[%s9227_s1 + $0x904] ss:$12 sps:$4 sm:$0xff]  }
 0x11f   : > { %3422 = vmatpush1.bf16.msra.mxu0 %v6799_v29  ;;  %v6918_v29 = vld [vmem:[%s9227_s1 + $0x8a4] ss:$12 sps:$4 sm:$0xff]  }
 0x120   : > { %3423 = vmatprep.subr.bf16.mxu0 %v6806_v30  ;;  %v6916_v30 = vld [vmem:[%s9227_s1 + $0x8a0] ss:$12 sps:$4 sm:$0xff]  }
 0x121   : > { %6283 = vmatpush3.bf16.msra.mxu1 %v6879_v42  ;;  %v6931_v42 = vld [vmem:[%s9227_s1 + $0x918] ss:$12 sps:$4 sm:$0xff]  }
 0x122   : > { %6284 = vmatprep.subr.bf16.mxu1 %v6883_v43  ;;  %v6936_v43 = vld [vmem:[%s9227_s1 + $0x934] ss:$12 sps:$4 sm:$0xff]  }
 0x123   : > { %3424 = vmatpush1.bf16.msra.mxu0 %v6804_v33  ;;  %v6924_v33 = vld [vmem:[%s9227_s1 + $0x8d4] ss:$12 sps:$4 sm:$0xff]  }
 0x124   : > { %3425 = vmatprep.subr.bf16.mxu0 %v6811_v35  ;;  %v6927_v35 = vld [vmem:[%s9227_s1 + $0x8ec] ss:$12 sps:$4 sm:$0xff]  }
 0x125   : > { %6285 = vmatpush3.bf16.msra.mxu1 %v6884_v46  ;;  %v6939_v46 = vld [vmem:[%s9227_s1 + $0x94c] ss:$12 sps:$4 sm:$0xff]  }
 0x126   : > { %6286 = vmatprep.subr.bf16.mxu1 %v6888_v47  ;;  %v6937_v47 = vld [vmem:[%s9227_s1 + $0x948] ss:$12 sps:$4 sm:$0xff]  }
 0x127   : > { %3426 = vmatpush1.bf16.msra.mxu0 %v6809_v40  ;;  %v6933_v40 = vld [vmem:[%s9227_s1 + $0x91c] ss:$12 sps:$4 sm:$0xff]  }
 0x128   : > { %3427 = vmatprep.subr.bf16.mxu0 %v6816_v41  ;;  %v7265_v41 = vld [vmem:[%s7364_s24 + $0x28] ss:$72 sps:$4 sm:$0xff]  }
 0x129   : > { %6287 = vmatpush3.bf16.msra.mxu1 %v6889_v50  ;;  %v6945_v50 = vld [vmem:[%s9227_s1 + $0x97c] ss:$12 sps:$4 sm:$0xff]  }
 0x12a   : > { %6288 = vmatprep.subr.bf16.mxu1 %v6893_v51  ;;  %v6943_v51 = vld [vmem:[%s9227_s1 + $0x978] ss:$12 sps:$4 sm:$0xff]  }
 0x12b   : > { %3428 = vmatpush1.bf16.msra.mxu0 %v6814_v44  ;;  %v7266_v44 = vld [vmem:[%s7364_s24 + $0x34] ss:$72 sps:$4 sm:$0xff]  }
 0x12c   : > { %3429 = vmatprep.subr.bf16.mxu0 %v6821_v45  ;;  %v6934_v45 = vld [vmem:[%s9227_s1 + $0x930] ss:$12 sps:$4 sm:$0xff]  }
 0x12d   : > { %6289 = vmatpush3.bf16.msra.mxu1 %v6894_v55  ;;  %v6951_v55 = vld [vmem:[%s9227_s1 + $0x9ac] ss:$12 sps:$4 sm:$0xff]  }
 0x12e   : > { %6290 = vmatprep.subr.bf16.mxu1 %v6898_v56  ;;  %v6949_v56 = vld [vmem:[%s9227_s1 + $0x9a8] ss:$12 sps:$4 sm:$0xff]  }
 0x12f   : > { %3430 = vmatpush1.bf16.msra.mxu0 %v6819_v48  ;;  %v6942_v48 = vld [vmem:[%s9227_s1 + $0x964] ss:$12 sps:$4 sm:$0xff]  }
 0x130   : > { %3431 = vmatprep.subr.bf16.mxu0 %v6826_v49  ;;  %v6940_v49 = vld [vmem:[%s9227_s1 + $0x960] ss:$12 sps:$4 sm:$0xff]  }
 0x131   : > { %6291 = vmatpush3.bf16.msra.mxu1 %v6899_v59  ;;  %v6957_v59 = vld [vmem:[%s9227_s1 + $0x9dc] ss:$12 sps:$4 sm:$0xff]  }
 0x132   : > { %6292 = vmatprep.subr.bf16.mxu1 %v6903_v60  ;;  %v6120_v60 = vpop.f32.mrb[0].mxu1 }
 0x133   : > { %3432 = vmatpush1.bf16.msra.mxu0 %v6824_v52  ;;  %v6948_v52 = vld [vmem:[%s9227_s1 + $0x994] ss:$12 sps:$4 sm:$0xff]  }
 0x134   : > { %3433 = vmatprep.subr.bf16.mxu0 %v6834_v53  ;;  %v6946_v53 = vld [vmem:[%s9227_s1 + $0x990] ss:$12 sps:$4 sm:$0xff]  }
 0x135   : > { %6293 = vmatpush3.bf16.msra.mxu1 %v6904_v63  ;;  %v6121_v63 = vpop.f32.mrb[1].mxu1 }
 0x136   : > { %6294 = vmatprep.subr.bf16.mxu1 %v6908_v0  ;;  %v6960_v0 = vld [vmem:[%s9227_s1 + $0x9f4] ss:$12 sps:$4 sm:$0xff]  }
 0x137   : > { %3434 = vmatpush1.bf16.msra.mxu0 %v6832_v57  ;;  %v6954_v57 = vld [vmem:[%s9227_s1 + $0x9c4] ss:$12 sps:$4 sm:$0xff]  }
 0x138   : > { %3435 = vmatprep.subr.bf16.mxu0 %v6839_v58  ;;  %v6952_v58 = vld [vmem:[%s9227_s1 + $0x9c0] ss:$12 sps:$4 sm:$0xff]  }
 0x139   : > { %6295 = vmatpush3.bf16.msra.mxu1 %v6909_v3 }
 0x13b   : > { %3436 = vmatpush1.bf16.msra.mxu0 %v6837_v61  ;;  %v6955_v61 = vld [vmem:[%s9227_s1 + $0x9d8] ss:$12 sps:$4 sm:$0xff]  }
 0x13c   : > { %3437 = vmatprep.subr.bf16.mxu0 %v6844_v62  ;;  %3985 = vmatmul.mubr.bf16.vlgmr.msra.gmra.mrb[32].mxu1 %v6913_v4  ;;  %v831_v62 = vlaneseq }
 0x13e   : > { %v8446_v3 = vshrl.u32 %v831_v62, 7 }
 0x13f   : > { %3438 = vmatpush1.bf16.msra.mxu0 %v6842_v1  ;;  %v6122_v1 = vadd.f32 %v6121_v63, %v6120_v60  ;;  %v6973_v60 = vld [vmem:[%s9227_s1 + $0xa68] ss:$12 sps:$4 sm:$0xff]   ;;  %v6976_v63 = vld [vmem:[%s9227_s1 + $0xa80] ss:$12 sps:$4 sm:$0xff]  }
 0x140   : > { %3439 = vmatprep.subr.bf16.mxu0 %v6849_v2  ;;  %v6123_v2 = vpop.f32.mrb[2].mxu1 }
 0x141   : > { %v6124_v4 = vpop.f32.mrb[3].mxu1 }
 0x143   : > { %3440 = vmatpush1.bf16.msra.mxu0 %v6847_v6  ;;  %v236_v6 = vld [vmem:[%s9230_s4 + $0x10] sm:$0xff] }
 0x144   : > { %3452 = vmatprep.subr.bf16.mxu0 %v6854_v7  ;;  %v6125_v7 = vadd.f32 %v6124_v4, %v6123_v2  ;;  %v7072_v2 = vld [vmem:[%s9228_s2] ss:$12 sps:$4 sm:$0xff]   ;;  %v7074_v4 = vld [vmem:[%s9228_s2 + $0x4] ss:$12 sps:$4 sm:$0xff]  }
 0x145   : > { %4494 = vmatprep.subr.bf16.mxu1 %v7074_v4 }
 0x146   : > { %3442 = vmatmul.mubr.bf16.vlgmr.msra.gmra.mrb[0].mxu0 %v7264_v10  ;;  %v8455_v10 = vsub.s32 0, %v8446_v3  ;;  %4495 = vmatpush1.bf16.msra.mxu1 %v7072_v2  ;;  %v7015_v2 = vld [vmem:[%s9227_s1 + $0xbb8] ss:$12 sps:$4 sm:$0xff]  }
 0x147   : > { %3453 = vmatpush1.bf16.msra.mxu0 %v6852_v54  ;;  %3484 = vmatprep.mubr.bf16.mxu0 %v7916_v5  ;;  %v6877_v5 = vld [vmem:[%s9227_s1 + $0x7e4] ss:$12 sps:$4 sm:$0xff]   ;;  %v6142_v54 = vpop.f32.mrb[4].mxu1 }
 0x148   : > { %3454 = vmatprep.subr.bf16.mxu0 %v6859_v9  ;;  %v6958_v9 = vld [vmem:[%s9227_s1 + $0x9f0] ss:$12 sps:$4 sm:$0xff]  }
 0x14b   : > { %3455 = vmatpush1.bf16.msra.mxu0 %v6857_v11  ;;  %v6143_v11 = vpop.f32.mrb[5].mxu1 }
 0x14c   : > { %3456 = vmatprep.subr.bf16.mxu0 %v6864_v8  ;;  %v6963_v8 = vld [vmem:[%s9227_s1 + $0xa0c] ss:$12 sps:$4 sm:$0xff]  }
 0x14f   : > { %3457 = vmatpush1.bf16.msra.mxu0 %v6862_v12  ;;  %v6144_v12 = vadd.f32 %v6143_v11, %v6142_v54  ;;  %v7077_v54 = vld [vmem:[%s9228_s2 + $0x1c] ss:$12 sps:$4 sm:$0xff]   ;;  %v7075_v11 = vld [vmem:[%s9228_s2 + $0x18] ss:$12 sps:$4 sm:$0xff]  }
 0x150   : > { %3458 = vmatprep.subr.bf16.mxu0 %v6869_v25  ;;  %v6145_v25 = vpop.f32.mrb[6].mxu1  ;;  %4496 = vmatprep.subr.bf16.mxu1 %v7077_v54 }
 0x151   : > { %4497 = vmatpush1.bf16.msra.mxu1 %v7075_v11 }
 0x153   : > { %3459 = vmatpush1.bf16.msra.mxu0 %v6867_v13  ;;  %v842_v13 = vrot.slane %v236_v6, %v8455_v10  ;;  %v6979_v6 = vld [vmem:[%s9227_s1 + $0xa98] ss:$12 sps:$4 sm:$0xff]  }
 0x154   : > { %3460 = vmatprep.subr.bf16.mxu0 %v6877_v5  ;;  %v6146_v5 = vpop.f32.mrb[7].mxu1 }
 0x157   : > { %3461 = vmatpush1.bf16.msra.mxu0 %v6875_v14  ;;  %v6147_v14 = vadd.f32 %v6146_v5, %v6145_v25  ;;  %v6987_v25 = vld [vmem:[%s9227_s1 + $0xacc] ss:$12 sps:$4 sm:$0xff]  }
 0x158   : > { %3462 = vmatprep.subr.bf16.mxu0 %v6882_v15  ;;  %v6164_v15 = vpop.f32.mrb[8].mxu1  ;;  %v7083_v5 = vld [vmem:[%s9228_s2 + $0x4c] ss:$12 sps:$4 sm:$0xff]  }
 0x15b   : > { %3463 = vmatpush1.bf16.msra.mxu0 %v6880_v38  ;;  %v6961_v38 = vld [vmem:[%s9227_s1 + $0xa08] ss:$12 sps:$4 sm:$0xff]  }
 0x15c   : > { %3464 = vmatprep.subr.bf16.mxu0 %v6887_v16  ;;  %v3659_v16 = vadd.f32 %v6122_v1, %v842_v13  ;;  %v7267_v1 = vld [vmem:[%s7364_s24 + $0x30] ss:$72 sps:$4 sm:$0xff]  }
 0x15f   : > { %3465 = vmatpush1.bf16.msra.mxu0 %v6885_v17  ;;  %v3662_v17 = vadd.f32 %v6125_v7, %v842_v13  ;;  %v7268_v7 = vld [vmem:[%s7364_s24 + $0x3c] ss:$72 sps:$4 sm:$0xff]  }
 0x160   : > { %3466 = vmatprep.subr.bf16.mxu0 %v6892_v18  ;;  %v6165_v18 = vpop.f32.mrb[9].mxu1  ;;  %v7078_v13 = vld [vmem:[%s9228_s2 + $0x30] ss:$12 sps:$4 sm:$0xff]  }
 0x163   : > { %3467 = vmatpush1.bf16.msra.mxu0 %v6890_v19  ;;  %v6966_v19 = vld [vmem:[%s9227_s1 + $0xa24] ss:$12 sps:$4 sm:$0xff]  }
 0x164   : > { %3468 = vmatprep.subr.bf16.mxu0 %v6897_v20  ;;  %v6166_v20 = vadd.f32 %v6165_v18, %v6164_v15  ;;  %v6990_v15 = vld [vmem:[%s9227_s1 + $0xae4] ss:$12 sps:$4 sm:$0xff]   ;;  %v6993_v18 = vld [vmem:[%s9227_s1 + $0xafc] ss:$12 sps:$4 sm:$0xff]  }
 0x167   : > { %3469 = vmatpush1.bf16.msra.mxu0 %v6895_v21  ;;  %v6167_v21 = vpop.f32.mrb[10].mxu1 }
 0x168   : > { %3470 = vmatprep.subr.bf16.mxu0 %v6902_v22  ;;  %v3700_v22 = vadd.f32 %v6144_v12, %v3659_v16  ;;  %v6982_v12 = vld [vmem:[%s9227_s1 + $0xab0] ss:$12 sps:$4 sm:$0xff]  }
 0x169   : > { %v7086_v16 = vld [vmem:[%s9228_s2 + $0x64] ss:$12 sps:$4 sm:$0xff]  }
 0x16b   : > { %3471 = vmatpush1.bf16.msra.mxu0 %v6900_v23  ;;  %v3703_v23 = vadd.f32 %v6147_v14, %v3662_v17  ;;  %v6985_v14 = vld [vmem:[%s9227_s1 + $0xac8] ss:$12 sps:$4 sm:$0xff]   ;;  %v6988_v17 = vld [vmem:[%s9227_s1 + $0xae0] ss:$12 sps:$4 sm:$0xff]  }
 0x16c   : > { %3472 = vmatprep.subr.bf16.mxu0 %v6907_v24  ;;  %v6168_v24 = vpop.f32.mrb[11].mxu1 }
 0x16f   : > { %3473 = vmatpush1.bf16.msra.mxu0 %v6905_v26  ;;  %v6169_v26 = vadd.f32 %v6168_v24, %v6167_v21 }
 0x170   : > { %3474 = vmatprep.subr.bf16.mxu0 %v6912_v27  ;;  %v6186_v27 = vpop.f32.mrb[12].mxu1 }
 0x173   : > { %3475 = vmatpush1.bf16.msra.mxu0 %v6910_v28  ;;  %v6964_v28 = vld [vmem:[%s9227_s1 + $0xa20] ss:$12 sps:$4 sm:$0xff]  }
 0x174   : > { %3476 = vmatprep.subr.bf16.mxu0 %v6918_v29  ;;  %v3741_v29 = vadd.f32 %v6166_v20, %v3700_v22  ;;  %v7084_v20 = vld [vmem:[%s9228_s2 + $0x60] ss:$12 sps:$4 sm:$0xff]   ;;  %v7089_v22 = vld [vmem:[%s9228_s2 + $0x7c] ss:$12 sps:$4 sm:$0xff]  }
 0x177   : > { %3477 = vmatpush1.bf16.msra.mxu0 %v6916_v30  ;;  %v6187_v30 = vpop.f32.mrb[13].mxu1 }
 0x178   : > { %3478 = vmatprep.subr.bf16.mxu0 %v6921_v31  ;;  %v6969_v31 = vld [vmem:[%s9227_s1 + $0xa3c] ss:$12 sps:$4 sm:$0xff]  }
 0x17b   : > { %3479 = vmatpush1.bf16.msra.mxu0 %v6919_v32  ;;  %v3744_v32 = vadd.f32 %v6169_v26, %v3703_v23  ;;  %v6991_v23 = vld [vmem:[%s9227_s1 + $0xaf8] ss:$12 sps:$4 sm:$0xff]  }
 0x17c   : > { %3480 = vmatprep.subr.bf16.mxu0 %v6924_v33  ;;  %v6188_v33 = vadd.f32 %v6187_v30, %v6186_v27  ;;  %v6996_v27 = vld [vmem:[%s9227_s1 + $0xb14] ss:$12 sps:$4 sm:$0xff]  }
 0x17f   : > { %3481 = vmatpush1.bf16.msra.mxu0 %v6922_v34  ;;  %v6189_v34 = vpop.f32.mrb[14].mxu1 }
 0x180   : > { %3482 = vmatprep.subr.bf16.mxu0 %v6927_v35  ;;  %v6190_v35 = vpop.f32.mrb[15].mxu1 }
 0x183   : > { %3483 = vmatpush1.bf16.msra.mxu0 %v6925_v36  ;;  %v3782_v36 = vadd.f32 %v6188_v33, %v3741_v29  ;;  %v6994_v33 = vld [vmem:[%s9227_s1 + $0xb10] ss:$12 sps:$4 sm:$0xff]  }
 0x184   : > { %3495 = vmatprep.subr.bf16.mxu0 %v6930_v37  ;;  %v6191_v37 = vadd.f32 %v6190_v35, %v6189_v34  ;;  %v6999_v35 = vld [vmem:[%s9227_s1 + $0xb2c] ss:$12 sps:$4 sm:$0xff]  }
 0x186   : > { %3485 = vmatmul.mubr.bf16.vlgmr.msra.gmra.mrb[0].mxu0 %v7265_v41 }
 0x187   : > { %3496 = vmatpush1.bf16.msra.mxu0 %v6928_v39  ;;  %3527 = vmatprep.mubr.bf16.mxu0 %v7266_v44  ;;  %v6208_v39 = vpop.f32.mrb[16].mxu1 }
 0x188   : > { %3497 = vmatprep.subr.bf16.mxu0 %v6933_v40  ;;  %v6967_v40 = vld [vmem:[%s9227_s1 + $0xa38] ss:$12 sps:$4 sm:$0xff]   ;;  %v6209_v41 = vpop.f32.mrb[17].mxu1 }
 0x189   : > { %v6210_v44 = vadd.f32 %v6209_v41, %v6208_v39  ;;  %v6997_v39 = vld [vmem:[%s9227_s1 + $0xb28] ss:$12 sps:$4 sm:$0xff]  }
 0x18a   : > { %v7093_v41 = vld [vmem:[%s9228_s2 + $0xa8] ss:$12 sps:$4 sm:$0xff]  }
 0x18b   : > { %3498 = vmatpush1.bf16.msra.mxu0 %v6931_v42  ;;  %v6972_v42 = vld [vmem:[%s9227_s1 + $0xa54] ss:$12 sps:$4 sm:$0xff]  }
 0x18c   : > { %3499 = vmatprep.subr.bf16.mxu0 %v6936_v43  ;;  %v3785_v43 = vadd.f32 %v6191_v37, %v3744_v32  ;;  %v7092_v32 = vld [vmem:[%s9228_s2 + $0x94] ss:$12 sps:$4 sm:$0xff]   ;;  %v7095_v37 = vld [vmem:[%s9228_s2 + $0xac] ss:$12 sps:$4 sm:$0xff]  }
 0x18f   : > { %3500 = vmatpush1.bf16.msra.mxu0 %v6934_v45  ;;  %v6211_v45 = vpop.f32.mrb[18].mxu1 }
 0x190   : > { %3501 = vmatprep.subr.bf16.mxu0 %v6939_v46  ;;  %v6212_v46 = vpop.f32.mrb[19].mxu1 }
 0x193   : > { %3502 = vmatpush1.bf16.msra.mxu0 %v6937_v47  ;;  %v3823_v47 = vadd.f32 %v6210_v44, %v3782_v36  ;;  %v7090_v36 = vld [vmem:[%s9228_s2 + $0x90] ss:$12 sps:$4 sm:$0xff]  }
 0x194   : > { %3503 = vmatprep.subr.bf16.mxu0 %v6942_v48  ;;  %v6213_v48 = vadd.f32 %v6212_v46, %v6211_v45  ;;  %v7005_v44 = vld [vmem:[%s9227_s1 + $0xb5c] ss:$12 sps:$4 sm:$0xff]   ;;  %v7096_v45 = vld [vmem:[%s9228_s2 + $0xc0] ss:$12 sps:$4 sm:$0xff]  }
 0x195   : > { %v7101_v46 = vld [vmem:[%s9228_s2 + $0xdc] ss:$12 sps:$4 sm:$0xff]  }
 0x197   : > { %3504 = vmatpush1.bf16.msra.mxu0 %v6940_v49 }
 0x198   : > { %3505 = vmatprep.subr.bf16.mxu0 %v6945_v50  ;;  %v6970_v50 = vld [vmem:[%s9227_s1 + $0xa50] ss:$12 sps:$4 sm:$0xff]  }
 0x19b   : > { %3506 = vmatpush1.bf16.msra.mxu0 %v6943_v51 }
 0x19c   : > { %3507 = vmatprep.subr.bf16.mxu0 %v6948_v52  ;;  %v6975_v52 = vld [vmem:[%s9227_s1 + $0xa6c] ss:$12 sps:$4 sm:$0xff]  }
 0x19f   : > { %3508 = vmatpush1.bf16.msra.mxu0 %v6946_v53  ;;  %v6230_v49 = vpop.f32.mrb[20].mxu1  ;;  %v3826_v53 = vadd.f32 %v6213_v48, %v3785_v43  ;;  %v7000_v43 = vld [vmem:[%s9227_s1 + $0xb40] ss:$12 sps:$4 sm:$0xff]  }
 0x1a0   : > { %3509 = vmatprep.subr.bf16.mxu0 %v6951_v55  ;;  %v6231_v51 = vpop.f32.mrb[21].mxu1  ;;  %v7008_v48 = vld [vmem:[%s9227_s1 + $0xb74] ss:$12 sps:$4 sm:$0xff]  }
 0x1a1   : > { %v6232_v55 = vadd.f32 %v6231_v51, %v6230_v49  ;;  %v7099_v49 = vld [vmem:[%s9228_s2 + $0xd8] ss:$12 sps:$4 sm:$0xff]   ;;  %v7006_v51 = vld [vmem:[%s9227_s1 + $0xb70] ss:$12 sps:$4 sm:$0xff]  }
 0x1a3   : > { %3510 = vmatpush1.bf16.msra.mxu0 %v6949_v56  ;;  %v6233_v56 = vpop.f32.mrb[22].mxu1 }
 0x1a4   : > { %3511 = vmatprep.subr.bf16.mxu0 %v6954_v57  ;;  %v6234_v57 = vpop.f32.mrb[23].mxu1 }
 0x1a7   : > { %3512 = vmatpush1.bf16.msra.mxu0 %v6952_v58  ;;  %v3864_v58 = vadd.f32 %v6232_v55, %v3823_v47  ;;  %v7003_v47 = vld [vmem:[%s9227_s1 + $0xb58] ss:$12 sps:$4 sm:$0xff]  }
 0x1a8   : > { %3513 = vmatprep.subr.bf16.mxu0 %v6957_v59  ;;  %v6235_v59 = vadd.f32 %v6234_v57, %v6233_v56  ;;  %v7107_v55 = vld [vmem:[%s9228_s2 + $0x10c] ss:$12 sps:$4 sm:$0xff]   ;;  %v7009_v56 = vld [vmem:[%s9227_s1 + $0xb88] ss:$12 sps:$4 sm:$0xff]   ;;  %v7014_v57 = vld [vmem:[%s9227_s1 + $0xba4] ss:$12 sps:$4 sm:$0xff]  }
 0x1aa   : > { %v3867_v62 = vadd.f32 %v6235_v59, %v3826_v53  ;;  %v7102_v53 = vld [vmem:[%s9228_s2 + $0xf0] ss:$12 sps:$4 sm:$0xff]  }
 0x1ab   : > { %3514 = vmatpush1.bf16.msra.mxu0 %v6955_v61  ;;  %v6978_v61 = vld [vmem:[%s9227_s1 + $0xa84] ss:$12 sps:$4 sm:$0xff]  }
 0x1ac   : > { %3515 = vmatprep.subr.bf16.mxu0 %v6960_v0  ;;  %v6981_v0 = vld [vmem:[%s9227_s1 + $0xa9c] ss:$12 sps:$4 sm:$0xff]   ;;  %v7110_v59 = vld [vmem:[%s9228_s2 + $0x124] ss:$12 sps:$4 sm:$0xff]  }
 0x1af   : > { %3516 = vmatpush1.bf16.msra.mxu0 %v6958_v9  ;;  %v6984_v9 = vld [vmem:[%s9227_s1 + $0xab4] ss:$12 sps:$4 sm:$0xff]  }
 0x1b0   : > { %3517 = vmatprep.subr.bf16.mxu0 %v6963_v8  ;;  %v7080_v8 = vld [vmem:[%s9228_s2 + $0x34] ss:$12 sps:$4 sm:$0xff]  }
 0x1b1   : > { %4498 = vmatprep.subr.bf16.mxu1 %v7080_v8  ;;  %v7111_v8 = vld [vmem:[%s9228_s2 + $0x138] ss:$12 sps:$4 sm:$0xff]  }
 0x1b2   : > { %4499 = vmatpush1.bf16.msra.mxu1 %v7078_v13  ;;  %v7023_v13 = vld [vmem:[%s9227_s1 + $0xbec] ss:$12 sps:$4 sm:$0xff]  }
 0x1b3   : > { %3518 = vmatpush1.bf16.msra.mxu0 %v6961_v38  ;;  %v7081_v38 = vld [vmem:[%s9228_s2 + $0x48] ss:$12 sps:$4 sm:$0xff]   ;;  %4500 = vmatprep.subr.bf16.mxu1 %v7083_v5 }
 0x1b4   : > { %3519 = vmatprep.subr.bf16.mxu0 %v6966_v19  ;;  %v7021_v5 = vld [vmem:[%s9227_s1 + $0xbe8] ss:$12 sps:$4 sm:$0xff]  }
 0x1b6   : > { %4501 = vmatpush1.bf16.msra.mxu1 %v7081_v38  ;;  %v7029_v38 = vld [vmem:[%s9227_s1 + $0xc1c] ss:$12 sps:$4 sm:$0xff]  }
 0x1b7   : > { %3520 = vmatpush1.bf16.msra.mxu0 %v6964_v28  ;;  %4502 = vmatprep.subr.bf16.mxu1 %v7086_v16  ;;  %v7269_v16 = vld [vmem:[%s7364_s24 + $0x38] ss:$72 sps:$4 sm:$0xff]  }
 0x1b8   : > { %3521 = vmatprep.subr.bf16.mxu0 %v6969_v31  ;;  %v7087_v31 = vld [vmem:[%s9228_s2 + $0x78] ss:$12 sps:$4 sm:$0xff]  }
 0x1ba   : > { %4503 = vmatpush1.bf16.msra.mxu1 %v7084_v20  ;;  %v7030_v20 = vld [vmem:[%s9227_s1 + $0xc30] ss:$12 sps:$4 sm:$0xff]  }
 0x1bb   : > { %3522 = vmatpush1.bf16.msra.mxu0 %v6967_v40  ;;  %4504 = vmatprep.subr.bf16.mxu1 %v7089_v22  ;;  %v7002_v40 = vld [vmem:[%s9227_s1 + $0xb44] ss:$12 sps:$4 sm:$0xff]   ;;  %v7033_v22 = vld [vmem:[%s9227_s1 + $0xc48] ss:$12 sps:$4 sm:$0xff]  }
 0x1bc   : > { %3523 = vmatprep.subr.bf16.mxu0 %v6972_v42  ;;  %v7098_v42 = vld [vmem:[%s9228_s2 + $0xc4] ss:$12 sps:$4 sm:$0xff]  }
 0x1be   : > { %4505 = vmatpush1.bf16.msra.mxu1 %v7087_v31 }
 0x1bf   : > { %3524 = vmatpush1.bf16.msra.mxu0 %v6970_v50  ;;  %v6252_v19 = vpop.f32.mrb[24].mxu1  ;;  %4506 = vmatprep.subr.bf16.mxu1 %v7092_v32  ;;  %v7104_v50 = vld [vmem:[%s9228_s2 + $0xf4] ss:$12 sps:$4 sm:$0xff]  }
 0x1c0   : > { %3525 = vmatprep.subr.bf16.mxu0 %v6975_v52  ;;  %v6253_v21 = vpop.f32.mrb[25].mxu1  ;;  %v7011_v52 = vld [vmem:[%s9227_s1 + $0xb8c] ss:$12 sps:$4 sm:$0xff]   ;;  %v7044_v32 = vld [vmem:[%s9227_s1 + $0xc94] ss:$12 sps:$4 sm:$0xff]  }
 0x1c1   : > { %v6254_v24 = vadd.f32 %v6253_v21, %v6252_v19  ;;  %v6255_v26 = vpop.f32.mrb[26].mxu1  ;;  %v7032_v19 = vld [vmem:[%s9227_s1 + $0xc34] ss:$12 sps:$4 sm:$0xff]   ;;  %v7035_v21 = vld [vmem:[%s9227_s1 + $0xc4c] ss:$12 sps:$4 sm:$0xff]  }
 0x1c2   : > { %v6256_v28 = vpop.f32.mrb[27].mxu1  ;;  %4507 = vmatpush1.bf16.msra.mxu1 %v7090_v36  ;;  %v7042_v36 = vld [vmem:[%s9227_s1 + $0xc90] ss:$12 sps:$4 sm:$0xff]  }
 0x1c3   : > { %3526 = vmatpush1.bf16.msra.mxu0 %v6973_v60  ;;  %v8562_v29 = vadd.f32 %v6254_v24, %v3864_v58  ;;  %v6257_v30 = vadd.f32 %v6256_v28, %v6255_v26  ;;  %4508 = vmatprep.subr.bf16.mxu1 %v7095_v37  ;;  %v7105_v58 = vld [vmem:[%s9228_s2 + $0x108] ss:$12 sps:$4 sm:$0xff]   ;;  %v7012_v60 = vld [vmem:[%s9227_s1 + $0xba0] ss:$12 sps:$4 sm:$0xff]  }
 0x1c4   : > { %3538 = vmatprep.subr.bf16.mxu0 %v6978_v61  ;;  %v7017_v61 = vld [vmem:[%s9227_s1 + $0xbbc] ss:$12 sps:$4 sm:$0xff]   ;;  %v7036_v24 = vld [vmem:[%s9227_s1 + $0xc60] ss:$12 sps:$4 sm:$0xff]  }
 0x1c5   : > { %v8573_v34 = vadd.f32 %v6257_v30, %v3867_v62  ;;  %v7041_v26 = vld [vmem:[%s9227_s1 + $0xc7c] ss:$12 sps:$4 sm:$0xff]  }
 0x1c6   : > { %3528 = vmatmul.mubr.bf16.vlgmr.msra.gmra.mrb[0].mxu0 %v7267_v1  ;;  %4509 = vmatpush1.bf16.msra.mxu1 %v7093_v41  ;;  %v7113_v1 = vld [vmem:[%s9228_s2 + $0x13c] ss:$12 sps:$4 sm:$0xff]  }
 0x1c7   : > { %3539 = vmatpush1.bf16.msra.mxu0 %v6976_v63  ;;  %3570 = vmatprep.mubr.bf16.mxu0 %v7268_v7  ;;  %v7108_v63 = vld [vmem:[%s9228_s2 + $0x120] ss:$12 sps:$4 sm:$0xff]  }
 0x1c8   : > { %3540 = vmatprep.subr.bf16.mxu0 %v6981_v0  ;;  %4510 = vmatprep.subr.bf16.mxu1 %v7098_v42  ;;  %v7020_v7 = vld [vmem:[%s9227_s1 + $0xbd4] ss:$12 sps:$4 sm:$0xff]  }
 0x1c9   : > { %v7045_v42 = vld [vmem:[%s9227_s1 + $0xca8] ss:$12 sps:$4 sm:$0xff]  }
 0x1ca   : > { %4511 = vmatpush1.bf16.msra.mxu1 %v7096_v45  ;;  %v7048_v45 = vld [vmem:[%s9227_s1 + $0xcc0] ss:$12 sps:$4 sm:$0xff]  }
 0x1cb   : > { %3541 = vmatpush1.bf16.msra.mxu0 %v6979_v6  ;;  %4512 = vmatprep.subr.bf16.mxu1 %v7101_v46  ;;  %v7053_v46 = vld [vmem:[%s9227_s1 + $0xcdc] ss:$12 sps:$4 sm:$0xff]  }
 0x1cc   : > { %3542 = vmatprep.subr.bf16.mxu0 %v6984_v9 }
 0x1ce   : > { %4513 = vmatpush1.bf16.msra.mxu1 %v7099_v49  ;;  %v7054_v49 = vld [vmem:[%s9227_s1 + $0xcf0] ss:$12 sps:$4 sm:$0xff]  }
 0x1cf   : > { %3543 = vmatpush1.bf16.msra.mxu0 %v6982_v12  ;;  %4514 = vmatprep.subr.bf16.mxu1 %v7104_v50  ;;  %v7018_v12 = vld [vmem:[%s9227_s1 + $0xbd0] ss:$12 sps:$4 sm:$0xff]   ;;  %v7059_v50 = vld [vmem:[%s9227_s1 + $0xd0c] ss:$12 sps:$4 sm:$0xff]  }
 0x1d0   : > { %3544 = vmatprep.subr.bf16.mxu0 %v6987_v25 }
 0x1d2   : > { %4515 = vmatpush1.bf16.msra.mxu1 %v7102_v53  ;;  %v7060_v53 = vld [vmem:[%s9227_s1 + $0xd20] ss:$12 sps:$4 sm:$0xff]  }
 0x1d3   : > { %3545 = vmatpush1.bf16.msra.mxu0 %v6985_v14  ;;  %4516 = vmatprep.subr.bf16.mxu1 %v7107_v55  ;;  %v7026_v14 = vld [vmem:[%s9227_s1 + $0xc04] ss:$12 sps:$4 sm:$0xff]   ;;  %v7065_v55 = vld [vmem:[%s9227_s1 + $0xd3c] ss:$12 sps:$4 sm:$0xff]  }
 0x1d4   : > { %3546 = vmatprep.subr.bf16.mxu0 %v6990_v15  ;;  %v7024_v15 = vld [vmem:[%s9227_s1 + $0xc00] ss:$12 sps:$4 sm:$0xff]  }
 0x1d6   : > { %4517 = vmatpush1.bf16.msra.mxu1 %v7105_v58  ;;  %v7066_v58 = vld [vmem:[%s9227_s1 + $0xd50] ss:$12 sps:$4 sm:$0xff]  }
 0x1d7   : > { %3547 = vmatpush1.bf16.msra.mxu0 %v6988_v17  ;;  %4518 = vmatprep.subr.bf16.mxu1 %v7110_v59  ;;  %v7027_v17 = vld [vmem:[%s9227_s1 + $0xc18] ss:$12 sps:$4 sm:$0xff]  }
 0x1d8   : > { %3548 = vmatprep.subr.bf16.mxu0 %v6993_v18  ;;  %v7270_v18 = vld [vmem:[%s7364_s24 + $0x44] ss:$72 sps:$4 sm:$0xff]  }
 0x1d9   : > { %v7071_v59 = vld [vmem:[%s9227_s1 + $0xd6c] ss:$12 sps:$4 sm:$0xff]  }
 0x1da   : > { %4519 = vmatpush1.bf16.msra.mxu1 %v7108_v63  ;;  %v7114_v63 = vld [vmem:[%s9228_s2 + $0x150] ss:$12 sps:$4 sm:$0xff]  }
 0x1db   : > { %3549 = vmatpush1.bf16.msra.mxu0 %v6991_v23  ;;  %4520 = vmatprep.subr.bf16.mxu1 %v7113_v1  ;;  %v7038_v23 = vld [vmem:[%s9227_s1 + $0xc64] ss:$12 sps:$4 sm:$0xff]   ;;  %v7117_v1 = vld [vmem:[%s9228_s2 + $0x168] ss:$12 sps:$4 sm:$0xff]  }
 0x1dc   : > { %3550 = vmatprep.subr.bf16.mxu0 %v6996_v27 }
 0x1de   : > { %4521 = vmatpush1.bf16.msra.mxu1 %v7111_v8 }
 0x1df   : > { %3551 = vmatpush1.bf16.msra.mxu0 %v6994_v33 }
 0x1e0   : > { %3552 = vmatprep.subr.bf16.mxu0 %v6999_v35 }
 0x1e3   : > { %3553 = vmatpush1.bf16.msra.mxu0 %v6997_v39 }
 0x1e4   : > { %3554 = vmatprep.subr.bf16.mxu0 %v7002_v40  ;;  %v7047_v40 = vld [vmem:[%s9227_s1 + $0xcac] ss:$12 sps:$4 sm:$0xff]  }
 0x1e7   : > { %3555 = vmatpush1.bf16.msra.mxu0 %v7000_v43 }
 0x1e8   : > { %3556 = vmatprep.subr.bf16.mxu0 %v7005_v44  ;;  %v7050_v44 = vld [vmem:[%s9227_s1 + $0xcc4] ss:$12 sps:$4 sm:$0xff]  }
 0x1eb   : > { %3557 = vmatpush1.bf16.msra.mxu0 %v7003_v47  ;;  %v7051_v47 = vld [vmem:[%s9227_s1 + $0xcd8] ss:$12 sps:$4 sm:$0xff]  }
 0x1ec   : > { %3558 = vmatprep.subr.bf16.mxu0 %v7008_v48  ;;  %v7056_v48 = vld [vmem:[%s9227_s1 + $0xcf4] ss:$12 sps:$4 sm:$0xff]  }
 0x1ef   : > { %3559 = vmatpush1.bf16.msra.mxu0 %v7006_v51  ;;  %v6274_v62 = vpop.f32.mrb[28].mxu1  ;;  %v7057_v51 = vld [vmem:[%s9227_s1 + $0xd08] ss:$12 sps:$4 sm:$0xff]  }
 0x1f0   : > { %3560 = vmatprep.subr.bf16.mxu0 %v7011_v52  ;;  %v6275_v0 = vpop.f32.mrb[29].mxu1  ;;  %v7062_v52 = vld [vmem:[%s9227_s1 + $0xd24] ss:$12 sps:$4 sm:$0xff]  }
 0x1f1   : > { %v6276_v4 = vadd.f32 %v6275_v0, %v6274_v62  ;;  %v6277_v6 = vpop.f32.mrb[30].mxu1  ;;  %v7116_v62 = vld [vmem:[%s9228_s2 + $0x154] ss:$12 sps:$4 sm:$0xff]   ;;  %v7119_v0 = vld [vmem:[%s9228_s2 + $0x16c] ss:$12 sps:$4 sm:$0xff]  }
 0x1f2   : > { %v6278_v54 = vpop.f32.mrb[31].mxu1  ;;  %4522 = vmatprep.subr.bf16.mxu1 %v7116_v62  ;;  %v7166_v62 = vld [vmem:[%s9228_s2 + $0x218] ss:$12 sps:$4 sm:$0xff]  }
 0x1f3   : > { %3561 = vmatpush1.bf16.msra.mxu0 %v7009_v56  ;;  %v3946_v9 = vadd.f32 %v6276_v4, %v8562_v29  ;;  %v6279_v11 = vadd.f32 %v6278_v54, %v6277_v6  ;;  %v7039_v29 = vld [vmem:[%s9227_s1 + $0xc78] ss:$12 sps:$4 sm:$0xff]   ;;  %4523 = vmatpush1.bf16.msra.mxu1 %v7114_v63  ;;  %v7281_v4 = vmov 0.0   ;;  %v7167_v63 = vld [vmem:[%s9228_s2 + $0x230] ss:$12 sps:$4 sm:$0xff]  }
 0x1f4   : > { %3562 = vmatprep.subr.bf16.mxu0 %v7014_v57  ;;  %v7063_v56 = vld [vmem:[%s9227_s1 + $0xd38] ss:$12 sps:$4 sm:$0xff]   ;;  %v7068_v57 = vld [vmem:[%s9227_s1 + $0xd54] ss:$12 sps:$4 sm:$0xff]   ;;  %4524 = vmatprep.subr.bf16.mxu1 %v7119_v0 }
 0x1f5   : > { %v3949_v25 = vadd.f32 %v6279_v11, %v8573_v34  ;;  %v8798_v6 = vld [vmem:[%s9230_s4] sm:$0xff] }
 0x1f6   : > { %v834_v54 = vrot.slane %v8798_v6, %v8455_v10  ;;  %v7170_v0 = vld [vmem:[%s9229_s3 + $0x4] ss:$12 sps:$4 sm:$0xff]  }
 0x1f7   : > { %3563 = vmatpush1.bf16.msra.mxu0 %v7012_v60  ;;  %v7069_v60 = vld [vmem:[%s9227_s1 + $0xd68] ss:$12 sps:$4 sm:$0xff]   ;;  %4525 = vmatpush1.bf16.msra.mxu1 %v7117_v1  ;;  %v7168_v1 = vld [vmem:[%s9229_s3] ss:$12 sps:$4 sm:$0xff]  }
 0x1f8   : > { %3564 = vmatprep.subr.bf16.mxu0 %v7017_v61  ;;  %v7271_v61 = vld [vmem:[%s7364_s24 + $0x40] ss:$72 sps:$4 sm:$0xff]   ;;  %s6457_s24 = smul.u32 12, %s9233_s30 }
 0x1fa   : > { %s231_s7 = scalar_lea.vmem %s9231_s5, %s6457_s24 }
 0x1fb   : > { %3565 = vmatpush1.bf16.msra.mxu0 %v7015_v2  ;;  %v7122_v2 = vld [vmem:[%s9228_s2 + $0x184] ss:$12 sps:$4 sm:$0xff]  }
 0x1fc   : > { %3566 = vmatprep.subr.bf16.mxu0 %v7020_v7  ;;  %4537 = vmatprep.subr.bf16.mxu1 %v7122_v2  ;;  %v8803_v7 = vld [vmem:[%s9230_s4 + $0x8] sm:$0xff] }
 0x1fd   : > { %v7173_v2 = vld [vmem:[%s9229_s3 + $0x1c] ss:$12 sps:$4 sm:$0xff]  }
 0x1ff   : > { %3567 = vmatpush1.bf16.msra.mxu0 %v7018_v12 }
 0x200   : > { %3568 = vmatprep.subr.bf16.mxu0 %v7023_v13 }
 0x203   : > { %3569 = vmatpush1.bf16.msra.mxu0 %v7021_v5 }
 0x204   : > { %3581 = vmatprep.subr.bf16.mxu0 %v7026_v14 }
 0x206   : > { %3571 = vmatmul.mubr.bf16.vlgmr.msra.gmra.mrb[0].mxu0 %v7269_v16 }
 0x207   : > { %3582 = vmatpush1.bf16.msra.mxu0 %v7024_v15  ;;  %3613 = vmatprep.mubr.bf16.mxu0 %v7270_v18 }
 0x208   : > { %3583 = vmatprep.subr.bf16.mxu0 %v7029_v38 }
 0x20b   : > { %3584 = vmatpush1.bf16.msra.mxu0 %v7027_v17 }
 0x20c   : > { %3585 = vmatprep.subr.bf16.mxu0 %v7032_v19 }
 0x20f   : > { %3586 = vmatpush1.bf16.msra.mxu0 %v7030_v20  ;;  %v6296_v27 = vpop.f32.mrb[32].mxu1 }
 0x210   : > { %3587 = vmatprep.subr.bf16.mxu0 %v7035_v21  ;;  %v6297_v28 = vpop.f32.mrb[33].mxu1  ;;  %v7120_v21 = vld [vmem:[%s9228_s2 + $0x180] ss:$12 sps:$4 sm:$0xff]  }
 0x211   : > { %v6298_v30 = vadd.f32 %v6297_v28, %v6296_v27  ;;  %v6299_v31 = vpop.f32.mrb[34].mxu1  ;;  %v7131_v27 = vld [vmem:[%s9228_s2 + $0x1cc] ss:$12 sps:$4 sm:$0xff]   ;;  %v7129_v28 = vld [vmem:[%s9228_s2 + $0x1c8] ss:$12 sps:$4 sm:$0xff]  }
 0x212   : > { %v6300_v33 = vpop.f32.mrb[35].mxu1 }
 0x213   : > { %3588 = vmatpush1.bf16.msra.mxu0 %v7033_v22  ;;  %v3987_v34 = vadd.f32 %v6298_v30, %v3946_v9  ;;  %v6301_v35 = vadd.f32 %v6300_v33, %v6299_v31  ;;  %v838_v9 = vrot.slane %v8803_v7, %v8455_v10  ;;  %v7125_v10 = vld [vmem:[%s9228_s2 + $0x19c] ss:$12 sps:$4 sm:$0xff]   ;;  %v7123_v22 = vld [vmem:[%s9228_s2 + $0x198] ss:$12 sps:$4 sm:$0xff]   ;;  %v7132_v30 = vld [vmem:[%s9228_s2 + $0x1e0] ss:$12 sps:$4 sm:$0xff]  }
 0x214   : > { %3589 = vmatprep.subr.bf16.mxu0 %v7038_v23  ;;  %v7283_v23 = vmov 0   ;;  %v7137_v31 = vld [vmem:[%s9228_s2 + $0x1fc] ss:$12 sps:$4 sm:$0xff]   ;;  %v7140_v33 = vld [vmem:[%s9228_s2 + $0x214] ss:$12 sps:$4 sm:$0xff]  }
 0x215   : > { %v3995_v37 = vmax.f32 %v3987_v34, 0.0  ;;  %v3990_v39 = vadd.f32 %v6301_v35, %v3949_v25  ;;  %v7138_v34 = vld [vmem:[%s9228_s2 + $0x210] ss:$12 sps:$4 sm:$0xff]   ;;  %v7143_v35 = vld [vmem:[%s9228_s2 + $0x22c] ss:$12 sps:$4 sm:$0xff]  }
 0x217   : > { %3590 = vmatpush1.bf16.msra.mxu0 %v7036_v24  ;;  %v3998_v41 = vmax.f32 %v3990_v39, 0.0  ;;  %v7128_v24 = vld [vmem:[%s9228_s2 + $0x1b4] ss:$12 sps:$4 sm:$0xff]  }
 0x218   : > { %3591 = vmatprep.subr.bf16.mxu0 %v7041_v26  ;;  %v7126_v26 = vld [vmem:[%s9228_s2 + $0x1b0] ss:$12 sps:$4 sm:$0xff]   ;;  %v7145_v39 = vld [vmem:[%s9228_s2 + $0x8] ss:$12 sps:$4 sm:$0xff]  }
 0x219   : > { %v8726_v43 = vpack.c.bf16 %v3998_v41, %v3995_v37  ;;  %v7144_v37 = vld [vmem:[%s9228_s2 + $0xc8] ss:$12 sps:$4 sm:$0xff]   ;;  %v7147_v41 = vld [vmem:[%s9228_s2 + $0x20] ss:$12 sps:$4 sm:$0xff]  }
 0x21b   : > { %3592 = vmatpush1.bf16.msra.mxu0 %v7039_v29  ;;  %v7134_v29 = vld [vmem:[%s9228_s2 + $0x1e4] ss:$12 sps:$4 sm:$0xff]  }
 0x21c   : > { %3593 = vmatprep.subr.bf16.mxu0 %v7044_v32  ;;  %v7135_v32 = vld [vmem:[%s9228_s2 + $0x1f8] ss:$12 sps:$4 sm:$0xff]  }
 0x21f   : > { %3594 = vmatpush1.bf16.msra.mxu0 %v7042_v36  ;;  %v7141_v36 = vld [vmem:[%s9228_s2 + $0x228] ss:$12 sps:$4 sm:$0xff]  }
 0x220   : > { %3595 = vmatprep.subr.bf16.mxu0 %v7047_v40  ;;  %v7146_v40 = vld [vmem:[%s9228_s2 + $0xe0] ss:$12 sps:$4 sm:$0xff]  }
 0x223   : > { %3596 = vmatpush1.bf16.msra.mxu0 %v7045_v42  ;;  %v7148_v42 = vld [vmem:[%s9228_s2 + $0xf8] ss:$12 sps:$4 sm:$0xff]  }
 0x224   : > { %3597 = vmatprep.subr.bf16.mxu0 %v7050_v44  ;;  %v7149_v44 = vld [vmem:[%s9228_s2 + $0x38] ss:$12 sps:$4 sm:$0xff]  }
 0x227   : > { %3598 = vmatpush1.bf16.msra.mxu0 %v7048_v45  ;;  %v7150_v45 = vld [vmem:[%s9228_s2 + $0x110] ss:$12 sps:$4 sm:$0xff]  }
 0x228   : > { %3599 = vmatprep.subr.bf16.mxu0 %v7053_v46  ;;  %v7151_v46 = vld [vmem:[%s9228_s2 + $0x50] ss:$12 sps:$4 sm:$0xff]  }
 0x22b   : > { %3600 = vmatpush1.bf16.msra.mxu0 %v7051_v47  ;;  %v7152_v47 = vld [vmem:[%s9228_s2 + $0x128] ss:$12 sps:$4 sm:$0xff]  }
 0x22c   : > { %3601 = vmatprep.subr.bf16.mxu0 %v7056_v48  ;;  %v7153_v48 = vld [vmem:[%s9228_s2 + $0x68] ss:$12 sps:$4 sm:$0xff]  }
 0x22f   : > { %3602 = vmatpush1.bf16.msra.mxu0 %v7054_v49  ;;  %v7154_v49 = vld [vmem:[%s9228_s2 + $0x140] ss:$12 sps:$4 sm:$0xff]  }
 0x230   : > { %3603 = vmatprep.subr.bf16.mxu0 %v7059_v50  ;;  %v7155_v50 = vld [vmem:[%s9228_s2 + $0x80] ss:$12 sps:$4 sm:$0xff]  }
 0x233   : > { %3604 = vmatpush1.bf16.msra.mxu0 %v7057_v51  ;;  %v7156_v51 = vld [vmem:[%s9228_s2 + $0x158] ss:$12 sps:$4 sm:$0xff]  }
 0x234   : > { %3605 = vmatprep.subr.bf16.mxu0 %v7062_v52  ;;  %v7157_v52 = vld [vmem:[%s9228_s2 + $0x98] ss:$12 sps:$4 sm:$0xff]  }
 0x237   : > { %3606 = vmatpush1.bf16.msra.mxu0 %v7060_v53  ;;  %v7158_v53 = vld [vmem:[%s9228_s2 + $0x170] ss:$12 sps:$4 sm:$0xff]  }
 0x238   : > { %3607 = vmatprep.subr.bf16.mxu0 %v7065_v55  ;;  %v7159_v55 = vld [vmem:[%s9228_s2 + $0xb0] ss:$12 sps:$4 sm:$0xff]  }
 0x23b   : > { %3608 = vmatpush1.bf16.msra.mxu0 %v7063_v56  ;;  %v7160_v56 = vld [vmem:[%s9228_s2 + $0x188] ss:$12 sps:$4 sm:$0xff]  }
 0x23c   : > { %3609 = vmatprep.subr.bf16.mxu0 %v7068_v57  ;;  %v7161_v57 = vld [vmem:[%s9228_s2 + $0x1a0] ss:$12 sps:$4 sm:$0xff]  }
 0x23f   : > { %3610 = vmatpush1.bf16.msra.mxu0 %v7066_v58  ;;  %v7162_v58 = vld [vmem:[%s9228_s2 + $0x1b8] ss:$12 sps:$4 sm:$0xff]  }
 0x240   : > { %3611 = vmatprep.subr.bf16.mxu0 %v7071_v59  ;;  %v7163_v59 = vld [vmem:[%s9228_s2 + $0x1d0] ss:$12 sps:$4 sm:$0xff]  }
 0x243   : > { %3612 = vmatpush1.bf16.msra.mxu0 %v7069_v60  ;;  %v7164_v60 = vld [vmem:[%s9228_s2 + $0x1e8] ss:$12 sps:$4 sm:$0xff]  }
 0x244   : > { %6384 = vmatprep.subr.bf16.mxu0 %v7281_v4 }
 0x246   : > { %3614 = vmatmul.mubr.bf16.vlgmr.msra.gmra.mrb[0].mxu0 %v7271_v61  ;;  %v7165_v61 = vld [vmem:[%s9228_s2 + $0x200] ss:$12 sps:$4 sm:$0xff]  }
 0x247   : > { %6400 = vmatprep.mubr.msk.bf16.mxu0 %vm7282_vm0, %v7281_v4 }
 0x319   : > { %v3615_v11 = vpop.f32.mrb[0].mxu0 }
 0x31a   : > { %v6404_v8 = vadd.f32 %v3615_v11, %v834_v54  ;;  %v3617_v12 = vpop.f32.mrb[1].mxu0  ;;  %v7174_v11 = vld [vmem:[%s9229_s3 + $0x30] ss:$12 sps:$4 sm:$0xff]  }
 0x31b   : > { %v6405_v25 = vadd.f32 %v3617_v12, %v838_v9  ;;  %v3619_v13 = vpop.f32.mrb[2].mxu0  ;;  %v7182_v12 = vld [vmem:[%s9229_s3 + $0x64] ss:$12 sps:$4 sm:$0xff]  }
 0x31c   : > { %v6406_v5 = vadd.f32 %v3619_v13, %v834_v54  ;;  %v3621_v14 = vpop.f32.mrb[3].mxu0  ;;  %v3993_v38 = vmax.f32 %v6404_v8, 0.0  ;;  %v7171_v54 = vld [vmem:[%s9229_s3 + $0x18] ss:$12 sps:$4 sm:$0xff]   ;;  %v7177_v8 = vld [vmem:[%s9229_s3 + $0x48] ss:$12 sps:$4 sm:$0xff]  }
 0x31d   : > { %v6407_v15 = vadd.f32 %v3621_v14, %v838_v9  ;;  %v3994_v17 = vmax.f32 %v6405_v25, 0.0  ;;  %v7176_v9 = vld [vmem:[%s9229_s3 + $0x34] ss:$12 sps:$4 sm:$0xff]   ;;  %v7185_v13 = vld [vmem:[%s9229_s3 + $0x7c] ss:$12 sps:$4 sm:$0xff]  }
 0x31e   : > { %v3996_v16 = vmax.f32 %v6406_v5, 0.0  ;;  %v7180_v25 = vld [vmem:[%s9229_s3 + $0x60] ss:$12 sps:$4 sm:$0xff]   ;;  %v7183_v5 = vld [vmem:[%s9229_s3 + $0x78] ss:$12 sps:$4 sm:$0xff]  }
 0x31f   : > { %v3997_v18 = vmax.f32 %v6407_v15, 0.0  ;;  %v7188_v14 = vld [vmem:[%s9229_s3 + $0x94] ss:$12 sps:$4 sm:$0xff]   ;;  %v7186_v15 = vld [vmem:[%s9229_s3 + $0x90] ss:$12 sps:$4 sm:$0xff]  }
 0x320   : > { %v8809_v19 = vpack.c.bf16 %v3996_v16, %v3993_v38  ;;  %v7191_v38 = vld [vmem:[%s9229_s3 + $0xac] ss:$12 sps:$4 sm:$0xff]   ;;  %v7189_v16 = vld [vmem:[%s9229_s3 + $0xa8] ss:$12 sps:$4 sm:$0xff]  }
 0x321   : > { %v4000_v20 = vpack.c.bf16 %v3997_v18, %v3994_v17  ;;  %v7194_v17 = vld [vmem:[%s9229_s3 + $0xc4] ss:$12 sps:$4 sm:$0xff]   ;;  %v7192_v18 = vld [vmem:[%s9229_s3 + $0xc0] ss:$12 sps:$4 sm:$0xff]  }
 0x323   : > { %4526 = vmatprep.mubr.bf16.mxu1 %v4000_v20 }
 0x324   : > { %4527 = vmatmul.mubr.bf16.vlgmr.msra.gmra.mrb[36].mxu1 %v8809_v19 }
 0x325   : > { %4538 = vmatpush1.bf16.msra.mxu1 %v7120_v21  ;;  %4569 = vmatprep.mubr.bf16.mxu1 %v7283_v23  ;;  %v7200_v21 = vld [vmem:[%s9229_s3 + $0xf4] ss:$12 sps:$4 sm:$0xff]  }
 0x326   : > { %4539 = vmatprep.subr.bf16.mxu1 %v7125_v10  ;;  %v7198_v10 = vld [vmem:[%s9229_s3 + $0xf0] ss:$12 sps:$4 sm:$0xff]  }
 0x329   : > { %4540 = vmatpush1.bf16.msra.mxu1 %v7123_v22  ;;  %v7203_v22 = vld [vmem:[%s9229_s3 + $0x10c] ss:$12 sps:$4 sm:$0xff]  }
 0x32a   : > { %4541 = vmatprep.subr.bf16.mxu1 %v7128_v24  ;;  %v7201_v24 = vld [vmem:[%s9229_s3 + $0x108] ss:$12 sps:$4 sm:$0xff]  }
 0x32d   : > { %4542 = vmatpush1.bf16.msra.mxu1 %v7126_v26  ;;  %v7206_v26 = vld [vmem:[%s9229_s3 + $0x124] ss:$12 sps:$4 sm:$0xff]  }
 0x32e   : > { %4543 = vmatprep.subr.bf16.mxu1 %v7131_v27  ;;  %v7204_v27 = vld [vmem:[%s9229_s3 + $0x120] ss:$12 sps:$4 sm:$0xff]  }
 0x331   : > { %4544 = vmatpush1.bf16.msra.mxu1 %v7129_v28  ;;  %v7209_v28 = vld [vmem:[%s9229_s3 + $0x13c] ss:$12 sps:$4 sm:$0xff]  }
 0x332   : > { %4545 = vmatprep.subr.bf16.mxu1 %v7134_v29  ;;  %v7207_v29 = vld [vmem:[%s9229_s3 + $0x138] ss:$12 sps:$4 sm:$0xff]  }
 0x335   : > { %4546 = vmatpush1.bf16.msra.mxu1 %v7132_v30  ;;  %v7212_v30 = vld [vmem:[%s9229_s3 + $0x154] ss:$12 sps:$4 sm:$0xff]  }
 0x336   : > { %4547 = vmatprep.subr.bf16.mxu1 %v7137_v31  ;;  %v7210_v31 = vld [vmem:[%s9229_s3 + $0x150] ss:$12 sps:$4 sm:$0xff]  }
 0x339   : > { %4548 = vmatpush1.bf16.msra.mxu1 %v7135_v32  ;;  %v7215_v32 = vld [vmem:[%s9229_s3 + $0x16c] ss:$12 sps:$4 sm:$0xff]  }
 0x33a   : > { %4549 = vmatprep.subr.bf16.mxu1 %v7140_v33  ;;  %v7219_v33 = vld [vmem:[%s9229_s3 + $0x188] ss:$12 sps:$4 sm:$0xff]  }
 0x33b   : > { %6385 = vmatpush3.bf16.msra.mxu0 %v7219_v33  ;;  %v7244_v33 = vld [vmem:[%s9229_s3 + $0x228] ss:$12 sps:$4 sm:$0xff]  }
 0x33c   : > { %6386 = vmatprep.subr.bf16.mxu0 %v7281_v4 }
 0x33d   : > { %4550 = vmatpush1.bf16.msra.mxu1 %v7138_v34  ;;  %v7213_v34 = vld [vmem:[%s9229_s3 + $0x168] ss:$12 sps:$4 sm:$0xff]  }
 0x33e   : > { %4551 = vmatprep.subr.bf16.mxu1 %v7143_v35  ;;  %v7223_v35 = vld [vmem:[%s9229_s3 + $0x1a0] ss:$12 sps:$4 sm:$0xff]  }
 0x33f   : > { %6387 = vmatpush3.bf16.msra.mxu0 %v7223_v35  ;;  %v9152_v35 = vld [vmem:[%s9230_s4 + $0x10] sm:$0xff] }
 0x340   : > { %6388 = vmatprep.subr.bf16.mxu0 %v7281_v4 }
 0x341   : > { %4552 = vmatpush1.bf16.msra.mxu1 %v7141_v36  ;;  %v7218_v36 = vld [vmem:[%s9229_s3 + $0x184] ss:$12 sps:$4 sm:$0xff]  }
 0x342   : > { %6302 = vmatprep.subr.bf16.mxu1 %v7144_v37  ;;  %v7227_v37 = vld [vmem:[%s9229_s3 + $0x1b8] ss:$12 sps:$4 sm:$0xff]  }
 0x343   : > { %6389 = vmatpush3.bf16.msra.mxu0 %v7227_v37 }
 0x344   : > { %4570 = vmatmul.mubr.bf16.vlgmr.msra.gmra.mrb[36].mxu1 %v8726_v43  ;;  %6390 = vmatprep.subr.bf16.mxu0 %v7281_v4 }
 0x345   : > { %6303 = vmatpush3.bf16.msra.mxu1 %v7145_v39  ;;  %4612 = vmatprep.mubr.bf16.mxu1 %v4000_v20  ;;  %v7195_v20 = vld [vmem:[%s9229_s3 + $0xd8] ss:$12 sps:$4 sm:$0xff]   ;;  %v7231_v39 = vld [vmem:[%s9229_s3 + $0x1d0] ss:$12 sps:$4 sm:$0xff]  }
 0x346   : > { %6304 = vmatprep.subr.bf16.mxu1 %v7146_v40  ;;  %v7235_v40 = vld [vmem:[%s9229_s3 + $0x1e8] ss:$12 sps:$4 sm:$0xff]  }
 0x347   : > { %6391 = vmatpush3.bf16.msra.mxu0 %v7231_v39 }
 0x348   : > { %6392 = vmatprep.subr.bf16.mxu0 %v7281_v4 }
 0x349   : > { %6305 = vmatpush3.bf16.msra.mxu1 %v7147_v41  ;;  %v7239_v41 = vld [vmem:[%s9229_s3 + $0x200] ss:$12 sps:$4 sm:$0xff]  }
 0x34a   : > { %6306 = vmatprep.subr.bf16.mxu1 %v7148_v42  ;;  %v7243_v42 = vld [vmem:[%s9229_s3 + $0x218] ss:$12 sps:$4 sm:$0xff]  }
 0x34b   : > { %6393 = vmatpush3.bf16.msra.mxu0 %v7235_v40 }
 0x34c   : > { %6394 = vmatprep.subr.bf16.mxu0 %v7281_v4 }
 0x34d   : > { %6307 = vmatpush3.bf16.msra.mxu1 %v7149_v44  ;;  %v7247_v44 = vld [vmem:[%s9229_s3 + $0x230] ss:$12 sps:$4 sm:$0xff]  }
 0x34e   : > { %6308 = vmatprep.subr.bf16.mxu1 %v7150_v45  ;;  %v9074_v45 = vsub.s32 1, %v8446_v3 }
 0x34f   : > { %6395 = vmatpush3.bf16.msra.mxu0 %v7239_v41 }
 0x350   : > { %6396 = vmatprep.subr.bf16.mxu0 %v7281_v4 }
 0x351   : > { %6309 = vmatpush3.bf16.msra.mxu1 %v7151_v46  ;;  %v4101_v46 = vrot.slane %v8798_v6, %v9074_v45 }
 0x352   : > { %6310 = vmatprep.subr.bf16.mxu1 %v7152_v47  ;;  %v9079_v47 = vsub.s32 2, %v8446_v3 }
 0x353   : > { %6397 = vmatpush3.bf16.msra.mxu0 %v7243_v42 }
 0x354   : > { %6398 = vmatprep.subr.bf16.mxu0 %v7281_v4  ;;  %v4679_v41 = vrot.slane %v9152_v35, %v9079_v47 }
 0x355   : > { %6311 = vmatpush3.bf16.msra.mxu1 %v7153_v48  ;;  %v4105_v48 = vrot.slane %v8803_v7, %v9074_v45 }
 0x356   : > { %6312 = vmatprep.subr.bf16.mxu1 %v7154_v49 }
 0x357   : > { %6399 = vmatpush3.bf16.msra.mxu0 %v7247_v44 }
 0x359   : > { %6313 = vmatpush3.bf16.msra.mxu1 %v7155_v50 }
 0x35a   : > { %6314 = vmatprep.subr.bf16.mxu1 %v7156_v51  ;;  %v9086_v51 = vsub.s32 3, %v8446_v3 }
 0x35d   : > { %6315 = vmatpush3.bf16.msra.mxu1 %v7157_v52 }
 0x35e   : > { %6316 = vmatprep.subr.bf16.mxu1 %v7158_v53 }
 0x361   : > { %6317 = vmatpush3.bf16.msra.mxu1 %v7159_v55  ;;  %v4675_v55 = vrot.slane %v8803_v7, %v9079_v47 }
 0x362   : > { %6364 = vmatprep.subr.bf16.mxu1 %v7281_v4 }
 0x364   : > { %4613 = vmatmul.mubr.bf16.vlgmr.msra.gmra.mrb[40].mxu1 %v8809_v19  ;;  %v7197_v19 = vld [vmem:[%s9229_s3 + $0xdc] ss:$12 sps:$4 sm:$0xff]  }
 0x365   : > { %6365 = vmatpush3.bf16.msra.mxu1 %v7160_v56  ;;  %6380 = vmatprep.mubr.msk.bf16.mxu1 %vm7282_vm0, %v7281_v4 }
 0x366   : > { %6366 = vmatprep.subr.bf16.mxu1 %v7281_v4 }
 0x369   : > { %6367 = vmatpush3.bf16.msra.mxu1 %v7161_v57 }
 0x36a   : > { %6368 = vmatprep.subr.bf16.mxu1 %v7281_v4 }
 0x36d   : > { %6369 = vmatpush3.bf16.msra.mxu1 %v7162_v58 }
 0x36e   : > { %6370 = vmatprep.subr.bf16.mxu1 %v7281_v4 }
 0x371   : > { %6371 = vmatpush3.bf16.msra.mxu1 %v7163_v59 }
 0x372   : > { %6372 = vmatprep.subr.bf16.mxu1 %v7281_v4 }
 0x375   : > { %6373 = vmatpush3.bf16.msra.mxu1 %v7164_v60 }
 0x376   : > { %6374 = vmatprep.subr.bf16.mxu1 %v7281_v4 }
 0x379   : > { %6375 = vmatpush3.bf16.msra.mxu1 %v7165_v61 }
 0x37a   : > { %6376 = vmatprep.subr.bf16.mxu1 %v7281_v4 }
 0x37d   : > { %6377 = vmatpush3.bf16.msra.mxu1 %v7166_v62 }
 0x37e   : > { %6378 = vmatprep.subr.bf16.mxu1 %v7281_v4  ;;  %v4671_v4 = vrot.slane %v8798_v6, %v9079_v47  ;;  %v7250_v47 = vld [vmem:[%s9229_s3 + $0xe0] ss:$12 sps:$4 sm:$0xff]  }
 0x381   : > { %6379 = vmatpush3.bf16.msra.mxu1 %v7167_v63  ;;  %v4689_v63 = vrot.slane %v8798_v6, %v9086_v51 }
 0x382   : > { %5199 = vmatprep.subr.bf16.mxu1 %v7170_v0 }
 0x384   : > { %6381 = vmatmul.mubr.bf16.vlgmr.msra.gmra.mrb[44].mxu1 %v8726_v43  ;;  %v7179_v43 = vld [vmem:[%s9229_s3 + $0x4c] ss:$12 sps:$4 sm:$0xff]  }
 0x385   : > { %5200 = vmatpush1.bf16.msra.mxu1 %v7168_v1 }
 0x386   : > { %5201 = vmatprep.subr.bf16.mxu1 %v7173_v2  ;;  %v4693_v2 = vrot.slane %v8803_v7, %v9086_v51 }
 0x389   : > { %5202 = vmatpush1.bf16.msra.mxu1 %v7171_v54 }
 0x38a   : > { %5203 = vmatprep.subr.bf16.mxu1 %v7176_v9 }
 0x38d   : > { %5204 = vmatpush1.bf16.msra.mxu1 %v7174_v11 }
 0x38e   : > { %5205 = vmatprep.subr.bf16.mxu1 %v7179_v43 }
 0x391   : > { %5206 = vmatpush1.bf16.msra.mxu1 %v7177_v8 }
 0x392   : > { %5207 = vmatprep.subr.bf16.mxu1 %v7182_v12 }
 0x395   : > { %5208 = vmatpush1.bf16.msra.mxu1 %v7180_v25 }
 0x396   : > { %5209 = vmatprep.subr.bf16.mxu1 %v7185_v13 }
 0x399   : > { %5210 = vmatpush1.bf16.msra.mxu1 %v7183_v5 }
 0x39a   : > { %5211 = vmatprep.subr.bf16.mxu1 %v7188_v14  ;;  %v7216_v14 = vld [vmem:[%s9229_s3 + $0x180] ss:$12 sps:$4 sm:$0xff]  }
 0x39d   : > { %5212 = vmatpush1.bf16.msra.mxu1 %v7186_v15  ;;  %v7222_v15 = vld [vmem:[%s9229_s3 + $0x19c] ss:$12 sps:$4 sm:$0xff]  }
 0x39e   : > { %5213 = vmatprep.subr.bf16.mxu1 %v7191_v38  ;;  %v7220_v38 = vld [vmem:[%s9229_s3 + $0x198] ss:$12 sps:$4 sm:$0xff]  }
 0x3a1   : > { %5214 = vmatpush1.bf16.msra.mxu1 %v7189_v16  ;;  %v7226_v16 = vld [vmem:[%s9229_s3 + $0x1b4] ss:$12 sps:$4 sm:$0xff]  }
 0x3a2   : > { %5215 = vmatprep.subr.bf16.mxu1 %v7194_v17  ;;  %v7224_v17 = vld [vmem:[%s9229_s3 + $0x1b0] ss:$12 sps:$4 sm:$0xff]  }
 0x3a5   : > { %5216 = vmatpush1.bf16.msra.mxu1 %v7192_v18  ;;  %v7230_v18 = vld [vmem:[%s9229_s3 + $0x1cc] ss:$12 sps:$4 sm:$0xff]  }
 0x3a6   : > { %5217 = vmatprep.subr.bf16.mxu1 %v7197_v19  ;;  %v7234_v19 = vld [vmem:[%s9229_s3 + $0x1e4] ss:$12 sps:$4 sm:$0xff]  }
 0x3a9   : > { %5218 = vmatpush1.bf16.msra.mxu1 %v7195_v20  ;;  %v7232_v20 = vld [vmem:[%s9229_s3 + $0x1e0] ss:$12 sps:$4 sm:$0xff]  }
 0x3aa   : > { %5219 = vmatprep.subr.bf16.mxu1 %v7200_v21  ;;  %v7238_v21 = vld [vmem:[%s9229_s3 + $0x1fc] ss:$12 sps:$4 sm:$0xff]  }
 0x3ad   : > { %5220 = vmatpush1.bf16.msra.mxu1 %v7198_v10 }
 0x3ae   : > { %5221 = vmatprep.subr.bf16.mxu1 %v7203_v22  ;;  %v7236_v22 = vld [vmem:[%s9229_s3 + $0x1f8] ss:$12 sps:$4 sm:$0xff]  }
 0x3b1   : > { %5222 = vmatpush1.bf16.msra.mxu1 %v7201_v24 }
 0x3b2   : > { %5223 = vmatprep.subr.bf16.mxu1 %v7206_v26  ;;  %v7242_v26 = vld [vmem:[%s9229_s3 + $0x214] ss:$12 sps:$4 sm:$0xff]  }
 0x3b5   : > { %5224 = vmatpush1.bf16.msra.mxu1 %v7204_v27 }
 0x3b6   : > { %5225 = vmatprep.subr.bf16.mxu1 %v7209_v28 }
 0x3b9   : > { %5226 = vmatpush1.bf16.msra.mxu1 %v7207_v29 }
 0x3ba   : > { %5227 = vmatprep.subr.bf16.mxu1 %v7212_v30 }
 0x3bd   : > { %5228 = vmatpush1.bf16.msra.mxu1 %v7210_v31  ;;  %v7240_v31 = vld [vmem:[%s9229_s3 + $0x210] ss:$12 sps:$4 sm:$0xff]  }
 0x3be   : > { %5229 = vmatprep.subr.bf16.mxu1 %v7215_v32  ;;  %v7246_v32 = vld [vmem:[%s9229_s3 + $0x22c] ss:$12 sps:$4 sm:$0xff]  }
 0x3c1   : > { %5230 = vmatpush1.bf16.msra.mxu1 %v7213_v34  ;;  %v7248_v34 = vld [vmem:[%s9229_s3 + $0xc8] ss:$12 sps:$4 sm:$0xff]  }
 0x3c2   : > { %5242 = vmatprep.subr.bf16.mxu1 %v7218_v36  ;;  %v4109_v36 = vrot.slane %v9152_v35, %v9074_v45 }
 0x417   : > { %v4571_v49 = vpop.f32.mrb[36].mxu1 }
 0x418   : > { %v6408_v50 = vadd.f32 %v4571_v49, %v4101_v46  ;;  %v4573_v52 = vpop.f32.mrb[37].mxu1  ;;  %v4697_v49 = vrot.slane %v9152_v35, %v9086_v51  ;;  %v7251_v51 = vld [vmem:[%s9229_s3 + $0x20] ss:$12 sps:$4 sm:$0xff]  }
 0x419   : > { %v6409_v53 = vadd.f32 %v4573_v52, %v4105_v48  ;;  %v4575_v56 = vpop.f32.mrb[38].mxu1 }
 0x41a   : > { %v4662_v57 = vmax.f32 %v6408_v50, 0.0  ;;  %v6410_v58 = vadd.f32 %v4575_v56, %v4101_v46  ;;  %v4577_v59 = vpop.f32.mrb[39].mxu1 }
 0x41b   : > { %v4663_v60 = vmax.f32 %v6409_v53, 0.0  ;;  %v6411_v61 = vadd.f32 %v4577_v59, %v4105_v48  ;;  %v7252_v59 = vld [vmem:[%s9229_s3 + $0xf8] ss:$12 sps:$4 sm:$0xff]  }
 0x41c   : > { %v4680_v62 = vmul.f32 %v4671_v4, %v4662_v57  ;;  %v4665_v0 = vmax.f32 %v6410_v58, 0.0  ;;  %v7249_v57 = vld [vmem:[%s9229_s3 + $0x8] ss:$12 sps:$4 sm:$0xff]  }
 0x41d   : > { %v4681_v1 = vmul.f32 %v4675_v55, %v4663_v60  ;;  %v4666_v54 = vmax.f32 %v6411_v61, 0.0  ;;  %v7253_v60 = vld [vmem:[%s9229_s3 + $0x38] ss:$12 sps:$4 sm:$0xff]   ;;  %v7254_v61 = vld [vmem:[%s9229_s3 + $0x110] ss:$12 sps:$4 sm:$0xff]  }
 0x41e   : > { %v4683_v9 = vmul.f32 %v4671_v4, %v4665_v0  ;;  %v4698_v43 = vadd.f32 %v4689_v63, %v4680_v62  ;;  %v7255_v62 = vld [vmem:[%s9229_s3 + $0x50] ss:$12 sps:$4 sm:$0xff]   ;;  %v7257_v0 = vld [vmem:[%s9229_s3 + $0x68] ss:$12 sps:$4 sm:$0xff]  }
 0x41f   : > { %v4684_v11 = vmul.f32 %v4675_v55, %v4666_v54  ;;  %v4699_v12 = vadd.f32 %v4693_v2, %v4681_v1  ;;  %v7258_v1 = vld [vmem:[%s9229_s3 + $0x140] ss:$12 sps:$4 sm:$0xff]   ;;  %v7260_v54 = vld [vmem:[%s9229_s3 + $0x158] ss:$12 sps:$4 sm:$0xff]  }
 0x420   : > { %v4701_v8 = vadd.f32 %v4689_v63, %v4683_v9  ;;  %v7256_v63 = vld [vmem:[%s9229_s3 + $0x128] ss:$12 sps:$4 sm:$0xff]   ;;  %v7261_v9 = vld [vmem:[%s9229_s3 + $0x98] ss:$12 sps:$4 sm:$0xff]  }
 0x421   : > { %v4702_v25 = vadd.f32 %v4693_v2, %v4684_v11  ;;  %v7259_v2 = vld [vmem:[%s9229_s3 + $0x80] ss:$12 sps:$4 sm:$0xff]   ;;  %v7262_v11 = vld [vmem:[%s9229_s3 + $0x170] ss:$12 sps:$4 sm:$0xff]  }
 0x422   : > { %v9094_v13 = vpack.c.bf16 %v4701_v8, %v4698_v43  ;;  %v7263_v43 = vld [vmem:[%s9229_s3 + $0xb0] ss:$12 sps:$4 sm:$0xff]   ;;  %v4805_v8 = vsub.s32 4, %v8446_v3 }
 0x423   : > { %v9096_v5 = vpack.c.bf16 %v4702_v25, %v4699_v12  ;;  %v5375_v25 = vsub.s32 5, %v8446_v3 }
 0x424   : > { %v4806_v12 = vrot.slane %v8798_v6, %v4805_v8 }
 0x425   : > { %5231 = vmatprep.mubr.bf16.mxu1 %v9096_v5 }
 0x426   : > { %5232 = vmatmul.mubr.bf16.vlgmr.msra.gmra.mrb[48].mxu1 %v9094_v13 }
 0x427   : > { %5243 = vmatpush1.bf16.msra.mxu1 %v7216_v14  ;;  %5274 = vmatprep.mubr.bf16.mxu1 %v7283_v23  ;;  %v7228_v23 = vld [vmem:[%s9229_s3 + $0x1c8] ss:$12 sps:$4 sm:$0xff]   ;;  %v5393_v14 = vsub.s32 6, %v8446_v3 }
 0x428   : > { %5244 = vmatprep.subr.bf16.mxu1 %v7222_v15 }
 0x42b   : > { %5245 = vmatpush1.bf16.msra.mxu1 %v7220_v38 }
 0x42c   : > { %5246 = vmatprep.subr.bf16.mxu1 %v7226_v16 }
 0x42f   : > { %5247 = vmatpush1.bf16.msra.mxu1 %v7224_v17  ;;  %v5376_v17 = vrot.slane %v8798_v6, %v5375_v25 }
 0x430   : > { %5248 = vmatprep.subr.bf16.mxu1 %v7230_v18 }
 0x433   : > { %5249 = vmatpush1.bf16.msra.mxu1 %v7228_v23 }
 0x434   : > { %5250 = vmatprep.subr.bf16.mxu1 %v7234_v19 }
 0x437   : > { %v6318_v10 = vpop.f32.mrb[40].mxu1  ;;  %5251 = vmatpush1.bf16.msra.mxu1 %v7232_v20 }
 0x438   : > { %v6319_v24 = vpop.f32.mrb[41].mxu1  ;;  %5252 = vmatprep.subr.bf16.mxu1 %v7238_v21 }
 0x439   : > { %v6320_v27 = vadd.f32 %v6319_v24, %v6318_v10  ;;  %v6321_v28 = vpop.f32.mrb[42].mxu1 }
 0x43a   : > { %v6322_v29 = vpop.f32.mrb[43].mxu1 }
 0x43b   : > { %v6323_v30 = vadd.f32 %v6322_v29, %v6321_v28  ;;  %5253 = vmatpush1.bf16.msra.mxu1 %v7236_v22  ;;  %v4615_v37 = vadd.f32 %v6320_v27, %v4109_v36  ;;  %v5394_v22 = vrot.slane %v8798_v6, %v5393_v14  ;;  %v5398_v28 = vrot.slane %v8803_v7, %v5393_v14 }
 0x43c   : > { %5254 = vmatprep.subr.bf16.mxu1 %v7242_v26 }
 0x43d   : > { %v4618_v44 = vadd.f32 %v6323_v30, %v4109_v36 }
 0x43f   : > { %5255 = vmatpush1.bf16.msra.mxu1 %v7240_v31 }
 0x440   : > { %5256 = vmatprep.subr.bf16.mxu1 %v7246_v32 }
 0x443   : > { %5257 = vmatpush1.bf16.msra.mxu1 %v7244_v33 }
 0x444   : > { %6333 = vmatprep.subr.bf16.mxu1 %v7248_v34 }
 0x457   : > { %v4655_v39 = vpop.f32.mrb[44].mxu1 }
 0x458   : > { %v4656_v40 = vadd.f32 %v4655_v39, %v4615_v37  ;;  %v6382_v42 = vpop.f32.mrb[45].mxu1 }
 0x459   : > { %v4658_v46 = vpop.f32.mrb[46].mxu1 }
 0x45a   : > { %v4664_v48 = vmax.f32 %v4656_v40, 0.0  ;;  %v4659_v50 = vadd.f32 %v4658_v46, %v4618_v44  ;;  %v6383_v4 = vpop.f32.mrb[47].mxu1  ;;  %v4814_v44 = vrot.slane %v9152_v35, %v4805_v8 }
 0x45c   : > { %v4682_v52 = vmul.f32 %v4679_v41, %v4664_v48  ;;  %v4667_v53 = vmax.f32 %v4659_v50, 0.0 }
 0x45e   : > { %v4700_v55 = vadd.f32 %v4697_v49, %v4682_v52  ;;  %v4685_v56 = vmul.f32 %v4679_v41, %v4667_v53 }
 0x460   : > { %v4703_v45 = vadd.f32 %v4697_v49, %v4685_v56 }
 0x462   : > { %v4706_v58 = vpack.c.bf16 %v4703_v45, %v4700_v55  ;;  %v5384_v55 = vrot.slane %v9152_v35, %v5375_v25 }
 0x464   : > { %5275 = vmatmul.mubr.bf16.vlgmr.msra.gmra.mrb[48].mxu1 %v4706_v58  ;;  %6401 = vmatmul.mubr.bf16.vlgmr.msra.gmra.mrb[4].mxu0 %v4706_v58 }
 0x465   : > { %6334 = vmatpush3.bf16.msra.mxu1 %v7249_v57  ;;  %5317 = vmatprep.mubr.bf16.mxu1 %v9096_v5  ;;  %v4810_v5 = vrot.slane %v8803_v7, %v4805_v8  ;;  %v5402_v57 = vrot.slane %v9152_v35, %v5393_v14 }
 0x466   : > { %6335 = vmatprep.subr.bf16.mxu1 %v7250_v47 }
 0x469   : > { %6336 = vmatpush3.bf16.msra.mxu1 %v7251_v51 }
 0x46a   : > { %6337 = vmatprep.subr.bf16.mxu1 %v7252_v59 }
 0x46d   : > { %6338 = vmatpush3.bf16.msra.mxu1 %v7253_v60 }
 0x46e   : > { %6339 = vmatprep.subr.bf16.mxu1 %v7254_v61 }
 0x471   : > { %6340 = vmatpush3.bf16.msra.mxu1 %v7255_v62 }
 0x472   : > { %6341 = vmatprep.subr.bf16.mxu1 %v7256_v63 }
 0x475   : > { %6342 = vmatpush3.bf16.msra.mxu1 %v7257_v0 }
 0x476   : > { %6343 = vmatprep.subr.bf16.mxu1 %v7258_v1 }
 0x479   : > { %6344 = vmatpush3.bf16.msra.mxu1 %v7259_v2 }
 0x47a   : > { %6345 = vmatprep.subr.bf16.mxu1 %v7260_v54 }
 0x47d   : > { %6346 = vmatpush3.bf16.msra.mxu1 %v7261_v9 }
 0x47e   : > { %6347 = vmatprep.subr.bf16.mxu1 %v7262_v11 }
 0x481   : > { %6348 = vmatpush3.bf16.msra.mxu1 %v7263_v43 }
 0x484   : > { %5318 = vmatmul.mubr.bf16.vlgmr.msra.gmra.mrb[52].mxu1 %v9094_v13  ;;  %v5380_v13 = vrot.slane %v8803_v7, %v5375_v25 }
 0x537   : > { %v5276_v15 = vpop.f32.mrb[48].mxu1  ;;  %v5360_v38 = vpop.f32.mrb[4].mxu0 }
 0x538   : > { %v6412_v16 = vadd.f32 %v5276_v15, %v4806_v12  ;;  %v5278_v18 = vpop.f32.mrb[49].mxu1  ;;  %v6402_v23 = vpop.f32.mrb[5].mxu0 }
 0x539   : > { %v6413_v19 = vadd.f32 %v5278_v18, %v4810_v5  ;;  %v5280_v20 = vpop.f32.mrb[50].mxu1  ;;  %v5363_v21 = vpop.f32.mrb[6].mxu0 }
 0x53a   : > { %v5367_v10 = vmax.f32 %v6412_v16, 0.0  ;;  %v6414_v24 = vadd.f32 %v5280_v20, %v4806_v12  ;;  %v5282_v26 = vpop.f32.mrb[51].mxu1  ;;  %v6403_v27 = vpop.f32.mrb[7].mxu0 }
 0x53b   : > { %v5368_v3 = vmax.f32 %v6413_v19, 0.0  ;;  %v6415_v29 = vadd.f32 %v5282_v26, %v4810_v5 }
 0x53c   : > { %v5385_v30 = vmul.f32 %v5376_v17, %v5367_v10  ;;  %v5370_v31 = vmax.f32 %v6414_v24, 0.0 }
 0x53d   : > { %v5386_v32 = vmul.f32 %v5380_v13, %v5368_v3  ;;  %v5371_v33 = vmax.f32 %v6415_v29, 0.0 }
 0x53e   : > { %v5403_v34 = vadd.f32 %v5394_v22, %v5385_v30  ;;  %v5388_v36 = vmul.f32 %v5376_v17, %v5370_v31 }
 0x53f   : > { %v5404_v37 = vadd.f32 %v5398_v28, %v5386_v32  ;;  %v5389_v39 = vmul.f32 %v5380_v13, %v5371_v33 }
 0x540   : > { %v5406_v6 = vadd.f32 %v5394_v22, %v5388_v36 }
 0x541   : > { %v6100_v40 = vpack.c.bf16 %v5404_v37, %v5403_v34  ;;  %v5407_v41 = vadd.f32 %v5398_v28, %v5389_v39 }
 0x543   : > { %5429 = vst [vmem:[%s231_s7] sm:$0xff] %v6100_v40  ;;  %v6102_v42 = vpack.c.bf16 %v5407_v41, %v5406_v6 }
 0x545   : > { %5431 = vst [vmem:[%s231_s7 + $0xc] sm:$0xff] %v6102_v42 }
 0x557   : > { %v6349_v7 = vpop.f32.mrb[52].mxu1 }
 0x558   : > { %v6350_v46 = vpop.f32.mrb[53].mxu1 }
 0x559   : > { %v6351_v48 = vadd.f32 %v6350_v46, %v6349_v7  ;;  %v6352_v49 = vpop.f32.mrb[54].mxu1 }
 0x55a   : > { %v6353_v50 = vpop.f32.mrb[55].mxu1 }
 0x55b   : > { %v5320_v4 = vadd.f32 %v6351_v48, %v4814_v44  ;;  %v6354_v52 = vadd.f32 %v6353_v50, %v6352_v49 }
 0x55d   : > { %v5361_v53 = vadd.f32 %v5360_v38, %v5320_v4  ;;  %v5323_v56 = vadd.f32 %v6354_v52, %v4814_v44 }
 0x55f   : > { %v5369_v45 = vmax.f32 %v5361_v53, 0.0  ;;  %v5364_v58 = vadd.f32 %v5363_v21, %v5323_v56 }
 0x561   : > { %v5387_v47 = vmul.f32 %v5384_v55, %v5369_v45  ;;  %v5372_v51 = vmax.f32 %v5364_v58, 0.0 }
 0x563   : > { %v5405_v59 = vadd.f32 %v5402_v57, %v5387_v47  ;;  %v5390_v60 = vmul.f32 %v5384_v55, %v5372_v51 }
 0x565   : > { %v6101_v61 = vpack.c.bf16 %v5405_v59, %v5405_v59  ;;  %v5408_v62 = vadd.f32 %v5402_v57, %v5390_v60 }
 0x567   : > { %5430 = vst [vmem:[%s231_s7 + $0x8] sm:$0xf] %v6101_v61  ;;  %v6103_v63 = vpack.c.bf16 %v5408_v62, %v5408_v62 }
 0x569   : > { %5432 = vst [vmem:[%s231_s7 + $0x14] sm:$0xf] %v6103_v63 }
 0x56a PF: > { %s15_s18 = sadd.s32 1, %s7279_s18  }
 0x56b   : > { %p12_p4 = scmp.ge.s32.totalorder %s15_s18, 4  }
 0x56d   :  { %14 = sbr.rel (!%p12_p4) target bundleno = 1 (0x1), region = 70 }

// kernel: nin_forward.7
= control target key start
LH: loop header
LB: loop body
LE: loop exit
PB: predicated region body
PF: predicated region fallthrough
CT: control target
= control target key end

     0   :  { %s3994_s18 = smov 0   ;;  %s4793_s0 = inlined_call_operand.vmem [shape: bf16[32,3456], index: 0, kind: input, shape index: {}]   ;;  %s4794_s1 = inlined_call_operand.vmem [shape: bf16[3456,128], index: 1, kind: input, shape index: {}]   ;;  %s4795_s2 = inlined_call_operand.vmem [shape: bf16[128,128], index: 2, kind: input, shape index: {}]   ;;  %s4796_s3 = inlined_call_operand.vmem [shape: bf16[128,128], index: 3, kind: input, shape index: {}]   ;;  %s4797_s4 = inlined_call_operand.vmem [shape: f32[8,128], index: 4, kind: input, shape index: {}]   ;;  %s4798_s5 = inlined_call_operand.vmem [shape: bf16[32,128], index: 5, kind: output, shape index: {}]  }
   0x1 LB: > { %s3019_s19 = sadd.s32 4294967295, %s3960_s18   ;;  %p3023_p0 = scmp.ge.s32.totalorder %s3960_s18, 1  ;;  %s3960_s18 = sphi %s3994_s18, %s15_s18  }
   0x2   : > { %p189_p1 = scmp.lt.s32.totalorder %s3960_s18, 3 }
   0x4   : > { %p190_p2 = pnand %p3023_p0, %p189_p1 }
   0x5   : > { %v3682_v0 = vld [vmem:[%s4794_s1 + $0x40] sm:$0xff] (!%p190_p2)   ;;  %v3686_v4 = vld [vmem:[%s4794_s1 + $0x48] sm:$0xff] (!%p190_p2)   ;;  %v3690_v8 = vld [vmem:[%s4794_s1 + $0x50] sm:$0xff] (!%p190_p2)   ;;  %s3024_s25 = sshll.u32 (!%p190_p2), %s3019_s19, 1  ;;  %vm3963_vm0 = vmmov (!%p190_p2), 0  }
   0x6   : > { %193 = sbr.rel (%p190_p2) target bundleno = 904 (0x388), region = 40  ;;  %v3683_v1 = vld [vmem:[%s4794_s1] sm:$0xff] (!%p190_p2)   ;;  %3298 = vmatprep.subr.bf16.mxu0 (!%p190_p2), %v3682_v0  ;;  %v3687_v5 = vld [vmem:[%s4794_s1 + $0x8] sm:$0xff] (!%p190_p2)   ;;  %v3691_v9 = vld [vmem:[%s4794_s1 + $0x10] sm:$0xff] (!%p190_p2)   ;;  %p219_p3 = scmp.lt.s32.totalorder (!%p190_p2), %s3024_s25, 3 }
   0x7   : > { %v3684_v2 = vld [vmem:[%s4794_s1 + $0xc0] sm:$0xff] (!%p190_p2)   ;;  %3299 = vmatpush3.bf16.msra.mxu0 (!%p190_p2), %v3683_v1  ;;  %v3688_v6 = vld [vmem:[%s4794_s1 + $0xc8] sm:$0xff] (!%p190_p2)   ;;  %v3692_v10 = vld [vmem:[%s4794_s1 + $0xd0] sm:$0xff] (!%p190_p2)  }
   0x8   : > { %v3685_v3 = vld [vmem:[%s4794_s1 + $0x80] sm:$0xff] (!%p190_p2)   ;;  %3320 = vmatprep.subr.bf16.mxu1 (!%p190_p2), %v3684_v2  ;;  %3300 = vmatprep.subr.bf16.mxu0 (!%p190_p2), %v3686_v4  ;;  %v3689_v7 = vld [vmem:[%s4794_s1 + $0x88] sm:$0xff] (!%p190_p2)   ;;  %v3693_v11 = vld [vmem:[%s4794_s1 + $0x90] sm:$0xff] (!%p190_p2)  }
   0x9   : > { %3321 = vmatpush3.bf16.msra.mxu1 (!%p190_p2), %v3685_v3  ;;  %v3694_v12 = vld [vmem:[%s4794_s1 + $0x58] sm:$0xff] (!%p190_p2)   ;;  %v3698_v16 = vld [vmem:[%s4794_s1 + $0x60] sm:$0xff] (!%p190_p2)   ;;  %v3702_v20 = vld [vmem:[%s4794_s1 + $0x68] sm:$0xff] (!%p190_p2)  }
   0xa   : > { %3322 = vmatprep.subr.bf16.mxu1 (!%p190_p2), %v3688_v6  ;;  %v3695_v13 = vld [vmem:[%s4794_s1 + $0x18] sm:$0xff] (!%p190_p2)   ;;  %v3699_v17 = vld [vmem:[%s4794_s1 + $0x20] sm:$0xff] (!%p190_p2)   ;;  %v3703_v21 = vld [vmem:[%s4794_s1 + $0x28] sm:$0xff] (!%p190_p2)  }
   0xb   : > { %3301 = vmatpush3.bf16.msra.mxu0 (!%p190_p2), %v3687_v5  ;;  %v3696_v14 = vld [vmem:[%s4794_s1 + $0xd8] sm:$0xff] (!%p190_p2)   ;;  %v3700_v18 = vld [vmem:[%s4794_s1 + $0xe0] sm:$0xff] (!%p190_p2)   ;;  %v3704_v22 = vld [vmem:[%s4794_s1 + $0xe8] sm:$0xff] (!%p190_p2)  }
   0xc   : > { %3302 = vmatprep.subr.bf16.mxu0 (!%p190_p2), %v3690_v8  ;;  %v3697_v15 = vld [vmem:[%s4794_s1 + $0x98] sm:$0xff] (!%p190_p2)   ;;  %v3701_v19 = vld [vmem:[%s4794_s1 + $0xa0] sm:$0xff] (!%p190_p2)   ;;  %v3705_v23 = vld [vmem:[%s4794_s1 + $0xa8] sm:$0xff] (!%p190_p2)  }
   0xd   : > { %3323 = vmatpush3.bf16.msra.mxu1 %v3689_v7  ;;  %s4800_s25 = smov (!%p219_p3, %s3024_s25), 3  ;;  %v3706_v24 = vld [vmem:[%s4794_s1 + $0x70] sm:$0xff]   ;;  %v3710_v28 = vld [vmem:[%s4794_s1 + $0x78] sm:$0xff]   ;;  %v3717_v34 = vld [vmem:[%s4794_s1 + $0x140] sm:$0xff]  }
   0xe   : > { %3324 = vmatprep.subr.bf16.mxu1 %v3692_v10  ;;  %s3671_s24 = smul.u32 108, %s4800_s25  ;;  %v3707_v25 = vld [vmem:[%s4794_s1 + $0x30] sm:$0xff]   ;;  %v3711_v29 = vld [vmem:[%s4794_s1 + $0x38] sm:$0xff]   ;;  %v3721_v37 = vld [vmem:[%s4794_s1 + $0x100] sm:$0xff]   ;;  %s3027_s23 = sshll.u32 %s4800_s25, 2 }
   0xf   : > { %3303 = vmatpush3.bf16.msra.mxu0 %v3691_v9  ;;  %v3708_v26 = vld [vmem:[%s4794_s1 + $0xf0] sm:$0xff]   ;;  %v3712_v30 = vld [vmem:[%s4794_s1 + $0xf8] sm:$0xff]   ;;  %v3722_v38 = vld [vmem:[%s4794_s1 + $0x1c0] sm:$0xff]   ;;  %s229_s27 = scalar_lea.vmem %s4798_s5, %s3027_s23 }
  0x10   : > { %3304 = vmatprep.subr.bf16.mxu0 %v3694_v12  ;;  %v3709_v27 = vld [vmem:[%s4794_s1 + $0xb0] sm:$0xff]   ;;  %s4097_s10 = scalar_lea.vmem %s4793_s0, %s3671_s24  ;;  %v3716_v33 = vld [vmem:[%s4794_s1 + $0xb8] sm:$0xff]   ;;  %v3723_v39 = vld [vmem:[%s4794_s1 + $0x180] sm:$0xff]  }
  0x11   : > { %3325 = vmatpush3.bf16.msra.mxu1 %v3693_v11  ;;  %v3713_v31 = vld [vmem:[%s4097_s10] ss:$108 sps:$4 sm:$0xff]   ;;  %v3715_v32 = vld [vmem:[%s4097_s10 + $0x4] ss:$108 sps:$4 sm:$0xff]   ;;  %v3718_v35 = vld [vmem:[%s4097_s10 + $0x8] ss:$108 sps:$4 sm:$0xff]  }
  0x12   : > { %3326 = vmatprep.subr.bf16.mxu1 %v3696_v14  ;;  %2161 = vmatprep.mubr.bf16.mxu0 %v3715_v32  ;;  %v3720_v36 = vld [vmem:[%s4097_s10 + $0xc] ss:$108 sps:$4 sm:$0xff]   ;;  %v3728_v44 = vld [vmem:[%s4794_s1 + $0x150] sm:$0xff]   ;;  %v3736_v52 = vld [vmem:[%s4794_s1 + $0x160] sm:$0xff]  }
  0x13   : > { %3305 = vmatpush3.bf16.msra.mxu0 %v3695_v13  ;;  %2202 = vmatprep.mubr.bf16.mxu1 %v3720_v36  ;;  %v3724_v40 = vld [vmem:[%s4794_s1 + $0x148] sm:$0xff]   ;;  %v3729_v45 = vld [vmem:[%s4794_s1 + $0x110] sm:$0xff]   ;;  %v3732_v48 = vld [vmem:[%s4794_s1 + $0x158] sm:$0xff]  }
  0x14   : > { %3306 = vmatprep.subr.bf16.mxu0 %v3698_v16  ;;  %v3725_v41 = vld [vmem:[%s4794_s1 + $0x108] sm:$0xff]   ;;  %v3730_v46 = vld [vmem:[%s4794_s1 + $0x1d0] sm:$0xff]   ;;  %v3733_v49 = vld [vmem:[%s4794_s1 + $0x118] sm:$0xff]  }
  0x15   : > { %3327 = vmatpush3.bf16.msra.mxu1 %v3697_v15  ;;  %v3726_v42 = vld [vmem:[%s4794_s1 + $0x1c8] sm:$0xff]   ;;  %v3731_v47 = vld [vmem:[%s4794_s1 + $0x190] sm:$0xff]   ;;  %v3734_v50 = vld [vmem:[%s4794_s1 + $0x1d8] sm:$0xff]  }
  0x16   : > { %3328 = vmatprep.subr.bf16.mxu1 %v3700_v18  ;;  %v3727_v43 = vld [vmem:[%s4794_s1 + $0x188] sm:$0xff]   ;;  %v3735_v51 = vld [vmem:[%s4794_s1 + $0x198] sm:$0xff]   ;;  %v3737_v53 = vld [vmem:[%s4794_s1 + $0x120] sm:$0xff]  }
  0x17   : > { %3307 = vmatpush3.bf16.msra.mxu0 %v3699_v17  ;;  %v3738_v54 = vld [vmem:[%s4794_s1 + $0x1e0] sm:$0xff]   ;;  %v3740_v56 = vld [vmem:[%s4794_s1 + $0x168] sm:$0xff]   ;;  %v3744_v60 = vld [vmem:[%s4794_s1 + $0x170] sm:$0xff]  }
  0x18   : > { %3308 = vmatprep.subr.bf16.mxu0 %v3702_v20  ;;  %v3739_v55 = vld [vmem:[%s4794_s1 + $0x1a0] sm:$0xff]   ;;  %v3741_v57 = vld [vmem:[%s4794_s1 + $0x128] sm:$0xff]   ;;  %v3745_v61 = vld [vmem:[%s4794_s1 + $0x130] sm:$0xff]  }
  0x19   : > { %3329 = vmatpush3.bf16.msra.mxu1 %v3701_v19  ;;  %v3742_v58 = vld [vmem:[%s4794_s1 + $0x1e8] sm:$0xff]   ;;  %v3746_v62 = vld [vmem:[%s4794_s1 + $0x1f0] sm:$0xff]   ;;  %v3748_v0 = vld [vmem:[%s4794_s1 + $0x178] sm:$0xff]  }
  0x1a   : > { %3330 = vmatprep.subr.bf16.mxu1 %v3704_v22  ;;  %v3743_v59 = vld [vmem:[%s4794_s1 + $0x1a8] sm:$0xff]   ;;  %v3747_v63 = vld [vmem:[%s4794_s1 + $0x1b0] sm:$0xff]   ;;  %v3749_v1 = vld [vmem:[%s4794_s1 + $0x138] sm:$0xff]  }
  0x1b   : > { %3309 = vmatpush3.bf16.msra.mxu0 %v3703_v21  ;;  %v3750_v2 = vld [vmem:[%s4794_s1 + $0x1f8] sm:$0xff]   ;;  %v3753_v4 = vld [vmem:[%s4097_s10 + $0x14] ss:$108 sps:$4 sm:$0xff]   ;;  %v3762_v12 = vld [vmem:[%s4794_s1 + $0x248] sm:$0xff]  }
  0x1c   : > { %3310 = vmatprep.subr.bf16.mxu0 %v3706_v24  ;;  %v3751_v3 = vld [vmem:[%s4097_s10 + $0x10] ss:$108 sps:$4 sm:$0xff]   ;;  %v3755_v6 = vld [vmem:[%s4794_s1 + $0x240] sm:$0xff]   ;;  %v3763_v13 = vld [vmem:[%s4794_s1 + $0x208] sm:$0xff]  }
  0x1d   : > { %3331 = vmatpush3.bf16.msra.mxu1 %v3705_v23  ;;  %v3754_v5 = vld [vmem:[%s4794_s1 + $0x1b8] sm:$0xff]   ;;  %v3759_v9 = vld [vmem:[%s4794_s1 + $0x200] sm:$0xff]   ;;  %v3764_v14 = vld [vmem:[%s4794_s1 + $0x2c8] sm:$0xff]  }
  0x1e   : > { %3332 = vmatprep.subr.bf16.mxu1 %v3708_v26  ;;  %v3756_v7 = vld [vmem:[%s4097_s10 + $0x18] ss:$108 sps:$4 sm:$0xff]   ;;  %v3758_v8 = vld [vmem:[%s4097_s10 + $0x1c] ss:$108 sps:$4 sm:$0xff]   ;;  %v3766_v16 = vld [vmem:[%s4794_s1 + $0x250] sm:$0xff]  }
  0x1f   : > { %3311 = vmatpush3.bf16.msra.mxu0 %v3707_v25  ;;  %v3760_v10 = vld [vmem:[%s4794_s1 + $0x2c0] sm:$0xff]   ;;  %v3765_v15 = vld [vmem:[%s4794_s1 + $0x288] sm:$0xff]   ;;  %v3767_v17 = vld [vmem:[%s4794_s1 + $0x210] sm:$0xff]  }
  0x20   : > { %3312 = vmatprep.subr.bf16.mxu0 %v3710_v28  ;;  %v3761_v11 = vld [vmem:[%s4794_s1 + $0x280] sm:$0xff]   ;;  %v3768_v18 = vld [vmem:[%s4794_s1 + $0x2d0] sm:$0xff]   ;;  %v3770_v20 = vld [vmem:[%s4794_s1 + $0x258] sm:$0xff]  }
  0x21   : > { %3333 = vmatpush3.bf16.msra.mxu1 %v3709_v27  ;;  %v3769_v19 = vld [vmem:[%s4794_s1 + $0x290] sm:$0xff]   ;;  %v3771_v21 = vld [vmem:[%s4794_s1 + $0x218] sm:$0xff]   ;;  %v3774_v24 = vld [vmem:[%s4794_s1 + $0x260] sm:$0xff]  }
  0x22   : > { %3334 = vmatprep.subr.bf16.mxu1 %v3712_v30  ;;  %v3772_v22 = vld [vmem:[%s4794_s1 + $0x2d8] sm:$0xff]   ;;  %v3775_v25 = vld [vmem:[%s4794_s1 + $0x220] sm:$0xff]   ;;  %v3778_v28 = vld [vmem:[%s4794_s1 + $0x268] sm:$0xff]  }
  0x23   : > { %3313 = vmatpush3.bf16.msra.mxu0 %v3711_v29  ;;  %v3773_v23 = vld [vmem:[%s4794_s1 + $0x298] sm:$0xff]   ;;  %v3776_v26 = vld [vmem:[%s4794_s1 + $0x2e0] sm:$0xff]   ;;  %v3779_v29 = vld [vmem:[%s4794_s1 + $0x228] sm:$0xff]  }
  0x24   : > { %3342 = vmatprep.subr.bf16.mxu0 %v3717_v34  ;;  %v3777_v27 = vld [vmem:[%s4794_s1 + $0x2a0] sm:$0xff]   ;;  %v3780_v30 = vld [vmem:[%s4794_s1 + $0x2e8] sm:$0xff]   ;;  %v3782_v32 = vld [vmem:[%s4794_s1 + $0x270] sm:$0xff]  }
  0x25   : > { %3335 = vmatpush3.bf16.msra.mxu1 %v3716_v33  ;;  %v3783_v33 = vld [vmem:[%s4794_s1 + $0x230] sm:$0xff]   ;;  %v3786_v36 = vld [vmem:[%s4794_s1 + $0x278] sm:$0xff]  }
  0x26   : > { %2162 = vmatmul.mubr.bf16.vlgmr.msra.gmra.mrb[0].mxu0 %v3713_v31  ;;  %3364 = vmatprep.subr.bf16.mxu1 %v3722_v38  ;;  %v3781_v31 = vld [vmem:[%s4794_s1 + $0x2a8] sm:$0xff]   ;;  %v3784_v34 = vld [vmem:[%s4794_s1 + $0x2f0] sm:$0xff]   ;;  %v3788_v38 = vld [vmem:[%s4794_s1 + $0x2f8] sm:$0xff]  }
  0x27   : > { %3343 = vmatpush3.bf16.msra.mxu0 %v3721_v37  ;;  %2243 = vmatprep.mubr.bf16.mxu0 %v3753_v4  ;;  %v3787_v37 = vld [vmem:[%s4794_s1 + $0x238] sm:$0xff]   ;;  %v3820_v4 = vld [vmem:[%s4794_s1 + $0x370] sm:$0xff]  }
  0x28   : > { %2203 = vmatmul.mubr.bf16.vlgmr.msra.gmra.mrb[0].mxu1 %v3718_v35  ;;  %3344 = vmatprep.subr.bf16.mxu0 %v3724_v40  ;;  %v3785_v35 = vld [vmem:[%s4794_s1 + $0x2b0] sm:$0xff]  }
  0x29   : > { %3365 = vmatpush3.bf16.msra.mxu1 %v3723_v39  ;;  %2284 = vmatprep.mubr.bf16.mxu1 %v3758_v8  ;;  %v3789_v39 = vld [vmem:[%s4097_s10 + $0x20] ss:$108 sps:$4 sm:$0xff]   ;;  %v3791_v40 = vld [vmem:[%s4097_s10 + $0x24] ss:$108 sps:$4 sm:$0xff]   ;;  %v3824_v8 = vld [vmem:[%s4794_s1 + $0x378] sm:$0xff]  }
  0x2a   : > { %3366 = vmatprep.subr.bf16.mxu1 %v3726_v42  ;;  %v3793_v42 = vld [vmem:[%s4794_s1 + $0x340] sm:$0xff]  }
  0x2b   : > { %3345 = vmatpush3.bf16.msra.mxu0 %v3725_v41  ;;  %v3792_v41 = vld [vmem:[%s4794_s1 + $0x2b8] sm:$0xff]  }
  0x2c   : > { %3346 = vmatprep.subr.bf16.mxu0 %v3728_v44  ;;  %v3796_v44 = vld [vmem:[%s4097_s10 + $0x2c] ss:$108 sps:$4 sm:$0xff]  }
  0x2d   : > { %3367 = vmatpush3.bf16.msra.mxu1 %v3727_v43  ;;  %v3794_v43 = vld [vmem:[%s4097_s10 + $0x28] ss:$108 sps:$4 sm:$0xff]  }
  0x2e   : > { %3368 = vmatprep.subr.bf16.mxu1 %v3730_v46  ;;  %v3798_v46 = vld [vmem:[%s4794_s1 + $0x3c0] sm:$0xff]  }
  0x2f   : > { %3347 = vmatpush3.bf16.msra.mxu0 %v3729_v45  ;;  %v3797_v45 = vld [vmem:[%s4794_s1 + $0x300] sm:$0xff]  }
  0x30   : > { %3348 = vmatprep.subr.bf16.mxu0 %v3732_v48  ;;  %v3800_v48 = vld [vmem:[%s4794_s1 + $0x348] sm:$0xff]  }
  0x31   : > { %3369 = vmatpush3.bf16.msra.mxu1 %v3731_v47  ;;  %v3799_v47 = vld [vmem:[%s4794_s1 + $0x380] sm:$0xff]  }
  0x32   : > { %3370 = vmatprep.subr.bf16.mxu1 %v3734_v50  ;;  %v3802_v50 = vld [vmem:[%s4794_s1 + $0x3c8] sm:$0xff]  }
  0x33   : > { %3349 = vmatpush3.bf16.msra.mxu0 %v3733_v49  ;;  %v3801_v49 = vld [vmem:[%s4794_s1 + $0x308] sm:$0xff]  }
  0x34   : > { %3350 = vmatprep.subr.bf16.mxu0 %v3736_v52  ;;  %v3804_v52 = vld [vmem:[%s4794_s1 + $0x350] sm:$0xff]  }
  0x35   : > { %3371 = vmatpush3.bf16.msra.mxu1 %v3735_v51  ;;  %v3803_v51 = vld [vmem:[%s4794_s1 + $0x388] sm:$0xff]  }
  0x36   : > { %3372 = vmatprep.subr.bf16.mxu1 %v3738_v54  ;;  %v3806_v54 = vld [vmem:[%s4794_s1 + $0x3d0] sm:$0xff]  }
  0x37   : > { %3351 = vmatpush3.bf16.msra.mxu0 %v3737_v53  ;;  %v3805_v53 = vld [vmem:[%s4794_s1 + $0x310] sm:$0xff]  }
  0x38   : > { %3352 = vmatprep.subr.bf16.mxu0 %v3740_v56  ;;  %v3808_v56 = vld [vmem:[%s4794_s1 + $0x358] sm:$0xff]  }
  0x39   : > { %3373 = vmatpush3.bf16.msra.mxu1 %v3739_v55  ;;  %v3807_v55 = vld [vmem:[%s4794_s1 + $0x390] sm:$0xff]  }
  0x3a   : > { %3374 = vmatprep.subr.bf16.mxu1 %v3742_v58  ;;  %v3810_v58 = vld [vmem:[%s4794_s1 + $0x3d8] sm:$0xff]  }
  0x3b   : > { %3353 = vmatpush3.bf16.msra.mxu0 %v3741_v57  ;;  %v3809_v57 = vld [vmem:[%s4794_s1 + $0x318] sm:$0xff]  }
  0x3c   : > { %3354 = vmatprep.subr.bf16.mxu0 %v3744_v60  ;;  %v3812_v60 = vld [vmem:[%s4794_s1 + $0x360] sm:$0xff]  }
  0x3d   : > { %3375 = vmatpush3.bf16.msra.mxu1 %v3743_v59  ;;  %v3811_v59 = vld [vmem:[%s4794_s1 + $0x398] sm:$0xff]  }
  0x3e   : > { %3376 = vmatprep.subr.bf16.mxu1 %v3746_v62  ;;  %v3814_v62 = vld [vmem:[%s4794_s1 + $0x3e0] sm:$0xff]  }
  0x3f   : > { %3355 = vmatpush3.bf16.msra.mxu0 %v3745_v61  ;;  %v3813_v61 = vld [vmem:[%s4794_s1 + $0x320] sm:$0xff]  }
  0x40   : > { %3356 = vmatprep.subr.bf16.mxu0 %v3748_v0  ;;  %v3816_v0 = vld [vmem:[%s4794_s1 + $0x368] sm:$0xff]  }
  0x41   : > { %3377 = vmatpush3.bf16.msra.mxu1 %v3747_v63  ;;  %v3815_v63 = vld [vmem:[%s4794_s1 + $0x3a0] sm:$0xff]  }
  0x42   : > { %3378 = vmatprep.subr.bf16.mxu1 %v3750_v2  ;;  %v3818_v2 = vld [vmem:[%s4794_s1 + $0x3e8] sm:$0xff]  }
  0x43   : > { %3357 = vmatpush3.bf16.msra.mxu0 %v3749_v1  ;;  %v3817_v1 = vld [vmem:[%s4794_s1 + $0x328] sm:$0xff]  }
  0x44   : > { %3386 = vmatprep.subr.bf16.mxu0 %v3755_v6  ;;  %v3822_v6 = vld [vmem:[%s4794_s1 + $0x3f0] sm:$0xff]  }
  0x45   : > { %3379 = vmatpush3.bf16.msra.mxu1 %v3754_v5  ;;  %v3821_v5 = vld [vmem:[%s4794_s1 + $0x330] sm:$0xff]  }
  0x46   : > { %2244 = vmatmul.mubr.bf16.vlgmr.msra.gmra.mrb[4].mxu0 %v3751_v3  ;;  %3408 = vmatprep.subr.bf16.mxu1 %v3760_v10  ;;  %v3819_v3 = vld [vmem:[%s4794_s1 + $0x3a8] sm:$0xff]   ;;  %v3826_v10 = vld [vmem:[%s4794_s1 + $0x3f8] sm:$0xff]  }
  0x47   : > { %3387 = vmatpush3.bf16.msra.mxu0 %v3759_v9  ;;  %2325 = vmatprep.mubr.bf16.mxu0 %v3791_v40  ;;  %v3825_v9 = vld [vmem:[%s4794_s1 + $0x338] sm:$0xff]   ;;  %v3858_v40 = vld [vmem:[%s4794_s1 + $0x470] sm:$0xff]  }
  0x48   : > { %2285 = vmatmul.mubr.bf16.vlgmr.msra.gmra.mrb[4].mxu1 %v3756_v7  ;;  %3388 = vmatprep.subr.bf16.mxu0 %v3762_v12  ;;  %v3823_v7 = vld [vmem:[%s4794_s1 + $0x3b0] sm:$0xff]  }
  0x49   : > { %3409 = vmatpush3.bf16.msra.mxu1 %v3761_v11  ;;  %2366 = vmatprep.mubr.bf16.mxu1 %v3796_v44  ;;  %v3827_v11 = vld [vmem:[%s4097_s10 + $0x30] ss:$108 sps:$4 sm:$0xff]   ;;  %v3829_v12 = vld [vmem:[%s4097_s10 + $0x34] ss:$108 sps:$4 sm:$0xff]  }
  0x4a   : > { %3410 = vmatprep.subr.bf16.mxu1 %v3764_v14  ;;  %v3831_v14 = vld [vmem:[%s4794_s1 + $0x440] sm:$0xff]   ;;  %v3862_v44 = vld [vmem:[%s4794_s1 + $0x478] sm:$0xff]  }
  0x4b   : > { %3389 = vmatpush3.bf16.msra.mxu0 %v3763_v13  ;;  %v3830_v13 = vld [vmem:[%s4794_s1 + $0x3b8] sm:$0xff]  }
  0x4c   : > { %3390 = vmatprep.subr.bf16.mxu0 %v3766_v16  ;;  %v3834_v16 = vld [vmem:[%s4097_s10 + $0x3c] ss:$108 sps:$4 sm:$0xff]  }
  0x4d   : > { %3411 = vmatpush3.bf16.msra.mxu1 %v3765_v15  ;;  %v3832_v15 = vld [vmem:[%s4097_s10 + $0x38] ss:$108 sps:$4 sm:$0xff]  }
  0x4e   : > { %3412 = vmatprep.subr.bf16.mxu1 %v3768_v18  ;;  %v3836_v18 = vld [vmem:[%s4794_s1 + $0x4c0] sm:$0xff]  }
  0x4f   : > { %3391 = vmatpush3.bf16.msra.mxu0 %v3767_v17  ;;  %v3835_v17 = vld [vmem:[%s4794_s1 + $0x400] sm:$0xff]  }
  0x50   : > { %3392 = vmatprep.subr.bf16.mxu0 %v3770_v20  ;;  %v3838_v20 = vld [vmem:[%s4794_s1 + $0x448] sm:$0xff]  }
  0x51   : > { %3413 = vmatpush3.bf16.msra.mxu1 %v3769_v19  ;;  %v3837_v19 = vld [vmem:[%s4794_s1 + $0x480] sm:$0xff]  }
  0x52   : > { %3414 = vmatprep.subr.bf16.mxu1 %v3772_v22  ;;  %v3840_v22 = vld [vmem:[%s4794_s1 + $0x4c8] sm:$0xff]  }
  0x53   : > { %3393 = vmatpush3.bf16.msra.mxu0 %v3771_v21  ;;  %v3839_v21 = vld [vmem:[%s4794_s1 + $0x408] sm:$0xff]  }
  0x54   : > { %3394 = vmatprep.subr.bf16.mxu0 %v3774_v24  ;;  %v3842_v24 = vld [vmem:[%s4794_s1 + $0x450] sm:$0xff]  }
  0x55   : > { %3415 = vmatpush3.bf16.msra.mxu1 %v3773_v23  ;;  %v3841_v23 = vld [vmem:[%s4794_s1 + $0x488] sm:$0xff]  }
  0x56   : > { %3416 = vmatprep.subr.bf16.mxu1 %v3776_v26  ;;  %v3844_v26 = vld [vmem:[%s4794_s1 + $0x4d0] sm:$0xff]  }
  0x57   : > { %3395 = vmatpush3.bf16.msra.mxu0 %v3775_v25  ;;  %v3843_v25 = vld [vmem:[%s4794_s1 + $0x410] sm:$0xff]  }
  0x58   : > { %3396 = vmatprep.subr.bf16.mxu0 %v3778_v28  ;;  %v3846_v28 = vld [vmem:[%s4794_s1 + $0x458] sm:$0xff]  }
  0x59   : > { %3417 = vmatpush3.bf16.msra.mxu1 %v3777_v27  ;;  %v3845_v27 = vld [vmem:[%s4794_s1 + $0x490] sm:$0xff]  }
  0x5a   : > { %3418 = vmatprep.subr.bf16.mxu1 %v3780_v30  ;;  %v3848_v30 = vld [vmem:[%s4794_s1 + $0x4d8] sm:$0xff]  }
  0x5b   : > { %3397 = vmatpush3.bf16.msra.mxu0 %v3779_v29  ;;  %v3847_v29 = vld [vmem:[%s4794_s1 + $0x418] sm:$0xff]  }
  0x5c   : > { %3398 = vmatprep.subr.bf16.mxu0 %v3782_v32  ;;  %v3850_v32 = vld [vmem:[%s4794_s1 + $0x460] sm:$0xff]  }
  0x5d   : > { %3419 = vmatpush3.bf16.msra.mxu1 %v3781_v31  ;;  %v3849_v31 = vld [vmem:[%s4794_s1 + $0x498] sm:$0xff]  }
  0x5e   : > { %3420 = vmatprep.subr.bf16.mxu1 %v3784_v34  ;;  %v3852_v34 = vld [vmem:[%s4794_s1 + $0x4e0] sm:$0xff]  }
  0x5f   : > { %3399 = vmatpush3.bf16.msra.mxu0 %v3783_v33  ;;  %v3851_v33 = vld [vmem:[%s4794_s1 + $0x420] sm:$0xff]  }
  0x60   : > { %3400 = vmatprep.subr.bf16.mxu0 %v3786_v36  ;;  %v3854_v36 = vld [vmem:[%s4794_s1 + $0x468] sm:$0xff]  }
  0x61   : > { %3421 = vmatpush3.bf16.msra.mxu1 %v3785_v35  ;;  %v3853_v35 = vld [vmem:[%s4794_s1 + $0x4a0] sm:$0xff]  }
  0x62   : > { %3422 = vmatprep.subr.bf16.mxu1 %v3788_v38  ;;  %v3856_v38 = vld [vmem:[%s4794_s1 + $0x4e8] sm:$0xff]  }
  0x63   : > { %3401 = vmatpush3.bf16.msra.mxu0 %v3787_v37  ;;  %v3855_v37 = vld [vmem:[%s4794_s1 + $0x428] sm:$0xff]  }
  0x64   : > { %3430 = vmatprep.subr.bf16.mxu0 %v3793_v42  ;;  %v3860_v42 = vld [vmem:[%s4794_s1 + $0x4f0] sm:$0xff]  }
  0x65   : > { %3423 = vmatpush3.bf16.msra.mxu1 %v3792_v41  ;;  %v3859_v41 = vld [vmem:[%s4794_s1 + $0x430] sm:$0xff]  }
  0x66   : > { %2326 = vmatmul.mubr.bf16.vlgmr.msra.gmra.mrb[8].mxu0 %v3789_v39  ;;  %3452 = vmatprep.subr.bf16.mxu1 %v3798_v46  ;;  %v3857_v39 = vld [vmem:[%s4794_s1 + $0x4a8] sm:$0xff]   ;;  %v3864_v46 = vld [vmem:[%s4794_s1 + $0x4f8] sm:$0xff]  }
  0x67   : > { %3431 = vmatpush3.bf16.msra.mxu0 %v3797_v45  ;;  %2407 = vmatprep.mubr.bf16.mxu0 %v3829_v12  ;;  %v3863_v45 = vld [vmem:[%s4794_s1 + $0x438] sm:$0xff]   ;;  %v3896_v12 = vld [vmem:[%s4794_s1 + $0x570] sm:$0xff]  }
  0x68   : > { %2367 = vmatmul.mubr.bf16.vlgmr.msra.gmra.mrb[8].mxu1 %v3794_v43  ;;  %3432 = vmatprep.subr.bf16.mxu0 %v3800_v48  ;;  %v3861_v43 = vld [vmem:[%s4794_s1 + $0x4b0] sm:$0xff]  }
  0x69   : > { %3453 = vmatpush3.bf16.msra.mxu1 %v3799_v47  ;;  %2448 = vmatprep.mubr.bf16.mxu1 %v3834_v16  ;;  %v3865_v47 = vld [vmem:[%s4097_s10 + $0x40] ss:$108 sps:$4 sm:$0xff]   ;;  %v3867_v48 = vld [vmem:[%s4097_s10 + $0x44] ss:$108 sps:$4 sm:$0xff]   ;;  %v3900_v16 = vld [vmem:[%s4794_s1 + $0x578] sm:$0xff]  }
  0x6a   : > { %3454 = vmatprep.subr.bf16.mxu1 %v3802_v50  ;;  %v3869_v50 = vld [vmem:[%s4794_s1 + $0x540] sm:$0xff]  }
  0x6b   : > { %3433 = vmatpush3.bf16.msra.mxu0 %v3801_v49  ;;  %v3868_v49 = vld [vmem:[%s4794_s1 + $0x4b8] sm:$0xff]  }
  0x6c   : > { %3434 = vmatprep.subr.bf16.mxu0 %v3804_v52  ;;  %v3872_v52 = vld [vmem:[%s4097_s10 + $0x4c] ss:$108 sps:$4 sm:$0xff]  }
  0x6d   : > { %3455 = vmatpush3.bf16.msra.mxu1 %v3803_v51  ;;  %v3870_v51 = vld [vmem:[%s4097_s10 + $0x48] ss:$108 sps:$4 sm:$0xff]  }
  0x6e   : > { %3456 = vmatprep.subr.bf16.mxu1 %v3806_v54  ;;  %v3874_v54 = vld [vmem:[%s4794_s1 + $0x5c0] sm:$0xff]  }
  0x6f   : > { %3435 = vmatpush3.bf16.msra.mxu0 %v3805_v53  ;;  %v3873_v53 = vld [vmem:[%s4794_s1 + $0x500] sm:$0xff]  }
  0x70   : > { %3436 = vmatprep.subr.bf16.mxu0 %v3808_v56  ;;  %v3876_v56 = vld [vmem:[%s4794_s1 + $0x548] sm:$0xff]  }
  0x71   : > { %3457 = vmatpush3.bf16.msra.mxu1 %v3807_v55  ;;  %v3875_v55 = vld [vmem:[%s4794_s1 + $0x580] sm:$0xff]  }
  0x72   : > { %3458 = vmatprep.subr.bf16.mxu1 %v3810_v58  ;;  %v3878_v58 = vld [vmem:[%s4794_s1 + $0x5c8] sm:$0xff]  }
  0x73   : > { %3437 = vmatpush3.bf16.msra.mxu0 %v3809_v57  ;;  %v3877_v57 = vld [vmem:[%s4794_s1 + $0x508] sm:$0xff]  }
  0x74   : > { %3438 = vmatprep.subr.bf16.mxu0 %v3812_v60  ;;  %v3880_v60 = vld [vmem:[%s4794_s1 + $0x550] sm:$0xff]  }
  0x75   : > { %3459 = vmatpush3.bf16.msra.mxu1 %v3811_v59  ;;  %v3879_v59 = vld [vmem:[%s4794_s1 + $0x588] sm:$0xff]  }
  0x76   : > { %3460 = vmatprep.subr.bf16.mxu1 %v3814_v62  ;;  %v3882_v62 = vld [vmem:[%s4794_s1 + $0x5d0] sm:$0xff]  }
  0x77   : > { %3439 = vmatpush3.bf16.msra.mxu0 %v3813_v61  ;;  %v3881_v61 = vld [vmem:[%s4794_s1 + $0x510] sm:$0xff]  }
  0x78   : > { %3440 = vmatprep.subr.bf16.mxu0 %v3816_v0  ;;  %v3884_v0 = vld [vmem:[%s4794_s1 + $0x558] sm:$0xff]  }
  0x79   : > { %3461 = vmatpush3.bf16.msra.mxu1 %v3815_v63  ;;  %v3883_v63 = vld [vmem:[%s4794_s1 + $0x590] sm:$0xff]  }
  0x7a   : > { %3462 = vmatprep.subr.bf16.mxu1 %v3818_v2  ;;  %v3886_v2 = vld [vmem:[%s4794_s1 + $0x5d8] sm:$0xff]  }
  0x7b   : > { %3441 = vmatpush3.bf16.msra.mxu0 %v3817_v1  ;;  %v3885_v1 = vld [vmem:[%s4794_s1 + $0x518] sm:$0xff]  }
  0x7c   : > { %3442 = vmatprep.subr.bf16.mxu0 %v3820_v4  ;;  %v3888_v4 = vld [vmem:[%s4794_s1 + $0x560] sm:$0xff]  }
  0x7d   : > { %3463 = vmatpush3.bf16.msra.mxu1 %v3819_v3  ;;  %v3887_v3 = vld [vmem:[%s4794_s1 + $0x598] sm:$0xff]  }
  0x7e   : > { %3464 = vmatprep.subr.bf16.mxu1 %v3822_v6  ;;  %v3890_v6 = vld [vmem:[%s4794_s1 + $0x5e0] sm:$0xff]  }
  0x7f   : > { %3443 = vmatpush3.bf16.msra.mxu0 %v3821_v5  ;;  %v3889_v5 = vld [vmem:[%s4794_s1 + $0x520] sm:$0xff]  }
  0x80   : > { %3444 = vmatprep.subr.bf16.mxu0 %v3824_v8  ;;  %v3892_v8 = vld [vmem:[%s4794_s1 + $0x568] sm:$0xff]  }
  0x81   : > { %3465 = vmatpush3.bf16.msra.mxu1 %v3823_v7  ;;  %v3891_v7 = vld [vmem:[%s4794_s1 + $0x5a0] sm:$0xff]  }
  0x82   : > { %3466 = vmatprep.subr.bf16.mxu1 %v3826_v10  ;;  %v3894_v10 = vld [vmem:[%s4794_s1 + $0x5e8] sm:$0xff]  }
  0x83   : > { %3445 = vmatpush3.bf16.msra.mxu0 %v3825_v9  ;;  %v3893_v9 = vld [vmem:[%s4794_s1 + $0x528] sm:$0xff]  }
  0x84   : > { %3474 = vmatprep.subr.bf16.mxu0 %v3831_v14  ;;  %v3898_v14 = vld [vmem:[%s4794_s1 + $0x5f0] sm:$0xff]  }
  0x85   : > { %3467 = vmatpush3.bf16.msra.mxu1 %v3830_v13  ;;  %v3897_v13 = vld [vmem:[%s4794_s1 + $0x530] sm:$0xff]  }
  0x86   : > { %2408 = vmatmul.mubr.bf16.vlgmr.msra.gmra.mrb[12].mxu0 %v3827_v11  ;;  %3496 = vmatprep.subr.bf16.mxu1 %v3836_v18  ;;  %v3895_v11 = vld [vmem:[%s4794_s1 + $0x5a8] sm:$0xff]   ;;  %v3902_v18 = vld [vmem:[%s4794_s1 + $0x5f8] sm:$0xff]  }
  0x87   : > { %3475 = vmatpush3.bf16.msra.mxu0 %v3835_v17  ;;  %2489 = vmatprep.mubr.bf16.mxu0 %v3867_v48  ;;  %v3901_v17 = vld [vmem:[%s4794_s1 + $0x538] sm:$0xff]  }
  0x88   : > { %2449 = vmatmul.mubr.bf16.vlgmr.msra.gmra.mrb[12].mxu1 %v3832_v15  ;;  %3476 = vmatprep.subr.bf16.mxu0 %v3838_v20  ;;  %v3899_v15 = vld [vmem:[%s4794_s1 + $0x5b0] sm:$0xff]   ;;  %v3931_v48 = vld [vmem:[%s4794_s1 + $0x678] sm:$0xff]  }
  0x89   : > { %3497 = vmatpush3.bf16.msra.mxu1 %v3837_v19  ;;  %2530 = vmatprep.mubr.bf16.mxu1 %v3872_v52  ;;  %v3903_v19 = vld [vmem:[%s4097_s10 + $0x50] ss:$108 sps:$4 sm:$0xff]   ;;  %v3905_v20 = vld [vmem:[%s4097_s10 + $0x54] ss:$108 sps:$4 sm:$0xff]  }
  0x8a   : > { %3498 = vmatprep.subr.bf16.mxu1 %v3840_v22  ;;  %v3907_v22 = vld [vmem:[%s4794_s1 + $0x640] sm:$0xff]  }
  0x8b   : > { %3477 = vmatpush3.bf16.msra.mxu0 %v3839_v21  ;;  %v3906_v21 = vld [vmem:[%s4794_s1 + $0x5b8] sm:$0xff]  }
  0x8c   : > { %3478 = vmatprep.subr.bf16.mxu0 %v3842_v24  ;;  %v3910_v24 = vld [vmem:[%s4097_s10 + $0x5c] ss:$108 sps:$4 sm:$0xff]  }
  0x8d   : > { %3499 = vmatpush3.bf16.msra.mxu1 %v3841_v23  ;;  %v3908_v23 = vld [vmem:[%s4097_s10 + $0x58] ss:$108 sps:$4 sm:$0xff]  }
  0x8e   : > { %3500 = vmatprep.subr.bf16.mxu1 %v3844_v26  ;;  %v3962_v26 = vmov 0.0  }
  0x8f   : > { %3479 = vmatpush3.bf16.msra.mxu0 %v3843_v25  ;;  %v3911_v25 = vld [vmem:[%s4794_s1 + $0x600] sm:$0xff]  }
  0x90   : > { %3480 = vmatprep.subr.bf16.mxu0 %v3846_v28  ;;  %v3913_v28 = vld [vmem:[%s4794_s1 + $0x648] sm:$0xff]  }
  0x91   : > { %3501 = vmatpush3.bf16.msra.mxu1 %v3845_v27  ;;  %v3912_v27 = vld [vmem:[%s4794_s1 + $0x680] sm:$0xff]  }
  0x92   : > { %3502 = vmatprep.subr.bf16.mxu1 %v3848_v30  ;;  %v3915_v30 = vld [vmem:[%s4794_s1 + $0x688] sm:$0xff]  }
  0x93   : > { %3481 = vmatpush3.bf16.msra.mxu0 %v3847_v29  ;;  %v3914_v29 = vld [vmem:[%s4794_s1 + $0x608] sm:$0xff]  }
  0x94   : > { %3482 = vmatprep.subr.bf16.mxu0 %v3850_v32  ;;  %v3917_v32 = vld [vmem:[%s4794_s1 + $0x610] sm:$0xff]  }
  0x95   : > { %3503 = vmatpush3.bf16.msra.mxu1 %v3849_v31  ;;  %v3916_v31 = vld [vmem:[%s4794_s1 + $0x650] sm:$0xff]  }
  0x96   : > { %3504 = vmatprep.subr.bf16.mxu1 %v3852_v34  ;;  %v3919_v34 = vld [vmem:[%s4794_s1 + $0x658] sm:$0xff]  }
  0x97   : > { %3483 = vmatpush3.bf16.msra.mxu0 %v3851_v33  ;;  %v3918_v33 = vld [vmem:[%s4794_s1 + $0x690] sm:$0xff]  }
  0x98   : > { %3484 = vmatprep.subr.bf16.mxu0 %v3854_v36  ;;  %v3921_v36 = vld [vmem:[%s4794_s1 + $0x698] sm:$0xff]  }
  0x99   : > { %3505 = vmatpush3.bf16.msra.mxu1 %v3853_v35  ;;  %v3920_v35 = vld [vmem:[%s4794_s1 + $0x618] sm:$0xff]  }
  0x9a   : > { %3506 = vmatprep.subr.bf16.mxu1 %v3856_v38  ;;  %v3923_v38 = vld [vmem:[%s4794_s1 + $0x620] sm:$0xff]  }
  0x9b   : > { %3485 = vmatpush3.bf16.msra.mxu0 %v3855_v37  ;;  %v3922_v37 = vld [vmem:[%s4794_s1 + $0x660] sm:$0xff]  }
  0x9c   : > { %3486 = vmatprep.subr.bf16.mxu0 %v3858_v40  ;;  %v3925_v40 = vld [vmem:[%s4794_s1 + $0x668] sm:$0xff]  }
  0x9d   : > { %3507 = vmatpush3.bf16.msra.mxu1 %v3857_v39  ;;  %v3924_v39 = vld [vmem:[%s4794_s1 + $0x6a0] sm:$0xff]  }
  0x9e   : > { %3508 = vmatprep.subr.bf16.mxu1 %v3860_v42  ;;  %v693_v42 = vlaneseq }
  0x9f   : > { %3487 = vmatpush3.bf16.msra.mxu0 %v3859_v41  ;;  %v3926_v41 = vld [vmem:[%s4794_s1 + $0x628] sm:$0xff]  }
  0xa0   : > { %3488 = vmatprep.subr.bf16.mxu0 %v3862_v44  ;;  %v3928_v44 = vld [vmem:[%s4794_s1 + $0x670] sm:$0xff]  }
  0xa1   : > { %3509 = vmatpush3.bf16.msra.mxu1 %v3861_v43  ;;  %v3927_v43 = vld [vmem:[%s4794_s1 + $0x6a8] sm:$0xff]  }
  0xa2   : > { %3510 = vmatprep.subr.bf16.mxu1 %v3864_v46  ;;  %v3930_v46 = vld [vmem:[%s4794_s1 + $0x6b0] sm:$0xff]  }
  0xa3   : > { %3489 = vmatpush3.bf16.msra.mxu0 %v3863_v45  ;;  %v3929_v45 = vld [vmem:[%s4794_s1 + $0x630] sm:$0xff]  }
  0xa4   : > { %3518 = vmatprep.subr.bf16.mxu0 %v3869_v50  ;;  %v3932_v50 = vld [vmem:[%s4794_s1 + $0x638] sm:$0xff]  }
  0xa5   : > { %3511 = vmatpush3.bf16.msra.mxu1 %v3868_v49  ;;  %v3935_v49 = vld [vmem:[%s4097_s10 + $0x64] ss:$108 sps:$4 sm:$0xff]  }
  0xa6   : > { %2490 = vmatmul.mubr.bf16.vlgmr.msra.gmra.mrb[16].mxu0 %v3865_v47  ;;  %3540 = vmatprep.subr.bf16.mxu1 %v3874_v54  ;;  %v4683_v47 = vshrl.u32 %v693_v42, 7  ;;  %v3937_v54 = vld [vmem:[%s4097_s10 + $0x68] ss:$108 sps:$4 sm:$0xff]  }
  0xa7   : > { %3519 = vmatpush3.bf16.msra.mxu0 %v3873_v53  ;;  %2571 = vmatprep.mubr.bf16.mxu0 %v3905_v20  ;;  %v3933_v53 = vld [vmem:[%s4097_s10 + $0x60] ss:$108 sps:$4 sm:$0xff]  }
  0xa8   : > { %2531 = vmatmul.mubr.bf16.vlgmr.msra.gmra.mrb[16].mxu1 %v3870_v51  ;;  %3520 = vmatprep.subr.bf16.mxu0 %v3876_v56  ;;  %v3936_v51 = vld [vmem:[%s4794_s1 + $0x6b8] sm:$0xff]   ;;  %v695_v52 = vsub.s32 0, %v4683_v47 }
  0xa9   : > { %3541 = vmatpush3.bf16.msra.mxu1 %v3875_v55  ;;  %2612 = vmatprep.mubr.bf16.mxu1 %v3910_v24  ;;  %v4704_v55 = vld [vmem:[%s4797_s4] sm:$0xff] }
  0xaa   : > { %3542 = vmatprep.subr.bf16.mxu1 %v3878_v58 }
  0xab   : > { %3521 = vmatpush3.bf16.msra.mxu0 %v3877_v57  ;;  %v696_v57 = vrot.slane %v4704_v55, %v695_v52  ;;  %v3947_v52 = vld [vmem:[%s4796_s3 + $0x8] sm:$0xff]  }
  0xac   : > { %3522 = vmatprep.subr.bf16.mxu0 %v3880_v60 }
  0xad   : > { %3543 = vmatpush3.bf16.msra.mxu1 %v3879_v59 }
  0xae   : > { %3544 = vmatprep.subr.bf16.mxu1 %v3882_v62 }
  0xaf   : > { %3523 = vmatpush3.bf16.msra.mxu0 %v3881_v61 }
  0xb0   : > { %3524 = vmatprep.subr.bf16.mxu0 %v3884_v0 }
  0xb1   : > { %3545 = vmatpush3.bf16.msra.mxu1 %v3883_v63 }
  0xb2   : > { %3546 = vmatprep.subr.bf16.mxu1 %v3886_v2 }
  0xb3   : > { %3525 = vmatpush3.bf16.msra.mxu0 %v3885_v1 }
  0xb4   : > { %3526 = vmatprep.subr.bf16.mxu0 %v3888_v4 }
  0xb5   : > { %3547 = vmatpush3.bf16.msra.mxu1 %v3887_v3 }
  0xb6   : > { %3548 = vmatprep.subr.bf16.mxu1 %v3890_v6 }
  0xb7   : > { %3527 = vmatpush3.bf16.msra.mxu0 %v3889_v5 }
  0xb8   : > { %3528 = vmatprep.subr.bf16.mxu0 %v3892_v8 }
  0xb9   : > { %3549 = vmatpush3.bf16.msra.mxu1 %v3891_v7 }
  0xba   : > { %3550 = vmatprep.subr.bf16.mxu1 %v3894_v10 }
  0xbb   : > { %3529 = vmatpush3.bf16.msra.mxu0 %v3893_v9 }
  0xbc   : > { %3530 = vmatprep.subr.bf16.mxu0 %v3896_v12 }
  0xbd   : > { %3551 = vmatpush3.bf16.msra.mxu1 %v3895_v11 }
  0xbe   : > { %3552 = vmatprep.subr.bf16.mxu1 %v3898_v14 }
  0xbf   : > { %3531 = vmatpush3.bf16.msra.mxu0 %v3897_v13 }
  0xc0   : > { %3532 = vmatprep.subr.bf16.mxu0 %v3900_v16 }
  0xc1   : > { %3553 = vmatpush3.bf16.msra.mxu1 %v3899_v15 }
  0xc2   : > { %3554 = vmatprep.subr.bf16.mxu1 %v3902_v18 }
  0xc3   : > { %3533 = vmatpush3.bf16.msra.mxu0 %v3901_v17 }
  0xc4   : > { %3562 = vmatprep.subr.bf16.mxu0 %v3907_v22 }
  0xc5   : > { %3555 = vmatpush3.bf16.msra.mxu1 %v3906_v21 }
  0xc6   : > { %2572 = vmatmul.mubr.bf16.vlgmr.msra.gmra.mrb[20].mxu0 %v3903_v19  ;;  %3611 = vmatprep.subr.bf16.mxu1 %v3962_v26 }
  0xc7   : > { %3563 = vmatpush3.bf16.msra.mxu0 %v3911_v25  ;;  %2653 = vmatprep.mubr.bf16.mxu0 %v3935_v49  ;;  %v3938_v25 = vld [vmem:[%s4795_s2] sm:$0xff]   ;;  %v3944_v49 = vld [vmem:[%s4795_s2 + $0x30] sm:$0xff]  }
  0xc8   : > { %2613 = vmatmul.mubr.bf16.vlgmr.msra.gmra.mrb[20].mxu1 %v3908_v23  ;;  %3564 = vmatprep.subr.bf16.mxu0 %v3913_v28  ;;  %v3940_v28 = vld [vmem:[%s4795_s2 + $0x10] sm:$0xff]  }
  0xc9   : > { %3612 = vmatpush3.bf16.msra.mxu1 %v3912_v27  ;;  %3627 = vmatprep.mubr.msk.bf16.mxu1 %vm3963_vm0, %v3962_v26  ;;  %v3939_v27 = vld [vmem:[%s4795_s2 + $0x8] sm:$0xff]  }
  0xca   : > { %3613 = vmatprep.subr.bf16.mxu1 %v3962_v26 }
  0xcb   : > { %3565 = vmatpush3.bf16.msra.mxu0 %v3914_v29  ;;  %v3941_v29 = vld [vmem:[%s4795_s2 + $0x18] sm:$0xff]  }
  0xcc   : > { %3566 = vmatprep.subr.bf16.mxu0 %v3916_v31 }
  0xcd   : > { %3614 = vmatpush3.bf16.msra.mxu1 %v3915_v30  ;;  %v3942_v30 = vld [vmem:[%s4795_s2 + $0x20] sm:$0xff]  }
  0xce   : > { %3615 = vmatprep.subr.bf16.mxu1 %v3962_v26 }
  0xcf   : > { %3567 = vmatpush3.bf16.msra.mxu0 %v3917_v32 }
  0xd0   : > { %3568 = vmatprep.subr.bf16.mxu0 %v3919_v34 }
  0xd1   : > { %3616 = vmatpush3.bf16.msra.mxu1 %v3918_v33 }
  0xd2   : > { %3617 = vmatprep.subr.bf16.mxu1 %v3962_v26 }
  0xd3   : > { %3569 = vmatpush3.bf16.msra.mxu0 %v3920_v35 }
  0xd4   : > { %3570 = vmatprep.subr.bf16.mxu0 %v3922_v37 }
  0xd5   : > { %3618 = vmatpush3.bf16.msra.mxu1 %v3921_v36 }
  0xd6   : > { %3619 = vmatprep.subr.bf16.mxu1 %v3962_v26 }
  0xd7   : > { %3571 = vmatpush3.bf16.msra.mxu0 %v3923_v38 }
  0xd8   : > { %3572 = vmatprep.subr.bf16.mxu0 %v3925_v40 }
  0xd9   : > { %3620 = vmatpush3.bf16.msra.mxu1 %v3924_v39 }
  0xda   : > { %3621 = vmatprep.subr.bf16.mxu1 %v3962_v26 }
  0xdb   : > { %3573 = vmatpush3.bf16.msra.mxu0 %v3926_v41 }
  0xdc   : > { %3574 = vmatprep.subr.bf16.mxu0 %v3928_v44 }
  0xdd   : > { %3622 = vmatpush3.bf16.msra.mxu1 %v3927_v43 }
  0xde   : > { %3623 = vmatprep.subr.bf16.mxu1 %v3962_v26 }
  0xdf   : > { %3575 = vmatpush3.bf16.msra.mxu0 %v3929_v45 }
  0xe0   : > { %3576 = vmatprep.subr.bf16.mxu0 %v3931_v48  ;;  %v3943_v48 = vld [vmem:[%s4795_s2 + $0x28] sm:$0xff]  }
  0xe1   : > { %3624 = vmatpush3.bf16.msra.mxu1 %v3930_v46 }
  0xe2   : > { %3625 = vmatprep.subr.bf16.mxu1 %v3962_v26 }
  0xe3   : > { %3577 = vmatpush3.bf16.msra.mxu0 %v3932_v50  ;;  %v3945_v50 = vld [vmem:[%s4795_s2 + $0x38] sm:$0xff]  }
  0xe4   : > { %3631 = vmatprep.subr.bf16.mxu0 %v3962_v26 }
  0xe5   : > { %3626 = vmatpush3.bf16.msra.mxu1 %v3936_v51  ;;  %v3946_v51 = vld [vmem:[%s4796_s3] sm:$0xff]  }
  0xe6   : > { %3651 = vmatprep.subr.bf16.mxu1 %v3962_v26  ;;  %2654 = vmatmul.mubr.bf16.vlgmr.msra.gmra.mrb[24].mxu0 %v3933_v53  ;;  %v3948_v53 = vld [vmem:[%s4796_s3 + $0x10] sm:$0xff]  }
  0xe7   : > { %3647 = vmatprep.mubr.msk.bf16.mxu0 %vm3963_vm0, %v3962_v26  ;;  %3632 = vmatpush3.bf16.msra.mxu0 %v3938_v25 }
  0xe8   : > { %3628 = vmatmul.mubr.bf16.vlgmr.msra.gmra.mrb[24].mxu1 %v3937_v54  ;;  %3633 = vmatprep.subr.bf16.mxu0 %v3962_v26  ;;  %v3949_v54 = vld [vmem:[%s4796_s3 + $0x18] sm:$0xff]  }
  0xe9   : > { %3667 = vmatprep.mubr.msk.bf16.mxu1 %vm3963_vm0, %v3962_v26  ;;  %3652 = vmatpush3.bf16.msra.mxu1 %v3946_v51 }
  0xea   : > { %3653 = vmatprep.subr.bf16.mxu1 %v3962_v26 }
  0xeb   : > { %3634 = vmatpush3.bf16.msra.mxu0 %v3939_v27 }
  0xec   : > { %3635 = vmatprep.subr.bf16.mxu0 %v3962_v26 }
  0xed   : > { %3654 = vmatpush3.bf16.msra.mxu1 %v3947_v52 }
  0xee   : > { %3655 = vmatprep.subr.bf16.mxu1 %v3962_v26 }
  0xef   : > { %3636 = vmatpush3.bf16.msra.mxu0 %v3940_v28 }
  0xf0   : > { %3637 = vmatprep.subr.bf16.mxu0 %v3962_v26 }
  0xf1   : > { %3656 = vmatpush3.bf16.msra.mxu1 %v3948_v53 }
  0xf2   : > { %3657 = vmatprep.subr.bf16.mxu1 %v3962_v26 }
  0xf3   : > { %3638 = vmatpush3.bf16.msra.mxu0 %v3941_v29 }
  0xf4   : > { %3639 = vmatprep.subr.bf16.mxu0 %v3962_v26 }
  0xf5   : > { %3658 = vmatpush3.bf16.msra.mxu1 %v3949_v54 }
  0xf6   : > { %3659 = vmatprep.subr.bf16.mxu1 %v3962_v26 }
  0xf7   : > { %3640 = vmatpush3.bf16.msra.mxu0 %v3942_v30 }
  0xf8   : > { %3641 = vmatprep.subr.bf16.mxu0 %v3962_v26 }
  0xf9   : > { %v3314_v56 = vpop.f32.mrb[0].mxu0 }
  0xfa   : > { %v3315_v58 = vpop.f32.mrb[1].mxu0 }
  0xfb   : > { %v3316_v59 = vadd.f32 %v3315_v58, %v3314_v56  ;;  %v3317_v60 = vpop.f32.mrb[2].mxu0  ;;  %v3336_v61 = vpop.f32.mrb[0].mxu1  ;;  %3642 = vmatpush3.bf16.msra.mxu0 %v3943_v48 }
  0xfc   : > { %v3318_v62 = vpop.f32.mrb[3].mxu0  ;;  %v3337_v1 = vpop.f32.mrb[1].mxu1  ;;  %3643 = vmatprep.subr.bf16.mxu0 %v3962_v26 }
  0xfd   : > { %v2164_v63 = vadd.f32 %v3316_v59, %v696_v57  ;;  %v3319_v0 = vadd.f32 %v3318_v62, %v3317_v60  ;;  %v3338_v2 = vadd.f32 %v3337_v1, %v3336_v61  ;;  %v3339_v3 = vpop.f32.mrb[2].mxu1  ;;  %v3950_v62 = vld [vmem:[%s4796_s3 + $0x20] sm:$0xff]  }
  0xfe   : > { %v3340_v5 = vpop.f32.mrb[3].mxu1  ;;  %3660 = vmatpush3.bf16.msra.mxu1 %v3950_v62  ;;  %v3952_v62 = vld [vmem:[%s4796_s3 + $0x30] sm:$0xff]  }
  0xff   : > { %v2167_v4 = vadd.f32 %v3319_v0, %v696_v57  ;;  %v2205_v6 = vadd.f32 %v3338_v2, %v2164_v63  ;;  %v3341_v7 = vadd.f32 %v3340_v5, %v3339_v3  ;;  %3644 = vmatpush3.bf16.msra.mxu0 %v3944_v49  ;;  %3661 = vmatprep.subr.bf16.mxu1 %v3962_v26 }
 0x100   : > { %3645 = vmatprep.subr.bf16.mxu0 %v3962_v26 }
 0x101   : > { %v2208_v8 = vadd.f32 %v3341_v7, %v2167_v4 }
 0x103   : > { %3646 = vmatpush3.bf16.msra.mxu0 %v3945_v50 }
 0x119   : > { %v3358_v9 = vpop.f32.mrb[4].mxu0 }
 0x11a   : > { %v3359_v10 = vpop.f32.mrb[5].mxu0 }
 0x11b   : > { %v3360_v11 = vadd.f32 %v3359_v10, %v3358_v9  ;;  %v3361_v12 = vpop.f32.mrb[6].mxu0  ;;  %v3380_v15 = vpop.f32.mrb[4].mxu1 }
 0x11c   : > { %v3362_v13 = vpop.f32.mrb[7].mxu0  ;;  %v3381_v17 = vpop.f32.mrb[5].mxu1 }
 0x11d   : > { %v2246_v14 = vadd.f32 %v3360_v11, %v2205_v6  ;;  %v3363_v16 = vadd.f32 %v3362_v13, %v3361_v12  ;;  %v3382_v19 = vadd.f32 %v3381_v17, %v3380_v15  ;;  %v3383_v20 = vpop.f32.mrb[6].mxu1 }
 0x11e   : > { %v3384_v21 = vpop.f32.mrb[7].mxu1 }
 0x11f   : > { %v2249_v18 = vadd.f32 %v3363_v16, %v2208_v8  ;;  %v2287_v22 = vadd.f32 %v3382_v19, %v2246_v14  ;;  %v3385_v23 = vadd.f32 %v3384_v21, %v3383_v20 }
 0x121   : > { %v2290_v24 = vadd.f32 %v3385_v23, %v2249_v18 }
 0x139   : > { %v3402_v31 = vpop.f32.mrb[8].mxu0 }
 0x13a   : > { %v3403_v32 = vpop.f32.mrb[9].mxu0 }
 0x13b   : > { %v3404_v33 = vadd.f32 %v3403_v32, %v3402_v31  ;;  %v3405_v34 = vpop.f32.mrb[10].mxu0  ;;  %v3424_v35 = vpop.f32.mrb[8].mxu1 }
 0x13c   : > { %v3406_v36 = vpop.f32.mrb[11].mxu0  ;;  %v3425_v39 = vpop.f32.mrb[9].mxu1 }
 0x13d   : > { %v2328_v37 = vadd.f32 %v3404_v33, %v2287_v22  ;;  %v3407_v38 = vadd.f32 %v3406_v36, %v3405_v34  ;;  %v3426_v40 = vadd.f32 %v3425_v39, %v3424_v35  ;;  %v3427_v41 = vpop.f32.mrb[10].mxu1 }
 0x13e   : > { %v3428_v43 = vpop.f32.mrb[11].mxu1 }
 0x13f   : > { %v2331_v42 = vadd.f32 %v3407_v38, %v2290_v24  ;;  %v2369_v44 = vadd.f32 %v3426_v40, %v2328_v37  ;;  %v3429_v45 = vadd.f32 %v3428_v43, %v3427_v41 }
 0x141   : > { %v2372_v46 = vadd.f32 %v3429_v45, %v2331_v42 }
 0x159   : > { %v3446_v56 = vpop.f32.mrb[12].mxu0 }
 0x15a   : > { %v3447_v57 = vpop.f32.mrb[13].mxu0 }
 0x15b   : > { %v3448_v58 = vadd.f32 %v3447_v57, %v3446_v56  ;;  %v3449_v59 = vpop.f32.mrb[14].mxu0  ;;  %v3468_v60 = vpop.f32.mrb[12].mxu1 }
 0x15c   : > { %v3450_v61 = vpop.f32.mrb[15].mxu0  ;;  %v3469_v1 = vpop.f32.mrb[13].mxu1 }
 0x15d   : > { %v2410_v63 = vadd.f32 %v3448_v58, %v2369_v44  ;;  %v3451_v0 = vadd.f32 %v3450_v61, %v3449_v59  ;;  %v3470_v2 = vadd.f32 %v3469_v1, %v3468_v60  ;;  %v3471_v3 = vpop.f32.mrb[14].mxu1  ;;  %v3951_v61 = vld [vmem:[%s4796_s3 + $0x28] sm:$0xff]  }
 0x15e   : > { %v3472_v5 = vpop.f32.mrb[15].mxu1  ;;  %3662 = vmatpush3.bf16.msra.mxu1 %v3951_v61 }
 0x15f   : > { %v2413_v4 = vadd.f32 %v3451_v0, %v2372_v46  ;;  %v2451_v6 = vadd.f32 %v3470_v2, %v2410_v63  ;;  %v3473_v7 = vadd.f32 %v3472_v5, %v3471_v3  ;;  %3663 = vmatprep.subr.bf16.mxu1 %v3962_v26  ;;  %v3953_v63 = vld [vmem:[%s4796_s3 + $0x38] sm:$0xff]   ;;  %v2724_v0 = vsub.s32 1, %v4683_v47 }
 0x160   : > { %v2819_v2 = vsub.s32 2, %v4683_v47 }
 0x161   : > { %v2454_v8 = vadd.f32 %v3473_v7, %v2413_v4  ;;  %v2725_v1 = vrot.slane %v4704_v55, %v2724_v0 }
 0x162   : > { %3664 = vmatpush3.bf16.msra.mxu1 %v3952_v62  ;;  %v2820_v5 = vrot.slane %v4704_v55, %v2819_v2 }
 0x163   : > { %3665 = vmatprep.subr.bf16.mxu1 %v3962_v26 }
 0x166   : > { %3666 = vmatpush3.bf16.msra.mxu1 %v3953_v63 }
 0x179   : > { %v3490_v9 = vpop.f32.mrb[16].mxu0 }
 0x17a   : > { %v3491_v10 = vpop.f32.mrb[17].mxu0 }
 0x17b   : > { %v3492_v11 = vadd.f32 %v3491_v10, %v3490_v9  ;;  %v3493_v12 = vpop.f32.mrb[18].mxu0  ;;  %v3512_v15 = vpop.f32.mrb[16].mxu1 }
 0x17c   : > { %v3494_v13 = vpop.f32.mrb[19].mxu0  ;;  %v3513_v17 = vpop.f32.mrb[17].mxu1 }
 0x17d   : > { %v2492_v14 = vadd.f32 %v3492_v11, %v2451_v6  ;;  %v3495_v16 = vadd.f32 %v3494_v13, %v3493_v12  ;;  %v3514_v19 = vadd.f32 %v3513_v17, %v3512_v15  ;;  %v3515_v20 = vpop.f32.mrb[18].mxu1  ;;  %v2825_v6 = vsub.s32 3, %v4683_v47 }
 0x17e   : > { %v3516_v21 = vpop.f32.mrb[19].mxu1 }
 0x17f   : > { %v2495_v18 = vadd.f32 %v3495_v16, %v2454_v8  ;;  %v2533_v22 = vadd.f32 %v3514_v19, %v2492_v14  ;;  %v3517_v23 = vadd.f32 %v3516_v21, %v3515_v20  ;;  %v2826_v12 = vrot.slane %v4704_v55, %v2825_v6 }
 0x180   : > { %v2943_v20 = vsub.s32 5, %v4683_v47 }
 0x181   : > { %v2536_v24 = vadd.f32 %v3517_v23, %v2495_v18  ;;  %v2848_v18 = vsub.s32 4, %v4683_v47 }
 0x182   : > { %v2944_v23 = vrot.slane %v4704_v55, %v2943_v20 }
 0x183   : > { %v2849_v19 = vrot.slane %v4704_v55, %v2848_v18 }
 0x199   : > { %v3534_v25 = vpop.f32.mrb[20].mxu0 }
 0x19a   : > { %v3535_v27 = vpop.f32.mrb[21].mxu0 }
 0x19b   : > { %v3536_v28 = vadd.f32 %v3535_v27, %v3534_v25  ;;  %v3537_v29 = vpop.f32.mrb[22].mxu0  ;;  %v3556_v30 = vpop.f32.mrb[20].mxu1 }
 0x19c   : > { %v3538_v31 = vpop.f32.mrb[23].mxu0  ;;  %v3557_v34 = vpop.f32.mrb[21].mxu1 }
 0x19d   : > { %v2574_v32 = vadd.f32 %v3536_v28, %v2533_v22  ;;  %v3539_v33 = vadd.f32 %v3538_v31, %v3537_v29  ;;  %v3558_v35 = vadd.f32 %v3557_v34, %v3556_v30  ;;  %v3559_v36 = vpop.f32.mrb[22].mxu1 }
 0x19e   : > { %v3560_v38 = vpop.f32.mrb[23].mxu1 }
 0x19f   : > { %v2577_v37 = vadd.f32 %v3539_v33, %v2536_v24  ;;  %v2615_v39 = vadd.f32 %v3558_v35, %v2574_v32  ;;  %v3561_v40 = vadd.f32 %v3560_v38, %v3559_v36  ;;  %v2949_v24 = vsub.s32 6, %v4683_v47 }
 0x1a1   : > { %v2618_v41 = vadd.f32 %v3561_v40, %v2577_v37  ;;  %v2950_v32 = vrot.slane %v4704_v55, %v2949_v24 }
 0x1b9   : > { %v3578_v42 = vpop.f32.mrb[24].mxu0 }
 0x1ba   : > { %v3579_v43 = vpop.f32.mrb[25].mxu0 }
 0x1bb   : > { %v2696_v44 = vpop.f32.mrb[24].mxu1  ;;  %v3580_v45 = vadd.f32 %v3579_v43, %v3578_v42  ;;  %v3581_v46 = vpop.f32.mrb[26].mxu0 }
 0x1bc   : > { %v3629_v48 = vpop.f32.mrb[25].mxu1  ;;  %v3582_v49 = vpop.f32.mrb[27].mxu0 }
 0x1bd   : > { %v2699_v50 = vpop.f32.mrb[26].mxu1  ;;  %v2656_v51 = vadd.f32 %v3580_v45, %v2615_v39  ;;  %v3583_v52 = vadd.f32 %v3582_v49, %v3581_v46 }
 0x1be   : > { %v3630_v53 = vpop.f32.mrb[27].mxu1 }
 0x1bf   : > { %v2697_v54 = vadd.f32 %v2696_v44, %v2656_v51  ;;  %v2659_v56 = vadd.f32 %v3583_v52, %v2618_v41 }
 0x1c1   : > { %v2700_v57 = vadd.f32 %v2699_v50, %v2659_v56  ;;  %v2703_v58 = vmax.f32 %v2697_v54, 0.0 }
 0x1c3   : > { %v2704_v59 = vmax.f32 %v2700_v57, 0.0 }
 0x1c5   : > { %v2705_v60 = vpack.c.bf16 %v2704_v59, %v2703_v58 }
 0x1c7   : > { %3648 = vmatmul.mubr.bf16.vlgmr.msra.gmra.mrb[28].mxu0 %v2705_v60 }
 0x29a   : > { %v2808_v3 = vpop.f32.mrb[28].mxu0 }
 0x29b   : > { %v2809_v4 = vadd.f32 %v2808_v3, %v2725_v1  ;;  %v3649_v7 = vpop.f32.mrb[29].mxu0 }
 0x29c   : > { %v2811_v8 = vpop.f32.mrb[30].mxu0 }
 0x29d   : > { %v2815_v26 = vmax.f32 %v2809_v4, 0.0  ;;  %v2812_v9 = vadd.f32 %v2811_v8, %v2725_v1  ;;  %v3650_v10 = vpop.f32.mrb[31].mxu0 }
 0x29f   : > { %v2821_v11 = vmul.f32 %v2820_v5, %v2815_v26  ;;  %v2816_v13 = vmax.f32 %v2812_v9, 0.0 }
 0x2a1   : > { %v2822_v14 = vmul.f32 %v2820_v5, %v2816_v13  ;;  %v2827_v15 = vadd.f32 %v2826_v12, %v2821_v11 }
 0x2a3   : > { %v2828_v16 = vadd.f32 %v2826_v12, %v2822_v14 }
 0x2a5   : > { %v2829_v17 = vpack.c.bf16 %v2828_v16, %v2827_v15 }
 0x2a7   : > { %3668 = vmatmul.mubr.bf16.vlgmr.msra.gmra.mrb[28].mxu1 %v2829_v17 }
 0x37a   : > { %v2932_v21 = vpop.f32.mrb[28].mxu1 }
 0x37b   : > { %v2933_v22 = vadd.f32 %v2932_v21, %v2849_v19  ;;  %v3669_v25 = vpop.f32.mrb[29].mxu1 }
 0x37c   : > { %v2935_v27 = vpop.f32.mrb[30].mxu1 }
 0x37d   : > { %v2939_v28 = vmax.f32 %v2933_v22, 0.0  ;;  %v2936_v29 = vadd.f32 %v2935_v27, %v2849_v19  ;;  %v3670_v30 = vpop.f32.mrb[31].mxu1 }
 0x37f   : > { %v2945_v31 = vmul.f32 %v2944_v23, %v2939_v28  ;;  %v2940_v33 = vmax.f32 %v2936_v29, 0.0 }
 0x381   : > { %v2946_v34 = vmul.f32 %v2944_v23, %v2940_v33  ;;  %v2951_v35 = vadd.f32 %v2950_v32, %v2945_v31 }
 0x383   : > { %v2952_v36 = vadd.f32 %v2950_v32, %v2946_v34 }
 0x385   : > { %v3296_v37 = vpack.c.bf16 %v2952_v36, %v2951_v35 }
 0x387   : > { %3297 = vst [vmem:[%s229_s27] sm:$0xff] %v3296_v37  }
 0x388 PF: > { %s15_s18 = sadd.s32 1, %s3960_s18  }
 0x389   : > { %p12_p4 = scmp.ge.s32.totalorder %s15_s18, 4  }
 0x38b   :  { %14 = sbr.rel (!%p12_p4) target bundleno = 1 (0x1), region = 70 }

</bundles_post_ra>
